<compile_context>
chip_gen: v7x
topology: tpu7x:2x2x1
jax: 0.10.0
libtpu: 0.0.40
codegen_flags: <defaults>
</compile_context>

<pallas_src>
import functools

import jax
import jax.numpy as jnp
from jax.experimental import pallas as pl
from jax.experimental.pallas import tpu as pltpu


def _round_up(x, m):
    return ((x + m - 1) // m) * m


# ---------------------------------------------------------------------------
# Fused conv + bias + InstanceNorm (+ReLU) (+residual) Pallas kernel
# ---------------------------------------------------------------------------

def _fused_conv_in_kernel(*refs, taps, relu, eps, inv_cnt, has_res):
    """Per-sample fused layer, channels on sublanes / flat spatial on lanes.

      x_ref : (1, s*s, cin_p, Lp)   bf16  phase-decomposed padded input
      w_ref : (kh*kw, cout, cin_p)  bf16  per-tap weights
      b_ref : (cout, 1)             f32   bias
      m_ref : (1, La)               f32   valid-column mask (junk cols = 0)
      r_ref : (1, cout, La)         f32   optional residual (same layout)
      o_ref : (1, cout, La)         f32
    """
    if has_res:
        x_ref, w_ref, b_ref, m_ref, r_ref, o_ref = refs
    else:
        x_ref, w_ref, b_ref, m_ref, o_ref = refs
        r_ref = None
    cout, La = o_ref.shape[1], o_ref.shape[2]

    # Convolution as kh*kw shifted bf16 matmuls, f32 accumulation on the MXU.
    acc = jnp.zeros((cout, La), jnp.float32)
    for t, (ph, off) in enumerate(taps):
        xs = x_ref[0, ph, :, pl.ds(off, La)]               # (cin_p, La) bf16
        acc = acc + jnp.dot(w_ref[t], xs,
                            preferred_element_type=jnp.float32)
    acc = acc + b_ref[...]                                 # bias (cout,1)

    # InstanceNorm over valid spatial positions (biased var, affine=False),
    # spatial on lanes -> packed lane reductions.
    mask = m_ref[...]                                      # (1, La)
    mean = jnp.sum(acc * mask, axis=1, keepdims=True) * inv_cnt
    cen = acc - mean
    var = jnp.sum(cen * cen * mask, axis=1, keepdims=True) * inv_cnt
    y = cen * jax.lax.rsqrt(var + eps)
    if relu:
        y = jnp.maximum(y, 0.0)
    if has_res:
        y = y + r_ref[0]                                   # fused skip add
    o_ref[0] = y


def fused_conv_in(x, w, b, *, stride, pad, pad_mode, relu, residual=None,
                  eps=1e-5):
    """x: (N, Cin, H, W) f32; w: (Cout, Cin, kh, kw); b: (Cout,).

    Returns InstanceNorm(conv(x) + b) [+ReLU] [+residual] as (N, Cout, oh, ow).
    """
    N, cin, H, W = x.shape
    cout, _, kh, kw = w.shape
    s = stride

    mode = "reflect" if pad_mode == "reflect" else "constant"
    xp = jnp.pad(x, ((0, 0), (0, 0), (pad, pad), (pad, pad)), mode=mode)
    Hp, Wp = H + 2 * pad, W + 2 * pad
    oh = (Hp - kh) // s + 1
    ow = (Wp - kw) // s + 1

    # Round padded spatial dims up to multiples of the stride (zero fill that
    # valid outputs never read) so the s*s phase decomposition is uniform.
    Hp2, Wp2 = _round_up(Hp, s), _round_up(Wp, s)
    if (Hp2, Wp2) != (Hp, Wp):
        xp = jnp.pad(xp, ((0, 0), (0, 0), (0, Hp2 - Hp), (0, Wp2 - Wp)))
    Hq, Wq = Hp2 // s, Wp2 // s

    # Space-to-depth phases: phase (a, b) = xp[:, :, a::s, b::s], flat spatial.
    phases = [xp[:, :, a::s, bb::s].reshape(N, cin, Hq * Wq)
              for a in range(s) for bb in range(s)]
    xph = jnp.stack(phases, axis=1)                        # (N, s*s, cin, Hq*Wq)

    La = oh * Wq                                           # accumulator length
    need = La + ((kh - 1) // s) * Wq + ((kw - 1) // s)     # max tap read extent
    Lp = _round_up(max(need, Hq * Wq), 128)                # lane-aligned input
    cin_p = _round_up(cin, 8)
    xph = jnp.pad(xph, ((0, 0), (0, 0), (0, cin_p - cin), (0, Lp - Hq * Wq)))
    xph = xph.astype(jnp.bfloat16)                         # bf16 MXU operand

    # Per-tap weights (kh*kw, cout, cin_p), bf16.
    wt = jnp.transpose(w, (2, 3, 0, 1)).reshape(kh * kw, cout, cin)
    wt = jnp.pad(wt, ((0, 0), (0, 0), (0, cin_p - cin))).astype(jnp.bfloat16)
    taps = tuple(((i % s) * s + (j % s), (i // s) * Wq + (j // s))
                 for i in range(kh) for j in range(kw))

    bias = b.reshape(cout, 1).astype(jnp.float32)
    mask = ((jnp.arange(La, dtype=jnp.int32) % Wq) < ow)
    mask = mask.astype(jnp.float32).reshape(1, La)

    inputs = [xph, wt, bias, mask]
    in_specs = [
        pl.BlockSpec((1, s * s, cin_p, Lp), lambda n: (n, 0, 0, 0)),
        pl.BlockSpec((kh * kw, cout, cin_p), lambda n: (0, 0, 0)),
        pl.BlockSpec((cout, 1), lambda n: (0, 0)),
        pl.BlockSpec((1, La), lambda n: (0, 0)),
    ]
    has_res = residual is not None
    if has_res:
        # Embed the skip tensor (N, cout, oh, ow) into the accumulator's
        # (oh, Wq) junk-column layout so the add fuses into the epilogue.
        r = jnp.pad(residual, ((0, 0), (0, 0), (0, 0), (0, Wq - ow)))
        inputs.append(r.reshape(N, cout, La).astype(jnp.float32))
        in_specs.append(pl.BlockSpec((1, cout, La), lambda n: (n, 0, 0)))

    kern = functools.partial(
        _fused_conv_in_kernel, taps=taps, relu=relu, eps=eps,
        inv_cnt=1.0 / float(oh * ow), has_res=has_res)

    out = pl.pallas_call(
        kern,
        out_shape=jax.ShapeDtypeStruct((N, cout, La), jnp.float32),
        grid=(N,),
        in_specs=in_specs,
        out_specs=pl.BlockSpec((1, cout, La), lambda n: (n, 0, 0)),
        compiler_params=pltpu.CompilerParams(
            dimension_semantics=("parallel",),
            vmem_limit_bytes=32 * 1024 * 1024),
    )(*inputs)

    # Drop the junk columns: (N, cout, La) -> (N, cout, oh, ow).
    return out.reshape(N, cout, oh, Wq)[:, :, :, :ow]


# ---------------------------------------------------------------------------
# Encoder: parameters + forward (NCHW in / NCHW out, PyTorch semantics)
# ---------------------------------------------------------------------------

def _conv_param(key, cout, cin, k):
    k1, k2 = jax.random.split(key)
    w = jax.random.normal(k1, (cout, cin, k, k), jnp.float32) * 0.05
    b = jax.random.normal(k2, (cout,), jnp.float32) * 0.01
    return w, b


def init_encoder_params(key, in_channels=3, dim=8, n_residual=1, n_downsample=2):
    n_keys = 1 + n_downsample + 2 * n_residual
    keys = list(jax.random.split(key, n_keys))
    params = {}
    params["stem"] = _conv_param(keys.pop(0), dim, in_channels, 7)
    d = dim
    params["down"] = []
    for _ in range(n_downsample):
        params["down"].append(_conv_param(keys.pop(0), d * 2, d, 4))
        d *= 2
    params["res"] = []
    for _ in range(n_residual):
        c1 = _conv_param(keys.pop(0), d, d, 3)
        c2 = _conv_param(keys.pop(0), d, d, 3)
        params["res"].append((c1, c2))
    return params


def encoder_forward(params, x_nchw):
    x = x_nchw.astype(jnp.float32)

    # ReflectionPad2d(3) + Conv2d(in, dim, 7) + InstanceNorm2d + ReLU
    w, b = params["stem"]
    x = fused_conv_in(x, w, b, stride=1, pad=3, pad_mode="reflect", relu=True)

    # Downsample blocks: Conv2d(d, 2d, 4, stride=2, padding=1) + IN + ReLU
    for (w, b) in params["down"]:
        x = fused_conv_in(x, w, b, stride=2, pad=1, pad_mode="zero", relu=True)

    # ResidualBlock(dim, 'in'): ReflPad1+Conv3+IN+ReLU+ReflPad1+Conv3+IN, + skip
    for (w1, b1), (w2, b2) in params["res"]:
        h = fused_conv_in(x, w1, b1, stride=1, pad=1, pad_mode="reflect",
                          relu=True)
        x = fused_conv_in(h, w2, b2, stride=1, pad=1, pad_mode="reflect",
                          relu=False, residual=x)
    return x


if __name__ == "__main__":
    key = jax.random.PRNGKey(0)
    kp, kx = jax.random.split(key)

    # Small shapes consistent with the module's forward:
    #   in_channels=3, dim=8, n_downsample=2, n_residual=1, input 2x3x16x16
    in_channels, dim, n_residual, n_downsample = 3, 8, 1, 2
    params = init_encoder_params(kp, in_channels, dim, n_residual, n_downsample)
    x = jax.random.normal(kx, (2, in_channels, 16, 16), jnp.float32)

    fwd = jax.jit(encoder_forward)
    out = fwd(params, x)
    jax.block_until_ready(out)

    expected_c = dim * (2 ** n_downsample)
    expected_hw = 16 // (2 ** n_downsample)
    assert out.shape == (2, expected_c, expected_hw, expected_hw), out.shape
    assert bool(jnp.all(jnp.isfinite(out))), "non-finite output"
    print("KERNEL_OK")
</pallas_src>

<mosaic_0001>
module attributes {stable_mosaic.version = 11 : i64} {
  func.func @_fused_conv_in_kernel(%arg0: i32, %arg1: memref<1x1x8x512xbf16, #tpu.memory_space<vmem>>, %arg2: memref<49x8x8xbf16, #tpu.memory_space<vmem>>, %arg3: memref<8x1xf32, #tpu.memory_space<vmem>>, %arg4: memref<1x352xf32, #tpu.memory_space<vmem>>, %arg5: memref<1x8x352xf32, #tpu.memory_space<vmem>>) attributes {dimension_semantics = [#tpu.dimension_semantics<parallel>], iteration_bounds = array<i64: 2>, scalar_prefetch = 0 : i64, scratch_operands = 0 : i64, tpu.core_type = #tpu.core_type<tc>, window_params = [{transform_indices = @transform_0, window_bounds = array<i64: 1, 1, 8, 512>}, {pipeline_mode = #tpu.pipeline_mode<synchronous>, transform_indices = @transform_1, window_bounds = array<i64: 49, 8, 8>}, {pipeline_mode = #tpu.pipeline_mode<synchronous>, transform_indices = @transform_2, window_bounds = array<i64: 8, 1>}, {pipeline_mode = #tpu.pipeline_mode<synchronous>, transform_indices = @transform_3, window_bounds = array<i64: 1, 352>}, {transform_indices = @transform_4, window_bounds = array<i64: 1, 8, 352>}]} {
    %cst = arith.constant 0.000000e+00 : f32
    %0 = vector.broadcast %cst : f32 to vector<8x352xf32>
    %c0 = arith.constant 0 : index
    %c0_0 = arith.constant 0 : index
    %c0_1 = arith.constant 0 : index
    %c0_2 = arith.constant 0 : index
    %1 = vector.load %arg1[%c0, %c0_0, %c0_1, %c0_2] : memref<1x1x8x512xbf16, #tpu.memory_space<vmem>>, vector<1x1x8x352xbf16>
    %2 = vector.shape_cast %1 : vector<1x1x8x352xbf16> to vector<8x352xbf16>
    %c0_3 = arith.constant 0 : index
    %c0_4 = arith.constant 0 : index
    %c0_5 = arith.constant 0 : index
    %3 = vector.load %arg2[%c0_3, %c0_4, %c0_5] : memref<49x8x8xbf16, #tpu.memory_space<vmem>>, vector<1x8x8xbf16>
    %4 = vector.shape_cast %3 : vector<1x8x8xbf16> to vector<8x8xbf16>
    %cst_6 = arith.constant dense<0.000000e+00> : vector<8x352xf32>
    %5 = tpu.matmul %4, %2, %cst_6 {dimension_numbers = #tpu.dot_dimension_numbers<[1], [0], [0], [1], [0, 0, 1, 1], [], []>} : vector<8x8xbf16>, vector<8x352xbf16>, vector<8x352xf32> -> vector<8x352xf32>
    %6 = arith.addf %0, %5 : vector<8x352xf32>
    %c0_7 = arith.constant 0 : index
    %c0_8 = arith.constant 0 : index
    %c0_9 = arith.constant 0 : index
    %c1 = arith.constant 1 : index
    %7 = vector.load %arg1[%c0_7, %c0_8, %c0_9, %c1] : memref<1x1x8x512xbf16, #tpu.memory_space<vmem>>, vector<1x1x8x352xbf16>
    %8 = vector.shape_cast %7 : vector<1x1x8x352xbf16> to vector<8x352xbf16>
    %c1_10 = arith.constant 1 : index
    %c0_11 = arith.constant 0 : index
    %c0_12 = arith.constant 0 : index
    %9 = vector.load %arg2[%c1_10, %c0_11, %c0_12] : memref<49x8x8xbf16, #tpu.memory_space<vmem>>, vector<1x8x8xbf16>
    %10 = vector.shape_cast %9 : vector<1x8x8xbf16> to vector<8x8xbf16>
    %cst_13 = arith.constant dense<0.000000e+00> : vector<8x352xf32>
    %11 = tpu.matmul %10, %8, %cst_13 {dimension_numbers = #tpu.dot_dimension_numbers<[1], [0], [0], [1], [0, 0, 1, 1], [], []>} : vector<8x8xbf16>, vector<8x352xbf16>, vector<8x352xf32> -> vector<8x352xf32>
    %12 = arith.addf %6, %11 : vector<8x352xf32>
    %c0_14 = arith.constant 0 : index
    %c0_15 = arith.constant 0 : index
    %c0_16 = arith.constant 0 : index
    %c2 = arith.constant 2 : index
    %13 = vector.load %arg1[%c0_14, %c0_15, %c0_16, %c2] : memref<1x1x8x512xbf16, #tpu.memory_space<vmem>>, vector<1x1x8x352xbf16>
    %14 = vector.shape_cast %13 : vector<1x1x8x352xbf16> to vector<8x352xbf16>
    %c2_17 = arith.constant 2 : index
    %c0_18 = arith.constant 0 : index
    %c0_19 = arith.constant 0 : index
    %15 = vector.load %arg2[%c2_17, %c0_18, %c0_19] : memref<49x8x8xbf16, #tpu.memory_space<vmem>>, vector<1x8x8xbf16>
    %16 = vector.shape_cast %15 : vector<1x8x8xbf16> to vector<8x8xbf16>
    %cst_20 = arith.constant dense<0.000000e+00> : vector<8x352xf32>
    %17 = tpu.matmul %16, %14, %cst_20 {dimension_numbers = #tpu.dot_dimension_numbers<[1], [0], [0], [1], [0, 0, 1, 1], [], []>} : vector<8x8xbf16>, vector<8x352xbf16>, vector<8x352xf32> -> vector<8x352xf32>
    %18 = arith.addf %12, %17 : vector<8x352xf32>
    %c0_21 = arith.constant 0 : index
    %c0_22 = arith.constant 0 : index
    %c0_23 = arith.constant 0 : index
    %c3 = arith.constant 3 : index
    %19 = vector.load %arg1[%c0_21, %c0_22, %c0_23, %c3] : memref<1x1x8x512xbf16, #tpu.memory_space<vmem>>, vector<1x1x8x352xbf16>
    %20 = vector.shape_cast %19 : vector<1x1x8x352xbf16> to vector<8x352xbf16>
    %c3_24 = arith.constant 3 : index
    %c0_25 = arith.constant 0 : index
    %c0_26 = arith.constant 0 : index
    %21 = vector.load %arg2[%c3_24, %c0_25, %c0_26] : memref<49x8x8xbf16, #tpu.memory_space<vmem>>, vector<1x8x8xbf16>
    %22 = vector.shape_cast %21 : vector<1x8x8xbf16> to vector<8x8xbf16>
    %cst_27 = arith.constant dense<0.000000e+00> : vector<8x352xf32>
    %23 = tpu.matmul %22, %20, %cst_27 {dimension_numbers = #tpu.dot_dimension_numbers<[1], [0], [0], [1], [0, 0, 1, 1], [], []>} : vector<8x8xbf16>, vector<8x352xbf16>, vector<8x352xf32> -> vector<8x352xf32>
    %24 = arith.addf %18, %23 : vector<8x352xf32>
    %c0_28 = arith.constant 0 : index
    %c0_29 = arith.constant 0 : index
    %c0_30 = arith.constant 0 : index
    %c4 = arith.constant 4 : index
    %25 = vector.load %arg1[%c0_28, %c0_29, %c0_30, %c4] : memref<1x1x8x512xbf16, #tpu.memory_space<vmem>>, vector<1x1x8x352xbf16>
    %26 = vector.shape_cast %25 : vector<1x1x8x352xbf16> to vector<8x352xbf16>
    %c4_31 = arith.constant 4 : index
    %c0_32 = arith.constant 0 : index
    %c0_33 = arith.constant 0 : index
    %27 = vector.load %arg2[%c4_31, %c0_32, %c0_33] : memref<49x8x8xbf16, #tpu.memory_space<vmem>>, vector<1x8x8xbf16>
    %28 = vector.shape_cast %27 : vector<1x8x8xbf16> to vector<8x8xbf16>
    %cst_34 = arith.constant dense<0.000000e+00> : vector<8x352xf32>
    %29 = tpu.matmul %28, %26, %cst_34 {dimension_numbers = #tpu.dot_dimension_numbers<[1], [0], [0], [1], [0, 0, 1, 1], [], []>} : vector<8x8xbf16>, vector<8x352xbf16>, vector<8x352xf32> -> vector<8x352xf32>
    %30 = arith.addf %24, %29 : vector<8x352xf32>
    %c0_35 = arith.constant 0 : index
    %c0_36 = arith.constant 0 : index
    %c0_37 = arith.constant 0 : index
    %c5 = arith.constant 5 : index
    %31 = vector.load %arg1[%c0_35, %c0_36, %c0_37, %c5] : memref<1x1x8x512xbf16, #tpu.memory_space<vmem>>, vector<1x1x8x352xbf16>
    %32 = vector.shape_cast %31 : vector<1x1x8x352xbf16> to vector<8x352xbf16>
    %c5_38 = arith.constant 5 : index
    %c0_39 = arith.constant 0 : index
    %c0_40 = arith.constant 0 : index
    %33 = vector.load %arg2[%c5_38, %c0_39, %c0_40] : memref<49x8x8xbf16, #tpu.memory_space<vmem>>, vector<1x8x8xbf16>
    %34 = vector.shape_cast %33 : vector<1x8x8xbf16> to vector<8x8xbf16>
    %cst_41 = arith.constant dense<0.000000e+00> : vector<8x352xf32>
    %35 = tpu.matmul %34, %32, %cst_41 {dimension_numbers = #tpu.dot_dimension_numbers<[1], [0], [0], [1], [0, 0, 1, 1], [], []>} : vector<8x8xbf16>, vector<8x352xbf16>, vector<8x352xf32> -> vector<8x352xf32>
    %36 = arith.addf %30, %35 : vector<8x352xf32>
    %c0_42 = arith.constant 0 : index
    %c0_43 = arith.constant 0 : index
    %c0_44 = arith.constant 0 : index
    %c6 = arith.constant 6 : index
    %37 = vector.load %arg1[%c0_42, %c0_43, %c0_44, %c6] : memref<1x1x8x512xbf16, #tpu.memory_space<vmem>>, vector<1x1x8x352xbf16>
    %38 = vector.shape_cast %37 : vector<1x1x8x352xbf16> to vector<8x352xbf16>
    %c6_45 = arith.constant 6 : index
    %c0_46 = arith.constant 0 : index
    %c0_47 = arith.constant 0 : index
    %39 = vector.load %arg2[%c6_45, %c0_46, %c0_47] : memref<49x8x8xbf16, #tpu.memory_space<vmem>>, vector<1x8x8xbf16>
    %40 = vector.shape_cast %39 : vector<1x8x8xbf16> to vector<8x8xbf16>
    %cst_48 = arith.constant dense<0.000000e+00> : vector<8x352xf32>
    %41 = tpu.matmul %40, %38, %cst_48 {dimension_numbers = #tpu.dot_dimension_numbers<[1], [0], [0], [1], [0, 0, 1, 1], [], []>} : vector<8x8xbf16>, vector<8x352xbf16>, vector<8x352xf32> -> vector<8x352xf32>
    %42 = arith.addf %36, %41 : vector<8x352xf32>
    %c0_49 = arith.constant 0 : index
    %c0_50 = arith.constant 0 : index
    %c0_51 = arith.constant 0 : index
    %c22 = arith.constant 22 : index
    %43 = vector.load %arg1[%c0_49, %c0_50, %c0_51, %c22] : memref<1x1x8x512xbf16, #tpu.memory_space<vmem>>, vector<1x1x8x352xbf16>
    %44 = vector.shape_cast %43 : vector<1x1x8x352xbf16> to vector<8x352xbf16>
    %c7 = arith.constant 7 : index
    %c0_52 = arith.constant 0 : index
    %c0_53 = arith.constant 0 : index
    %45 = vector.load %arg2[%c7, %c0_52, %c0_53] : memref<49x8x8xbf16, #tpu.memory_space<vmem>>, vector<1x8x8xbf16>
    %46 = vector.shape_cast %45 : vector<1x8x8xbf16> to vector<8x8xbf16>
    %cst_54 = arith.constant dense<0.000000e+00> : vector<8x352xf32>
    %47 = tpu.matmul %46, %44, %cst_54 {dimension_numbers = #tpu.dot_dimension_numbers<[1], [0], [0], [1], [0, 0, 1, 1], [], []>} : vector<8x8xbf16>, vector<8x352xbf16>, vector<8x352xf32> -> vector<8x352xf32>
    %48 = arith.addf %42, %47 : vector<8x352xf32>
    %c0_55 = arith.constant 0 : index
    %c0_56 = arith.constant 0 : index
    %c0_57 = arith.constant 0 : index
    %c23 = arith.constant 23 : index
    %49 = vector.load %arg1[%c0_55, %c0_56, %c0_57, %c23] : memref<1x1x8x512xbf16, #tpu.memory_space<vmem>>, vector<1x1x8x352xbf16>
    %50 = vector.shape_cast %49 : vector<1x1x8x352xbf16> to vector<8x352xbf16>
    %c8 = arith.constant 8 : index
    %c0_58 = arith.constant 0 : index
    %c0_59 = arith.constant 0 : index
    %51 = vector.load %arg2[%c8, %c0_58, %c0_59] : memref<49x8x8xbf16, #tpu.memory_space<vmem>>, vector<1x8x8xbf16>
    %52 = vector.shape_cast %51 : vector<1x8x8xbf16> to vector<8x8xbf16>
    %cst_60 = arith.constant dense<0.000000e+00> : vector<8x352xf32>
    %53 = tpu.matmul %52, %50, %cst_60 {dimension_numbers = #tpu.dot_dimension_numbers<[1], [0], [0], [1], [0, 0, 1, 1], [], []>} : vector<8x8xbf16>, vector<8x352xbf16>, vector<8x352xf32> -> vector<8x352xf32>
    %54 = arith.addf %48, %53 : vector<8x352xf32>
    %c0_61 = arith.constant 0 : index
    %c0_62 = arith.constant 0 : index
    %c0_63 = arith.constant 0 : index
    %c24 = arith.constant 24 : index
    %55 = vector.load %arg1[%c0_61, %c0_62, %c0_63, %c24] : memref<1x1x8x512xbf16, #tpu.memory_space<vmem>>, vector<1x1x8x352xbf16>
    %56 = vector.shape_cast %55 : vector<1x1x8x352xbf16> to vector<8x352xbf16>
    %c9 = arith.constant 9 : index
    %c0_64 = arith.constant 0 : index
    %c0_65 = arith.constant 0 : index
    %57 = vector.load %arg2[%c9, %c0_64, %c0_65] : memref<49x8x8xbf16, #tpu.memory_space<vmem>>, vector<1x8x8xbf16>
    %58 = vector.shape_cast %57 : vector<1x8x8xbf16> to vector<8x8xbf16>
    %cst_66 = arith.constant dense<0.000000e+00> : vector<8x352xf32>
    %59 = tpu.matmul %58, %56, %cst_66 {dimension_numbers = #tpu.dot_dimension_numbers<[1], [0], [0], [1], [0, 0, 1, 1], [], []>} : vector<8x8xbf16>, vector<8x352xbf16>, vector<8x352xf32> -> vector<8x352xf32>
    %60 = arith.addf %54, %59 : vector<8x352xf32>
    %c0_67 = arith.constant 0 : index
    %c0_68 = arith.constant 0 : index
    %c0_69 = arith.constant 0 : index
    %c25 = arith.constant 25 : index
    %61 = vector.load %arg1[%c0_67, %c0_68, %c0_69, %c25] : memref<1x1x8x512xbf16, #tpu.memory_space<vmem>>, vector<1x1x8x352xbf16>
    %62 = vector.shape_cast %61 : vector<1x1x8x352xbf16> to vector<8x352xbf16>
    %c10 = arith.constant 10 : index
    %c0_70 = arith.constant 0 : index
    %c0_71 = arith.constant 0 : index
    %63 = vector.load %arg2[%c10, %c0_70, %c0_71] : memref<49x8x8xbf16, #tpu.memory_space<vmem>>, vector<1x8x8xbf16>
    %64 = vector.shape_cast %63 : vector<1x8x8xbf16> to vector<8x8xbf16>
    %cst_72 = arith.constant dense<0.000000e+00> : vector<8x352xf32>
    %65 = tpu.matmul %64, %62, %cst_72 {dimension_numbers = #tpu.dot_dimension_numbers<[1], [0], [0], [1], [0, 0, 1, 1], [], []>} : vector<8x8xbf16>, vector<8x352xbf16>, vector<8x352xf32> -> vector<8x352xf32>
    %66 = arith.addf %60, %65 : vector<8x352xf32>
    %c0_73 = arith.constant 0 : index
    %c0_74 = arith.constant 0 : index
    %c0_75 = arith.constant 0 : index
    %c26 = arith.constant 26 : index
    %67 = vector.load %arg1[%c0_73, %c0_74, %c0_75, %c26] : memref<1x1x8x512xbf16, #tpu.memory_space<vmem>>, vector<1x1x8x352xbf16>
    %68 = vector.shape_cast %67 : vector<1x1x8x352xbf16> to vector<8x352xbf16>
    %c11 = arith.constant 11 : index
    %c0_76 = arith.constant 0 : index
    %c0_77 = arith.constant 0 : index
    %69 = vector.load %arg2[%c11, %c0_76, %c0_77] : memref<49x8x8xbf16, #tpu.memory_space<vmem>>, vector<1x8x8xbf16>
    %70 = vector.shape_cast %69 : vector<1x8x8xbf16> to vector<8x8xbf16>
    %cst_78 = arith.constant dense<0.000000e+00> : vector<8x352xf32>
    %71 = tpu.matmul %70, %68, %cst_78 {dimension_numbers = #tpu.dot_dimension_numbers<[1], [0], [0], [1], [0, 0, 1, 1], [], []>} : vector<8x8xbf16>, vector<8x352xbf16>, vector<8x352xf32> -> vector<8x352xf32>
    %72 = arith.addf %66, %71 : vector<8x352xf32>
    %c0_79 = arith.constant 0 : index
    %c0_80 = arith.constant 0 : index
    %c0_81 = arith.constant 0 : index
    %c27 = arith.constant 27 : index
    %73 = vector.load %arg1[%c0_79, %c0_80, %c0_81, %c27] : memref<1x1x8x512xbf16, #tpu.memory_space<vmem>>, vector<1x1x8x352xbf16>
    %74 = vector.shape_cast %73 : vector<1x1x8x352xbf16> to vector<8x352xbf16>
    %c12 = arith.constant 12 : index
    %c0_82 = arith.constant 0 : index
    %c0_83 = arith.constant 0 : index
    %75 = vector.load %arg2[%c12, %c0_82, %c0_83] : memref<49x8x8xbf16, #tpu.memory_space<vmem>>, vector<1x8x8xbf16>
    %76 = vector.shape_cast %75 : vector<1x8x8xbf16> to vector<8x8xbf16>
    %cst_84 = arith.constant dense<0.000000e+00> : vector<8x352xf32>
    %77 = tpu.matmul %76, %74, %cst_84 {dimension_numbers = #tpu.dot_dimension_numbers<[1], [0], [0], [1], [0, 0, 1, 1], [], []>} : vector<8x8xbf16>, vector<8x352xbf16>, vector<8x352xf32> -> vector<8x352xf32>
    %78 = arith.addf %72, %77 : vector<8x352xf32>
    %c0_85 = arith.constant 0 : index
    %c0_86 = arith.constant 0 : index
    %c0_87 = arith.constant 0 : index
    %c28 = arith.constant 28 : index
    %79 = vector.load %arg1[%c0_85, %c0_86, %c0_87, %c28] : memref<1x1x8x512xbf16, #tpu.memory_space<vmem>>, vector<1x1x8x352xbf16>
    %80 = vector.shape_cast %79 : vector<1x1x8x352xbf16> to vector<8x352xbf16>
    %c13 = arith.constant 13 : index
    %c0_88 = arith.constant 0 : index
    %c0_89 = arith.constant 0 : index
    %81 = vector.load %arg2[%c13, %c0_88, %c0_89] : memref<49x8x8xbf16, #tpu.memory_space<vmem>>, vector<1x8x8xbf16>
    %82 = vector.shape_cast %81 : vector<1x8x8xbf16> to vector<8x8xbf16>
    %cst_90 = arith.constant dense<0.000000e+00> : vector<8x352xf32>
    %83 = tpu.matmul %82, %80, %cst_90 {dimension_numbers = #tpu.dot_dimension_numbers<[1], [0], [0], [1], [0, 0, 1, 1], [], []>} : vector<8x8xbf16>, vector<8x352xbf16>, vector<8x352xf32> -> vector<8x352xf32>
    %84 = arith.addf %78, %83 : vector<8x352xf32>
    %c0_91 = arith.constant 0 : index
    %c0_92 = arith.constant 0 : index
    %c0_93 = arith.constant 0 : index
    %c44 = arith.constant 44 : index
    %85 = vector.load %arg1[%c0_91, %c0_92, %c0_93, %c44] : memref<1x1x8x512xbf16, #tpu.memory_space<vmem>>, vector<1x1x8x352xbf16>
    %86 = vector.shape_cast %85 : vector<1x1x8x352xbf16> to vector<8x352xbf16>
    %c14 = arith.constant 14 : index
    %c0_94 = arith.constant 0 : index
    %c0_95 = arith.constant 0 : index
    %87 = vector.load %arg2[%c14, %c0_94, %c0_95] : memref<49x8x8xbf16, #tpu.memory_space<vmem>>, vector<1x8x8xbf16>
    %88 = vector.shape_cast %87 : vector<1x8x8xbf16> to vector<8x8xbf16>
    %cst_96 = arith.constant dense<0.000000e+00> : vector<8x352xf32>
    %89 = tpu.matmul %88, %86, %cst_96 {dimension_numbers = #tpu.dot_dimension_numbers<[1], [0], [0], [1], [0, 0, 1, 1], [], []>} : vector<8x8xbf16>, vector<8x352xbf16>, vector<8x352xf32> -> vector<8x352xf32>
    %90 = arith.addf %84, %89 : vector<8x352xf32>
    %c0_97 = arith.constant 0 : index
    %c0_98 = arith.constant 0 : index
    %c0_99 = arith.constant 0 : index
    %c45 = arith.constant 45 : index
    %91 = vector.load %arg1[%c0_97, %c0_98, %c0_99, %c45] : memref<1x1x8x512xbf16, #tpu.memory_space<vmem>>, vector<1x1x8x352xbf16>
    %92 = vector.shape_cast %91 : vector<1x1x8x352xbf16> to vector<8x352xbf16>
    %c15 = arith.constant 15 : index
    %c0_100 = arith.constant 0 : index
    %c0_101 = arith.constant 0 : index
    %93 = vector.load %arg2[%c15, %c0_100, %c0_101] : memref<49x8x8xbf16, #tpu.memory_space<vmem>>, vector<1x8x8xbf16>
    %94 = vector.shape_cast %93 : vector<1x8x8xbf16> to vector<8x8xbf16>
    %cst_102 = arith.constant dense<0.000000e+00> : vector<8x352xf32>
    %95 = tpu.matmul %94, %92, %cst_102 {dimension_numbers = #tpu.dot_dimension_numbers<[1], [0], [0], [1], [0, 0, 1, 1], [], []>} : vector<8x8xbf16>, vector<8x352xbf16>, vector<8x352xf32> -> vector<8x352xf32>
    %96 = arith.addf %90, %95 : vector<8x352xf32>
    %c0_103 = arith.constant 0 : index
    %c0_104 = arith.constant 0 : index
    %c0_105 = arith.constant 0 : index
    %c46 = arith.constant 46 : index
    %97 = vector.load %arg1[%c0_103, %c0_104, %c0_105, %c46] : memref<1x1x8x512xbf16, #tpu.memory_space<vmem>>, vector<1x1x8x352xbf16>
    %98 = vector.shape_cast %97 : vector<1x1x8x352xbf16> to vector<8x352xbf16>
    %c16 = arith.constant 16 : index
    %c0_106 = arith.constant 0 : index
    %c0_107 = arith.constant 0 : index
    %99 = vector.load %arg2[%c16, %c0_106, %c0_107] : memref<49x8x8xbf16, #tpu.memory_space<vmem>>, vector<1x8x8xbf16>
    %100 = vector.shape_cast %99 : vector<1x8x8xbf16> to vector<8x8xbf16>
    %cst_108 = arith.constant dense<0.000000e+00> : vector<8x352xf32>
    %101 = tpu.matmul %100, %98, %cst_108 {dimension_numbers = #tpu.dot_dimension_numbers<[1], [0], [0], [1], [0, 0, 1, 1], [], []>} : vector<8x8xbf16>, vector<8x352xbf16>, vector<8x352xf32> -> vector<8x352xf32>
    %102 = arith.addf %96, %101 : vector<8x352xf32>
    %c0_109 = arith.constant 0 : index
    %c0_110 = arith.constant 0 : index
    %c0_111 = arith.constant 0 : index
    %c47 = arith.constant 47 : index
    %103 = vector.load %arg1[%c0_109, %c0_110, %c0_111, %c47] : memref<1x1x8x512xbf16, #tpu.memory_space<vmem>>, vector<1x1x8x352xbf16>
    %104 = vector.shape_cast %103 : vector<1x1x8x352xbf16> to vector<8x352xbf16>
    %c17 = arith.constant 17 : index
    %c0_112 = arith.constant 0 : index
    %c0_113 = arith.constant 0 : index
    %105 = vector.load %arg2[%c17, %c0_112, %c0_113] : memref<49x8x8xbf16, #tpu.memory_space<vmem>>, vector<1x8x8xbf16>
    %106 = vector.shape_cast %105 : vector<1x8x8xbf16> to vector<8x8xbf16>
    %cst_114 = arith.constant dense<0.000000e+00> : vector<8x352xf32>
    %107 = tpu.matmul %106, %104, %cst_114 {dimension_numbers = #tpu.dot_dimension_numbers<[1], [0], [0], [1], [0, 0, 1, 1], [], []>} : vector<8x8xbf16>, vector<8x352xbf16>, vector<8x352xf32> -> vector<8x352xf32>
    %108 = arith.addf %102, %107 : vector<8x352xf32>
    %c0_115 = arith.constant 0 : index
    %c0_116 = arith.constant 0 : index
    %c0_117 = arith.constant 0 : index
    %c48 = arith.constant 48 : index
    %109 = vector.load %arg1[%c0_115, %c0_116, %c0_117, %c48] : memref<1x1x8x512xbf16, #tpu.memory_space<vmem>>, vector<1x1x8x352xbf16>
    %110 = vector.shape_cast %109 : vector<1x1x8x352xbf16> to vector<8x352xbf16>
    %c18 = arith.constant 18 : index
    %c0_118 = arith.constant 0 : index
    %c0_119 = arith.constant 0 : index
    %111 = vector.load %arg2[%c18, %c0_118, %c0_119] : memref<49x8x8xbf16, #tpu.memory_space<vmem>>, vector<1x8x8xbf16>
    %112 = vector.shape_cast %111 : vector<1x8x8xbf16> to vector<8x8xbf16>
    %cst_120 = arith.constant dense<0.000000e+00> : vector<8x352xf32>
    %113 = tpu.matmul %112, %110, %cst_120 {dimension_numbers = #tpu.dot_dimension_numbers<[1], [0], [0], [1], [0, 0, 1, 1], [], []>} : vector<8x8xbf16>, vector<8x352xbf16>, vector<8x352xf32> -> vector<8x352xf32>
    %114 = arith.addf %108, %113 : vector<8x352xf32>
    %c0_121 = arith.constant 0 : index
    %c0_122 = arith.constant 0 : index
    %c0_123 = arith.constant 0 : index
    %c49 = arith.constant 49 : index
    %115 = vector.load %arg1[%c0_121, %c0_122, %c0_123, %c49] : memref<1x1x8x512xbf16, #tpu.memory_space<vmem>>, vector<1x1x8x352xbf16>
    %116 = vector.shape_cast %115 : vector<1x1x8x352xbf16> to vector<8x352xbf16>
    %c19 = arith.constant 19 : index
    %c0_124 = arith.constant 0 : index
    %c0_125 = arith.constant 0 : index
    %117 = vector.load %arg2[%c19, %c0_124, %c0_125] : memref<49x8x8xbf16, #tpu.memory_space<vmem>>, vector<1x8x8xbf16>
    %118 = vector.shape_cast %117 : vector<1x8x8xbf16> to vector<8x8xbf16>
    %cst_126 = arith.constant dense<0.000000e+00> : vector<8x352xf32>
    %119 = tpu.matmul %118, %116, %cst_126 {dimension_numbers = #tpu.dot_dimension_numbers<[1], [0], [0], [1], [0, 0, 1, 1], [], []>} : vector<8x8xbf16>, vector<8x352xbf16>, vector<8x352xf32> -> vector<8x352xf32>
    %120 = arith.addf %114, %119 : vector<8x352xf32>
    %c0_127 = arith.constant 0 : index
    %c0_128 = arith.constant 0 : index
    %c0_129 = arith.constant 0 : index
    %c50 = arith.constant 50 : index
    %121 = vector.load %arg1[%c0_127, %c0_128, %c0_129, %c50] : memref<1x1x8x512xbf16, #tpu.memory_space<vmem>>, vector<1x1x8x352xbf16>
    %122 = vector.shape_cast %121 : vector<1x1x8x352xbf16> to vector<8x352xbf16>
    %c20 = arith.constant 20 : index
    %c0_130 = arith.constant 0 : index
    %c0_131 = arith.constant 0 : index
    %123 = vector.load %arg2[%c20, %c0_130, %c0_131] : memref<49x8x8xbf16, #tpu.memory_space<vmem>>, vector<1x8x8xbf16>
    %124 = vector.shape_cast %123 : vector<1x8x8xbf16> to vector<8x8xbf16>
    %cst_132 = arith.constant dense<0.000000e+00> : vector<8x352xf32>
    %125 = tpu.matmul %124, %122, %cst_132 {dimension_numbers = #tpu.dot_dimension_numbers<[1], [0], [0], [1], [0, 0, 1, 1], [], []>} : vector<8x8xbf16>, vector<8x352xbf16>, vector<8x352xf32> -> vector<8x352xf32>
    %126 = arith.addf %120, %125 : vector<8x352xf32>
    %c0_133 = arith.constant 0 : index
    %c0_134 = arith.constant 0 : index
    %c0_135 = arith.constant 0 : index
    %c66 = arith.constant 66 : index
    %127 = vector.load %arg1[%c0_133, %c0_134, %c0_135, %c66] : memref<1x1x8x512xbf16, #tpu.memory_space<vmem>>, vector<1x1x8x352xbf16>
    %128 = vector.shape_cast %127 : vector<1x1x8x352xbf16> to vector<8x352xbf16>
    %c21 = arith.constant 21 : index
    %c0_136 = arith.constant 0 : index
    %c0_137 = arith.constant 0 : index
    %129 = vector.load %arg2[%c21, %c0_136, %c0_137] : memref<49x8x8xbf16, #tpu.memory_space<vmem>>, vector<1x8x8xbf16>
    %130 = vector.shape_cast %129 : vector<1x8x8xbf16> to vector<8x8xbf16>
    %cst_138 = arith.constant dense<0.000000e+00> : vector<8x352xf32>
    %131 = tpu.matmul %130, %128, %cst_138 {dimension_numbers = #tpu.dot_dimension_numbers<[1], [0], [0], [1], [0, 0, 1, 1], [], []>} : vector<8x8xbf16>, vector<8x352xbf16>, vector<8x352xf32> -> vector<8x352xf32>
    %132 = arith.addf %126, %131 : vector<8x352xf32>
    %c0_139 = arith.constant 0 : index
    %c0_140 = arith.constant 0 : index
    %c0_141 = arith.constant 0 : index
    %c67 = arith.constant 67 : index
    %133 = vector.load %arg1[%c0_139, %c0_140, %c0_141, %c67] : memref<1x1x8x512xbf16, #tpu.memory_space<vmem>>, vector<1x1x8x352xbf16>
    %134 = vector.shape_cast %133 : vector<1x1x8x352xbf16> to vector<8x352xbf16>
    %c22_142 = arith.constant 22 : index
    %c0_143 = arith.constant 0 : index
    %c0_144 = arith.constant 0 : index
    %135 = vector.load %arg2[%c22_142, %c0_143, %c0_144] : memref<49x8x8xbf16, #tpu.memory_space<vmem>>, vector<1x8x8xbf16>
    %136 = vector.shape_cast %135 : vector<1x8x8xbf16> to vector<8x8xbf16>
    %cst_145 = arith.constant dense<0.000000e+00> : vector<8x352xf32>
    %137 = tpu.matmul %136, %134, %cst_145 {dimension_numbers = #tpu.dot_dimension_numbers<[1], [0], [0], [1], [0, 0, 1, 1], [], []>} : vector<8x8xbf16>, vector<8x352xbf16>, vector<8x352xf32> -> vector<8x352xf32>
    %138 = arith.addf %132, %137 : vector<8x352xf32>
    %c0_146 = arith.constant 0 : index
    %c0_147 = arith.constant 0 : index
    %c0_148 = arith.constant 0 : index
    %c68 = arith.constant 68 : index
    %139 = vector.load %arg1[%c0_146, %c0_147, %c0_148, %c68] : memref<1x1x8x512xbf16, #tpu.memory_space<vmem>>, vector<1x1x8x352xbf16>
    %140 = vector.shape_cast %139 : vector<1x1x8x352xbf16> to vector<8x352xbf16>
    %c23_149 = arith.constant 23 : index
    %c0_150 = arith.constant 0 : index
    %c0_151 = arith.constant 0 : index
    %141 = vector.load %arg2[%c23_149, %c0_150, %c0_151] : memref<49x8x8xbf16, #tpu.memory_space<vmem>>, vector<1x8x8xbf16>
    %142 = vector.shape_cast %141 : vector<1x8x8xbf16> to vector<8x8xbf16>
    %cst_152 = arith.constant dense<0.000000e+00> : vector<8x352xf32>
    %143 = tpu.matmul %142, %140, %cst_152 {dimension_numbers = #tpu.dot_dimension_numbers<[1], [0], [0], [1], [0, 0, 1, 1], [], []>} : vector<8x8xbf16>, vector<8x352xbf16>, vector<8x352xf32> -> vector<8x352xf32>
    %144 = arith.addf %138, %143 : vector<8x352xf32>
    %c0_153 = arith.constant 0 : index
    %c0_154 = arith.constant 0 : index
    %c0_155 = arith.constant 0 : index
    %c69 = arith.constant 69 : index
    %145 = vector.load %arg1[%c0_153, %c0_154, %c0_155, %c69] : memref<1x1x8x512xbf16, #tpu.memory_space<vmem>>, vector<1x1x8x352xbf16>
    %146 = vector.shape_cast %145 : vector<1x1x8x352xbf16> to vector<8x352xbf16>
    %c24_156 = arith.constant 24 : index
    %c0_157 = arith.constant 0 : index
    %c0_158 = arith.constant 0 : index
    %147 = vector.load %arg2[%c24_156, %c0_157, %c0_158] : memref<49x8x8xbf16, #tpu.memory_space<vmem>>, vector<1x8x8xbf16>
    %148 = vector.shape_cast %147 : vector<1x8x8xbf16> to vector<8x8xbf16>
    %cst_159 = arith.constant dense<0.000000e+00> : vector<8x352xf32>
    %149 = tpu.matmul %148, %146, %cst_159 {dimension_numbers = #tpu.dot_dimension_numbers<[1], [0], [0], [1], [0, 0, 1, 1], [], []>} : vector<8x8xbf16>, vector<8x352xbf16>, vector<8x352xf32> -> vector<8x352xf32>
    %150 = arith.addf %144, %149 : vector<8x352xf32>
    %c0_160 = arith.constant 0 : index
    %c0_161 = arith.constant 0 : index
    %c0_162 = arith.constant 0 : index
    %c70 = arith.constant 70 : index
    %151 = vector.load %arg1[%c0_160, %c0_161, %c0_162, %c70] : memref<1x1x8x512xbf16, #tpu.memory_space<vmem>>, vector<1x1x8x352xbf16>
    %152 = vector.shape_cast %151 : vector<1x1x8x352xbf16> to vector<8x352xbf16>
    %c25_163 = arith.constant 25 : index
    %c0_164 = arith.constant 0 : index
    %c0_165 = arith.constant 0 : index
    %153 = vector.load %arg2[%c25_163, %c0_164, %c0_165] : memref<49x8x8xbf16, #tpu.memory_space<vmem>>, vector<1x8x8xbf16>
    %154 = vector.shape_cast %153 : vector<1x8x8xbf16> to vector<8x8xbf16>
    %cst_166 = arith.constant dense<0.000000e+00> : vector<8x352xf32>
    %155 = tpu.matmul %154, %152, %cst_166 {dimension_numbers = #tpu.dot_dimension_numbers<[1], [0], [0], [1], [0, 0, 1, 1], [], []>} : vector<8x8xbf16>, vector<8x352xbf16>, vector<8x352xf32> -> vector<8x352xf32>
    %156 = arith.addf %150, %155 : vector<8x352xf32>
    %c0_167 = arith.constant 0 : index
    %c0_168 = arith.constant 0 : index
    %c0_169 = arith.constant 0 : index
    %c71 = arith.constant 71 : index
    %157 = vector.load %arg1[%c0_167, %c0_168, %c0_169, %c71] : memref<1x1x8x512xbf16, #tpu.memory_space<vmem>>, vector<1x1x8x352xbf16>
    %158 = vector.shape_cast %157 : vector<1x1x8x352xbf16> to vector<8x352xbf16>
    %c26_170 = arith.constant 26 : index
    %c0_171 = arith.constant 0 : index
    %c0_172 = arith.constant 0 : index
    %159 = vector.load %arg2[%c26_170, %c0_171, %c0_172] : memref<49x8x8xbf16, #tpu.memory_space<vmem>>, vector<1x8x8xbf16>
    %160 = vector.shape_cast %159 : vector<1x8x8xbf16> to vector<8x8xbf16>
    %cst_173 = arith.constant dense<0.000000e+00> : vector<8x352xf32>
    %161 = tpu.matmul %160, %158, %cst_173 {dimension_numbers = #tpu.dot_dimension_numbers<[1], [0], [0], [1], [0, 0, 1, 1], [], []>} : vector<8x8xbf16>, vector<8x352xbf16>, vector<8x352xf32> -> vector<8x352xf32>
    %162 = arith.addf %156, %161 : vector<8x352xf32>
    %c0_174 = arith.constant 0 : index
    %c0_175 = arith.constant 0 : index
    %c0_176 = arith.constant 0 : index
    %c72 = arith.constant 72 : index
    %163 = vector.load %arg1[%c0_174, %c0_175, %c0_176, %c72] : memref<1x1x8x512xbf16, #tpu.memory_space<vmem>>, vector<1x1x8x352xbf16>
    %164 = vector.shape_cast %163 : vector<1x1x8x352xbf16> to vector<8x352xbf16>
    %c27_177 = arith.constant 27 : index
    %c0_178 = arith.constant 0 : index
    %c0_179 = arith.constant 0 : index
    %165 = vector.load %arg2[%c27_177, %c0_178, %c0_179] : memref<49x8x8xbf16, #tpu.memory_space<vmem>>, vector<1x8x8xbf16>
    %166 = vector.shape_cast %165 : vector<1x8x8xbf16> to vector<8x8xbf16>
    %cst_180 = arith.constant dense<0.000000e+00> : vector<8x352xf32>
    %167 = tpu.matmul %166, %164, %cst_180 {dimension_numbers = #tpu.dot_dimension_numbers<[1], [0], [0], [1], [0, 0, 1, 1], [], []>} : vector<8x8xbf16>, vector<8x352xbf16>, vector<8x352xf32> -> vector<8x352xf32>
    %168 = arith.addf %162, %167 : vector<8x352xf32>
    %c0_181 = arith.constant 0 : index
    %c0_182 = arith.constant 0 : index
    %c0_183 = arith.constant 0 : index
    %c88 = arith.constant 88 : index
    %169 = vector.load %arg1[%c0_181, %c0_182, %c0_183, %c88] : memref<1x1x8x512xbf16, #tpu.memory_space<vmem>>, vector<1x1x8x352xbf16>
    %170 = vector.shape_cast %169 : vector<1x1x8x352xbf16> to vector<8x352xbf16>
    %c28_184 = arith.constant 28 : index
    %c0_185 = arith.constant 0 : index
    %c0_186 = arith.constant 0 : index
    %171 = vector.load %arg2[%c28_184, %c0_185, %c0_186] : memref<49x8x8xbf16, #tpu.memory_space<vmem>>, vector<1x8x8xbf16>
    %172 = vector.shape_cast %171 : vector<1x8x8xbf16> to vector<8x8xbf16>
    %cst_187 = arith.constant dense<0.000000e+00> : vector<8x352xf32>
    %173 = tpu.matmul %172, %170, %cst_187 {dimension_numbers = #tpu.dot_dimension_numbers<[1], [0], [0], [1], [0, 0, 1, 1], [], []>} : vector<8x8xbf16>, vector<8x352xbf16>, vector<8x352xf32> -> vector<8x352xf32>
    %174 = arith.addf %168, %173 : vector<8x352xf32>
    %c0_188 = arith.constant 0 : index
    %c0_189 = arith.constant 0 : index
    %c0_190 = arith.constant 0 : index
    %c89 = arith.constant 89 : index
    %175 = vector.load %arg1[%c0_188, %c0_189, %c0_190, %c89] : memref<1x1x8x512xbf16, #tpu.memory_space<vmem>>, vector<1x1x8x352xbf16>
    %176 = vector.shape_cast %175 : vector<1x1x8x352xbf16> to vector<8x352xbf16>
    %c29 = arith.constant 29 : index
    %c0_191 = arith.constant 0 : index
    %c0_192 = arith.constant 0 : index
    %177 = vector.load %arg2[%c29, %c0_191, %c0_192] : memref<49x8x8xbf16, #tpu.memory_space<vmem>>, vector<1x8x8xbf16>
    %178 = vector.shape_cast %177 : vector<1x8x8xbf16> to vector<8x8xbf16>
    %cst_193 = arith.constant dense<0.000000e+00> : vector<8x352xf32>
    %179 = tpu.matmul %178, %176, %cst_193 {dimension_numbers = #tpu.dot_dimension_numbers<[1], [0], [0], [1], [0, 0, 1, 1], [], []>} : vector<8x8xbf16>, vector<8x352xbf16>, vector<8x352xf32> -> vector<8x352xf32>
    %180 = arith.addf %174, %179 : vector<8x352xf32>
    %c0_194 = arith.constant 0 : index
    %c0_195 = arith.constant 0 : index
    %c0_196 = arith.constant 0 : index
    %c90 = arith.constant 90 : index
    %181 = vector.load %arg1[%c0_194, %c0_195, %c0_196, %c90] : memref<1x1x8x512xbf16, #tpu.memory_space<vmem>>, vector<1x1x8x352xbf16>
    %182 = vector.shape_cast %181 : vector<1x1x8x352xbf16> to vector<8x352xbf16>
    %c30 = arith.constant 30 : index
    %c0_197 = arith.constant 0 : index
    %c0_198 = arith.constant 0 : index
    %183 = vector.load %arg2[%c30, %c0_197, %c0_198] : memref<49x8x8xbf16, #tpu.memory_space<vmem>>, vector<1x8x8xbf16>
    %184 = vector.shape_cast %183 : vector<1x8x8xbf16> to vector<8x8xbf16>
    %cst_199 = arith.constant dense<0.000000e+00> : vector<8x352xf32>
    %185 = tpu.matmul %184, %182, %cst_199 {dimension_numbers = #tpu.dot_dimension_numbers<[1], [0], [0], [1], [0, 0, 1, 1], [], []>} : vector<8x8xbf16>, vector<8x352xbf16>, vector<8x352xf32> -> vector<8x352xf32>
    %186 = arith.addf %180, %185 : vector<8x352xf32>
    %c0_200 = arith.constant 0 : index
    %c0_201 = arith.constant 0 : index
    %c0_202 = arith.constant 0 : index
    %c91 = arith.constant 91 : index
    %187 = vector.load %arg1[%c0_200, %c0_201, %c0_202, %c91] : memref<1x1x8x512xbf16, #tpu.memory_space<vmem>>, vector<1x1x8x352xbf16>
    %188 = vector.shape_cast %187 : vector<1x1x8x352xbf16> to vector<8x352xbf16>
    %c31 = arith.constant 31 : index
    %c0_203 = arith.constant 0 : index
    %c0_204 = arith.constant 0 : index
    %189 = vector.load %arg2[%c31, %c0_203, %c0_204] : memref<49x8x8xbf16, #tpu.memory_space<vmem>>, vector<1x8x8xbf16>
    %190 = vector.shape_cast %189 : vector<1x8x8xbf16> to vector<8x8xbf16>
    %cst_205 = arith.constant dense<0.000000e+00> : vector<8x352xf32>
    %191 = tpu.matmul %190, %188, %cst_205 {dimension_numbers = #tpu.dot_dimension_numbers<[1], [0], [0], [1], [0, 0, 1, 1], [], []>} : vector<8x8xbf16>, vector<8x352xbf16>, vector<8x352xf32> -> vector<8x352xf32>
    %192 = arith.addf %186, %191 : vector<8x352xf32>
    %c0_206 = arith.constant 0 : index
    %c0_207 = arith.constant 0 : index
    %c0_208 = arith.constant 0 : index
    %c92 = arith.constant 92 : index
    %193 = vector.load %arg1[%c0_206, %c0_207, %c0_208, %c92] : memref<1x1x8x512xbf16, #tpu.memory_space<vmem>>, vector<1x1x8x352xbf16>
    %194 = vector.shape_cast %193 : vector<1x1x8x352xbf16> to vector<8x352xbf16>
    %c32 = arith.constant 32 : index
    %c0_209 = arith.constant 0 : index
    %c0_210 = arith.constant 0 : index
    %195 = vector.load %arg2[%c32, %c0_209, %c0_210] : memref<49x8x8xbf16, #tpu.memory_space<vmem>>, vector<1x8x8xbf16>
    %196 = vector.shape_cast %195 : vector<1x8x8xbf16> to vector<8x8xbf16>
    %cst_211 = arith.constant dense<0.000000e+00> : vector<8x352xf32>
    %197 = tpu.matmul %196, %194, %cst_211 {dimension_numbers = #tpu.dot_dimension_numbers<[1], [0], [0], [1], [0, 0, 1, 1], [], []>} : vector<8x8xbf16>, vector<8x352xbf16>, vector<8x352xf32> -> vector<8x352xf32>
    %198 = arith.addf %192, %197 : vector<8x352xf32>
    %c0_212 = arith.constant 0 : index
    %c0_213 = arith.constant 0 : index
    %c0_214 = arith.constant 0 : index
    %c93 = arith.constant 93 : index
    %199 = vector.load %arg1[%c0_212, %c0_213, %c0_214, %c93] : memref<1x1x8x512xbf16, #tpu.memory_space<vmem>>, vector<1x1x8x352xbf16>
    %200 = vector.shape_cast %199 : vector<1x1x8x352xbf16> to vector<8x352xbf16>
    %c33 = arith.constant 33 : index
    %c0_215 = arith.constant 0 : index
    %c0_216 = arith.constant 0 : index
    %201 = vector.load %arg2[%c33, %c0_215, %c0_216] : memref<49x8x8xbf16, #tpu.memory_space<vmem>>, vector<1x8x8xbf16>
    %202 = vector.shape_cast %201 : vector<1x8x8xbf16> to vector<8x8xbf16>
    %cst_217 = arith.constant dense<0.000000e+00> : vector<8x352xf32>
    %203 = tpu.matmul %202, %200, %cst_217 {dimension_numbers = #tpu.dot_dimension_numbers<[1], [0], [0], [1], [0, 0, 1, 1], [], []>} : vector<8x8xbf16>, vector<8x352xbf16>, vector<8x352xf32> -> vector<8x352xf32>
    %204 = arith.addf %198, %203 : vector<8x352xf32>
    %c0_218 = arith.constant 0 : index
    %c0_219 = arith.constant 0 : index
    %c0_220 = arith.constant 0 : index
    %c94 = arith.constant 94 : index
    %205 = vector.load %arg1[%c0_218, %c0_219, %c0_220, %c94] : memref<1x1x8x512xbf16, #tpu.memory_space<vmem>>, vector<1x1x8x352xbf16>
    %206 = vector.shape_cast %205 : vector<1x1x8x352xbf16> to vector<8x352xbf16>
    %c34 = arith.constant 34 : index
    %c0_221 = arith.constant 0 : index
    %c0_222 = arith.constant 0 : index
    %207 = vector.load %arg2[%c34, %c0_221, %c0_222] : memref<49x8x8xbf16, #tpu.memory_space<vmem>>, vector<1x8x8xbf16>
    %208 = vector.shape_cast %207 : vector<1x8x8xbf16> to vector<8x8xbf16>
    %cst_223 = arith.constant dense<0.000000e+00> : vector<8x352xf32>
    %209 = tpu.matmul %208, %206, %cst_223 {dimension_numbers = #tpu.dot_dimension_numbers<[1], [0], [0], [1], [0, 0, 1, 1], [], []>} : vector<8x8xbf16>, vector<8x352xbf16>, vector<8x352xf32> -> vector<8x352xf32>
    %210 = arith.addf %204, %209 : vector<8x352xf32>
    %c0_224 = arith.constant 0 : index
    %c0_225 = arith.constant 0 : index
    %c0_226 = arith.constant 0 : index
    %c110 = arith.constant 110 : index
    %211 = vector.load %arg1[%c0_224, %c0_225, %c0_226, %c110] : memref<1x1x8x512xbf16, #tpu.memory_space<vmem>>, vector<1x1x8x352xbf16>
    %212 = vector.shape_cast %211 : vector<1x1x8x352xbf16> to vector<8x352xbf16>
    %c35 = arith.constant 35 : index
    %c0_227 = arith.constant 0 : index
    %c0_228 = arith.constant 0 : index
    %213 = vector.load %arg2[%c35, %c0_227, %c0_228] : memref<49x8x8xbf16, #tpu.memory_space<vmem>>, vector<1x8x8xbf16>
    %214 = vector.shape_cast %213 : vector<1x8x8xbf16> to vector<8x8xbf16>
    %cst_229 = arith.constant dense<0.000000e+00> : vector<8x352xf32>
    %215 = tpu.matmul %214, %212, %cst_229 {dimension_numbers = #tpu.dot_dimension_numbers<[1], [0], [0], [1], [0, 0, 1, 1], [], []>} : vector<8x8xbf16>, vector<8x352xbf16>, vector<8x352xf32> -> vector<8x352xf32>
    %216 = arith.addf %210, %215 : vector<8x352xf32>
    %c0_230 = arith.constant 0 : index
    %c0_231 = arith.constant 0 : index
    %c0_232 = arith.constant 0 : index
    %c111 = arith.constant 111 : index
    %217 = vector.load %arg1[%c0_230, %c0_231, %c0_232, %c111] : memref<1x1x8x512xbf16, #tpu.memory_space<vmem>>, vector<1x1x8x352xbf16>
    %218 = vector.shape_cast %217 : vector<1x1x8x352xbf16> to vector<8x352xbf16>
    %c36 = arith.constant 36 : index
    %c0_233 = arith.constant 0 : index
    %c0_234 = arith.constant 0 : index
    %219 = vector.load %arg2[%c36, %c0_233, %c0_234] : memref<49x8x8xbf16, #tpu.memory_space<vmem>>, vector<1x8x8xbf16>
    %220 = vector.shape_cast %219 : vector<1x8x8xbf16> to vector<8x8xbf16>
    %cst_235 = arith.constant dense<0.000000e+00> : vector<8x352xf32>
    %221 = tpu.matmul %220, %218, %cst_235 {dimension_numbers = #tpu.dot_dimension_numbers<[1], [0], [0], [1], [0, 0, 1, 1], [], []>} : vector<8x8xbf16>, vector<8x352xbf16>, vector<8x352xf32> -> vector<8x352xf32>
    %222 = arith.addf %216, %221 : vector<8x352xf32>
    %c0_236 = arith.constant 0 : index
    %c0_237 = arith.constant 0 : index
    %c0_238 = arith.constant 0 : index
    %c112 = arith.constant 112 : index
    %223 = vector.load %arg1[%c0_236, %c0_237, %c0_238, %c112] : memref<1x1x8x512xbf16, #tpu.memory_space<vmem>>, vector<1x1x8x352xbf16>
    %224 = vector.shape_cast %223 : vector<1x1x8x352xbf16> to vector<8x352xbf16>
    %c37 = arith.constant 37 : index
    %c0_239 = arith.constant 0 : index
    %c0_240 = arith.constant 0 : index
    %225 = vector.load %arg2[%c37, %c0_239, %c0_240] : memref<49x8x8xbf16, #tpu.memory_space<vmem>>, vector<1x8x8xbf16>
    %226 = vector.shape_cast %225 : vector<1x8x8xbf16> to vector<8x8xbf16>
    %cst_241 = arith.constant dense<0.000000e+00> : vector<8x352xf32>
    %227 = tpu.matmul %226, %224, %cst_241 {dimension_numbers = #tpu.dot_dimension_numbers<[1], [0], [0], [1], [0, 0, 1, 1], [], []>} : vector<8x8xbf16>, vector<8x352xbf16>, vector<8x352xf32> -> vector<8x352xf32>
    %228 = arith.addf %222, %227 : vector<8x352xf32>
    %c0_242 = arith.constant 0 : index
    %c0_243 = arith.constant 0 : index
    %c0_244 = arith.constant 0 : index
    %c113 = arith.constant 113 : index
    %229 = vector.load %arg1[%c0_242, %c0_243, %c0_244, %c113] : memref<1x1x8x512xbf16, #tpu.memory_space<vmem>>, vector<1x1x8x352xbf16>
    %230 = vector.shape_cast %229 : vector<1x1x8x352xbf16> to vector<8x352xbf16>
    %c38 = arith.constant 38 : index
    %c0_245 = arith.constant 0 : index
    %c0_246 = arith.constant 0 : index
    %231 = vector.load %arg2[%c38, %c0_245, %c0_246] : memref<49x8x8xbf16, #tpu.memory_space<vmem>>, vector<1x8x8xbf16>
    %232 = vector.shape_cast %231 : vector<1x8x8xbf16> to vector<8x8xbf16>
    %cst_247 = arith.constant dense<0.000000e+00> : vector<8x352xf32>
    %233 = tpu.matmul %232, %230, %cst_247 {dimension_numbers = #tpu.dot_dimension_numbers<[1], [0], [0], [1], [0, 0, 1, 1], [], []>} : vector<8x8xbf16>, vector<8x352xbf16>, vector<8x352xf32> -> vector<8x352xf32>
    %234 = arith.addf %228, %233 : vector<8x352xf32>
    %c0_248 = arith.constant 0 : index
    %c0_249 = arith.constant 0 : index
    %c0_250 = arith.constant 0 : index
    %c114 = arith.constant 114 : index
    %235 = vector.load %arg1[%c0_248, %c0_249, %c0_250, %c114] : memref<1x1x8x512xbf16, #tpu.memory_space<vmem>>, vector<1x1x8x352xbf16>
    %236 = vector.shape_cast %235 : vector<1x1x8x352xbf16> to vector<8x352xbf16>
    %c39 = arith.constant 39 : index
    %c0_251 = arith.constant 0 : index
    %c0_252 = arith.constant 0 : index
    %237 = vector.load %arg2[%c39, %c0_251, %c0_252] : memref<49x8x8xbf16, #tpu.memory_space<vmem>>, vector<1x8x8xbf16>
    %238 = vector.shape_cast %237 : vector<1x8x8xbf16> to vector<8x8xbf16>
    %cst_253 = arith.constant dense<0.000000e+00> : vector<8x352xf32>
    %239 = tpu.matmul %238, %236, %cst_253 {dimension_numbers = #tpu.dot_dimension_numbers<[1], [0], [0], [1], [0, 0, 1, 1], [], []>} : vector<8x8xbf16>, vector<8x352xbf16>, vector<8x352xf32> -> vector<8x352xf32>
    %240 = arith.addf %234, %239 : vector<8x352xf32>
    %c0_254 = arith.constant 0 : index
    %c0_255 = arith.constant 0 : index
    %c0_256 = arith.constant 0 : index
    %c115 = arith.constant 115 : index
    %241 = vector.load %arg1[%c0_254, %c0_255, %c0_256, %c115] : memref<1x1x8x512xbf16, #tpu.memory_space<vmem>>, vector<1x1x8x352xbf16>
    %242 = vector.shape_cast %241 : vector<1x1x8x352xbf16> to vector<8x352xbf16>
    %c40 = arith.constant 40 : index
    %c0_257 = arith.constant 0 : index
    %c0_258 = arith.constant 0 : index
    %243 = vector.load %arg2[%c40, %c0_257, %c0_258] : memref<49x8x8xbf16, #tpu.memory_space<vmem>>, vector<1x8x8xbf16>
    %244 = vector.shape_cast %243 : vector<1x8x8xbf16> to vector<8x8xbf16>
    %cst_259 = arith.constant dense<0.000000e+00> : vector<8x352xf32>
    %245 = tpu.matmul %244, %242, %cst_259 {dimension_numbers = #tpu.dot_dimension_numbers<[1], [0], [0], [1], [0, 0, 1, 1], [], []>} : vector<8x8xbf16>, vector<8x352xbf16>, vector<8x352xf32> -> vector<8x352xf32>
    %246 = arith.addf %240, %245 : vector<8x352xf32>
    %c0_260 = arith.constant 0 : index
    %c0_261 = arith.constant 0 : index
    %c0_262 = arith.constant 0 : index
    %c116 = arith.constant 116 : index
    %247 = vector.load %arg1[%c0_260, %c0_261, %c0_262, %c116] : memref<1x1x8x512xbf16, #tpu.memory_space<vmem>>, vector<1x1x8x352xbf16>
    %248 = vector.shape_cast %247 : vector<1x1x8x352xbf16> to vector<8x352xbf16>
    %c41 = arith.constant 41 : index
    %c0_263 = arith.constant 0 : index
    %c0_264 = arith.constant 0 : index
    %249 = vector.load %arg2[%c41, %c0_263, %c0_264] : memref<49x8x8xbf16, #tpu.memory_space<vmem>>, vector<1x8x8xbf16>
    %250 = vector.shape_cast %249 : vector<1x8x8xbf16> to vector<8x8xbf16>
    %cst_265 = arith.constant dense<0.000000e+00> : vector<8x352xf32>
    %251 = tpu.matmul %250, %248, %cst_265 {dimension_numbers = #tpu.dot_dimension_numbers<[1], [0], [0], [1], [0, 0, 1, 1], [], []>} : vector<8x8xbf16>, vector<8x352xbf16>, vector<8x352xf32> -> vector<8x352xf32>
    %252 = arith.addf %246, %251 : vector<8x352xf32>
    %c0_266 = arith.constant 0 : index
    %c0_267 = arith.constant 0 : index
    %c0_268 = arith.constant 0 : index
    %c132 = arith.constant 132 : index
    %253 = vector.load %arg1[%c0_266, %c0_267, %c0_268, %c132] : memref<1x1x8x512xbf16, #tpu.memory_space<vmem>>, vector<1x1x8x352xbf16>
    %254 = vector.shape_cast %253 : vector<1x1x8x352xbf16> to vector<8x352xbf16>
    %c42 = arith.constant 42 : index
    %c0_269 = arith.constant 0 : index
    %c0_270 = arith.constant 0 : index
    %255 = vector.load %arg2[%c42, %c0_269, %c0_270] : memref<49x8x8xbf16, #tpu.memory_space<vmem>>, vector<1x8x8xbf16>
    %256 = vector.shape_cast %255 : vector<1x8x8xbf16> to vector<8x8xbf16>
    %cst_271 = arith.constant dense<0.000000e+00> : vector<8x352xf32>
    %257 = tpu.matmul %256, %254, %cst_271 {dimension_numbers = #tpu.dot_dimension_numbers<[1], [0], [0], [1], [0, 0, 1, 1], [], []>} : vector<8x8xbf16>, vector<8x352xbf16>, vector<8x352xf32> -> vector<8x352xf32>
    %258 = arith.addf %252, %257 : vector<8x352xf32>
    %c0_272 = arith.constant 0 : index
    %c0_273 = arith.constant 0 : index
    %c0_274 = arith.constant 0 : index
    %c133 = arith.constant 133 : index
    %259 = vector.load %arg1[%c0_272, %c0_273, %c0_274, %c133] : memref<1x1x8x512xbf16, #tpu.memory_space<vmem>>, vector<1x1x8x352xbf16>
    %260 = vector.shape_cast %259 : vector<1x1x8x352xbf16> to vector<8x352xbf16>
    %c43 = arith.constant 43 : index
    %c0_275 = arith.constant 0 : index
    %c0_276 = arith.constant 0 : index
    %261 = vector.load %arg2[%c43, %c0_275, %c0_276] : memref<49x8x8xbf16, #tpu.memory_space<vmem>>, vector<1x8x8xbf16>
    %262 = vector.shape_cast %261 : vector<1x8x8xbf16> to vector<8x8xbf16>
    %cst_277 = arith.constant dense<0.000000e+00> : vector<8x352xf32>
    %263 = tpu.matmul %262, %260, %cst_277 {dimension_numbers = #tpu.dot_dimension_numbers<[1], [0], [0], [1], [0, 0, 1, 1], [], []>} : vector<8x8xbf16>, vector<8x352xbf16>, vector<8x352xf32> -> vector<8x352xf32>
    %264 = arith.addf %258, %263 : vector<8x352xf32>
    %c0_278 = arith.constant 0 : index
    %c0_279 = arith.constant 0 : index
    %c0_280 = arith.constant 0 : index
    %c134 = arith.constant 134 : index
    %265 = vector.load %arg1[%c0_278, %c0_279, %c0_280, %c134] : memref<1x1x8x512xbf16, #tpu.memory_space<vmem>>, vector<1x1x8x352xbf16>
    %266 = vector.shape_cast %265 : vector<1x1x8x352xbf16> to vector<8x352xbf16>
    %c44_281 = arith.constant 44 : index
    %c0_282 = arith.constant 0 : index
    %c0_283 = arith.constant 0 : index
    %267 = vector.load %arg2[%c44_281, %c0_282, %c0_283] : memref<49x8x8xbf16, #tpu.memory_space<vmem>>, vector<1x8x8xbf16>
    %268 = vector.shape_cast %267 : vector<1x8x8xbf16> to vector<8x8xbf16>
    %cst_284 = arith.constant dense<0.000000e+00> : vector<8x352xf32>
    %269 = tpu.matmul %268, %266, %cst_284 {dimension_numbers = #tpu.dot_dimension_numbers<[1], [0], [0], [1], [0, 0, 1, 1], [], []>} : vector<8x8xbf16>, vector<8x352xbf16>, vector<8x352xf32> -> vector<8x352xf32>
    %270 = arith.addf %264, %269 : vector<8x352xf32>
    %c0_285 = arith.constant 0 : index
    %c0_286 = arith.constant 0 : index
    %c0_287 = arith.constant 0 : index
    %c135 = arith.constant 135 : index
    %271 = vector.load %arg1[%c0_285, %c0_286, %c0_287, %c135] : memref<1x1x8x512xbf16, #tpu.memory_space<vmem>>, vector<1x1x8x352xbf16>
    %272 = vector.shape_cast %271 : vector<1x1x8x352xbf16> to vector<8x352xbf16>
    %c45_288 = arith.constant 45 : index
    %c0_289 = arith.constant 0 : index
    %c0_290 = arith.constant 0 : index
    %273 = vector.load %arg2[%c45_288, %c0_289, %c0_290] : memref<49x8x8xbf16, #tpu.memory_space<vmem>>, vector<1x8x8xbf16>
    %274 = vector.shape_cast %273 : vector<1x8x8xbf16> to vector<8x8xbf16>
    %cst_291 = arith.constant dense<0.000000e+00> : vector<8x352xf32>
    %275 = tpu.matmul %274, %272, %cst_291 {dimension_numbers = #tpu.dot_dimension_numbers<[1], [0], [0], [1], [0, 0, 1, 1], [], []>} : vector<8x8xbf16>, vector<8x352xbf16>, vector<8x352xf32> -> vector<8x352xf32>
    %276 = arith.addf %270, %275 : vector<8x352xf32>
    %c0_292 = arith.constant 0 : index
    %c0_293 = arith.constant 0 : index
    %c0_294 = arith.constant 0 : index
    %c136 = arith.constant 136 : index
    %277 = vector.load %arg1[%c0_292, %c0_293, %c0_294, %c136] : memref<1x1x8x512xbf16, #tpu.memory_space<vmem>>, vector<1x1x8x352xbf16>
    %278 = vector.shape_cast %277 : vector<1x1x8x352xbf16> to vector<8x352xbf16>
    %c46_295 = arith.constant 46 : index
    %c0_296 = arith.constant 0 : index
    %c0_297 = arith.constant 0 : index
    %279 = vector.load %arg2[%c46_295, %c0_296, %c0_297] : memref<49x8x8xbf16, #tpu.memory_space<vmem>>, vector<1x8x8xbf16>
    %280 = vector.shape_cast %279 : vector<1x8x8xbf16> to vector<8x8xbf16>
    %cst_298 = arith.constant dense<0.000000e+00> : vector<8x352xf32>
    %281 = tpu.matmul %280, %278, %cst_298 {dimension_numbers = #tpu.dot_dimension_numbers<[1], [0], [0], [1], [0, 0, 1, 1], [], []>} : vector<8x8xbf16>, vector<8x352xbf16>, vector<8x352xf32> -> vector<8x352xf32>
    %282 = arith.addf %276, %281 : vector<8x352xf32>
    %c0_299 = arith.constant 0 : index
    %c0_300 = arith.constant 0 : index
    %c0_301 = arith.constant 0 : index
    %c137 = arith.constant 137 : index
    %283 = vector.load %arg1[%c0_299, %c0_300, %c0_301, %c137] : memref<1x1x8x512xbf16, #tpu.memory_space<vmem>>, vector<1x1x8x352xbf16>
    %284 = vector.shape_cast %283 : vector<1x1x8x352xbf16> to vector<8x352xbf16>
    %c47_302 = arith.constant 47 : index
    %c0_303 = arith.constant 0 : index
    %c0_304 = arith.constant 0 : index
    %285 = vector.load %arg2[%c47_302, %c0_303, %c0_304] : memref<49x8x8xbf16, #tpu.memory_space<vmem>>, vector<1x8x8xbf16>
    %286 = vector.shape_cast %285 : vector<1x8x8xbf16> to vector<8x8xbf16>
    %cst_305 = arith.constant dense<0.000000e+00> : vector<8x352xf32>
    %287 = tpu.matmul %286, %284, %cst_305 {dimension_numbers = #tpu.dot_dimension_numbers<[1], [0], [0], [1], [0, 0, 1, 1], [], []>} : vector<8x8xbf16>, vector<8x352xbf16>, vector<8x352xf32> -> vector<8x352xf32>
    %288 = arith.addf %282, %287 : vector<8x352xf32>
    %c0_306 = arith.constant 0 : index
    %c0_307 = arith.constant 0 : index
    %c0_308 = arith.constant 0 : index
    %c138 = arith.constant 138 : index
    %289 = vector.load %arg1[%c0_306, %c0_307, %c0_308, %c138] : memref<1x1x8x512xbf16, #tpu.memory_space<vmem>>, vector<1x1x8x352xbf16>
    %290 = vector.shape_cast %289 : vector<1x1x8x352xbf16> to vector<8x352xbf16>
    %c48_309 = arith.constant 48 : index
    %c0_310 = arith.constant 0 : index
    %c0_311 = arith.constant 0 : index
    %291 = vector.load %arg2[%c48_309, %c0_310, %c0_311] : memref<49x8x8xbf16, #tpu.memory_space<vmem>>, vector<1x8x8xbf16>
    %292 = vector.shape_cast %291 : vector<1x8x8xbf16> to vector<8x8xbf16>
    %cst_312 = arith.constant dense<0.000000e+00> : vector<8x352xf32>
    %293 = tpu.matmul %292, %290, %cst_312 {dimension_numbers = #tpu.dot_dimension_numbers<[1], [0], [0], [1], [0, 0, 1, 1], [], []>} : vector<8x8xbf16>, vector<8x352xbf16>, vector<8x352xf32> -> vector<8x352xf32>
    %294 = arith.addf %288, %293 : vector<8x352xf32>
    %c0_313 = arith.constant 0 : index
    %c0_314 = arith.constant 0 : index
    %295 = vector.load %arg3[%c0_313, %c0_314] : memref<8x1xf32, #tpu.memory_space<vmem>>, vector<8x1xf32>
    %296 = vector.broadcast %295 : vector<8x1xf32> to vector<8x352xf32>
    %297 = arith.addf %294, %296 : vector<8x352xf32>
    %c0_315 = arith.constant 0 : index
    %c0_316 = arith.constant 0 : index
    %298 = vector.load %arg4[%c0_315, %c0_316] : memref<1x352xf32, #tpu.memory_space<vmem>>, vector<1x352xf32>
    %299 = vector.broadcast %298 : vector<1x352xf32> to vector<8x352xf32>
    %300 = arith.mulf %297, %299 : vector<8x352xf32>
    %cst_317 = arith.constant dense<0.000000e+00> : vector<8xf32>
    %301 = vector.multi_reduction <add>, %300, %cst_317 [1] : vector<8x352xf32> to vector<8xf32>
    %302 = vector.shape_cast %301 : vector<8xf32> to vector<8x1xf32>
    %cst_318 = arith.constant 3.906250e-03 : f32
    %303 = vector.broadcast %cst_318 : f32 to vector<8x1xf32>
    %304 = arith.mulf %302, %303 : vector<8x1xf32>
    %305 = vector.broadcast %304 : vector<8x1xf32> to vector<8x352xf32>
    %306 = arith.subf %297, %305 : vector<8x352xf32>
    %307 = arith.mulf %306, %306 : vector<8x352xf32>
    %308 = vector.broadcast %298 : vector<1x352xf32> to vector<8x352xf32>
    %309 = arith.mulf %307, %308 : vector<8x352xf32>
    %cst_319 = arith.constant dense<0.000000e+00> : vector<8xf32>
    %310 = vector.multi_reduction <add>, %309, %cst_319 [1] : vector<8x352xf32> to vector<8xf32>
    %311 = vector.shape_cast %310 : vector<8xf32> to vector<8x1xf32>
    %cst_320 = arith.constant 3.906250e-03 : f32
    %312 = vector.broadcast %cst_320 : f32 to vector<8x1xf32>
    %313 = arith.mulf %311, %312 : vector<8x1xf32>
    %cst_321 = arith.constant 9.99999974E-6 : f32
    %314 = vector.broadcast %cst_321 : f32 to vector<8x1xf32>
    %315 = arith.addf %313, %314 : vector<8x1xf32>
    %316 = math.rsqrt %315 : vector<8x1xf32>
    %317 = vector.broadcast %316 : vector<8x1xf32> to vector<8x352xf32>
    %318 = arith.mulf %306, %317 : vector<8x352xf32>
    %cst_322 = arith.constant 0.000000e+00 : f32
    %319 = vector.broadcast %cst_322 : f32 to vector<8x352xf32>
    %320 = arith.maximumf %318, %319 : vector<8x352xf32>
    %c0_323 = arith.constant 0 : index
    %c0_324 = arith.constant 0 : index
    %c0_325 = arith.constant 0 : index
    %321 = vector.load %arg5[%c0_323, %c0_324, %c0_325] : memref<1x8x352xf32, #tpu.memory_space<vmem>>, vector<1x8x352xf32>
    %322 = vector.shape_cast %321 : vector<1x8x352xf32> to vector<8x352xf32>
    %323 = vector.shape_cast %320 : vector<8x352xf32> to vector<1x8x352xf32>
    tpu.vector_store %arg5[%c0_323, %c0_324, %c0_325], %323 {strides = array<i32>} : memref<1x8x352xf32, #tpu.memory_space<vmem>>, vector<1x8x352xf32>,
    return
  }
  func.func @transform_0(%arg0: i32) -> (i32, i32, i32, i32) {
    %c0_i32 = arith.constant 0 : i32
    %c0_i32_0 = arith.constant 0 : i32
    %c0_i32_1 = arith.constant 0 : i32
    %c0_i32_2 = arith.constant 0 : i32
    return %arg0, %c0_i32, %c0_i32_0, %c0_i32_1 : i32, i32, i32, i32
  }
  func.func @transform_1(%arg0: i32) -> (i32, i32, i32) {
    %c0_i32 = arith.constant 0 : i32
    %c0_i32_0 = arith.constant 0 : i32
    %c0_i32_1 = arith.constant 0 : i32
    %c0_i32_2 = arith.constant 0 : i32
    return %c0_i32, %c0_i32_0, %c0_i32_1 : i32, i32, i32
  }
  func.func @transform_2(%arg0: i32) -> (i32, i32) {
    %c0_i32 = arith.constant 0 : i32
    %c0_i32_0 = arith.constant 0 : i32
    %c0_i32_1 = arith.constant 0 : i32
    return %c0_i32, %c0_i32_0 : i32, i32
  }
  func.func @transform_3(%arg0: i32) -> (i32, i32) {
    %c0_i32 = arith.constant 0 : i32
    %c0_i32_0 = arith.constant 0 : i32
    %c0_i32_1 = arith.constant 0 : i32
    return %c0_i32, %c0_i32_0 : i32, i32
  }
  func.func @transform_4(%arg0: i32) -> (i32, i32, i32) {
    %c0_i32 = arith.constant 0 : i32
    %c0_i32_0 = arith.constant 0 : i32
    %c0_i32_1 = arith.constant 0 : i32
    return %arg0, %c0_i32, %c0_i32_0 : i32, i32, i32
  }
}

module attributes {stable_mosaic.version = 11 : i64} {
  func.func @_fused_conv_in_kernel(%arg0: i32, %arg1: memref<1x4x8x128xbf16, #tpu.memory_space<vmem>>, %arg2: memref<16x16x8xbf16, #tpu.memory_space<vmem>>, %arg3: memref<16x1xf32, #tpu.memory_space<vmem>>, %arg4: memref<1x72xf32, #tpu.memory_space<vmem>>, %arg5: memref<1x16x72xf32, #tpu.memory_space<vmem>>) attributes {dimension_semantics = [#tpu.dimension_semantics<parallel>], iteration_bounds = array<i64: 2>, scalar_prefetch = 0 : i64, scratch_operands = 0 : i64, tpu.core_type = #tpu.core_type<tc>, window_params = [{transform_indices = @transform_0, window_bounds = array<i64: 1, 4, 8, 128>}, {pipeline_mode = #tpu.pipeline_mode<synchronous>, transform_indices = @transform_1, window_bounds = array<i64: 16, 16, 8>}, {pipeline_mode = #tpu.pipeline_mode<synchronous>, transform_indices = @transform_2, window_bounds = array<i64: 16, 1>}, {pipeline_mode = #tpu.pipeline_mode<synchronous>, transform_indices = @transform_3, window_bounds = array<i64: 1, 72>}, {transform_indices = @transform_4, window_bounds = array<i64: 1, 16, 72>}]} {
    %cst = arith.constant 0.000000e+00 : f32
    %0 = vector.broadcast %cst : f32 to vector<16x72xf32>
    %c0 = arith.constant 0 : index
    %c0_0 = arith.constant 0 : index
    %c0_1 = arith.constant 0 : index
    %c0_2 = arith.constant 0 : index
    %1 = vector.load %arg1[%c0, %c0_0, %c0_1, %c0_2] : memref<1x4x8x128xbf16, #tpu.memory_space<vmem>>, vector<1x1x8x72xbf16>
    %2 = vector.shape_cast %1 : vector<1x1x8x72xbf16> to vector<8x72xbf16>
    %c0_3 = arith.constant 0 : index
    %c0_4 = arith.constant 0 : index
    %c0_5 = arith.constant 0 : index
    %3 = vector.load %arg2[%c0_3, %c0_4, %c0_5] : memref<16x16x8xbf16, #tpu.memory_space<vmem>>, vector<1x16x8xbf16>
    %4 = vector.shape_cast %3 : vector<1x16x8xbf16> to vector<16x8xbf16>
    %cst_6 = arith.constant dense<0.000000e+00> : vector<16x72xf32>
    %5 = tpu.matmul %4, %2, %cst_6 {dimension_numbers = #tpu.dot_dimension_numbers<[1], [0], [0], [1], [0, 0, 1, 1], [], []>} : vector<16x8xbf16>, vector<8x72xbf16>, vector<16x72xf32> -> vector<16x72xf32>
    %6 = arith.addf %0, %5 : vector<16x72xf32>
    %c0_7 = arith.constant 0 : index
    %c1 = arith.constant 1 : index
    %c0_8 = arith.constant 0 : index
    %c0_9 = arith.constant 0 : index
    %7 = vector.load %arg1[%c0_7, %c1, %c0_8, %c0_9] : memref<1x4x8x128xbf16, #tpu.memory_space<vmem>>, vector<1x1x8x72xbf16>
    %8 = vector.shape_cast %7 : vector<1x1x8x72xbf16> to vector<8x72xbf16>
    %c1_10 = arith.constant 1 : index
    %c0_11 = arith.constant 0 : index
    %c0_12 = arith.constant 0 : index
    %9 = vector.load %arg2[%c1_10, %c0_11, %c0_12] : memref<16x16x8xbf16, #tpu.memory_space<vmem>>, vector<1x16x8xbf16>
    %10 = vector.shape_cast %9 : vector<1x16x8xbf16> to vector<16x8xbf16>
    %cst_13 = arith.constant dense<0.000000e+00> : vector<16x72xf32>
    %11 = tpu.matmul %10, %8, %cst_13 {dimension_numbers = #tpu.dot_dimension_numbers<[1], [0], [0], [1], [0, 0, 1, 1], [], []>} : vector<16x8xbf16>, vector<8x72xbf16>, vector<16x72xf32> -> vector<16x72xf32>
    %12 = arith.addf %6, %11 : vector<16x72xf32>
    %c0_14 = arith.constant 0 : index
    %c0_15 = arith.constant 0 : index
    %c0_16 = arith.constant 0 : index
    %c1_17 = arith.constant 1 : index
    %13 = vector.load %arg1[%c0_14, %c0_15, %c0_16, %c1_17] : memref<1x4x8x128xbf16, #tpu.memory_space<vmem>>, vector<1x1x8x72xbf16>
    %14 = vector.shape_cast %13 : vector<1x1x8x72xbf16> to vector<8x72xbf16>
    %c2 = arith.constant 2 : index
    %c0_18 = arith.constant 0 : index
    %c0_19 = arith.constant 0 : index
    %15 = vector.load %arg2[%c2, %c0_18, %c0_19] : memref<16x16x8xbf16, #tpu.memory_space<vmem>>, vector<1x16x8xbf16>
    %16 = vector.shape_cast %15 : vector<1x16x8xbf16> to vector<16x8xbf16>
    %cst_20 = arith.constant dense<0.000000e+00> : vector<16x72xf32>
    %17 = tpu.matmul %16, %14, %cst_20 {dimension_numbers = #tpu.dot_dimension_numbers<[1], [0], [0], [1], [0, 0, 1, 1], [], []>} : vector<16x8xbf16>, vector<8x72xbf16>, vector<16x72xf32> -> vector<16x72xf32>
    %18 = arith.addf %12, %17 : vector<16x72xf32>
    %c0_21 = arith.constant 0 : index
    %c1_22 = arith.constant 1 : index
    %c0_23 = arith.constant 0 : index
    %c1_24 = arith.constant 1 : index
    %19 = vector.load %arg1[%c0_21, %c1_22, %c0_23, %c1_24] : memref<1x4x8x128xbf16, #tpu.memory_space<vmem>>, vector<1x1x8x72xbf16>
    %20 = vector.shape_cast %19 : vector<1x1x8x72xbf16> to vector<8x72xbf16>
    %c3 = arith.constant 3 : index
    %c0_25 = arith.constant 0 : index
    %c0_26 = arith.constant 0 : index
    %21 = vector.load %arg2[%c3, %c0_25, %c0_26] : memref<16x16x8xbf16, #tpu.memory_space<vmem>>, vector<1x16x8xbf16>
    %22 = vector.shape_cast %21 : vector<1x16x8xbf16> to vector<16x8xbf16>
    %cst_27 = arith.constant dense<0.000000e+00> : vector<16x72xf32>
    %23 = tpu.matmul %22, %20, %cst_27 {dimension_numbers = #tpu.dot_dimension_numbers<[1], [0], [0], [1], [0, 0, 1, 1], [], []>} : vector<16x8xbf16>, vector<8x72xbf16>, vector<16x72xf32> -> vector<16x72xf32>
    %24 = arith.addf %18, %23 : vector<16x72xf32>
    %c0_28 = arith.constant 0 : index
    %c2_29 = arith.constant 2 : index
    %c0_30 = arith.constant 0 : index
    %c0_31 = arith.constant 0 : index
    %25 = vector.load %arg1[%c0_28, %c2_29, %c0_30, %c0_31] : memref<1x4x8x128xbf16, #tpu.memory_space<vmem>>, vector<1x1x8x72xbf16>
    %26 = vector.shape_cast %25 : vector<1x1x8x72xbf16> to vector<8x72xbf16>
    %c4 = arith.constant 4 : index
    %c0_32 = arith.constant 0 : index
    %c0_33 = arith.constant 0 : index
    %27 = vector.load %arg2[%c4, %c0_32, %c0_33] : memref<16x16x8xbf16, #tpu.memory_space<vmem>>, vector<1x16x8xbf16>
    %28 = vector.shape_cast %27 : vector<1x16x8xbf16> to vector<16x8xbf16>
    %cst_34 = arith.constant dense<0.000000e+00> : vector<16x72xf32>
    %29 = tpu.matmul %28, %26, %cst_34 {dimension_numbers = #tpu.dot_dimension_numbers<[1], [0], [0], [1], [0, 0, 1, 1], [], []>} : vector<16x8xbf16>, vector<8x72xbf16>, vector<16x72xf32> -> vector<16x72xf32>
    %30 = arith.addf %24, %29 : vector<16x72xf32>
    %c0_35 = arith.constant 0 : index
    %c3_36 = arith.constant 3 : index
    %c0_37 = arith.constant 0 : index
    %c0_38 = arith.constant 0 : index
    %31 = vector.load %arg1[%c0_35, %c3_36, %c0_37, %c0_38] : memref<1x4x8x128xbf16, #tpu.memory_space<vmem>>, vector<1x1x8x72xbf16>
    %32 = vector.shape_cast %31 : vector<1x1x8x72xbf16> to vector<8x72xbf16>
    %c5 = arith.constant 5 : index
    %c0_39 = arith.constant 0 : index
    %c0_40 = arith.constant 0 : index
    %33 = vector.load %arg2[%c5, %c0_39, %c0_40] : memref<16x16x8xbf16, #tpu.memory_space<vmem>>, vector<1x16x8xbf16>
    %34 = vector.shape_cast %33 : vector<1x16x8xbf16> to vector<16x8xbf16>
    %cst_41 = arith.constant dense<0.000000e+00> : vector<16x72xf32>
    %35 = tpu.matmul %34, %32, %cst_41 {dimension_numbers = #tpu.dot_dimension_numbers<[1], [0], [0], [1], [0, 0, 1, 1], [], []>} : vector<16x8xbf16>, vector<8x72xbf16>, vector<16x72xf32> -> vector<16x72xf32>
    %36 = arith.addf %30, %35 : vector<16x72xf32>
    %c0_42 = arith.constant 0 : index
    %c2_43 = arith.constant 2 : index
    %c0_44 = arith.constant 0 : index
    %c1_45 = arith.constant 1 : index
    %37 = vector.load %arg1[%c0_42, %c2_43, %c0_44, %c1_45] : memref<1x4x8x128xbf16, #tpu.memory_space<vmem>>, vector<1x1x8x72xbf16>
    %38 = vector.shape_cast %37 : vector<1x1x8x72xbf16> to vector<8x72xbf16>
    %c6 = arith.constant 6 : index
    %c0_46 = arith.constant 0 : index
    %c0_47 = arith.constant 0 : index
    %39 = vector.load %arg2[%c6, %c0_46, %c0_47] : memref<16x16x8xbf16, #tpu.memory_space<vmem>>, vector<1x16x8xbf16>
    %40 = vector.shape_cast %39 : vector<1x16x8xbf16> to vector<16x8xbf16>
    %cst_48 = arith.constant dense<0.000000e+00> : vector<16x72xf32>
    %41 = tpu.matmul %40, %38, %cst_48 {dimension_numbers = #tpu.dot_dimension_numbers<[1], [0], [0], [1], [0, 0, 1, 1], [], []>} : vector<16x8xbf16>, vector<8x72xbf16>, vector<16x72xf32> -> vector<16x72xf32>
    %42 = arith.addf %36, %41 : vector<16x72xf32>
    %c0_49 = arith.constant 0 : index
    %c3_50 = arith.constant 3 : index
    %c0_51 = arith.constant 0 : index
    %c1_52 = arith.constant 1 : index
    %43 = vector.load %arg1[%c0_49, %c3_50, %c0_51, %c1_52] : memref<1x4x8x128xbf16, #tpu.memory_space<vmem>>, vector<1x1x8x72xbf16>
    %44 = vector.shape_cast %43 : vector<1x1x8x72xbf16> to vector<8x72xbf16>
    %c7 = arith.constant 7 : index
    %c0_53 = arith.constant 0 : index
    %c0_54 = arith.constant 0 : index
    %45 = vector.load %arg2[%c7, %c0_53, %c0_54] : memref<16x16x8xbf16, #tpu.memory_space<vmem>>, vector<1x16x8xbf16>
    %46 = vector.shape_cast %45 : vector<1x16x8xbf16> to vector<16x8xbf16>
    %cst_55 = arith.constant dense<0.000000e+00> : vector<16x72xf32>
    %47 = tpu.matmul %46, %44, %cst_55 {dimension_numbers = #tpu.dot_dimension_numbers<[1], [0], [0], [1], [0, 0, 1, 1], [], []>} : vector<16x8xbf16>, vector<8x72xbf16>, vector<16x72xf32> -> vector<16x72xf32>
    %48 = arith.addf %42, %47 : vector<16x72xf32>
    %c0_56 = arith.constant 0 : index
    %c0_57 = arith.constant 0 : index
    %c0_58 = arith.constant 0 : index
    %c9 = arith.constant 9 : index
    %49 = vector.load %arg1[%c0_56, %c0_57, %c0_58, %c9] : memref<1x4x8x128xbf16, #tpu.memory_space<vmem>>, vector<1x1x8x72xbf16>
    %50 = vector.shape_cast %49 : vector<1x1x8x72xbf16> to vector<8x72xbf16>
    %c8 = arith.constant 8 : index
    %c0_59 = arith.constant 0 : index
    %c0_60 = arith.constant 0 : index
    %51 = vector.load %arg2[%c8, %c0_59, %c0_60] : memref<16x16x8xbf16, #tpu.memory_space<vmem>>, vector<1x16x8xbf16>
    %52 = vector.shape_cast %51 : vector<1x16x8xbf16> to vector<16x8xbf16>
    %cst_61 = arith.constant dense<0.000000e+00> : vector<16x72xf32>
    %53 = tpu.matmul %52, %50, %cst_61 {dimension_numbers = #tpu.dot_dimension_numbers<[1], [0], [0], [1], [0, 0, 1, 1], [], []>} : vector<16x8xbf16>, vector<8x72xbf16>, vector<16x72xf32> -> vector<16x72xf32>
    %54 = arith.addf %48, %53 : vector<16x72xf32>
    %c0_62 = arith.constant 0 : index
    %c1_63 = arith.constant 1 : index
    %c0_64 = arith.constant 0 : index
    %c9_65 = arith.constant 9 : index
    %55 = vector.load %arg1[%c0_62, %c1_63, %c0_64, %c9_65] : memref<1x4x8x128xbf16, #tpu.memory_space<vmem>>, vector<1x1x8x72xbf16>
    %56 = vector.shape_cast %55 : vector<1x1x8x72xbf16> to vector<8x72xbf16>
    %c9_66 = arith.constant 9 : index
    %c0_67 = arith.constant 0 : index
    %c0_68 = arith.constant 0 : index
    %57 = vector.load %arg2[%c9_66, %c0_67, %c0_68] : memref<16x16x8xbf16, #tpu.memory_space<vmem>>, vector<1x16x8xbf16>
    %58 = vector.shape_cast %57 : vector<1x16x8xbf16> to vector<16x8xbf16>
    %cst_69 = arith.constant dense<0.000000e+00> : vector<16x72xf32>
    %59 = tpu.matmul %58, %56, %cst_69 {dimension_numbers = #tpu.dot_dimension_numbers<[1], [0], [0], [1], [0, 0, 1, 1], [], []>} : vector<16x8xbf16>, vector<8x72xbf16>, vector<16x72xf32> -> vector<16x72xf32>
    %60 = arith.addf %54, %59 : vector<16x72xf32>
    %c0_70 = arith.constant 0 : index
    %c0_71 = arith.constant 0 : index
    %c0_72 = arith.constant 0 : index
    %c10 = arith.constant 10 : index
    %61 = vector.load %arg1[%c0_70, %c0_71, %c0_72, %c10] : memref<1x4x8x128xbf16, #tpu.memory_space<vmem>>, vector<1x1x8x72xbf16>
    %62 = vector.shape_cast %61 : vector<1x1x8x72xbf16> to vector<8x72xbf16>
    %c10_73 = arith.constant 10 : index
    %c0_74 = arith.constant 0 : index
    %c0_75 = arith.constant 0 : index
    %63 = vector.load %arg2[%c10_73, %c0_74, %c0_75] : memref<16x16x8xbf16, #tpu.memory_space<vmem>>, vector<1x16x8xbf16>
    %64 = vector.shape_cast %63 : vector<1x16x8xbf16> to vector<16x8xbf16>
    %cst_76 = arith.constant dense<0.000000e+00> : vector<16x72xf32>
    %65 = tpu.matmul %64, %62, %cst_76 {dimension_numbers = #tpu.dot_dimension_numbers<[1], [0], [0], [1], [0, 0, 1, 1], [], []>} : vector<16x8xbf16>, vector<8x72xbf16>, vector<16x72xf32> -> vector<16x72xf32>
    %66 = arith.addf %60, %65 : vector<16x72xf32>
    %c0_77 = arith.constant 0 : index
    %c1_78 = arith.constant 1 : index
    %c0_79 = arith.constant 0 : index
    %c10_80 = arith.constant 10 : index
    %67 = vector.load %arg1[%c0_77, %c1_78, %c0_79, %c10_80] : memref<1x4x8x128xbf16, #tpu.memory_space<vmem>>, vector<1x1x8x72xbf16>
    %68 = vector.shape_cast %67 : vector<1x1x8x72xbf16> to vector<8x72xbf16>
    %c11 = arith.constant 11 : index
    %c0_81 = arith.constant 0 : index
    %c0_82 = arith.constant 0 : index
    %69 = vector.load %arg2[%c11, %c0_81, %c0_82] : memref<16x16x8xbf16, #tpu.memory_space<vmem>>, vector<1x16x8xbf16>
    %70 = vector.shape_cast %69 : vector<1x16x8xbf16> to vector<16x8xbf16>
    %cst_83 = arith.constant dense<0.000000e+00> : vector<16x72xf32>
    %71 = tpu.matmul %70, %68, %cst_83 {dimension_numbers = #tpu.dot_dimension_numbers<[1], [0], [0], [1], [0, 0, 1, 1], [], []>} : vector<16x8xbf16>, vector<8x72xbf16>, vector<16x72xf32> -> vector<16x72xf32>
    %72 = arith.addf %66, %71 : vector<16x72xf32>
    %c0_84 = arith.constant 0 : index
    %c2_85 = arith.constant 2 : index
    %c0_86 = arith.constant 0 : index
    %c9_87 = arith.constant 9 : index
    %73 = vector.load %arg1[%c0_84, %c2_85, %c0_86, %c9_87] : memref<1x4x8x128xbf16, #tpu.memory_space<vmem>>, vector<1x1x8x72xbf16>
    %74 = vector.shape_cast %73 : vector<1x1x8x72xbf16> to vector<8x72xbf16>
    %c12 = arith.constant 12 : index
    %c0_88 = arith.constant 0 : index
    %c0_89 = arith.constant 0 : index
    %75 = vector.load %arg2[%c12, %c0_88, %c0_89] : memref<16x16x8xbf16, #tpu.memory_space<vmem>>, vector<1x16x8xbf16>
    %76 = vector.shape_cast %75 : vector<1x16x8xbf16> to vector<16x8xbf16>
    %cst_90 = arith.constant dense<0.000000e+00> : vector<16x72xf32>
    %77 = tpu.matmul %76, %74, %cst_90 {dimension_numbers = #tpu.dot_dimension_numbers<[1], [0], [0], [1], [0, 0, 1, 1], [], []>} : vector<16x8xbf16>, vector<8x72xbf16>, vector<16x72xf32> -> vector<16x72xf32>
    %78 = arith.addf %72, %77 : vector<16x72xf32>
    %c0_91 = arith.constant 0 : index
    %c3_92 = arith.constant 3 : index
    %c0_93 = arith.constant 0 : index
    %c9_94 = arith.constant 9 : index
    %79 = vector.load %arg1[%c0_91, %c3_92, %c0_93, %c9_94] : memref<1x4x8x128xbf16, #tpu.memory_space<vmem>>, vector<1x1x8x72xbf16>
    %80 = vector.shape_cast %79 : vector<1x1x8x72xbf16> to vector<8x72xbf16>
    %c13 = arith.constant 13 : index
    %c0_95 = arith.constant 0 : index
    %c0_96 = arith.constant 0 : index
    %81 = vector.load %arg2[%c13, %c0_95, %c0_96] : memref<16x16x8xbf16, #tpu.memory_space<vmem>>, vector<1x16x8xbf16>
    %82 = vector.shape_cast %81 : vector<1x16x8xbf16> to vector<16x8xbf16>
    %cst_97 = arith.constant dense<0.000000e+00> : vector<16x72xf32>
    %83 = tpu.matmul %82, %80, %cst_97 {dimension_numbers = #tpu.dot_dimension_numbers<[1], [0], [0], [1], [0, 0, 1, 1], [], []>} : vector<16x8xbf16>, vector<8x72xbf16>, vector<16x72xf32> -> vector<16x72xf32>
    %84 = arith.addf %78, %83 : vector<16x72xf32>
    %c0_98 = arith.constant 0 : index
    %c2_99 = arith.constant 2 : index
    %c0_100 = arith.constant 0 : index
    %c10_101 = arith.constant 10 : index
    %85 = vector.load %arg1[%c0_98, %c2_99, %c0_100, %c10_101] : memref<1x4x8x128xbf16, #tpu.memory_space<vmem>>, vector<1x1x8x72xbf16>
    %86 = vector.shape_cast %85 : vector<1x1x8x72xbf16> to vector<8x72xbf16>
    %c14 = arith.constant 14 : index
    %c0_102 = arith.constant 0 : index
    %c0_103 = arith.constant 0 : index
    %87 = vector.load %arg2[%c14, %c0_102, %c0_103] : memref<16x16x8xbf16, #tpu.memory_space<vmem>>, vector<1x16x8xbf16>
    %88 = vector.shape_cast %87 : vector<1x16x8xbf16> to vector<16x8xbf16>
    %cst_104 = arith.constant dense<0.000000e+00> : vector<16x72xf32>
    %89 = tpu.matmul %88, %86, %cst_104 {dimension_numbers = #tpu.dot_dimension_numbers<[1], [0], [0], [1], [0, 0, 1, 1], [], []>} : vector<16x8xbf16>, vector<8x72xbf16>, vector<16x72xf32> -> vector<16x72xf32>
    %90 = arith.addf %84, %89 : vector<16x72xf32>
    %c0_105 = arith.constant 0 : index
    %c3_106 = arith.constant 3 : index
    %c0_107 = arith.constant 0 : index
    %c10_108 = arith.constant 10 : index
    %91 = vector.load %arg1[%c0_105, %c3_106, %c0_107, %c10_108] : memref<1x4x8x128xbf16, #tpu.memory_space<vmem>>, vector<1x1x8x72xbf16>
    %92 = vector.shape_cast %91 : vector<1x1x8x72xbf16> to vector<8x72xbf16>
    %c15 = arith.constant 15 : index
    %c0_109 = arith.constant 0 : index
    %c0_110 = arith.constant 0 : index
    %93 = vector.load %arg2[%c15, %c0_109, %c0_110] : memref<16x16x8xbf16, #tpu.memory_space<vmem>>, vector<1x16x8xbf16>
    %94 = vector.shape_cast %93 : vector<1x16x8xbf16> to vector<16x8xbf16>
    %cst_111 = arith.constant dense<0.000000e+00> : vector<16x72xf32>
    %95 = tpu.matmul %94, %92, %cst_111 {dimension_numbers = #tpu.dot_dimension_numbers<[1], [0], [0], [1], [0, 0, 1, 1], [], []>} : vector<16x8xbf16>, vector<8x72xbf16>, vector<16x72xf32> -> vector<16x72xf32>
    %96 = arith.addf %90, %95 : vector<16x72xf32>
    %c0_112 = arith.constant 0 : index
    %c0_113 = arith.constant 0 : index
    %97 = vector.load %arg3[%c0_112, %c0_113] : memref<16x1xf32, #tpu.memory_space<vmem>>, vector<16x1xf32>
    %98 = vector.broadcast %97 : vector<16x1xf32> to vector<16x72xf32>
    %99 = arith.addf %96, %98 : vector<16x72xf32>
    %c0_114 = arith.constant 0 : index
    %c0_115 = arith.constant 0 : index
    %100 = vector.load %arg4[%c0_114, %c0_115] : memref<1x72xf32, #tpu.memory_space<vmem>>, vector<1x72xf32>
    %101 = vector.broadcast %100 : vector<1x72xf32> to vector<16x72xf32>
    %102 = arith.mulf %99, %101 : vector<16x72xf32>
    %cst_116 = arith.constant dense<0.000000e+00> : vector<16xf32>
    %103 = vector.multi_reduction <add>, %102, %cst_116 [1] : vector<16x72xf32> to vector<16xf32>
    %104 = vector.shape_cast %103 : vector<16xf32> to vector<16x1xf32>
    %cst_117 = arith.constant 1.562500e-02 : f32
    %105 = vector.broadcast %cst_117 : f32 to vector<16x1xf32>
    %106 = arith.mulf %104, %105 : vector<16x1xf32>
    %107 = vector.broadcast %106 : vector<16x1xf32> to vector<16x72xf32>
    %108 = arith.subf %99, %107 : vector<16x72xf32>
    %109 = arith.mulf %108, %108 : vector<16x72xf32>
    %110 = vector.broadcast %100 : vector<1x72xf32> to vector<16x72xf32>
    %111 = arith.mulf %109, %110 : vector<16x72xf32>
    %cst_118 = arith.constant dense<0.000000e+00> : vector<16xf32>
    %112 = vector.multi_reduction <add>, %111, %cst_118 [1] : vector<16x72xf32> to vector<16xf32>
    %113 = vector.shape_cast %112 : vector<16xf32> to vector<16x1xf32>
    %cst_119 = arith.constant 1.562500e-02 : f32
    %114 = vector.broadcast %cst_119 : f32 to vector<16x1xf32>
    %115 = arith.mulf %113, %114 : vector<16x1xf32>
    %cst_120 = arith.constant 9.99999974E-6 : f32
    %116 = vector.broadcast %cst_120 : f32 to vector<16x1xf32>
    %117 = arith.addf %115, %116 : vector<16x1xf32>
    %118 = math.rsqrt %117 : vector<16x1xf32>
    %119 = vector.broadcast %118 : vector<16x1xf32> to vector<16x72xf32>
    %120 = arith.mulf %108, %119 : vector<16x72xf32>
    %cst_121 = arith.constant 0.000000e+00 : f32
    %121 = vector.broadcast %cst_121 : f32 to vector<16x72xf32>
    %122 = arith.maximumf %120, %121 : vector<16x72xf32>
    %c0_122 = arith.constant 0 : index
    %c0_123 = arith.constant 0 : index
    %c0_124 = arith.constant 0 : index
    %123 = vector.load %arg5[%c0_122, %c0_123, %c0_124] : memref<1x16x72xf32, #tpu.memory_space<vmem>>, vector<1x16x72xf32>
    %124 = vector.shape_cast %123 : vector<1x16x72xf32> to vector<16x72xf32>
    %125 = vector.shape_cast %122 : vector<16x72xf32> to vector<1x16x72xf32>
    tpu.vector_store %arg5[%c0_122, %c0_123, %c0_124], %125 {strides = array<i32>} : memref<1x16x72xf32, #tpu.memory_space<vmem>>, vector<1x16x72xf32>,
    return
  }
  func.func @transform_0(%arg0: i32) -> (i32, i32, i32, i32) {
    %c0_i32 = arith.constant 0 : i32
    %c0_i32_0 = arith.constant 0 : i32
    %c0_i32_1 = arith.constant 0 : i32
    %c0_i32_2 = arith.constant 0 : i32
    return %arg0, %c0_i32, %c0_i32_0, %c0_i32_1 : i32, i32, i32, i32
  }
  func.func @transform_1(%arg0: i32) -> (i32, i32, i32) {
    %c0_i32 = arith.constant 0 : i32
    %c0_i32_0 = arith.constant 0 : i32
    %c0_i32_1 = arith.constant 0 : i32
    %c0_i32_2 = arith.constant 0 : i32
    return %c0_i32, %c0_i32_0, %c0_i32_1 : i32, i32, i32
  }
  func.func @transform_2(%arg0: i32) -> (i32, i32) {
    %c0_i32 = arith.constant 0 : i32
    %c0_i32_0 = arith.constant 0 : i32
    %c0_i32_1 = arith.constant 0 : i32
    return %c0_i32, %c0_i32_0 : i32, i32
  }
  func.func @transform_3(%arg0: i32) -> (i32, i32) {
    %c0_i32 = arith.constant 0 : i32
    %c0_i32_0 = arith.constant 0 : i32
    %c0_i32_1 = arith.constant 0 : i32
    return %c0_i32, %c0_i32_0 : i32, i32
  }
  func.func @transform_4(%arg0: i32) -> (i32, i32, i32) {
    %c0_i32 = arith.constant 0 : i32
    %c0_i32_0 = arith.constant 0 : i32
    %c0_i32_1 = arith.constant 0 : i32
    return %arg0, %c0_i32, %c0_i32_0 : i32, i32, i32
  }
}

module attributes {stable_mosaic.version = 11 : i64} {
  func.func @_fused_conv_in_kernel(%arg0: i32, %arg1: memref<1x4x16x128xbf16, #tpu.memory_space<vmem>>, %arg2: memref<16x32x16xbf16, #tpu.memory_space<vmem>>, %arg3: memref<32x1xf32, #tpu.memory_space<vmem>>, %arg4: memref<1x20xf32, #tpu.memory_space<vmem>>, %arg5: memref<1x32x20xf32, #tpu.memory_space<vmem>>) attributes {dimension_semantics = [#tpu.dimension_semantics<parallel>], iteration_bounds = array<i64: 2>, scalar_prefetch = 0 : i64, scratch_operands = 0 : i64, tpu.core_type = #tpu.core_type<tc>, window_params = [{transform_indices = @transform_0, window_bounds = array<i64: 1, 4, 16, 128>}, {pipeline_mode = #tpu.pipeline_mode<synchronous>, transform_indices = @transform_1, window_bounds = array<i64: 16, 32, 16>}, {pipeline_mode = #tpu.pipeline_mode<synchronous>, transform_indices = @transform_2, window_bounds = array<i64: 32, 1>}, {pipeline_mode = #tpu.pipeline_mode<synchronous>, transform_indices = @transform_3, window_bounds = array<i64: 1, 20>}, {transform_indices = @transform_4, window_bounds = array<i64: 1, 32, 20>}]} {
    %cst = arith.constant 0.000000e+00 : f32
    %0 = vector.broadcast %cst : f32 to vector<32x20xf32>
    %c0 = arith.constant 0 : index
    %c0_0 = arith.constant 0 : index
    %c0_1 = arith.constant 0 : index
    %c0_2 = arith.constant 0 : index
    %1 = vector.load %arg1[%c0, %c0_0, %c0_1, %c0_2] : memref<1x4x16x128xbf16, #tpu.memory_space<vmem>>, vector<1x1x16x20xbf16>
    %2 = vector.shape_cast %1 : vector<1x1x16x20xbf16> to vector<16x20xbf16>
    %c0_3 = arith.constant 0 : index
    %c0_4 = arith.constant 0 : index
    %c0_5 = arith.constant 0 : index
    %3 = vector.load %arg2[%c0_3, %c0_4, %c0_5] : memref<16x32x16xbf16, #tpu.memory_space<vmem>>, vector<1x32x16xbf16>
    %4 = vector.shape_cast %3 : vector<1x32x16xbf16> to vector<32x16xbf16>
    %cst_6 = arith.constant dense<0.000000e+00> : vector<32x20xf32>
    %5 = tpu.matmul %4, %2, %cst_6 {dimension_numbers = #tpu.dot_dimension_numbers<[1], [0], [0], [1], [0, 0, 1, 1], [], []>} : vector<32x16xbf16>, vector<16x20xbf16>, vector<32x20xf32> -> vector<32x20xf32>
    %6 = arith.addf %0, %5 : vector<32x20xf32>
    %c0_7 = arith.constant 0 : index
    %c1 = arith.constant 1 : index
    %c0_8 = arith.constant 0 : index
    %c0_9 = arith.constant 0 : index
    %7 = vector.load %arg1[%c0_7, %c1, %c0_8, %c0_9] : memref<1x4x16x128xbf16, #tpu.memory_space<vmem>>, vector<1x1x16x20xbf16>
    %8 = vector.shape_cast %7 : vector<1x1x16x20xbf16> to vector<16x20xbf16>
    %c1_10 = arith.constant 1 : index
    %c0_11 = arith.constant 0 : index
    %c0_12 = arith.constant 0 : index
    %9 = vector.load %arg2[%c1_10, %c0_11, %c0_12] : memref<16x32x16xbf16, #tpu.memory_space<vmem>>, vector<1x32x16xbf16>
    %10 = vector.shape_cast %9 : vector<1x32x16xbf16> to vector<32x16xbf16>
    %cst_13 = arith.constant dense<0.000000e+00> : vector<32x20xf32>
    %11 = tpu.matmul %10, %8, %cst_13 {dimension_numbers = #tpu.dot_dimension_numbers<[1], [0], [0], [1], [0, 0, 1, 1], [], []>} : vector<32x16xbf16>, vector<16x20xbf16>, vector<32x20xf32> -> vector<32x20xf32>
    %12 = arith.addf %6, %11 : vector<32x20xf32>
    %c0_14 = arith.constant 0 : index
    %c0_15 = arith.constant 0 : index
    %c0_16 = arith.constant 0 : index
    %c1_17 = arith.constant 1 : index
    %13 = vector.load %arg1[%c0_14, %c0_15, %c0_16, %c1_17] : memref<1x4x16x128xbf16, #tpu.memory_space<vmem>>, vector<1x1x16x20xbf16>
    %14 = vector.shape_cast %13 : vector<1x1x16x20xbf16> to vector<16x20xbf16>
    %c2 = arith.constant 2 : index
    %c0_18 = arith.constant 0 : index
    %c0_19 = arith.constant 0 : index
    %15 = vector.load %arg2[%c2, %c0_18, %c0_19] : memref<16x32x16xbf16, #tpu.memory_space<vmem>>, vector<1x32x16xbf16>
    %16 = vector.shape_cast %15 : vector<1x32x16xbf16> to vector<32x16xbf16>
    %cst_20 = arith.constant dense<0.000000e+00> : vector<32x20xf32>
    %17 = tpu.matmul %16, %14, %cst_20 {dimension_numbers = #tpu.dot_dimension_numbers<[1], [0], [0], [1], [0, 0, 1, 1], [], []>} : vector<32x16xbf16>, vector<16x20xbf16>, vector<32x20xf32> -> vector<32x20xf32>
    %18 = arith.addf %12, %17 : vector<32x20xf32>
    %c0_21 = arith.constant 0 : index
    %c1_22 = arith.constant 1 : index
    %c0_23 = arith.constant 0 : index
    %c1_24 = arith.constant 1 : index
    %19 = vector.load %arg1[%c0_21, %c1_22, %c0_23, %c1_24] : memref<1x4x16x128xbf16, #tpu.memory_space<vmem>>, vector<1x1x16x20xbf16>
    %20 = vector.shape_cast %19 : vector<1x1x16x20xbf16> to vector<16x20xbf16>
    %c3 = arith.constant 3 : index
    %c0_25 = arith.constant 0 : index
    %c0_26 = arith.constant 0 : index
    %21 = vector.load %arg2[%c3, %c0_25, %c0_26] : memref<16x32x16xbf16, #tpu.memory_space<vmem>>, vector<1x32x16xbf16>
    %22 = vector.shape_cast %21 : vector<1x32x16xbf16> to vector<32x16xbf16>
    %cst_27 = arith.constant dense<0.000000e+00> : vector<32x20xf32>
    %23 = tpu.matmul %22, %20, %cst_27 {dimension_numbers = #tpu.dot_dimension_numbers<[1], [0], [0], [1], [0, 0, 1, 1], [], []>} : vector<32x16xbf16>, vector<16x20xbf16>, vector<32x20xf32> -> vector<32x20xf32>
    %24 = arith.addf %18, %23 : vector<32x20xf32>
    %c0_28 = arith.constant 0 : index
    %c2_29 = arith.constant 2 : index
    %c0_30 = arith.constant 0 : index
    %c0_31 = arith.constant 0 : index
    %25 = vector.load %arg1[%c0_28, %c2_29, %c0_30, %c0_31] : memref<1x4x16x128xbf16, #tpu.memory_space<vmem>>, vector<1x1x16x20xbf16>
    %26 = vector.shape_cast %25 : vector<1x1x16x20xbf16> to vector<16x20xbf16>
    %c4 = arith.constant 4 : index
    %c0_32 = arith.constant 0 : index
    %c0_33 = arith.constant 0 : index
    %27 = vector.load %arg2[%c4, %c0_32, %c0_33] : memref<16x32x16xbf16, #tpu.memory_space<vmem>>, vector<1x32x16xbf16>
    %28 = vector.shape_cast %27 : vector<1x32x16xbf16> to vector<32x16xbf16>
    %cst_34 = arith.constant dense<0.000000e+00> : vector<32x20xf32>
    %29 = tpu.matmul %28, %26, %cst_34 {dimension_numbers = #tpu.dot_dimension_numbers<[1], [0], [0], [1], [0, 0, 1, 1], [], []>} : vector<32x16xbf16>, vector<16x20xbf16>, vector<32x20xf32> -> vector<32x20xf32>
    %30 = arith.addf %24, %29 : vector<32x20xf32>
    %c0_35 = arith.constant 0 : index
    %c3_36 = arith.constant 3 : index
    %c0_37 = arith.constant 0 : index
    %c0_38 = arith.constant 0 : index
    %31 = vector.load %arg1[%c0_35, %c3_36, %c0_37, %c0_38] : memref<1x4x16x128xbf16, #tpu.memory_space<vmem>>, vector<1x1x16x20xbf16>
    %32 = vector.shape_cast %31 : vector<1x1x16x20xbf16> to vector<16x20xbf16>
    %c5 = arith.constant 5 : index
    %c0_39 = arith.constant 0 : index
    %c0_40 = arith.constant 0 : index
    %33 = vector.load %arg2[%c5, %c0_39, %c0_40] : memref<16x32x16xbf16, #tpu.memory_space<vmem>>, vector<1x32x16xbf16>
    %34 = vector.shape_cast %33 : vector<1x32x16xbf16> to vector<32x16xbf16>
    %cst_41 = arith.constant dense<0.000000e+00> : vector<32x20xf32>
    %35 = tpu.matmul %34, %32, %cst_41 {dimension_numbers = #tpu.dot_dimension_numbers<[1], [0], [0], [1], [0, 0, 1, 1], [], []>} : vector<32x16xbf16>, vector<16x20xbf16>, vector<32x20xf32> -> vector<32x20xf32>
    %36 = arith.addf %30, %35 : vector<32x20xf32>
    %c0_42 = arith.constant 0 : index
    %c2_43 = arith.constant 2 : index
    %c0_44 = arith.constant 0 : index
    %c1_45 = arith.constant 1 : index
    %37 = vector.load %arg1[%c0_42, %c2_43, %c0_44, %c1_45] : memref<1x4x16x128xbf16, #tpu.memory_space<vmem>>, vector<1x1x16x20xbf16>
    %38 = vector.shape_cast %37 : vector<1x1x16x20xbf16> to vector<16x20xbf16>
    %c6 = arith.constant 6 : index
    %c0_46 = arith.constant 0 : index
    %c0_47 = arith.constant 0 : index
    %39 = vector.load %arg2[%c6, %c0_46, %c0_47] : memref<16x32x16xbf16, #tpu.memory_space<vmem>>, vector<1x32x16xbf16>
    %40 = vector.shape_cast %39 : vector<1x32x16xbf16> to vector<32x16xbf16>
    %cst_48 = arith.constant dense<0.000000e+00> : vector<32x20xf32>
    %41 = tpu.matmul %40, %38, %cst_48 {dimension_numbers = #tpu.dot_dimension_numbers<[1], [0], [0], [1], [0, 0, 1, 1], [], []>} : vector<32x16xbf16>, vector<16x20xbf16>, vector<32x20xf32> -> vector<32x20xf32>
    %42 = arith.addf %36, %41 : vector<32x20xf32>
    %c0_49 = arith.constant 0 : index
    %c3_50 = arith.constant 3 : index
    %c0_51 = arith.constant 0 : index
    %c1_52 = arith.constant 1 : index
    %43 = vector.load %arg1[%c0_49, %c3_50, %c0_51, %c1_52] : memref<1x4x16x128xbf16, #tpu.memory_space<vmem>>, vector<1x1x16x20xbf16>
    %44 = vector.shape_cast %43 : vector<1x1x16x20xbf16> to vector<16x20xbf16>
    %c7 = arith.constant 7 : index
    %c0_53 = arith.constant 0 : index
    %c0_54 = arith.constant 0 : index
    %45 = vector.load %arg2[%c7, %c0_53, %c0_54] : memref<16x32x16xbf16, #tpu.memory_space<vmem>>, vector<1x32x16xbf16>
    %46 = vector.shape_cast %45 : vector<1x32x16xbf16> to vector<32x16xbf16>
    %cst_55 = arith.constant dense<0.000000e+00> : vector<32x20xf32>
    %47 = tpu.matmul %46, %44, %cst_55 {dimension_numbers = #tpu.dot_dimension_numbers<[1], [0], [0], [1], [0, 0, 1, 1], [], []>} : vector<32x16xbf16>, vector<16x20xbf16>, vector<32x20xf32> -> vector<32x20xf32>
    %48 = arith.addf %42, %47 : vector<32x20xf32>
    %c0_56 = arith.constant 0 : index
    %c0_57 = arith.constant 0 : index
    %c0_58 = arith.constant 0 : index
    %c5_59 = arith.constant 5 : index
    %49 = vector.load %arg1[%c0_56, %c0_57, %c0_58, %c5_59] : memref<1x4x16x128xbf16, #tpu.memory_space<vmem>>, vector<1x1x16x20xbf16>
    %50 = vector.shape_cast %49 : vector<1x1x16x20xbf16> to vector<16x20xbf16>
    %c8 = arith.constant 8 : index
    %c0_60 = arith.constant 0 : index
    %c0_61 = arith.constant 0 : index
    %51 = vector.load %arg2[%c8, %c0_60, %c0_61] : memref<16x32x16xbf16, #tpu.memory_space<vmem>>, vector<1x32x16xbf16>
    %52 = vector.shape_cast %51 : vector<1x32x16xbf16> to vector<32x16xbf16>
    %cst_62 = arith.constant dense<0.000000e+00> : vector<32x20xf32>
    %53 = tpu.matmul %52, %50, %cst_62 {dimension_numbers = #tpu.dot_dimension_numbers<[1], [0], [0], [1], [0, 0, 1, 1], [], []>} : vector<32x16xbf16>, vector<16x20xbf16>, vector<32x20xf32> -> vector<32x20xf32>
    %54 = arith.addf %48, %53 : vector<32x20xf32>
    %c0_63 = arith.constant 0 : index
    %c1_64 = arith.constant 1 : index
    %c0_65 = arith.constant 0 : index
    %c5_66 = arith.constant 5 : index
    %55 = vector.load %arg1[%c0_63, %c1_64, %c0_65, %c5_66] : memref<1x4x16x128xbf16, #tpu.memory_space<vmem>>, vector<1x1x16x20xbf16>
    %56 = vector.shape_cast %55 : vector<1x1x16x20xbf16> to vector<16x20xbf16>
    %c9 = arith.constant 9 : index
    %c0_67 = arith.constant 0 : index
    %c0_68 = arith.constant 0 : index
    %57 = vector.load %arg2[%c9, %c0_67, %c0_68] : memref<16x32x16xbf16, #tpu.memory_space<vmem>>, vector<1x32x16xbf16>
    %58 = vector.shape_cast %57 : vector<1x32x16xbf16> to vector<32x16xbf16>
    %cst_69 = arith.constant dense<0.000000e+00> : vector<32x20xf32>
    %59 = tpu.matmul %58, %56, %cst_69 {dimension_numbers = #tpu.dot_dimension_numbers<[1], [0], [0], [1], [0, 0, 1, 1], [], []>} : vector<32x16xbf16>, vector<16x20xbf16>, vector<32x20xf32> -> vector<32x20xf32>
    %60 = arith.addf %54, %59 : vector<32x20xf32>
    %c0_70 = arith.constant 0 : index
    %c0_71 = arith.constant 0 : index
    %c0_72 = arith.constant 0 : index
    %c6_73 = arith.constant 6 : index
    %61 = vector.load %arg1[%c0_70, %c0_71, %c0_72, %c6_73] : memref<1x4x16x128xbf16, #tpu.memory_space<vmem>>, vector<1x1x16x20xbf16>
    %62 = vector.shape_cast %61 : vector<1x1x16x20xbf16> to vector<16x20xbf16>
    %c10 = arith.constant 10 : index
    %c0_74 = arith.constant 0 : index
    %c0_75 = arith.constant 0 : index
    %63 = vector.load %arg2[%c10, %c0_74, %c0_75] : memref<16x32x16xbf16, #tpu.memory_space<vmem>>, vector<1x32x16xbf16>
    %64 = vector.shape_cast %63 : vector<1x32x16xbf16> to vector<32x16xbf16>
    %cst_76 = arith.constant dense<0.000000e+00> : vector<32x20xf32>
    %65 = tpu.matmul %64, %62, %cst_76 {dimension_numbers = #tpu.dot_dimension_numbers<[1], [0], [0], [1], [0, 0, 1, 1], [], []>} : vector<32x16xbf16>, vector<16x20xbf16>, vector<32x20xf32> -> vector<32x20xf32>
    %66 = arith.addf %60, %65 : vector<32x20xf32>
    %c0_77 = arith.constant 0 : index
    %c1_78 = arith.constant 1 : index
    %c0_79 = arith.constant 0 : index
    %c6_80 = arith.constant 6 : index
    %67 = vector.load %arg1[%c0_77, %c1_78, %c0_79, %c6_80] : memref<1x4x16x128xbf16, #tpu.memory_space<vmem>>, vector<1x1x16x20xbf16>
    %68 = vector.shape_cast %67 : vector<1x1x16x20xbf16> to vector<16x20xbf16>
    %c11 = arith.constant 11 : index
    %c0_81 = arith.constant 0 : index
    %c0_82 = arith.constant 0 : index
    %69 = vector.load %arg2[%c11, %c0_81, %c0_82] : memref<16x32x16xbf16, #tpu.memory_space<vmem>>, vector<1x32x16xbf16>
    %70 = vector.shape_cast %69 : vector<1x32x16xbf16> to vector<32x16xbf16>
    %cst_83 = arith.constant dense<0.000000e+00> : vector<32x20xf32>
    %71 = tpu.matmul %70, %68, %cst_83 {dimension_numbers = #tpu.dot_dimension_numbers<[1], [0], [0], [1], [0, 0, 1, 1], [], []>} : vector<32x16xbf16>, vector<16x20xbf16>, vector<32x20xf32> -> vector<32x20xf32>
    %72 = arith.addf %66, %71 : vector<32x20xf32>
    %c0_84 = arith.constant 0 : index
    %c2_85 = arith.constant 2 : index
    %c0_86 = arith.constant 0 : index
    %c5_87 = arith.constant 5 : index
    %73 = vector.load %arg1[%c0_84, %c2_85, %c0_86, %c5_87] : memref<1x4x16x128xbf16, #tpu.memory_space<vmem>>, vector<1x1x16x20xbf16>
    %74 = vector.shape_cast %73 : vector<1x1x16x20xbf16> to vector<16x20xbf16>
    %c12 = arith.constant 12 : index
    %c0_88 = arith.constant 0 : index
    %c0_89 = arith.constant 0 : index
    %75 = vector.load %arg2[%c12, %c0_88, %c0_89] : memref<16x32x16xbf16, #tpu.memory_space<vmem>>, vector<1x32x16xbf16>
    %76 = vector.shape_cast %75 : vector<1x32x16xbf16> to vector<32x16xbf16>
    %cst_90 = arith.constant dense<0.000000e+00> : vector<32x20xf32>
    %77 = tpu.matmul %76, %74, %cst_90 {dimension_numbers = #tpu.dot_dimension_numbers<[1], [0], [0], [1], [0, 0, 1, 1], [], []>} : vector<32x16xbf16>, vector<16x20xbf16>, vector<32x20xf32> -> vector<32x20xf32>
    %78 = arith.addf %72, %77 : vector<32x20xf32>
    %c0_91 = arith.constant 0 : index
    %c3_92 = arith.constant 3 : index
    %c0_93 = arith.constant 0 : index
    %c5_94 = arith.constant 5 : index
    %79 = vector.load %arg1[%c0_91, %c3_92, %c0_93, %c5_94] : memref<1x4x16x128xbf16, #tpu.memory_space<vmem>>, vector<1x1x16x20xbf16>
    %80 = vector.shape_cast %79 : vector<1x1x16x20xbf16> to vector<16x20xbf16>
    %c13 = arith.constant 13 : index
    %c0_95 = arith.constant 0 : index
    %c0_96 = arith.constant 0 : index
    %81 = vector.load %arg2[%c13, %c0_95, %c0_96] : memref<16x32x16xbf16, #tpu.memory_space<vmem>>, vector<1x32x16xbf16>
    %82 = vector.shape_cast %81 : vector<1x32x16xbf16> to vector<32x16xbf16>
    %cst_97 = arith.constant dense<0.000000e+00> : vector<32x20xf32>
    %83 = tpu.matmul %82, %80, %cst_97 {dimension_numbers = #tpu.dot_dimension_numbers<[1], [0], [0], [1], [0, 0, 1, 1], [], []>} : vector<32x16xbf16>, vector<16x20xbf16>, vector<32x20xf32> -> vector<32x20xf32>
    %84 = arith.addf %78, %83 : vector<32x20xf32>
    %c0_98 = arith.constant 0 : index
    %c2_99 = arith.constant 2 : index
    %c0_100 = arith.constant 0 : index
    %c6_101 = arith.constant 6 : index
    %85 = vector.load %arg1[%c0_98, %c2_99, %c0_100, %c6_101] : memref<1x4x16x128xbf16, #tpu.memory_space<vmem>>, vector<1x1x16x20xbf16>
    %86 = vector.shape_cast %85 : vector<1x1x16x20xbf16> to vector<16x20xbf16>
    %c14 = arith.constant 14 : index
    %c0_102 = arith.constant 0 : index
    %c0_103 = arith.constant 0 : index
    %87 = vector.load %arg2[%c14, %c0_102, %c0_103] : memref<16x32x16xbf16, #tpu.memory_space<vmem>>, vector<1x32x16xbf16>
    %88 = vector.shape_cast %87 : vector<1x32x16xbf16> to vector<32x16xbf16>
    %cst_104 = arith.constant dense<0.000000e+00> : vector<32x20xf32>
    %89 = tpu.matmul %88, %86, %cst_104 {dimension_numbers = #tpu.dot_dimension_numbers<[1], [0], [0], [1], [0, 0, 1, 1], [], []>} : vector<32x16xbf16>, vector<16x20xbf16>, vector<32x20xf32> -> vector<32x20xf32>
    %90 = arith.addf %84, %89 : vector<32x20xf32>
    %c0_105 = arith.constant 0 : index
    %c3_106 = arith.constant 3 : index
    %c0_107 = arith.constant 0 : index
    %c6_108 = arith.constant 6 : index
    %91 = vector.load %arg1[%c0_105, %c3_106, %c0_107, %c6_108] : memref<1x4x16x128xbf16, #tpu.memory_space<vmem>>, vector<1x1x16x20xbf16>
    %92 = vector.shape_cast %91 : vector<1x1x16x20xbf16> to vector<16x20xbf16>
    %c15 = arith.constant 15 : index
    %c0_109 = arith.constant 0 : index
    %c0_110 = arith.constant 0 : index
    %93 = vector.load %arg2[%c15, %c0_109, %c0_110] : memref<16x32x16xbf16, #tpu.memory_space<vmem>>, vector<1x32x16xbf16>
    %94 = vector.shape_cast %93 : vector<1x32x16xbf16> to vector<32x16xbf16>
    %cst_111 = arith.constant dense<0.000000e+00> : vector<32x20xf32>
    %95 = tpu.matmul %94, %92, %cst_111 {dimension_numbers = #tpu.dot_dimension_numbers<[1], [0], [0], [1], [0, 0, 1, 1], [], []>} : vector<32x16xbf16>, vector<16x20xbf16>, vector<32x20xf32> -> vector<32x20xf32>
    %96 = arith.addf %90, %95 : vector<32x20xf32>
    %c0_112 = arith.constant 0 : index
    %c0_113 = arith.constant 0 : index
    %97 = vector.load %arg3[%c0_112, %c0_113] : memref<32x1xf32, #tpu.memory_space<vmem>>, vector<32x1xf32>
    %98 = vector.broadcast %97 : vector<32x1xf32> to vector<32x20xf32>
    %99 = arith.addf %96, %98 : vector<32x20xf32>
    %c0_114 = arith.constant 0 : index
    %c0_115 = arith.constant 0 : index
    %100 = vector.load %arg4[%c0_114, %c0_115] : memref<1x20xf32, #tpu.memory_space<vmem>>, vector<1x20xf32>
    %101 = vector.broadcast %100 : vector<1x20xf32> to vector<32x20xf32>
    %102 = arith.mulf %99, %101 : vector<32x20xf32>
    %cst_116 = arith.constant dense<0.000000e+00> : vector<32xf32>
    %103 = vector.multi_reduction <add>, %102, %cst_116 [1] : vector<32x20xf32> to vector<32xf32>
    %104 = vector.shape_cast %103 : vector<32xf32> to vector<32x1xf32>
    %cst_117 = arith.constant 6.250000e-02 : f32
    %105 = vector.broadcast %cst_117 : f32 to vector<32x1xf32>
    %106 = arith.mulf %104, %105 : vector<32x1xf32>
    %107 = vector.broadcast %106 : vector<32x1xf32> to vector<32x20xf32>
    %108 = arith.subf %99, %107 : vector<32x20xf32>
    %109 = arith.mulf %108, %108 : vector<32x20xf32>
    %110 = vector.broadcast %100 : vector<1x20xf32> to vector<32x20xf32>
    %111 = arith.mulf %109, %110 : vector<32x20xf32>
    %cst_118 = arith.constant dense<0.000000e+00> : vector<32xf32>
    %112 = vector.multi_reduction <add>, %111, %cst_118 [1] : vector<32x20xf32> to vector<32xf32>
    %113 = vector.shape_cast %112 : vector<32xf32> to vector<32x1xf32>
    %cst_119 = arith.constant 6.250000e-02 : f32
    %114 = vector.broadcast %cst_119 : f32 to vector<32x1xf32>
    %115 = arith.mulf %113, %114 : vector<32x1xf32>
    %cst_120 = arith.constant 9.99999974E-6 : f32
    %116 = vector.broadcast %cst_120 : f32 to vector<32x1xf32>
    %117 = arith.addf %115, %116 : vector<32x1xf32>
    %118 = math.rsqrt %117 : vector<32x1xf32>
    %119 = vector.broadcast %118 : vector<32x1xf32> to vector<32x20xf32>
    %120 = arith.mulf %108, %119 : vector<32x20xf32>
    %cst_121 = arith.constant 0.000000e+00 : f32
    %121 = vector.broadcast %cst_121 : f32 to vector<32x20xf32>
    %122 = arith.maximumf %120, %121 : vector<32x20xf32>
    %c0_122 = arith.constant 0 : index
    %c0_123 = arith.constant 0 : index
    %c0_124 = arith.constant 0 : index
    %123 = vector.load %arg5[%c0_122, %c0_123, %c0_124] : memref<1x32x20xf32, #tpu.memory_space<vmem>>, vector<1x32x20xf32>
    %124 = vector.shape_cast %123 : vector<1x32x20xf32> to vector<32x20xf32>
    %125 = vector.shape_cast %122 : vector<32x20xf32> to vector<1x32x20xf32>
    tpu.vector_store %arg5[%c0_122, %c0_123, %c0_124], %125 {strides = array<i32>} : memref<1x32x20xf32, #tpu.memory_space<vmem>>, vector<1x32x20xf32>,
    return
  }
  func.func @transform_0(%arg0: i32) -> (i32, i32, i32, i32) {
    %c0_i32 = arith.constant 0 : i32
    %c0_i32_0 = arith.constant 0 : i32
    %c0_i32_1 = arith.constant 0 : i32
    %c0_i32_2 = arith.constant 0 : i32
    return %arg0, %c0_i32, %c0_i32_0, %c0_i32_1 : i32, i32, i32, i32
  }
  func.func @transform_1(%arg0: i32) -> (i32, i32, i32) {
    %c0_i32 = arith.constant 0 : i32
    %c0_i32_0 = arith.constant 0 : i32
    %c0_i32_1 = arith.constant 0 : i32
    %c0_i32_2 = arith.constant 0 : i32
    return %c0_i32, %c0_i32_0, %c0_i32_1 : i32, i32, i32
  }
  func.func @transform_2(%arg0: i32) -> (i32, i32) {
    %c0_i32 = arith.constant 0 : i32
    %c0_i32_0 = arith.constant 0 : i32
    %c0_i32_1 = arith.constant 0 : i32
    return %c0_i32, %c0_i32_0 : i32, i32
  }
  func.func @transform_3(%arg0: i32) -> (i32, i32) {
    %c0_i32 = arith.constant 0 : i32
    %c0_i32_0 = arith.constant 0 : i32
    %c0_i32_1 = arith.constant 0 : i32
    return %c0_i32, %c0_i32_0 : i32, i32
  }
  func.func @transform_4(%arg0: i32) -> (i32, i32, i32) {
    %c0_i32 = arith.constant 0 : i32
    %c0_i32_0 = arith.constant 0 : i32
    %c0_i32_1 = arith.constant 0 : i32
    return %arg0, %c0_i32, %c0_i32_0 : i32, i32, i32
  }
}

module attributes {stable_mosaic.version = 11 : i64} {
  func.func @_fused_conv_in_kernel(%arg0: i32, %arg1: memref<1x1x32x128xbf16, #tpu.memory_space<vmem>>, %arg2: memref<9x32x32xbf16, #tpu.memory_space<vmem>>, %arg3: memref<32x1xf32, #tpu.memory_space<vmem>>, %arg4: memref<1x24xf32, #tpu.memory_space<vmem>>, %arg5: memref<1x32x24xf32, #tpu.memory_space<vmem>>) attributes {dimension_semantics = [#tpu.dimension_semantics<parallel>], iteration_bounds = array<i64: 2>, scalar_prefetch = 0 : i64, scratch_operands = 0 : i64, tpu.core_type = #tpu.core_type<tc>, window_params = [{transform_indices = @transform_0, window_bounds = array<i64: 1, 1, 32, 128>}, {pipeline_mode = #tpu.pipeline_mode<synchronous>, transform_indices = @transform_1, window_bounds = array<i64: 9, 32, 32>}, {pipeline_mode = #tpu.pipeline_mode<synchronous>, transform_indices = @transform_2, window_bounds = array<i64: 32, 1>}, {pipeline_mode = #tpu.pipeline_mode<synchronous>, transform_indices = @transform_3, window_bounds = array<i64: 1, 24>}, {transform_indices = @transform_4, window_bounds = array<i64: 1, 32, 24>}]} {
    %cst = arith.constant 0.000000e+00 : f32
    %0 = vector.broadcast %cst : f32 to vector<32x24xf32>
    %c0 = arith.constant 0 : index
    %c0_0 = arith.constant 0 : index
    %c0_1 = arith.constant 0 : index
    %c0_2 = arith.constant 0 : index
    %1 = vector.load %arg1[%c0, %c0_0, %c0_1, %c0_2] : memref<1x1x32x128xbf16, #tpu.memory_space<vmem>>, vector<1x1x32x24xbf16>
    %2 = vector.shape_cast %1 : vector<1x1x32x24xbf16> to vector<32x24xbf16>
    %c0_3 = arith.constant 0 : index
    %c0_4 = arith.constant 0 : index
    %c0_5 = arith.constant 0 : index
    %3 = vector.load %arg2[%c0_3, %c0_4, %c0_5] : memref<9x32x32xbf16, #tpu.memory_space<vmem>>, vector<1x32x32xbf16>
    %4 = vector.shape_cast %3 : vector<1x32x32xbf16> to vector<32x32xbf16>
    %cst_6 = arith.constant dense<0.000000e+00> : vector<32x24xf32>
    %5 = tpu.matmul %4, %2, %cst_6 {dimension_numbers = #tpu.dot_dimension_numbers<[1], [0], [0], [1], [0, 0, 1, 1], [], []>} : vector<32x32xbf16>, vector<32x24xbf16>, vector<32x24xf32> -> vector<32x24xf32>
    %6 = arith.addf %0, %5 : vector<32x24xf32>
    %c0_7 = arith.constant 0 : index
    %c0_8 = arith.constant 0 : index
    %c0_9 = arith.constant 0 : index
    %c1 = arith.constant 1 : index
    %7 = vector.load %arg1[%c0_7, %c0_8, %c0_9, %c1] : memref<1x1x32x128xbf16, #tpu.memory_space<vmem>>, vector<1x1x32x24xbf16>
    %8 = vector.shape_cast %7 : vector<1x1x32x24xbf16> to vector<32x24xbf16>
    %c1_10 = arith.constant 1 : index
    %c0_11 = arith.constant 0 : index
    %c0_12 = arith.constant 0 : index
    %9 = vector.load %arg2[%c1_10, %c0_11, %c0_12] : memref<9x32x32xbf16, #tpu.memory_space<vmem>>, vector<1x32x32xbf16>
    %10 = vector.shape_cast %9 : vector<1x32x32xbf16> to vector<32x32xbf16>
    %cst_13 = arith.constant dense<0.000000e+00> : vector<32x24xf32>
    %11 = tpu.matmul %10, %8, %cst_13 {dimension_numbers = #tpu.dot_dimension_numbers<[1], [0], [0], [1], [0, 0, 1, 1], [], []>} : vector<32x32xbf16>, vector<32x24xbf16>, vector<32x24xf32> -> vector<32x24xf32>
    %12 = arith.addf %6, %11 : vector<32x24xf32>
    %c0_14 = arith.constant 0 : index
    %c0_15 = arith.constant 0 : index
    %c0_16 = arith.constant 0 : index
    %c2 = arith.constant 2 : index
    %13 = vector.load %arg1[%c0_14, %c0_15, %c0_16, %c2] : memref<1x1x32x128xbf16, #tpu.memory_space<vmem>>, vector<1x1x32x24xbf16>
    %14 = vector.shape_cast %13 : vector<1x1x32x24xbf16> to vector<32x24xbf16>
    %c2_17 = arith.constant 2 : index
    %c0_18 = arith.constant 0 : index
    %c0_19 = arith.constant 0 : index
    %15 = vector.load %arg2[%c2_17, %c0_18, %c0_19] : memref<9x32x32xbf16, #tpu.memory_space<vmem>>, vector<1x32x32xbf16>
    %16 = vector.shape_cast %15 : vector<1x32x32xbf16> to vector<32x32xbf16>
    %cst_20 = arith.constant dense<0.000000e+00> : vector<32x24xf32>
    %17 = tpu.matmul %16, %14, %cst_20 {dimension_numbers = #tpu.dot_dimension_numbers<[1], [0], [0], [1], [0, 0, 1, 1], [], []>} : vector<32x32xbf16>, vector<32x24xbf16>, vector<32x24xf32> -> vector<32x24xf32>
    %18 = arith.addf %12, %17 : vector<32x24xf32>
    %c0_21 = arith.constant 0 : index
    %c0_22 = arith.constant 0 : index
    %c0_23 = arith.constant 0 : index
    %c6 = arith.constant 6 : index
    %19 = vector.load %arg1[%c0_21, %c0_22, %c0_23, %c6] : memref<1x1x32x128xbf16, #tpu.memory_space<vmem>>, vector<1x1x32x24xbf16>
    %20 = vector.shape_cast %19 : vector<1x1x32x24xbf16> to vector<32x24xbf16>
    %c3 = arith.constant 3 : index
    %c0_24 = arith.constant 0 : index
    %c0_25 = arith.constant 0 : index
    %21 = vector.load %arg2[%c3, %c0_24, %c0_25] : memref<9x32x32xbf16, #tpu.memory_space<vmem>>, vector<1x32x32xbf16>
    %22 = vector.shape_cast %21 : vector<1x32x32xbf16> to vector<32x32xbf16>
    %cst_26 = arith.constant dense<0.000000e+00> : vector<32x24xf32>
    %23 = tpu.matmul %22, %20, %cst_26 {dimension_numbers = #tpu.dot_dimension_numbers<[1], [0], [0], [1], [0, 0, 1, 1], [], []>} : vector<32x32xbf16>, vector<32x24xbf16>, vector<32x24xf32> -> vector<32x24xf32>
    %24 = arith.addf %18, %23 : vector<32x24xf32>
    %c0_27 = arith.constant 0 : index
    %c0_28 = arith.constant 0 : index
    %c0_29 = arith.constant 0 : index
    %c7 = arith.constant 7 : index
    %25 = vector.load %arg1[%c0_27, %c0_28, %c0_29, %c7] : memref<1x1x32x128xbf16, #tpu.memory_space<vmem>>, vector<1x1x32x24xbf16>
    %26 = vector.shape_cast %25 : vector<1x1x32x24xbf16> to vector<32x24xbf16>
    %c4 = arith.constant 4 : index
    %c0_30 = arith.constant 0 : index
    %c0_31 = arith.constant 0 : index
    %27 = vector.load %arg2[%c4, %c0_30, %c0_31] : memref<9x32x32xbf16, #tpu.memory_space<vmem>>, vector<1x32x32xbf16>
    %28 = vector.shape_cast %27 : vector<1x32x32xbf16> to vector<32x32xbf16>
    %cst_32 = arith.constant dense<0.000000e+00> : vector<32x24xf32>
    %29 = tpu.matmul %28, %26, %cst_32 {dimension_numbers = #tpu.dot_dimension_numbers<[1], [0], [0], [1], [0, 0, 1, 1], [], []>} : vector<32x32xbf16>, vector<32x24xbf16>, vector<32x24xf32> -> vector<32x24xf32>
    %30 = arith.addf %24, %29 : vector<32x24xf32>
    %c0_33 = arith.constant 0 : index
    %c0_34 = arith.constant 0 : index
    %c0_35 = arith.constant 0 : index
    %c8 = arith.constant 8 : index
    %31 = vector.load %arg1[%c0_33, %c0_34, %c0_35, %c8] : memref<1x1x32x128xbf16, #tpu.memory_space<vmem>>, vector<1x1x32x24xbf16>
    %32 = vector.shape_cast %31 : vector<1x1x32x24xbf16> to vector<32x24xbf16>
    %c5 = arith.constant 5 : index
    %c0_36 = arith.constant 0 : index
    %c0_37 = arith.constant 0 : index
    %33 = vector.load %arg2[%c5, %c0_36, %c0_37] : memref<9x32x32xbf16, #tpu.memory_space<vmem>>, vector<1x32x32xbf16>
    %34 = vector.shape_cast %33 : vector<1x32x32xbf16> to vector<32x32xbf16>
    %cst_38 = arith.constant dense<0.000000e+00> : vector<32x24xf32>
    %35 = tpu.matmul %34, %32, %cst_38 {dimension_numbers = #tpu.dot_dimension_numbers<[1], [0], [0], [1], [0, 0, 1, 1], [], []>} : vector<32x32xbf16>, vector<32x24xbf16>, vector<32x24xf32> -> vector<32x24xf32>
    %36 = arith.addf %30, %35 : vector<32x24xf32>
    %c0_39 = arith.constant 0 : index
    %c0_40 = arith.constant 0 : index
    %c0_41 = arith.constant 0 : index
    %c12 = arith.constant 12 : index
    %37 = vector.load %arg1[%c0_39, %c0_40, %c0_41, %c12] : memref<1x1x32x128xbf16, #tpu.memory_space<vmem>>, vector<1x1x32x24xbf16>
    %38 = vector.shape_cast %37 : vector<1x1x32x24xbf16> to vector<32x24xbf16>
    %c6_42 = arith.constant 6 : index
    %c0_43 = arith.constant 0 : index
    %c0_44 = arith.constant 0 : index
    %39 = vector.load %arg2[%c6_42, %c0_43, %c0_44] : memref<9x32x32xbf16, #tpu.memory_space<vmem>>, vector<1x32x32xbf16>
    %40 = vector.shape_cast %39 : vector<1x32x32xbf16> to vector<32x32xbf16>
    %cst_45 = arith.constant dense<0.000000e+00> : vector<32x24xf32>
    %41 = tpu.matmul %40, %38, %cst_45 {dimension_numbers = #tpu.dot_dimension_numbers<[1], [0], [0], [1], [0, 0, 1, 1], [], []>} : vector<32x32xbf16>, vector<32x24xbf16>, vector<32x24xf32> -> vector<32x24xf32>
    %42 = arith.addf %36, %41 : vector<32x24xf32>
    %c0_46 = arith.constant 0 : index
    %c0_47 = arith.constant 0 : index
    %c0_48 = arith.constant 0 : index
    %c13 = arith.constant 13 : index
    %43 = vector.load %arg1[%c0_46, %c0_47, %c0_48, %c13] : memref<1x1x32x128xbf16, #tpu.memory_space<vmem>>, vector<1x1x32x24xbf16>
    %44 = vector.shape_cast %43 : vector<1x1x32x24xbf16> to vector<32x24xbf16>
    %c7_49 = arith.constant 7 : index
    %c0_50 = arith.constant 0 : index
    %c0_51 = arith.constant 0 : index
    %45 = vector.load %arg2[%c7_49, %c0_50, %c0_51] : memref<9x32x32xbf16, #tpu.memory_space<vmem>>, vector<1x32x32xbf16>
    %46 = vector.shape_cast %45 : vector<1x32x32xbf16> to vector<32x32xbf16>
    %cst_52 = arith.constant dense<0.000000e+00> : vector<32x24xf32>
    %47 = tpu.matmul %46, %44, %cst_52 {dimension_numbers = #tpu.dot_dimension_numbers<[1], [0], [0], [1], [0, 0, 1, 1], [], []>} : vector<32x32xbf16>, vector<32x24xbf16>, vector<32x24xf32> -> vector<32x24xf32>
    %48 = arith.addf %42, %47 : vector<32x24xf32>
    %c0_53 = arith.constant 0 : index
    %c0_54 = arith.constant 0 : index
    %c0_55 = arith.constant 0 : index
    %c14 = arith.constant 14 : index
    %49 = vector.load %arg1[%c0_53, %c0_54, %c0_55, %c14] : memref<1x1x32x128xbf16, #tpu.memory_space<vmem>>, vector<1x1x32x24xbf16>
    %50 = vector.shape_cast %49 : vector<1x1x32x24xbf16> to vector<32x24xbf16>
    %c8_56 = arith.constant 8 : index
    %c0_57 = arith.constant 0 : index
    %c0_58 = arith.constant 0 : index
    %51 = vector.load %arg2[%c8_56, %c0_57, %c0_58] : memref<9x32x32xbf16, #tpu.memory_space<vmem>>, vector<1x32x32xbf16>
    %52 = vector.shape_cast %51 : vector<1x32x32xbf16> to vector<32x32xbf16>
    %cst_59 = arith.constant dense<0.000000e+00> : vector<32x24xf32>
    %53 = tpu.matmul %52, %50, %cst_59 {dimension_numbers = #tpu.dot_dimension_numbers<[1], [0], [0], [1], [0, 0, 1, 1], [], []>} : vector<32x32xbf16>, vector<32x24xbf16>, vector<32x24xf32> -> vector<32x24xf32>
    %54 = arith.addf %48, %53 : vector<32x24xf32>
    %c0_60 = arith.constant 0 : index
    %c0_61 = arith.constant 0 : index
    %55 = vector.load %arg3[%c0_60, %c0_61] : memref<32x1xf32, #tpu.memory_space<vmem>>, vector<32x1xf32>
    %56 = vector.broadcast %55 : vector<32x1xf32> to vector<32x24xf32>
    %57 = arith.addf %54, %56 : vector<32x24xf32>
    %c0_62 = arith.constant 0 : index
    %c0_63 = arith.constant 0 : index
    %58 = vector.load %arg4[%c0_62, %c0_63] : memref<1x24xf32, #tpu.memory_space<vmem>>, vector<1x24xf32>
    %59 = vector.broadcast %58 : vector<1x24xf32> to vector<32x24xf32>
    %60 = arith.mulf %57, %59 : vector<32x24xf32>
    %cst_64 = arith.constant dense<0.000000e+00> : vector<32xf32>
    %61 = vector.multi_reduction <add>, %60, %cst_64 [1] : vector<32x24xf32> to vector<32xf32>
    %62 = vector.shape_cast %61 : vector<32xf32> to vector<32x1xf32>
    %cst_65 = arith.constant 6.250000e-02 : f32
    %63 = vector.broadcast %cst_65 : f32 to vector<32x1xf32>
    %64 = arith.mulf %62, %63 : vector<32x1xf32>
    %65 = vector.broadcast %64 : vector<32x1xf32> to vector<32x24xf32>
    %66 = arith.subf %57, %65 : vector<32x24xf32>
    %67 = arith.mulf %66, %66 : vector<32x24xf32>
    %68 = vector.broadcast %58 : vector<1x24xf32> to vector<32x24xf32>
    %69 = arith.mulf %67, %68 : vector<32x24xf32>
    %cst_66 = arith.constant dense<0.000000e+00> : vector<32xf32>
    %70 = vector.multi_reduction <add>, %69, %cst_66 [1] : vector<32x24xf32> to vector<32xf32>
    %71 = vector.shape_cast %70 : vector<32xf32> to vector<32x1xf32>
    %cst_67 = arith.constant 6.250000e-02 : f32
    %72 = vector.broadcast %cst_67 : f32 to vector<32x1xf32>
    %73 = arith.mulf %71, %72 : vector<32x1xf32>
    %cst_68 = arith.constant 9.99999974E-6 : f32
    %74 = vector.broadcast %cst_68 : f32 to vector<32x1xf32>
    %75 = arith.addf %73, %74 : vector<32x1xf32>
    %76 = math.rsqrt %75 : vector<32x1xf32>
    %77 = vector.broadcast %76 : vector<32x1xf32> to vector<32x24xf32>
    %78 = arith.mulf %66, %77 : vector<32x24xf32>
    %cst_69 = arith.constant 0.000000e+00 : f32
    %79 = vector.broadcast %cst_69 : f32 to vector<32x24xf32>
    %80 = arith.maximumf %78, %79 : vector<32x24xf32>
    %c0_70 = arith.constant 0 : index
    %c0_71 = arith.constant 0 : index
    %c0_72 = arith.constant 0 : index
    %81 = vector.load %arg5[%c0_70, %c0_71, %c0_72] : memref<1x32x24xf32, #tpu.memory_space<vmem>>, vector<1x32x24xf32>
    %82 = vector.shape_cast %81 : vector<1x32x24xf32> to vector<32x24xf32>
    %83 = vector.shape_cast %80 : vector<32x24xf32> to vector<1x32x24xf32>
    tpu.vector_store %arg5[%c0_70, %c0_71, %c0_72], %83 {strides = array<i32>} : memref<1x32x24xf32, #tpu.memory_space<vmem>>, vector<1x32x24xf32>,
    return
  }
  func.func @transform_0(%arg0: i32) -> (i32, i32, i32, i32) {
    %c0_i32 = arith.constant 0 : i32
    %c0_i32_0 = arith.constant 0 : i32
    %c0_i32_1 = arith.constant 0 : i32
    %c0_i32_2 = arith.constant 0 : i32
    return %arg0, %c0_i32, %c0_i32_0, %c0_i32_1 : i32, i32, i32, i32
  }
  func.func @transform_1(%arg0: i32) -> (i32, i32, i32) {
    %c0_i32 = arith.constant 0 : i32
    %c0_i32_0 = arith.constant 0 : i32
    %c0_i32_1 = arith.constant 0 : i32
    %c0_i32_2 = arith.constant 0 : i32
    return %c0_i32, %c0_i32_0, %c0_i32_1 : i32, i32, i32
  }
  func.func @transform_2(%arg0: i32) -> (i32, i32) {
    %c0_i32 = arith.constant 0 : i32
    %c0_i32_0 = arith.constant 0 : i32
    %c0_i32_1 = arith.constant 0 : i32
    return %c0_i32, %c0_i32_0 : i32, i32
  }
  func.func @transform_3(%arg0: i32) -> (i32, i32) {
    %c0_i32 = arith.constant 0 : i32
    %c0_i32_0 = arith.constant 0 : i32
    %c0_i32_1 = arith.constant 0 : i32
    return %c0_i32, %c0_i32_0 : i32, i32
  }
  func.func @transform_4(%arg0: i32) -> (i32, i32, i32) {
    %c0_i32 = arith.constant 0 : i32
    %c0_i32_0 = arith.constant 0 : i32
    %c0_i32_1 = arith.constant 0 : i32
    return %arg0, %c0_i32, %c0_i32_0 : i32, i32, i32
  }
}

module attributes {stable_mosaic.version = 11 : i64} {
  func.func @_fused_conv_in_kernel(%arg0: i32, %arg1: memref<1x1x32x128xbf16, #tpu.memory_space<vmem>>, %arg2: memref<9x32x32xbf16, #tpu.memory_space<vmem>>, %arg3: memref<32x1xf32, #tpu.memory_space<vmem>>, %arg4: memref<1x24xf32, #tpu.memory_space<vmem>>, %arg5: memref<1x32x24xf32, #tpu.memory_space<vmem>>, %arg6: memref<1x32x24xf32, #tpu.memory_space<vmem>>) attributes {dimension_semantics = [#tpu.dimension_semantics<parallel>], iteration_bounds = array<i64: 2>, scalar_prefetch = 0 : i64, scratch_operands = 0 : i64, tpu.core_type = #tpu.core_type<tc>, window_params = [{transform_indices = @transform_0, window_bounds = array<i64: 1, 1, 32, 128>}, {pipeline_mode = #tpu.pipeline_mode<synchronous>, transform_indices = @transform_1, window_bounds = array<i64: 9, 32, 32>}, {pipeline_mode = #tpu.pipeline_mode<synchronous>, transform_indices = @transform_2, window_bounds = array<i64: 32, 1>}, {pipeline_mode = #tpu.pipeline_mode<synchronous>, transform_indices = @transform_3, window_bounds = array<i64: 1, 24>}, {transform_indices = @transform_4, window_bounds = array<i64: 1, 32, 24>}, {transform_indices = @transform_5, window_bounds = array<i64: 1, 32, 24>}]} {
    %cst = arith.constant 0.000000e+00 : f32
    %0 = vector.broadcast %cst : f32 to vector<32x24xf32>
    %c0 = arith.constant 0 : index
    %c0_0 = arith.constant 0 : index
    %c0_1 = arith.constant 0 : index
    %c0_2 = arith.constant 0 : index
    %1 = vector.load %arg1[%c0, %c0_0, %c0_1, %c0_2] : memref<1x1x32x128xbf16, #tpu.memory_space<vmem>>, vector<1x1x32x24xbf16>
    %2 = vector.shape_cast %1 : vector<1x1x32x24xbf16> to vector<32x24xbf16>
    %c0_3 = arith.constant 0 : index
    %c0_4 = arith.constant 0 : index
    %c0_5 = arith.constant 0 : index
    %3 = vector.load %arg2[%c0_3, %c0_4, %c0_5] : memref<9x32x32xbf16, #tpu.memory_space<vmem>>, vector<1x32x32xbf16>
    %4 = vector.shape_cast %3 : vector<1x32x32xbf16> to vector<32x32xbf16>
    %cst_6 = arith.constant dense<0.000000e+00> : vector<32x24xf32>
    %5 = tpu.matmul %4, %2, %cst_6 {dimension_numbers = #tpu.dot_dimension_numbers<[1], [0], [0], [1], [0, 0, 1, 1], [], []>} : vector<32x32xbf16>, vector<32x24xbf16>, vector<32x24xf32> -> vector<32x24xf32>
    %6 = arith.addf %0, %5 : vector<32x24xf32>
    %c0_7 = arith.constant 0 : index
    %c0_8 = arith.constant 0 : index
    %c0_9 = arith.constant 0 : index
    %c1 = arith.constant 1 : index
    %7 = vector.load %arg1[%c0_7, %c0_8, %c0_9, %c1] : memref<1x1x32x128xbf16, #tpu.memory_space<vmem>>, vector<1x1x32x24xbf16>
    %8 = vector.shape_cast %7 : vector<1x1x32x24xbf16> to vector<32x24xbf16>
    %c1_10 = arith.constant 1 : index
    %c0_11 = arith.constant 0 : index
    %c0_12 = arith.constant 0 : index
    %9 = vector.load %arg2[%c1_10, %c0_11, %c0_12] : memref<9x32x32xbf16, #tpu.memory_space<vmem>>, vector<1x32x32xbf16>
    %10 = vector.shape_cast %9 : vector<1x32x32xbf16> to vector<32x32xbf16>
    %cst_13 = arith.constant dense<0.000000e+00> : vector<32x24xf32>
    %11 = tpu.matmul %10, %8, %cst_13 {dimension_numbers = #tpu.dot_dimension_numbers<[1], [0], [0], [1], [0, 0, 1, 1], [], []>} : vector<32x32xbf16>, vector<32x24xbf16>, vector<32x24xf32> -> vector<32x24xf32>
    %12 = arith.addf %6, %11 : vector<32x24xf32>
    %c0_14 = arith.constant 0 : index
    %c0_15 = arith.constant 0 : index
    %c0_16 = arith.constant 0 : index
    %c2 = arith.constant 2 : index
    %13 = vector.load %arg1[%c0_14, %c0_15, %c0_16, %c2] : memref<1x1x32x128xbf16, #tpu.memory_space<vmem>>, vector<1x1x32x24xbf16>
    %14 = vector.shape_cast %13 : vector<1x1x32x24xbf16> to vector<32x24xbf16>
    %c2_17 = arith.constant 2 : index
    %c0_18 = arith.constant 0 : index
    %c0_19 = arith.constant 0 : index
    %15 = vector.load %arg2[%c2_17, %c0_18, %c0_19] : memref<9x32x32xbf16, #tpu.memory_space<vmem>>, vector<1x32x32xbf16>
    %16 = vector.shape_cast %15 : vector<1x32x32xbf16> to vector<32x32xbf16>
    %cst_20 = arith.constant dense<0.000000e+00> : vector<32x24xf32>
    %17 = tpu.matmul %16, %14, %cst_20 {dimension_numbers = #tpu.dot_dimension_numbers<[1], [0], [0], [1], [0, 0, 1, 1], [], []>} : vector<32x32xbf16>, vector<32x24xbf16>, vector<32x24xf32> -> vector<32x24xf32>
    %18 = arith.addf %12, %17 : vector<32x24xf32>
    %c0_21 = arith.constant 0 : index
    %c0_22 = arith.constant 0 : index
    %c0_23 = arith.constant 0 : index
    %c6 = arith.constant 6 : index
    %19 = vector.load %arg1[%c0_21, %c0_22, %c0_23, %c6] : memref<1x1x32x128xbf16, #tpu.memory_space<vmem>>, vector<1x1x32x24xbf16>
    %20 = vector.shape_cast %19 : vector<1x1x32x24xbf16> to vector<32x24xbf16>
    %c3 = arith.constant 3 : index
    %c0_24 = arith.constant 0 : index
    %c0_25 = arith.constant 0 : index
    %21 = vector.load %arg2[%c3, %c0_24, %c0_25] : memref<9x32x32xbf16, #tpu.memory_space<vmem>>, vector<1x32x32xbf16>
    %22 = vector.shape_cast %21 : vector<1x32x32xbf16> to vector<32x32xbf16>
    %cst_26 = arith.constant dense<0.000000e+00> : vector<32x24xf32>
    %23 = tpu.matmul %22, %20, %cst_26 {dimension_numbers = #tpu.dot_dimension_numbers<[1], [0], [0], [1], [0, 0, 1, 1], [], []>} : vector<32x32xbf16>, vector<32x24xbf16>, vector<32x24xf32> -> vector<32x24xf32>
    %24 = arith.addf %18, %23 : vector<32x24xf32>
    %c0_27 = arith.constant 0 : index
    %c0_28 = arith.constant 0 : index
    %c0_29 = arith.constant 0 : index
    %c7 = arith.constant 7 : index
    %25 = vector.load %arg1[%c0_27, %c0_28, %c0_29, %c7] : memref<1x1x32x128xbf16, #tpu.memory_space<vmem>>, vector<1x1x32x24xbf16>
    %26 = vector.shape_cast %25 : vector<1x1x32x24xbf16> to vector<32x24xbf16>
    %c4 = arith.constant 4 : index
    %c0_30 = arith.constant 0 : index
    %c0_31 = arith.constant 0 : index
    %27 = vector.load %arg2[%c4, %c0_30, %c0_31] : memref<9x32x32xbf16, #tpu.memory_space<vmem>>, vector<1x32x32xbf16>
    %28 = vector.shape_cast %27 : vector<1x32x32xbf16> to vector<32x32xbf16>
    %cst_32 = arith.constant dense<0.000000e+00> : vector<32x24xf32>
    %29 = tpu.matmul %28, %26, %cst_32 {dimension_numbers = #tpu.dot_dimension_numbers<[1], [0], [0], [1], [0, 0, 1, 1], [], []>} : vector<32x32xbf16>, vector<32x24xbf16>, vector<32x24xf32> -> vector<32x24xf32>
    %30 = arith.addf %24, %29 : vector<32x24xf32>
    %c0_33 = arith.constant 0 : index
    %c0_34 = arith.constant 0 : index
    %c0_35 = arith.constant 0 : index
    %c8 = arith.constant 8 : index
    %31 = vector.load %arg1[%c0_33, %c0_34, %c0_35, %c8] : memref<1x1x32x128xbf16, #tpu.memory_space<vmem>>, vector<1x1x32x24xbf16>
    %32 = vector.shape_cast %31 : vector<1x1x32x24xbf16> to vector<32x24xbf16>
    %c5 = arith.constant 5 : index
    %c0_36 = arith.constant 0 : index
    %c0_37 = arith.constant 0 : index
    %33 = vector.load %arg2[%c5, %c0_36, %c0_37] : memref<9x32x32xbf16, #tpu.memory_space<vmem>>, vector<1x32x32xbf16>
    %34 = vector.shape_cast %33 : vector<1x32x32xbf16> to vector<32x32xbf16>
    %cst_38 = arith.constant dense<0.000000e+00> : vector<32x24xf32>
    %35 = tpu.matmul %34, %32, %cst_38 {dimension_numbers = #tpu.dot_dimension_numbers<[1], [0], [0], [1], [0, 0, 1, 1], [], []>} : vector<32x32xbf16>, vector<32x24xbf16>, vector<32x24xf32> -> vector<32x24xf32>
    %36 = arith.addf %30, %35 : vector<32x24xf32>
    %c0_39 = arith.constant 0 : index
    %c0_40 = arith.constant 0 : index
    %c0_41 = arith.constant 0 : index
    %c12 = arith.constant 12 : index
    %37 = vector.load %arg1[%c0_39, %c0_40, %c0_41, %c12] : memref<1x1x32x128xbf16, #tpu.memory_space<vmem>>, vector<1x1x32x24xbf16>
    %38 = vector.shape_cast %37 : vector<1x1x32x24xbf16> to vector<32x24xbf16>
    %c6_42 = arith.constant 6 : index
    %c0_43 = arith.constant 0 : index
    %c0_44 = arith.constant 0 : index
    %39 = vector.load %arg2[%c6_42, %c0_43, %c0_44] : memref<9x32x32xbf16, #tpu.memory_space<vmem>>, vector<1x32x32xbf16>
    %40 = vector.shape_cast %39 : vector<1x32x32xbf16> to vector<32x32xbf16>
    %cst_45 = arith.constant dense<0.000000e+00> : vector<32x24xf32>
    %41 = tpu.matmul %40, %38, %cst_45 {dimension_numbers = #tpu.dot_dimension_numbers<[1], [0], [0], [1], [0, 0, 1, 1], [], []>} : vector<32x32xbf16>, vector<32x24xbf16>, vector<32x24xf32> -> vector<32x24xf32>
    %42 = arith.addf %36, %41 : vector<32x24xf32>
    %c0_46 = arith.constant 0 : index
    %c0_47 = arith.constant 0 : index
    %c0_48 = arith.constant 0 : index
    %c13 = arith.constant 13 : index
    %43 = vector.load %arg1[%c0_46, %c0_47, %c0_48, %c13] : memref<1x1x32x128xbf16, #tpu.memory_space<vmem>>, vector<1x1x32x24xbf16>
    %44 = vector.shape_cast %43 : vector<1x1x32x24xbf16> to vector<32x24xbf16>
    %c7_49 = arith.constant 7 : index
    %c0_50 = arith.constant 0 : index
    %c0_51 = arith.constant 0 : index
    %45 = vector.load %arg2[%c7_49, %c0_50, %c0_51] : memref<9x32x32xbf16, #tpu.memory_space<vmem>>, vector<1x32x32xbf16>
    %46 = vector.shape_cast %45 : vector<1x32x32xbf16> to vector<32x32xbf16>
    %cst_52 = arith.constant dense<0.000000e+00> : vector<32x24xf32>
    %47 = tpu.matmul %46, %44, %cst_52 {dimension_numbers = #tpu.dot_dimension_numbers<[1], [0], [0], [1], [0, 0, 1, 1], [], []>} : vector<32x32xbf16>, vector<32x24xbf16>, vector<32x24xf32> -> vector<32x24xf32>
    %48 = arith.addf %42, %47 : vector<32x24xf32>
    %c0_53 = arith.constant 0 : index
    %c0_54 = arith.constant 0 : index
    %c0_55 = arith.constant 0 : index
    %c14 = arith.constant 14 : index
    %49 = vector.load %arg1[%c0_53, %c0_54, %c0_55, %c14] : memref<1x1x32x128xbf16, #tpu.memory_space<vmem>>, vector<1x1x32x24xbf16>
    %50 = vector.shape_cast %49 : vector<1x1x32x24xbf16> to vector<32x24xbf16>
    %c8_56 = arith.constant 8 : index
    %c0_57 = arith.constant 0 : index
    %c0_58 = arith.constant 0 : index
    %51 = vector.load %arg2[%c8_56, %c0_57, %c0_58] : memref<9x32x32xbf16, #tpu.memory_space<vmem>>, vector<1x32x32xbf16>
    %52 = vector.shape_cast %51 : vector<1x32x32xbf16> to vector<32x32xbf16>
    %cst_59 = arith.constant dense<0.000000e+00> : vector<32x24xf32>
    %53 = tpu.matmul %52, %50, %cst_59 {dimension_numbers = #tpu.dot_dimension_numbers<[1], [0], [0], [1], [0, 0, 1, 1], [], []>} : vector<32x32xbf16>, vector<32x24xbf16>, vector<32x24xf32> -> vector<32x24xf32>
    %54 = arith.addf %48, %53 : vector<32x24xf32>
    %c0_60 = arith.constant 0 : index
    %c0_61 = arith.constant 0 : index
    %55 = vector.load %arg3[%c0_60, %c0_61] : memref<32x1xf32, #tpu.memory_space<vmem>>, vector<32x1xf32>
    %56 = vector.broadcast %55 : vector<32x1xf32> to vector<32x24xf32>
    %57 = arith.addf %54, %56 : vector<32x24xf32>
    %c0_62 = arith.constant 0 : index
    %c0_63 = arith.constant 0 : index
    %58 = vector.load %arg4[%c0_62, %c0_63] : memref<1x24xf32, #tpu.memory_space<vmem>>, vector<1x24xf32>
    %59 = vector.broadcast %58 : vector<1x24xf32> to vector<32x24xf32>
    %60 = arith.mulf %57, %59 : vector<32x24xf32>
    %cst_64 = arith.constant dense<0.000000e+00> : vector<32xf32>
    %61 = vector.multi_reduction <add>, %60, %cst_64 [1] : vector<32x24xf32> to vector<32xf32>
    %62 = vector.shape_cast %61 : vector<32xf32> to vector<32x1xf32>
    %cst_65 = arith.constant 6.250000e-02 : f32
    %63 = vector.broadcast %cst_65 : f32 to vector<32x1xf32>
    %64 = arith.mulf %62, %63 : vector<32x1xf32>
    %65 = vector.broadcast %64 : vector<32x1xf32> to vector<32x24xf32>
    %66 = arith.subf %57, %65 : vector<32x24xf32>
    %67 = arith.mulf %66, %66 : vector<32x24xf32>
    %68 = vector.broadcast %58 : vector<1x24xf32> to vector<32x24xf32>
    %69 = arith.mulf %67, %68 : vector<32x24xf32>
    %cst_66 = arith.constant dense<0.000000e+00> : vector<32xf32>
    %70 = vector.multi_reduction <add>, %69, %cst_66 [1] : vector<32x24xf32> to vector<32xf32>
    %71 = vector.shape_cast %70 : vector<32xf32> to vector<32x1xf32>
    %cst_67 = arith.constant 6.250000e-02 : f32
    %72 = vector.broadcast %cst_67 : f32 to vector<32x1xf32>
    %73 = arith.mulf %71, %72 : vector<32x1xf32>
    %cst_68 = arith.constant 9.99999974E-6 : f32
    %74 = vector.broadcast %cst_68 : f32 to vector<32x1xf32>
    %75 = arith.addf %73, %74 : vector<32x1xf32>
    %76 = math.rsqrt %75 : vector<32x1xf32>
    %77 = vector.broadcast %76 : vector<32x1xf32> to vector<32x24xf32>
    %78 = arith.mulf %66, %77 : vector<32x24xf32>
    %c0_69 = arith.constant 0 : index
    %c0_70 = arith.constant 0 : index
    %c0_71 = arith.constant 0 : index
    %79 = vector.load %arg5[%c0_69, %c0_70, %c0_71] : memref<1x32x24xf32, #tpu.memory_space<vmem>>, vector<1x32x24xf32>
    %80 = vector.shape_cast %79 : vector<1x32x24xf32> to vector<32x24xf32>
    %81 = arith.addf %78, %80 : vector<32x24xf32>
    %c0_72 = arith.constant 0 : index
    %c0_73 = arith.constant 0 : index
    %c0_74 = arith.constant 0 : index
    %82 = vector.load %arg6[%c0_72, %c0_73, %c0_74] : memref<1x32x24xf32, #tpu.memory_space<vmem>>, vector<1x32x24xf32>
    %83 = vector.shape_cast %82 : vector<1x32x24xf32> to vector<32x24xf32>
    %84 = vector.shape_cast %81 : vector<32x24xf32> to vector<1x32x24xf32>
    tpu.vector_store %arg6[%c0_72, %c0_73, %c0_74], %84 {strides = array<i32>} : memref<1x32x24xf32, #tpu.memory_space<vmem>>, vector<1x32x24xf32>,
    return
  }
  func.func @transform_0(%arg0: i32) -> (i32, i32, i32, i32) {
    %c0_i32 = arith.constant 0 : i32
    %c0_i32_0 = arith.constant 0 : i32
    %c0_i32_1 = arith.constant 0 : i32
    %c0_i32_2 = arith.constant 0 : i32
    return %arg0, %c0_i32, %c0_i32_0, %c0_i32_1 : i32, i32, i32, i32
  }
  func.func @transform_1(%arg0: i32) -> (i32, i32, i32) {
    %c0_i32 = arith.constant 0 : i32
    %c0_i32_0 = arith.constant 0 : i32
    %c0_i32_1 = arith.constant 0 : i32
    %c0_i32_2 = arith.constant 0 : i32
    return %c0_i32, %c0_i32_0, %c0_i32_1 : i32, i32, i32
  }
  func.func @transform_2(%arg0: i32) -> (i32, i32) {
    %c0_i32 = arith.constant 0 : i32
    %c0_i32_0 = arith.constant 0 : i32
    %c0_i32_1 = arith.constant 0 : i32
    return %c0_i32, %c0_i32_0 : i32, i32
  }
  func.func @transform_3(%arg0: i32) -> (i32, i32) {
    %c0_i32 = arith.constant 0 : i32
    %c0_i32_0 = arith.constant 0 : i32
    %c0_i32_1 = arith.constant 0 : i32
    return %c0_i32, %c0_i32_0 : i32, i32
  }
  func.func @transform_4(%arg0: i32) -> (i32, i32, i32) {
    %c0_i32 = arith.constant 0 : i32
    %c0_i32_0 = arith.constant 0 : i32
    %c0_i32_1 = arith.constant 0 : i32
    return %arg0, %c0_i32, %c0_i32_0 : i32, i32, i32
  }
  func.func @transform_5(%arg0: i32) -> (i32, i32, i32) {
    %c0_i32 = arith.constant 0 : i32
    %c0_i32_0 = arith.constant 0 : i32
    %c0_i32_1 = arith.constant 0 : i32
    return %arg0, %c0_i32, %c0_i32_0 : i32, i32, i32
  }
}

</mosaic_0001>

<bundles_post_ra>
// kernel: encoder_forward.6
= control target key start
LH: loop header
LB: loop body
LE: loop exit
PB: predicated region body
PF: predicated region fallthrough
CT: control target
= control target key end

     0   :  { %s1552_s15 = smov 0   ;;  %s1719_s0 = inlined_call_operand.vmem [shape: bf16[2,4,8,128], index: 0, kind: input, shape index: {}]   ;;  %s1720_s1 = inlined_call_operand.vmem [shape: bf16[16,16,8], index: 1, kind: input, shape index: {}]   ;;  %s1721_s2 = inlined_call_operand.vmem [shape: f32[16,1], index: 2, kind: input, shape index: {}]   ;;  %s1722_s3 = inlined_call_operand.vmem [shape: f32[1,72], index: 3, kind: input, shape index: {}]   ;;  %s1723_s4 = inlined_call_operand.vmem [shape: f32[2,16,72], index: 4, kind: output, shape index: {}]  }
   0x1 LB: > { %s1262_s16 = sadd.s32 4294967295, %s1519_s15   ;;  %p1266_p0 = scmp.ge.s32.totalorder %s1519_s15, 1  ;;  %s1519_s15 = sphi %s1552_s15, %s14_s15  }
   0x2   : > { %p162_p1 = scmp.lt.s32.totalorder %s1519_s15, 3 }
   0x4   : > { %p163_p2 = pnand %p1266_p0, %p162_p1 }
   0x5   : > { %p188_p3 = scmp.lt.s32.totalorder (!%p163_p2), %s1262_s16, 1  ;;  %v1521_v0 = vmov (!%p163_p2), 0.0   ;;  %vm1522_vm0 = vmmov (!%p163_p2), 0   ;;  %vm216_vm1 = vcmask (!%p163_p2), 1043456   ;;  %v1493_v8 = vld [vmem:[%s1720_s1 + $0x8] sm:$0xff] (!%p163_p2)   ;;  %vm212_vm2 = vcmask (!%p163_p2), 64512  }
   0x6   : > { %166 = sbr.rel (%p163_p2) target bundleno = 724 (0x2d4), region = 36  ;;  %1377 = vmatprep.subr.bf16.mxu0 (!%p163_p2), %v1521_v0  ;;  %1379 = vmatprep.mubr.msk.bf16.mxu0 (!%p163_p2), %vm1522_vm0, %v1521_v0  ;;  %v1494_v10 = vld [vmem:[%s1720_s1] sm:$0xff] (!%p163_p2)   ;;  %s1523_s25 = smov (!%p163_p2), 127   ;;  %v1152_v14 = vld [vmem:[%s1721_s2 + $0x8] sm:$0xff] (!%p163_p2)  ;;  %v1526_v15 = vmov (!%p163_p2), 0   ;;  %v1495_v18 = vld [vmem:[%s1720_s1 + $0x10] sm:$0xff] (!%p163_p2)  }
   0x7   : > { %1383 = vmatprep.subr.bf16.mxu1 (!%p163_p2), %v1521_v0  ;;  %1385 = vmatprep.mubr.msk.bf16.mxu1 (!%p163_p2), %vm1522_vm0, %v1521_v0  ;;  %s1524_s26 = smov (!%p163_p2), 119   ;;  %s1525_s27 = smov (!%p163_p2), 118   ;;  %v1151_v13 = vld [vmem:[%s1721_s2] sm:$0xff] (!%p163_p2)  ;;  %v1496_v22 = vld [vmem:[%s1720_s1 + $0x18] sm:$0xff] (!%p163_p2)   ;;  %v1498_v28 = vld [vmem:[%s1720_s1 + $0x28] sm:$0xff] (!%p163_p2)   ;;  %vm1174_vm3 = vcmask (!%p163_p2), 588800  }
   0x8   : > { %1487 = vset.pattern.permute.xlu0 (!%p163_p2), %v1526_v15  ;;  %1488 = vset.pattern.permute.xlu1 (!%p163_p2), %v1526_v15  ;;  %v1497_v25 = vld [vmem:[%s1720_s1 + $0x20] sm:$0xff] (!%p163_p2)   ;;  %v1499_v31 = vld [vmem:[%s1720_s1 + $0x30] sm:$0xff] (!%p163_p2)   ;;  %v1500_v34 = vld [vmem:[%s1720_s1 + $0x38] sm:$0xff] (!%p163_p2)  }
   0x9   : > { %v1501_v37 = vld [vmem:[%s1720_s1 + $0x40] sm:$0xff] (!%p163_p2)   ;;  %v1502_v40 = vld [vmem:[%s1720_s1 + $0x48] sm:$0xff] (!%p163_p2)   ;;  %v1503_v43 = vld [vmem:[%s1720_s1 + $0x50] sm:$0xff] (!%p163_p2)  }
   0xa   : > { %v1504_v46 = vld [vmem:[%s1720_s1 + $0x58] sm:$0xff] (!%p163_p2)   ;;  %v1505_v49 = vld [vmem:[%s1720_s1 + $0x60] sm:$0xff] (!%p163_p2)   ;;  %v1506_v52 = vld [vmem:[%s1720_s1 + $0x68] sm:$0xff] (!%p163_p2)  }
   0xb   : > { %v1507_v54 = vld [vmem:[%s1720_s1 + $0x70] sm:$0xff] (!%p163_p2)   ;;  %v1508_v55 = vld [vmem:[%s1720_s1 + $0x78] sm:$0xff] (!%p163_p2)  }
   0xd   : > { %s1725_s16 = smov (!%p188_p3, %s1262_s16), 1 }
   0xe   : > { %s1343_s17 = sshll.u32 %s1725_s16, 4 }
   0xf   : > { %s192_s20 = scalar_lea.vmem %s1719_s0, %s1343_s17  ;;  %s197_s18 = scalar_lea.vmem %s1723_s4, %s1343_s17 }
  0x10   : > { %v199_v1 = vld [vmem:[%s192_s20] sm:$0xf]  ;;  %v1271_v2 = vld [vmem:[%s192_s20 + $0x4] sm:$0xf]  ;;  %v1288_v3 = vld [vmem:[%s192_s20 + $0x8] sm:$0xf] }
  0x11   : > { %v1281_v4 = vcombine.low %v199_v1, %v199_v1  ;;  %v1301_v5 = vcombine.low %v1288_v3, %v1288_v3  ;;  %v1293_v6 = vld [vmem:[%s192_s20 + $0xc] sm:$0xf]  ;;  %v218_v7 = vsel %vm216_vm1, %v1271_v2, 0  ;;  %v270_v9 = vsel %vm216_vm1, %v199_v1, 0 }
  0x12   : > { %1378 = vmatpush3.bf16.msra.mxu0 %v218_v7  ;;  %v1286_v11 = vcombine.low %v1271_v2, %v1271_v2  ;;  %v1306_v12 = vcombine.low %v1293_v6, %v1293_v6  ;;  %1384 = vmatpush3.bf16.msra.mxu1 %v270_v9  ;;  %v451_v19 = vsel %vm216_vm1, %v1288_v3, 0  ;;  %v510_v24 = vsel %vm216_vm1, %v1293_v6, 0 }
  0x13   : > { %324 = vrot.lane.b32.xlu0 %v1281_v4, %s1523_s25  ;;  %566 = vrot.lane.b32.xlu1 %v1301_v5, %s1523_s25 }
  0x14   : > { %1389 = vmatprep.subr.bf16.mxu0 %v1521_v0  ;;  %1395 = vmatprep.subr.bf16.mxu1 %v1521_v0 }
  0x15   : > { %1380 = vmatmul.mubr.msk.bf16.vlgmr.msra.gmra.mrb[0].mxu0 %vm212_vm2, %v1493_v8  ;;  %1386 = vmatmul.mubr.msk.bf16.vlgmr.msra.gmra.mrb[0].mxu1 %vm212_vm2, %v1494_v10 }
  0x16   : > { %1391 = vmatprep.mubr.msk.bf16.mxu0 %vm1522_vm0, %v1521_v0  ;;  %1397 = vmatprep.mubr.msk.bf16.mxu1 %vm1522_vm0, %v1521_v0 }
  0x17   : > { %386 = vrot.lane.b32.xlu0 %v1286_v11, %s1523_s25  ;;  %628 = vrot.lane.b32.xlu1 %v1306_v12, %s1523_s25 }
  0x1b   : > { %687 = vrot.lane.b32.xlu0 %v1281_v4, %s1524_s26  ;;  %746 = vrot.lane.b32.xlu1 %v1286_v11, %s1524_s26 }
  0x1f   : > { %805 = vrot.lane.b32.xlu0 %v1281_v4, %s1525_s27  ;;  %864 = vrot.lane.b32.xlu1 %v1286_v11, %s1525_s27 }
  0x23   : > { %923 = vrot.lane.b32.xlu0 %v1301_v5, %s1524_s26  ;;  %982 = vrot.lane.b32.xlu1 %v1306_v12, %s1524_s26 }
  0x27   : > { %1041 = vrot.lane.b32.xlu0 %v1301_v5, %s1525_s27  ;;  %1100 = vrot.lane.b32.xlu1 %v1306_v12, %s1525_s27 }
  0x2b   : > { %1155 = vperm.xlu0 %1487, %v1151_v13   ;;  %1160 = vperm.xlu1 %1488, %v1152_v14  }
  0x85   : > { %v325_v16 = vpop.permute.xlu0 %324  ;;  %v567_v23 = vpop.permute.xlu1 %566 }
  0x86   : > { %v330_v17 = vsel %vm216_vm1, %v325_v16, 0  ;;  %v572_v26 = vsel %vm216_vm1, %v567_v23, 0 }
  0x87   : > { %1390 = vmatpush3.bf16.msra.mxu0 %v330_v17 }
  0x88   : > { %1401 = vmatprep.subr.bf16.mxu0 %v1521_v0 }
  0x89   : > { %v387_v20 = vpop.permute.xlu0 %386  ;;  %v629_v27 = vpop.permute.xlu1 %628 }
  0x8a   : > { %v392_v21 = vsel %vm216_vm1, %v387_v20, 0  ;;  %1392 = vmatmul.mubr.msk.bf16.vlgmr.msra.gmra.mrb[4].mxu0 %vm212_vm2, %v1495_v18  ;;  %v634_v29 = vsel %vm216_vm1, %v629_v27, 0 }
  0x8b   : > { %1396 = vmatpush3.bf16.msra.mxu1 %v392_v21  ;;  %1402 = vmatpush3.bf16.msra.mxu0 %v451_v19 }
  0x8c   : > { %1403 = vmatprep.mubr.msk.bf16.mxu0 %vm1522_vm0, %v1521_v0  ;;  %1407 = vmatprep.subr.bf16.mxu1 %v1521_v0 }
  0x8d   : > { %1413 = vmatprep.subr.bf16.mxu0 %v1521_v0  ;;  %v688_v30 = vpop.permute.xlu0 %687  ;;  %v747_v33 = vpop.permute.xlu1 %746 }
  0x8e   : > { %1398 = vmatmul.mubr.msk.bf16.vlgmr.msra.gmra.mrb[4].mxu1 %vm212_vm2, %v1496_v22  ;;  %v693_v32 = vsel %vm216_vm1, %v688_v30, 0  ;;  %v752_v35 = vsel %vm216_vm1, %v747_v33, 0 }
  0x8f   : > { %1408 = vmatpush3.bf16.msra.mxu1 %v510_v24  ;;  %1409 = vmatprep.mubr.msk.bf16.mxu1 %vm1522_vm0, %v1521_v0 }
  0x90   : > { %1419 = vmatprep.subr.bf16.mxu1 %v1521_v0 }
  0x91   : > { %v806_v36 = vpop.permute.xlu0 %805  ;;  %v865_v39 = vpop.permute.xlu1 %864 }
  0x92   : > { %1404 = vmatmul.mubr.msk.bf16.vlgmr.msra.gmra.mrb[8].mxu0 %vm212_vm2, %v1497_v25  ;;  %v811_v38 = vsel %vm216_vm1, %v806_v36, 0  ;;  %v870_v41 = vsel %vm216_vm1, %v865_v39, 0 }
  0x93   : > { %1414 = vmatpush3.bf16.msra.mxu0 %v572_v26  ;;  %1415 = vmatprep.mubr.msk.bf16.mxu0 %vm1522_vm0, %v1521_v0 }
  0x94   : > { %1425 = vmatprep.subr.bf16.mxu0 %v1521_v0 }
  0x95   : > { %v924_v42 = vpop.permute.xlu0 %923  ;;  %v983_v45 = vpop.permute.xlu1 %982 }
  0x96   : > { %1410 = vmatmul.mubr.msk.bf16.vlgmr.msra.gmra.mrb[8].mxu1 %vm212_vm2, %v1498_v28  ;;  %v929_v44 = vsel %vm216_vm1, %v924_v42, 0  ;;  %v988_v47 = vsel %vm216_vm1, %v983_v45, 0 }
  0x97   : > { %1420 = vmatpush3.bf16.msra.mxu1 %v634_v29  ;;  %1421 = vmatprep.mubr.msk.bf16.mxu1 %vm1522_vm0, %v1521_v0 }
  0x98   : > { %1431 = vmatprep.subr.bf16.mxu1 %v1521_v0 }
  0x99   : > { %v1042_v48 = vpop.permute.xlu0 %1041  ;;  %v1101_v51 = vpop.permute.xlu1 %1100 }
  0x9a   : > { %1416 = vmatmul.mubr.msk.bf16.vlgmr.msra.gmra.mrb[12].mxu0 %vm212_vm2, %v1499_v31  ;;  %v1047_v50 = vsel %vm216_vm1, %v1042_v48, 0  ;;  %v1106_v53 = vsel %vm216_vm1, %v1101_v51, 0 }
  0x9b   : > { %1426 = vmatpush3.bf16.msra.mxu0 %v693_v32  ;;  %1427 = vmatprep.mubr.msk.bf16.mxu0 %vm1522_vm0, %v1521_v0 }
  0x9c   : > { %1437 = vmatprep.subr.bf16.mxu0 %v1521_v0 }
  0x9e   : > { %1422 = vmatmul.mubr.msk.bf16.vlgmr.msra.gmra.mrb[12].mxu1 %vm212_vm2, %v1500_v34 }
  0x9f   : > { %1432 = vmatpush3.bf16.msra.mxu1 %v752_v35  ;;  %1433 = vmatprep.mubr.msk.bf16.mxu1 %vm1522_vm0, %v1521_v0 }
  0xa0   : > { %1443 = vmatprep.subr.bf16.mxu1 %v1521_v0 }
  0xa2   : > { %1428 = vmatmul.mubr.msk.bf16.vlgmr.msra.gmra.mrb[16].mxu0 %vm212_vm2, %v1501_v37 }
  0xa3   : > { %1438 = vmatpush3.bf16.msra.mxu0 %v811_v38  ;;  %1439 = vmatprep.mubr.msk.bf16.mxu0 %vm1522_vm0, %v1521_v0 }
  0xa4   : > { %1449 = vmatprep.subr.bf16.mxu0 %v1521_v0 }
  0xa6   : > { %1434 = vmatmul.mubr.msk.bf16.vlgmr.msra.gmra.mrb[16].mxu1 %vm212_vm2, %v1502_v40 }
  0xa7   : > { %1444 = vmatpush3.bf16.msra.mxu1 %v870_v41  ;;  %1445 = vmatprep.mubr.msk.bf16.mxu1 %vm1522_vm0, %v1521_v0 }
  0xa8   : > { %1455 = vmatprep.subr.bf16.mxu1 %v1521_v0 }
  0xaa   : > { %1440 = vmatmul.mubr.msk.bf16.vlgmr.msra.gmra.mrb[20].mxu0 %vm212_vm2, %v1503_v43 }
  0xab   : > { %1450 = vmatpush3.bf16.msra.mxu0 %v929_v44  ;;  %1451 = vmatprep.mubr.msk.bf16.mxu0 %vm1522_vm0, %v1521_v0 }
  0xac   : > { %1461 = vmatprep.subr.bf16.mxu0 %v1521_v0 }
  0xae   : > { %1446 = vmatmul.mubr.msk.bf16.vlgmr.msra.gmra.mrb[20].mxu1 %vm212_vm2, %v1504_v46 }
  0xaf   : > { %1456 = vmatpush3.bf16.msra.mxu1 %v988_v47  ;;  %1457 = vmatprep.mubr.msk.bf16.mxu1 %vm1522_vm0, %v1521_v0 }
  0xb0   : > { %1467 = vmatprep.subr.bf16.mxu1 %v1521_v0 }
  0xb2   : > { %1452 = vmatmul.mubr.msk.bf16.vlgmr.msra.gmra.mrb[24].mxu0 %vm212_vm2, %v1505_v49 }
  0xb3   : > { %1462 = vmatpush3.bf16.msra.mxu0 %v1047_v50  ;;  %1463 = vmatprep.mubr.msk.bf16.mxu0 %vm1522_vm0, %v1521_v0 }
  0xb6   : > { %1458 = vmatmul.mubr.msk.bf16.vlgmr.msra.gmra.mrb[24].mxu1 %vm212_vm2, %v1506_v52 }
  0xb7   : > { %1468 = vmatpush3.bf16.msra.mxu1 %v1106_v53  ;;  %1469 = vmatprep.mubr.msk.bf16.mxu1 %vm1522_vm0, %v1521_v0 }
  0xba   : > { %1464 = vmatmul.mubr.msk.bf16.vlgmr.msra.gmra.mrb[28].mxu0 %vm212_vm2, %v1507_v54 }
  0xbe   : > { %1470 = vmatmul.mubr.msk.bf16.vlgmr.msra.gmra.mrb[28].mxu1 %vm212_vm2, %v1508_v55 }
  0xe8   : > { %v254_v56 = vpop.f32.mrb[0].mxu0  ;;  %v306_v59 = vpop.f32.mrb[0].mxu1 }
  0xe9   : > { %v1381_v57 = vpop.f32.mrb[1].mxu0  ;;  %v307_v61 = vadd.f32 %v306_v59, %v254_v56  ;;  %v1387_v62 = vpop.f32.mrb[1].mxu1 }
  0xea   : > { %v257_v58 = vpop.f32.mrb[2].mxu0  ;;  %v309_v63 = vpop.f32.mrb[2].mxu1 }
  0xeb   : > { %v1382_v60 = vpop.f32.mrb[3].mxu0  ;;  %v310_v1 = vadd.f32 %v309_v63, %v257_v58  ;;  %v1388_v2 = vpop.f32.mrb[3].mxu1 }
 0x15d   : > { %v366_v3 = vpop.f32.mrb[4].mxu0 }
 0x15e   : > { %v373_v0 = vadd.f32 %v366_v3, %v307_v61  ;;  %v1393_v4 = vpop.f32.mrb[5].mxu0 }
 0x15f   : > { %v369_v5 = vpop.f32.mrb[6].mxu0 }
 0x160   : > { %v374_v6 = vadd.f32 %v369_v5, %v310_v1  ;;  %v1394_v7 = vpop.f32.mrb[7].mxu0 }
 0x161   : > { %v428_v8 = vpop.f32.mrb[4].mxu1 }
 0x162   : > { %v435_v9 = vadd.f32 %v428_v8, %v373_v0  ;;  %v1399_v10 = vpop.f32.mrb[5].mxu1 }
 0x163   : > { %v431_v11 = vpop.f32.mrb[6].mxu1 }
 0x164   : > { %v436_v12 = vadd.f32 %v431_v11, %v374_v6  ;;  %v1400_v13 = vpop.f32.mrb[7].mxu1 }
 0x165   : > { %v487_v14 = vpop.f32.mrb[8].mxu0 }
 0x166   : > { %v494_v15 = vadd.f32 %v487_v14, %v435_v9  ;;  %v1405_v16 = vpop.f32.mrb[9].mxu0 }
 0x167   : > { %v490_v17 = vpop.f32.mrb[10].mxu0 }
 0x168   : > { %v495_v18 = vadd.f32 %v490_v17, %v436_v12  ;;  %v1406_v19 = vpop.f32.mrb[11].mxu0  ;;  %v1156_v17 = vpop.permute.xlu0 %1155 }
 0x169   : > { %v546_v20 = vpop.f32.mrb[8].mxu1 }
 0x16a   : > { %v553_v21 = vadd.f32 %v546_v20, %v494_v15  ;;  %v1411_v22 = vpop.f32.mrb[9].mxu1 }
 0x16b   : > { %v549_v23 = vpop.f32.mrb[10].mxu1  ;;  %v1340_v22 = vld [vmem:[%s1722_s3] ss:$0 sm:$0xff] }
 0x16c   : > { %v554_v24 = vadd.f32 %v549_v23, %v495_v18  ;;  %v1412_v25 = vpop.f32.mrb[11].mxu1 }
 0x16d   : > { %v608_v26 = vpop.f32.mrb[12].mxu0 }
 0x16e   : > { %v615_v27 = vadd.f32 %v608_v26, %v553_v21  ;;  %v1417_v28 = vpop.f32.mrb[13].mxu0  ;;  %v1161_v21 = vpop.permute.xlu1 %1160 }
 0x16f   : > { %v611_v29 = vpop.f32.mrb[14].mxu0 }
 0x170   : > { %v616_v30 = vadd.f32 %v611_v29, %v554_v24  ;;  %v1418_v31 = vpop.f32.mrb[15].mxu0 }
 0x171   : > { %v670_v32 = vpop.f32.mrb[12].mxu1 }
 0x172   : > { %v677_v33 = vadd.f32 %v670_v32, %v615_v27  ;;  %v1423_v34 = vpop.f32.mrb[13].mxu1 }
 0x173   : > { %v673_v35 = vpop.f32.mrb[14].mxu1 }
 0x174   : > { %v678_v36 = vadd.f32 %v673_v35, %v616_v30  ;;  %v1424_v37 = vpop.f32.mrb[15].mxu1 }
 0x175   : > { %v729_v38 = vpop.f32.mrb[16].mxu0 }
 0x176   : > { %v736_v39 = vadd.f32 %v729_v38, %v677_v33  ;;  %v1429_v40 = vpop.f32.mrb[17].mxu0 }
 0x177   : > { %v732_v41 = vpop.f32.mrb[18].mxu0 }
 0x178   : > { %v737_v42 = vadd.f32 %v732_v41, %v678_v36  ;;  %v1430_v43 = vpop.f32.mrb[19].mxu0 }
 0x179   : > { %v788_v44 = vpop.f32.mrb[16].mxu1 }
 0x17a   : > { %v795_v45 = vadd.f32 %v788_v44, %v736_v39  ;;  %v1435_v46 = vpop.f32.mrb[17].mxu1 }
 0x17b   : > { %v791_v47 = vpop.f32.mrb[18].mxu1 }
 0x17c   : > { %v796_v48 = vadd.f32 %v791_v47, %v737_v42  ;;  %v1436_v49 = vpop.f32.mrb[19].mxu1 }
 0x17d   : > { %v847_v50 = vpop.f32.mrb[20].mxu0 }
 0x17e   : > { %v854_v51 = vadd.f32 %v847_v50, %v795_v45  ;;  %v1441_v52 = vpop.f32.mrb[21].mxu0 }
 0x17f   : > { %v850_v53 = vpop.f32.mrb[22].mxu0 }
 0x180   : > { %v855_v54 = vadd.f32 %v850_v53, %v796_v48  ;;  %v1442_v55 = vpop.f32.mrb[23].mxu0 }
 0x181   : > { %v906_v56 = vpop.f32.mrb[20].mxu1 }
 0x182   : > { %v913_v57 = vadd.f32 %v906_v56, %v854_v51  ;;  %v1447_v58 = vpop.f32.mrb[21].mxu1 }
 0x183   : > { %v909_v59 = vpop.f32.mrb[22].mxu1 }
 0x184   : > { %v914_v60 = vadd.f32 %v909_v59, %v855_v54  ;;  %v1448_v61 = vpop.f32.mrb[23].mxu1 }
 0x185   : > { %v965_v62 = vpop.f32.mrb[24].mxu0 }
 0x186   : > { %v972_v63 = vadd.f32 %v965_v62, %v913_v57  ;;  %v1453_v1 = vpop.f32.mrb[25].mxu0 }
 0x187   : > { %v968_v2 = vpop.f32.mrb[26].mxu0 }
 0x188   : > { %v973_v3 = vadd.f32 %v968_v2, %v914_v60  ;;  %v1454_v0 = vpop.f32.mrb[27].mxu0 }
 0x189   : > { %v1024_v4 = vpop.f32.mrb[24].mxu1 }
 0x18a   : > { %v1031_v5 = vadd.f32 %v1024_v4, %v972_v63  ;;  %v1459_v6 = vpop.f32.mrb[25].mxu1 }
 0x18b   : > { %v1027_v7 = vpop.f32.mrb[26].mxu1 }
 0x18c   : > { %v1032_v8 = vadd.f32 %v1027_v7, %v973_v3  ;;  %v1460_v9 = vpop.f32.mrb[27].mxu1 }
 0x18d   : > { %v1083_v10 = vpop.f32.mrb[28].mxu0 }
 0x18e   : > { %v1090_v11 = vadd.f32 %v1083_v10, %v1031_v5  ;;  %v1465_v12 = vpop.f32.mrb[29].mxu0 }
 0x18f   : > { %v1086_v13 = vpop.f32.mrb[30].mxu0 }
 0x190   : > { %v1091_v14 = vadd.f32 %v1086_v13, %v1032_v8  ;;  %v1466_v15 = vpop.f32.mrb[31].mxu0 }
 0x191   : > { %v1142_v16 = vpop.f32.mrb[28].mxu1 }
 0x192   : > { %v1149_v18 = vadd.f32 %v1142_v16, %v1090_v11  ;;  %v1471_v19 = vpop.f32.mrb[29].mxu1 }
 0x193   : > { %v1145_v20 = vpop.f32.mrb[30].mxu1 }
 0x194   : > { %v1163_v23 = vadd.f32 %v1156_v17, %v1149_v18  ;;  %v1150_v24 = vadd.f32 %v1145_v20, %v1091_v14  ;;  %v1472_v25 = vpop.f32.mrb[31].mxu1 }
 0x196   : > { %v1164_v26 = vadd.f32 %v1161_v21, %v1150_v24  ;;  %v1172_v27 = vmul.f32 %v1340_v22, %v1163_v23 }
 0x198   : > { %v1175_v28 = vsel %vm1174_vm3, %v1172_v27, 0.0  ;;  %v1173_v29 = vmul.f32 %v1340_v22, %v1164_v26 }
 0x199   : > { %1176 = vadd.xlane.f32.xlu1 %v1175_v28 }
 0x19a   : > { %v1178_v30 = vsel %vm1174_vm3, %v1173_v29, 0.0 }
 0x19b   : > { %1179 = vadd.xlane.f32.xlu0 %v1178_v30 }
 0x226   : > { %v1177_v31 = vpop.xlane.xlu1 %1176 }
 0x227   : > { %v1181_v32 = vmul.f32 0.015625, %v1177_v31 }
 0x228   : > { %v1180_v33 = vpop.xlane.xlu0 %1179 }
 0x229   : > { %v1183_v34 = vsub.f32 %v1163_v23, %v1181_v32  ;;  %v1182_v35 = vmul.f32 0.015625, %v1180_v33 }
 0x22b   : > { %v1184_v36 = vsub.f32 %v1164_v26, %v1182_v35  ;;  %v1185_v37 = vmul.f32 %v1183_v34, %v1183_v34 }
 0x22d   : > { %v1187_v38 = vmul.f32 %v1340_v22, %v1185_v37  ;;  %v1186_v39 = vmul.f32 %v1184_v36, %v1184_v36 }
 0x22f   : > { %v1189_v40 = vsel %vm1174_vm3, %v1187_v38, 0.0  ;;  %v1188_v41 = vmul.f32 %v1340_v22, %v1186_v39 }
 0x230   : > { %1190 = vadd.xlane.f32.xlu0 %v1189_v40 }
 0x231   : > { %v1192_v42 = vsel %vm1174_vm3, %v1188_v41, 0.0 }
 0x232   : > { %1193 = vadd.xlane.f32.xlu1 %v1192_v42 }
 0x2bd   : > { %v1191_v43 = vpop.xlane.xlu0 %1190 }
 0x2be   : > { %v1195_v44 = vmul.f32 0.015625, %v1191_v43 }
 0x2bf   : > { %v1194_v45 = vpop.xlane.xlu1 %1193 }
 0x2c0   : > { %v1197_v46 = vadd.f32 1e-05, %v1195_v44  ;;  %v1196_v47 = vmul.f32 0.015625, %v1194_v45 }
 0x2c2   : > { %1509 = vrsqrt.f32 %v1197_v46  ;;  %v1198_v48 = vadd.f32 1e-05, %v1196_v47 }
 0x2c4   : > { %1511 = vrsqrt.f32 %v1198_v48 }
 0x2cc   : > { %v1510_v49 = vpop.eup %1509 }
 0x2cd   : > { %v1201_v50 = vmul.f32 %v1510_v49, %v1183_v34 }
 0x2ce   : > { %v1512_v51 = vpop.eup %1511 }
 0x2cf   : > { %v1203_v52 = vmax.f32 %v1201_v50, 0.0  ;;  %v1202_v53 = vmul.f32 %v1512_v51, %v1184_v36 }
 0x2d1   : > { %1205 = vst.msk [vmem:[%s197_s18] sm:$0xff] %vm1174_vm3, %v1203_v52  ;;  %v1204_v54 = vmax.f32 %v1202_v53, 0.0 }
 0x2d3   : > { %1206 = vst.msk [vmem:[%s197_s18 + $0x8] sm:$0xff] %vm1174_vm3, %v1204_v54 }
 0x2d4 PF: > { %s14_s15 = sadd.s32 1, %s1519_s15  }
 0x2d5   : > { %p11_p4 = scmp.ge.s32.totalorder %s14_s15, 4  }
 0x2d7   :  { %13 = sbr.rel (!%p11_p4) target bundleno = 1 (0x1), region = 84 }

// kernel: encoder_forward.5
= control target key start
LH: loop header
LB: loop body
LE: loop exit
PB: predicated region body
PF: predicated region fallthrough
CT: control target
= control target key end

     0   :  { %s6415_s15 = smov 0   ;;  %s7464_s0 = inlined_call_operand.vmem [shape: bf16[2,1,8,512], index: 0, kind: input, shape index: {}]   ;;  %s7465_s1 = inlined_call_operand.vmem [shape: bf16[49,8,8], index: 1, kind: input, shape index: {}]   ;;  %s7466_s2 = inlined_call_operand.vmem [shape: f32[8,1], index: 2, kind: input, shape index: {}]   ;;  %s7467_s3 = inlined_call_operand.vmem [shape: f32[1,352], index: 3, kind: input, shape index: {}]   ;;  %s7468_s4 = inlined_call_operand.vmem [shape: f32[2,8,352], index: 4, kind: output, shape index: {}]  }
   0x1 LB: > { %s5658_s16 = sadd.s32 4294967295, %s6340_s15   ;;  %p5662_p0 = scmp.ge.s32.totalorder %s6340_s15, 1  ;;  %s6340_s15 = sphi %s6415_s15, %s14_s15  }
   0x2   : > { %p162_p1 = scmp.lt.s32.totalorder %s6340_s15, 3 }
   0x4   : > { %p163_p2 = pnand %p5662_p0, %p162_p1 }
   0x5   : > { %p188_p3 = scmp.lt.s32.totalorder (!%p163_p2), %s5658_s16, 1  ;;  %v6342_v0 = vmov (!%p163_p2), 0.0   ;;  %vm6343_vm0 = vmmov (!%p163_p2), 0   ;;  %v6344_v1 = vmov (!%p163_p2), 0   ;;  %s6345_s21 = smov (!%p163_p2), 127   ;;  %vm225_vm1 = vcmask (!%p163_p2), 1043456  }
   0x6   : > { %166 = sbr.rel (%p163_p2) target bundleno = 1067 (0x42b), region = 36  ;;  %5972 = vmatprep.subr.bf16.mxu1 (!%p163_p2), %v6342_v0  ;;  %5974 = vmatprep.mubr.msk.bf16.mxu1 (!%p163_p2), %vm6343_vm0, %v6342_v0  ;;  %s6346_s22 = smov (!%p163_p2), 126   ;;  %v5666_v12 = vld [vmem:[%s7465_s1 + $0x4] sm:$0xf] (!%p163_p2)  ;;  %vm221_vm2 = vcmask (!%p163_p2), 64512   ;;  %vm218_vm3 = vcmask (!%p163_p2), 1039360  }
   0x7   : > { %267 = vmatprep.mubr.bf16.mxu0 (!%p163_p2), %v6344_v1  ;;  %6323 = vset.pattern.permute.xlu0 (!%p163_p2), %v6344_v1  ;;  %s6347_s23 = smov (!%p163_p2), 125   ;;  %s6348_s24 = smov (!%p163_p2), 124   ;;  %vm417_vm4 = vcmask (!%p163_p2), 1031168   ;;  %v201_v22 = vld [vmem:[%s7465_s1] sm:$0xf] (!%p163_p2)  ;;  %vm524_vm5 = vcmask (!%p163_p2), 1022976  }
   0x8   : > { %s6349_s25 = smov (!%p163_p2), 123   ;;  %s6350_s26 = smov (!%p163_p2), 122   ;;  %v5676_v31 = vld [vmem:[%s7465_s1 + $0x8] sm:$0xf] (!%p163_p2)  ;;  %vm631_vm6 = vcmask (!%p163_p2), 1014784   ;;  %vm738_vm7 = vcmask (!%p163_p2), 1006592  }
   0x9   : > { %s6351_s27 = smov (!%p163_p2), 106   ;;  %s6352_s28 = smov (!%p163_p2), 105   ;;  %v5680_v40 = vld [vmem:[%s7465_s1 + $0xc] sm:$0xf] (!%p163_p2)  ;;  %v5684_v49 = vld [vmem:[%s7465_s1 + $0x10] sm:$0xf] (!%p163_p2) }
   0xa   : > { %s6353_s29 = smov (!%p163_p2), 104   ;;  %s6354_s30 = smov (!%p163_p2), 103   ;;  %vm845_vm8 = vcmask (!%p163_p2), 998400   ;;  %v5688_v58 = vld [vmem:[%s7465_s1 + $0x14] sm:$0xf] (!%p163_p2)  ;;  %vm952_vm9 = vcmask (!%p163_p2), 867328  }
   0xb   : > { %s6355_s5 = smov (!%p163_p2), 102   ;;  %s6356_s6 = smov (!%p163_p2), 101   ;;  %vm1059_vm10 = vcmask (!%p163_p2), 859136   ;;  %vm1166_vm11 = vcmask (!%p163_p2), 850944   ;;  %vm1273_vm12 = vcmask (!%p163_p2), 842752   ;;  %vm1380_vm13 = vcmask (!%p163_p2), 834560  }
   0xc   : > { %s6357_s7 = smov (!%p163_p2), 100   ;;  %s6358_s8 = smov (!%p163_p2), 84   ;;  %vm1487_vm14 = vcmask (!%p163_p2), 826368   ;;  %vm1594_vm15 = vcmask (!%p163_p2), 818176  }
   0xd   : > { %s7470_s16 = smov (!%p188_p3, %s5658_s16), 1  ;;  %s6359_s9 = smov 83  }
   0xe   : > { %s5873_s17 = sshll.u32 %s7470_s16, 4  ;;  %s6360_s10 = smov 82  }
   0xf   : > { %s6434_s20 = scalar_lea.vmem %s7464_s0, %s5873_s17  ;;  %s6361_s11 = smov 81  }
  0x10   : > { %v6437_v2 = vld [vmem:[%s6434_s20 + $0x8] ss:$0 sps:$4 sm:$0xff]   ;;  %v1693_v3 = vld [vmem:[%s6434_s20] sm:$0xff]  ;;  %s6362_s12 = smov 80   ;;  %s6363_s17 = smov 79  }
  0x11   : > { %v6440_v4 = vcombine.low %v1693_v3, %v1693_v3  ;;  %216 = vrot.lane.b32.xlu1 %v6437_v2, %s6345_s21  ;;  %v6443_v5 = vcombine.high %v1693_v3, %v1693_v3  ;;  %v1694_v6 = vld [vmem:[%s6434_s20 + $0x8] sm:$0xff]  ;;  %v326_v13 = vsel %vm225_vm1, %v6437_v2, 0  ;;  %s6368_s14 = smov 59   ;;  %s6369_s19 = smov 58  }
  0x12   : > { %v6492_v7 = vcombine.low %v1694_v6, %v1694_v6  ;;  %v6497_v8 = vcombine.high %v1694_v6, %v1694_v6  ;;  %s6388_s18 = smov 119  }
  0x13   : > { %212 = vrot.lane.b32.xlu0 %v6440_v4, %s6345_s21  ;;  %v320_v20 = vsel %vm225_vm1, %v6440_v4, 0 }
  0x15   : > { %411 = vrot.lane.b32.xlu1 %v6440_v4, %s6346_s22 }
  0x17   : > { %214 = vrot.lane.b32.xlu0 %v6443_v5, %s6345_s21  ;;  %s6364_s21 = smov 78  }
  0x19   : > { %415 = vrot.lane.b32.xlu1 %v6437_v2, %s6346_s22 }
  0x1b   : > { %413 = vrot.lane.b32.xlu0 %v6443_v5, %s6346_s22  ;;  %s6389_s22 = smov 118  }
  0x1d   : > { %520 = vrot.lane.b32.xlu1 %v6443_v5, %s6347_s23 }
  0x1f   : > { %518 = vrot.lane.b32.xlu0 %v6440_v4, %s6347_s23 }
  0x21   : > { %625 = vrot.lane.b32.xlu1 %v6440_v4, %s6348_s24 }
  0x23   : > { %522 = vrot.lane.b32.xlu0 %v6437_v2, %s6347_s23  ;;  %s6370_s23 = smov 57  }
  0x25   : > { %629 = vrot.lane.b32.xlu1 %v6437_v2, %s6348_s24 }
  0x27   : > { %627 = vrot.lane.b32.xlu0 %v6443_v5, %s6348_s24 }
  0x29   : > { %734 = vrot.lane.b32.xlu1 %v6443_v5, %s6349_s25 }
  0x2b   : > { %732 = vrot.lane.b32.xlu0 %v6440_v4, %s6349_s25 }
  0x2d   : > { %839 = vrot.lane.b32.xlu1 %v6440_v4, %s6350_s26 }
  0x2f   : > { %736 = vrot.lane.b32.xlu0 %v6437_v2, %s6349_s25 }
  0x31   : > { %843 = vrot.lane.b32.xlu1 %v6437_v2, %s6350_s26 }
  0x33   : > { %841 = vrot.lane.b32.xlu0 %v6443_v5, %s6350_s26 }
  0x35   : > { %948 = vrot.lane.b32.xlu1 %v6443_v5, %s6351_s27 }
  0x37   : > { %946 = vrot.lane.b32.xlu0 %v6440_v4, %s6351_s27 }
  0x39   : > { %1053 = vrot.lane.b32.xlu1 %v6440_v4, %s6352_s28 }
  0x3b   : > { %950 = vrot.lane.b32.xlu0 %v6437_v2, %s6351_s27  ;;  %s6383_s27 = smov 14  }
  0x3d   : > { %1057 = vrot.lane.b32.xlu1 %v6437_v2, %s6352_s28 }
  0x3f   : > { %1055 = vrot.lane.b32.xlu0 %v6443_v5, %s6352_s28 }
  0x41   : > { %1162 = vrot.lane.b32.xlu1 %v6443_v5, %s6353_s29 }
  0x43   : > { %1160 = vrot.lane.b32.xlu0 %v6440_v4, %s6353_s29 }
  0x45   : > { %1267 = vrot.lane.b32.xlu1 %v6440_v4, %s6354_s30 }
  0x47   : > { %1164 = vrot.lane.b32.xlu0 %v6437_v2, %s6353_s29  ;;  %s6365_s29 = smov 62  }
  0x49   : > { %1271 = vrot.lane.b32.xlu1 %v6437_v2, %s6354_s30 }
  0x4b   : > { %1269 = vrot.lane.b32.xlu0 %v6443_v5, %s6354_s30  ;;  %s6384_s30 = smov 13  }
  0x4d   : > { %1376 = vrot.lane.b32.xlu1 %v6443_v5, %s6355_s5 }
  0x4f   : > { %1374 = vrot.lane.b32.xlu0 %v6440_v4, %s6355_s5 }
  0x51   : > { %1481 = vrot.lane.b32.xlu1 %v6440_v4, %s6356_s6 }
  0x53   : > { %1378 = vrot.lane.b32.xlu0 %v6437_v2, %s6355_s5  ;;  %s6371_s5 = smov 56  }
  0x55   : > { %1485 = vrot.lane.b32.xlu1 %v6437_v2, %s6356_s6 }
  0x57   : > { %1483 = vrot.lane.b32.xlu0 %v6443_v5, %s6356_s6  ;;  %s6366_s6 = smov 61  }
  0x59   : > { %1590 = vrot.lane.b32.xlu1 %v6443_v5, %s6357_s7 }
  0x5b   : > { %1588 = vrot.lane.b32.xlu0 %v6440_v4, %s6357_s7 }
  0x5d   : > { %1707 = vrot.lane.b32.xlu1 %v6440_v4, %s6358_s8 }
  0x5f   : > { %1592 = vrot.lane.b32.xlu0 %v6437_v2, %s6357_s7  ;;  %s6385_s7 = smov 12  }
  0x61   : > { %1711 = vrot.lane.b32.xlu1 %v6492_v7, %s6358_s8 }
  0x63   : > { %1709 = vrot.lane.b32.xlu0 %v6443_v5, %s6358_s8 }
  0x65   : > { %1817 = vrot.lane.b32.xlu1 %v6440_v4, %s6359_s9 }
  0x67   : > { %1713 = vrot.lane.b32.xlu0 %v6497_v8, %s6358_s8  ;;  %s6372_s8 = smov 40  }
  0x69   : > { %1821 = vrot.lane.b32.xlu1 %v6492_v7, %s6359_s9 }
  0x6b   : > { %1819 = vrot.lane.b32.xlu0 %v6443_v5, %s6359_s9 }
  0x6d   : > { %1927 = vrot.lane.b32.xlu1 %v6440_v4, %s6360_s10 }
  0x6f   : > { %1823 = vrot.lane.b32.xlu0 %v6497_v8, %s6359_s9  ;;  %s6367_s9 = smov 60  }
  0x71   : > { %1931 = vrot.lane.b32.xlu1 %v6492_v7, %s6360_s10 }
  0x73   : > { %1929 = vrot.lane.b32.xlu0 %v6443_v5, %s6360_s10 }
  0x75   : > { %2037 = vrot.lane.b32.xlu1 %v6440_v4, %s6361_s11 }
  0x77   : > { %1933 = vrot.lane.b32.xlu0 %v6497_v8, %s6360_s10 }
  0x79   : > { %2041 = vrot.lane.b32.xlu1 %v6492_v7, %s6361_s11 }
  0x7b   : > { %2039 = vrot.lane.b32.xlu0 %v6443_v5, %s6361_s11 }
  0x7d   : > { %2147 = vrot.lane.b32.xlu1 %v6440_v4, %s6362_s12 }
  0x7f   : > { %2043 = vrot.lane.b32.xlu0 %v6497_v8, %s6361_s11  ;;  %s6373_s11 = smov 39  }
  0x81   : > { %2151 = vrot.lane.b32.xlu1 %v6492_v7, %s6362_s12 }
  0x83   : > { %2149 = vrot.lane.b32.xlu0 %v6443_v5, %s6362_s12  ;;  %v217_v9 = vpop.permute.xlu1 %216 }
  0x84   : > { %v233_v11 = vsel %vm225_vm1, %v217_v9, 0 }
  0x85   : > { %v213_v10 = vpop.permute.xlu0 %212  ;;  %5973 = vmatpush3.bf16.msra.mxu1 %v233_v11  ;;  %2257 = vrot.lane.b32.xlu1 %v6440_v4, %s6363_s17 }
  0x86   : > { %5978 = vmatprep.subr.bf16.mxu1 %v6342_v0 }
  0x87   : > { %2153 = vrot.lane.b32.xlu0 %v6497_v8, %s6362_s12  ;;  %v412_v14 = vpop.permute.xlu1 %411  ;;  %s6380_s12 = smov 17  }
  0x88   : > { %5975 = vmatmul.mubr.msk.bf16.vlgmr.msra.gmra.mrb[0].mxu1 %vm221_vm2, %v5666_v12 }
  0x89   : > { %v215_v15 = vpop.permute.xlu0 %214  ;;  %5979 = vmatpush3.bf16.msra.mxu1 %v326_v13  ;;  %5980 = vmatprep.mubr.msk.bf16.mxu1 %vm6343_vm0, %v6342_v0 }
  0x8a   : > { %v220_v16 = vsel %vm218_vm3, %v215_v15, %v217_v9  ;;  %v219_v17 = vsel %vm218_vm3, %v213_v10, %v215_v15  ;;  %5984 = vmatprep.subr.bf16.mxu1 %v6342_v0  ;;  %2261 = vrot.lane.b32.xlu1 %v6492_v7, %s6363_s17  ;;  %v5692_v9 = vld [vmem:[%s7465_s1 + $0x18] sm:$0xf]  ;;  %vm1715_vm3 = vcmask 687104  }
  0x8b   : > { %5670 = vmatprep.subr.msk.bf16.mxu0 %vm225_vm1, %v220_v16  ;;  %v227_v18 = vsel %vm225_vm1, %v219_v17, 0  ;;  %v416_v19 = vpop.permute.xlu1 %415  ;;  %2259 = vrot.lane.b32.xlu0 %v6443_v5, %s6363_s17 }
  0x8c   : > { %236 = vmatpush1.bf16.msra.mxu0 %v227_v18  ;;  %v430_v24 = vsel %vm225_vm1, %v416_v19, 0  ;;  %v5696_v18 = vld [vmem:[%s7465_s1 + $0x1c] sm:$0xf] }
  0x8d   : > { %5673 = vmatprep.subr.msk.bf16.mxu0 %vm225_vm1, %v6443_v5  ;;  %v414_v21 = vpop.permute.xlu0 %413 }
  0x8e   : > { %v419_v23 = vsel %vm417_vm4, %v414_v21, %v416_v19  ;;  %v418_v27 = vsel %vm417_vm4, %v412_v14, %v414_v21  ;;  %2367 = vrot.lane.b32.xlu1 %v6440_v4, %s6364_s21  ;;  %vm1825_vm4 = vcmask 678912  }
  0x8f   : > { %5671 = vmatmul.mubr.msk.bf16.vlgmr.msra.gmra.mrb[0].mxu0 %vm221_vm2, %v5666_v12  ;;  %v521_v25 = vpop.permute.xlu1 %520  ;;  %2263 = vrot.lane.b32.xlu0 %v6497_v8, %s6363_s17  ;;  %v424_v29 = vsel %vm225_vm1, %v418_v27, 0  ;;  %v5700_v27 = vld [vmem:[%s7465_s1 + $0x20] sm:$0xf]  ;;  %s6381_s17 = smov 16  }
  0x90   : > { %329 = vmatpush1.bf16.msra.mxu0 %v320_v20  ;;  %360 = vmatprep.mubr.bf16.mxu0 %v6344_v1 }
  0x91   : > { %5981 = vmatmul.mubr.msk.bf16.vlgmr.msra.gmra.mrb[4].mxu1 %vm221_vm2, %v201_v22  ;;  %5677 = vmatprep.subr.msk.bf16.mxu0 %vm225_vm1, %v419_v23  ;;  %v519_v26 = vpop.permute.xlu0 %518 }
  0x92   : > { %5985 = vmatpush3.bf16.msra.mxu1 %v430_v24  ;;  %5986 = vmatprep.mubr.msk.bf16.mxu1 %vm6343_vm0, %v6342_v0  ;;  %v525_v36 = vsel %vm524_vm5, %v519_v26, %v521_v25 }
  0x93   : > { %5990 = vmatprep.subr.bf16.mxu1 %v6342_v0  ;;  %v626_v28 = vpop.permute.xlu1 %625  ;;  %2369 = vrot.lane.b32.xlu0 %v6443_v5, %s6364_s21  ;;  %v531_v38 = vsel %vm225_vm1, %v525_v36, 0  ;;  %v5704_v36 = vld [vmem:[%s7465_s1 + $0x24] sm:$0xf] }
  0x94   : > { %2371 = vrot.lane.b32.xlu1 %v6492_v7, %s6364_s21 }
  0x95   : > { %v523_v30 = vpop.permute.xlu0 %522 }
  0x96   : > { %v526_v32 = vsel %vm524_vm5, %v521_v25, %v523_v30  ;;  %v537_v33 = vsel %vm225_vm1, %v523_v30, 0  ;;  %vm1935_vm5 = vcmask 670720  }
  0x97   : > { %5674 = vmatmul.mubr.msk.bf16.vlgmr.msra.gmra.mrb[4].mxu0 %vm221_vm2, %v201_v22  ;;  %v630_v34 = vpop.permute.xlu1 %629  ;;  %2373 = vrot.lane.b32.xlu0 %v6497_v8, %s6364_s21  ;;  %s6382_s21 = smov 15  }
  0x98   : > { %433 = vmatpush1.bf16.msra.mxu0 %v424_v29  ;;  %464 = vmatprep.mubr.bf16.mxu0 %v6344_v1  ;;  %v644_v42 = vsel %vm225_vm1, %v630_v34, 0 }
  0x99   : > { %5987 = vmatmul.mubr.msk.bf16.vlgmr.msra.gmra.mrb[8].mxu1 %vm221_vm2, %v5676_v31  ;;  %5681 = vmatprep.subr.msk.bf16.mxu0 %vm225_vm1, %v526_v32  ;;  %v628_v35 = vpop.permute.xlu0 %627 }
  0x9a   : > { %5991 = vmatpush3.bf16.msra.mxu1 %v537_v33  ;;  %5992 = vmatprep.mubr.msk.bf16.mxu1 %vm6343_vm0, %v6342_v0  ;;  %v633_v41 = vsel %vm631_vm6, %v628_v35, %v630_v34  ;;  %v632_v45 = vsel %vm631_vm6, %v626_v28, %v628_v35 }
  0x9b   : > { %5996 = vmatprep.subr.bf16.mxu1 %v6342_v0  ;;  %v735_v37 = vpop.permute.xlu1 %734  ;;  %2477 = vrot.lane.b32.xlu1 %v6440_v4, %s6365_s29  ;;  %v638_v47 = vsel %vm225_vm1, %v632_v45, 0  ;;  %v5708_v45 = vld [vmem:[%s7465_s1 + $0x28] sm:$0xf] }
  0x9c   : > { %2479 = vrot.lane.b32.xlu0 %v6443_v5, %s6365_s29 }
  0x9d   : > { %v733_v39 = vpop.permute.xlu0 %732 }
  0x9e   : > { %v739_v54 = vsel %vm738_vm7, %v733_v39, %v735_v37 }
  0x9f   : > { %5678 = vmatmul.mubr.msk.bf16.vlgmr.msra.gmra.mrb[8].mxu0 %vm221_vm2, %v5676_v31  ;;  %v840_v43 = vpop.permute.xlu1 %839  ;;  %2481 = vrot.lane.b32.xlu1 %v6492_v7, %s6365_s29  ;;  %v745_v56 = vsel %vm225_vm1, %v739_v54, 0  ;;  %v5712_v54 = vld [vmem:[%s7465_s1 + $0x2c] sm:$0xf] }
  0xa0   : > { %540 = vmatpush1.bf16.msra.mxu0 %v531_v38  ;;  %571 = vmatprep.mubr.bf16.mxu0 %v6344_v1 }
  0xa1   : > { %5993 = vmatmul.mubr.msk.bf16.vlgmr.msra.gmra.mrb[12].mxu1 %vm221_vm2, %v5680_v40  ;;  %5685 = vmatprep.subr.msk.bf16.mxu0 %vm225_vm1, %v633_v41  ;;  %v737_v44 = vpop.permute.xlu0 %736 }
  0xa2   : > { %5997 = vmatpush3.bf16.msra.mxu1 %v644_v42  ;;  %5998 = vmatprep.mubr.msk.bf16.mxu1 %vm6343_vm0, %v6342_v0  ;;  %v740_v50 = vsel %vm738_vm7, %v735_v37, %v737_v44  ;;  %v751_v51 = vsel %vm225_vm1, %v737_v44, 0 }
  0xa3   : > { %6002 = vmatprep.subr.bf16.mxu1 %v6342_v0  ;;  %v844_v46 = vpop.permute.xlu1 %843  ;;  %2483 = vrot.lane.b32.xlu0 %v6497_v8, %s6365_s29  ;;  %s6377_s29 = smov 35  }
  0xa4   : > { %2587 = vrot.lane.b32.xlu1 %v6440_v4, %s6366_s6  ;;  %v858_v60 = vsel %vm225_vm1, %v844_v46, 0 }
  0xa5   : > { %v842_v48 = vpop.permute.xlu0 %841 }
  0xa6   : > { %v847_v59 = vsel %vm845_vm8, %v842_v48, %v844_v46  ;;  %v846_v63 = vsel %vm845_vm8, %v840_v43, %v842_v48 }
  0xa7   : > { %5682 = vmatmul.mubr.msk.bf16.vlgmr.msra.gmra.mrb[12].mxu0 %vm221_vm2, %v5680_v40  ;;  %v949_v52 = vpop.permute.xlu1 %948  ;;  %2589 = vrot.lane.b32.xlu0 %v6443_v5, %s6366_s6  ;;  %v852_v3 = vsel %vm225_vm1, %v846_v63, 0  ;;  %v5716_v63 = vld [vmem:[%s7465_s1 + $0x30] sm:$0xf] }
  0xa8   : > { %647 = vmatpush1.bf16.msra.mxu0 %v638_v47  ;;  %678 = vmatprep.mubr.bf16.mxu0 %v6344_v1 }
  0xa9   : > { %5999 = vmatmul.mubr.msk.bf16.vlgmr.msra.gmra.mrb[16].mxu1 %vm221_vm2, %v5684_v49  ;;  %5689 = vmatprep.subr.msk.bf16.mxu0 %vm225_vm1, %v740_v50  ;;  %v947_v53 = vpop.permute.xlu0 %946 }
  0xaa   : > { %6003 = vmatpush3.bf16.msra.mxu1 %v751_v51  ;;  %6004 = vmatprep.mubr.msk.bf16.mxu1 %vm6343_vm0, %v6342_v0  ;;  %v953_v14 = vsel %vm952_vm9, %v947_v53, %v949_v52 }
  0xab   : > { %6008 = vmatprep.subr.bf16.mxu1 %v6342_v0  ;;  %v1054_v55 = vpop.permute.xlu1 %1053  ;;  %2591 = vrot.lane.b32.xlu1 %v6492_v7, %s6366_s6  ;;  %v959_v16 = vsel %vm225_vm1, %v953_v14, 0 }
  0xac   : > { %2593 = vrot.lane.b32.xlu0 %v6497_v8, %s6366_s6  ;;  %s6378_s6 = smov 34  }
  0xad   : > { %v951_v57 = vpop.permute.xlu0 %950 }
  0xae   : > { %v954_v10 = vsel %vm952_vm9, %v949_v52, %v951_v57  ;;  %v965_v11 = vsel %vm225_vm1, %v951_v57, 0  ;;  %vm2045_vm9 = vcmask 662528  }
  0xaf   : > { %5686 = vmatmul.mubr.msk.bf16.vlgmr.msra.gmra.mrb[16].mxu0 %vm221_vm2, %v5684_v49  ;;  %v1058_v61 = vpop.permute.xlu1 %1057  ;;  %2697 = vrot.lane.b32.xlu1 %v6440_v4, %s6367_s9 }
  0xb0   : > { %754 = vmatpush1.bf16.msra.mxu0 %v745_v56  ;;  %785 = vmatprep.mubr.bf16.mxu0 %v6344_v1  ;;  %v1072_v20 = vsel %vm225_vm1, %v1058_v61, 0 }
  0xb1   : > { %6005 = vmatmul.mubr.msk.bf16.vlgmr.msra.gmra.mrb[20].mxu1 %vm221_vm2, %v5688_v58  ;;  %5693 = vmatprep.subr.msk.bf16.mxu0 %vm225_vm1, %v847_v59  ;;  %v1056_v62 = vpop.permute.xlu0 %1055 }
  0xb2   : > { %6009 = vmatpush3.bf16.msra.mxu1 %v858_v60  ;;  %6010 = vmatprep.mubr.msk.bf16.mxu1 %vm6343_vm0, %v6342_v0  ;;  %v1061_v19 = vsel %vm1059_vm10, %v1056_v62, %v1058_v61  ;;  %v1060_v23 = vsel %vm1059_vm10, %v1054_v55, %v1056_v62  ;;  %vm2155_vm10 = vcmask 654336  }
  0xb3   : > { %6014 = vmatprep.subr.bf16.mxu1 %v6342_v0  ;;  %v1163_v2 = vpop.permute.xlu1 %1162  ;;  %2699 = vrot.lane.b32.xlu0 %v6443_v5, %s6367_s9  ;;  %v1066_v25 = vsel %vm225_vm1, %v1060_v23, 0 }
  0xb4   : > { %2701 = vrot.lane.b32.xlu1 %v6492_v7, %s6367_s9 }
  0xb5   : > { %v1161_v6 = vpop.permute.xlu0 %1160 }
  0xb6   : > { %v1167_v32 = vsel %vm1166_vm11, %v1161_v6, %v1163_v2 }
  0xb7   : > { %5690 = vmatmul.mubr.msk.bf16.vlgmr.msra.gmra.mrb[20].mxu0 %vm221_vm2, %v5688_v58  ;;  %v6633_v12 = vpop.permute.xlu1 %1267  ;;  %2703 = vrot.lane.b32.xlu0 %v6497_v8, %s6367_s9  ;;  %v1173_v34 = vsel %vm225_vm1, %v1167_v32, 0  ;;  %s6379_s9 = smov 18  }
  0xb8   : > { %861 = vmatpush1.bf16.msra.mxu0 %v852_v3  ;;  %892 = vmatprep.mubr.bf16.mxu0 %v6344_v1 }
  0xb9   : > { %6011 = vmatmul.mubr.msk.bf16.vlgmr.msra.gmra.mrb[24].mxu1 %vm221_vm2, %v5692_v9  ;;  %5697 = vmatprep.subr.msk.bf16.mxu0 %vm225_vm1, %v954_v10  ;;  %v1165_v13 = vpop.permute.xlu0 %1164 }
  0xba   : > { %6015 = vmatpush3.bf16.msra.mxu1 %v965_v11  ;;  %6016 = vmatprep.mubr.msk.bf16.mxu1 %vm6343_vm0, %v6342_v0  ;;  %v1168_v28 = vsel %vm1166_vm11, %v1163_v2, %v1165_v13  ;;  %v1179_v29 = vsel %vm225_vm1, %v1165_v13, 0  ;;  %vm2265_vm11 = vcmask 646144  }
  0xbb   : > { %6020 = vmatprep.subr.bf16.mxu1 %v6342_v0  ;;  %v1272_v15 = vpop.permute.xlu1 %1271  ;;  %2807 = vrot.lane.b32.xlu1 %v6440_v4, %s6368_s14 }
  0xbc   : > { %2809 = vrot.lane.b32.xlu0 %v6443_v5, %s6368_s14  ;;  %v1286_v38 = vsel %vm225_vm1, %v1272_v15, 0 }
  0xbd   : > { %v1270_v17 = vpop.permute.xlu0 %1269 }
  0xbe   : > { %v1275_v37 = vsel %vm1273_vm12, %v1270_v17, %v1272_v15  ;;  %v1274_v41 = vsel %vm1273_vm12, %v6633_v12, %v1270_v17  ;;  %v5720_v15 = vld [vmem:[%s7465_s1 + $0x34] sm:$0xf]  ;;  %vm2375_vm12 = vcmask 637952  }
  0xbf   : > { %5694 = vmatmul.mubr.msk.bf16.vlgmr.msra.gmra.mrb[24].mxu0 %vm221_vm2, %v5692_v9  ;;  %v6652_v21 = vpop.permute.xlu1 %1376  ;;  %2811 = vrot.lane.b32.xlu1 %v6492_v7, %s6368_s14  ;;  %v1280_v43 = vsel %vm225_vm1, %v1274_v41, 0 }
  0xc0   : > { %968 = vmatpush1.bf16.msra.mxu0 %v959_v16  ;;  %999 = vmatprep.mubr.bf16.mxu0 %v6344_v1 }
  0xc1   : > { %6017 = vmatmul.mubr.msk.bf16.vlgmr.msra.gmra.mrb[28].mxu1 %vm221_vm2, %v5696_v18  ;;  %5701 = vmatprep.subr.msk.bf16.mxu0 %vm225_vm1, %v1061_v19  ;;  %v6656_v22 = vpop.permute.xlu0 %1374 }
  0xc2   : > { %6021 = vmatpush3.bf16.msra.mxu1 %v1072_v20  ;;  %6022 = vmatprep.mubr.msk.bf16.mxu1 %vm6343_vm0, %v6342_v0  ;;  %v1381_v50 = vsel %vm1380_vm13, %v6656_v22, %v6652_v21 }
  0xc3   : > { %6026 = vmatprep.subr.bf16.mxu1 %v6342_v0  ;;  %v6664_v24 = vpop.permute.xlu1 %1481  ;;  %2813 = vrot.lane.b32.xlu0 %v6497_v8, %s6368_s14  ;;  %v1387_v52 = vsel %vm225_vm1, %v1381_v50, 0  ;;  %s6374_s14 = smov 38  }
  0xc4   : > { %2917 = vrot.lane.b32.xlu1 %v6440_v4, %s6369_s19 }
  0xc5   : > { %v1379_v26 = vpop.permute.xlu0 %1378 }
  0xc6   : > { %v1382_v46 = vsel %vm1380_vm13, %v6652_v21, %v1379_v26  ;;  %v1393_v47 = vsel %vm225_vm1, %v1379_v26, 0  ;;  %vm2485_vm13 = vcmask 506880  }
  0xc7   : > { %5698 = vmatmul.mubr.msk.bf16.vlgmr.msra.gmra.mrb[28].mxu0 %vm221_vm2, %v5696_v18  ;;  %v6675_v30 = vpop.permute.xlu1 %1485  ;;  %2919 = vrot.lane.b32.xlu0 %v6443_v5, %s6369_s19 }
  0xc8   : > { %1075 = vmatpush1.bf16.msra.mxu0 %v1066_v25  ;;  %1106 = vmatprep.mubr.bf16.mxu0 %v6344_v1  ;;  %v1500_v56 = vsel %vm225_vm1, %v6675_v30, 0  ;;  %v5724_v25 = vld [vmem:[%s7465_s1 + $0x38] sm:$0xf] }
  0xc9   : > { %6023 = vmatmul.mubr.msk.bf16.vlgmr.msra.gmra.mrb[32].mxu1 %vm221_vm2, %v5700_v27  ;;  %5705 = vmatprep.subr.msk.bf16.mxu0 %vm225_vm1, %v1168_v28  ;;  %v6679_v31 = vpop.permute.xlu0 %1483 }
  0xca   : > { %6027 = vmatpush3.bf16.msra.mxu1 %v1179_v29  ;;  %6028 = vmatprep.mubr.msk.bf16.mxu1 %vm6343_vm0, %v6342_v0  ;;  %v1489_v55 = vsel %vm1487_vm14, %v6679_v31, %v6675_v30  ;;  %v1488_v59 = vsel %vm1487_vm14, %v6664_v24, %v6679_v31  ;;  %vm2595_vm14 = vcmask 498688  }
  0xcb   : > { %6032 = vmatprep.subr.bf16.mxu1 %v6342_v0  ;;  %v6687_v33 = vpop.permute.xlu1 %1590  ;;  %2921 = vrot.lane.b32.xlu1 %v6492_v7, %s6369_s19  ;;  %v1494_v61 = vsel %vm225_vm1, %v1488_v59, 0 }
  0xcc   : > { %2923 = vrot.lane.b32.xlu0 %v6497_v8, %s6369_s19  ;;  %s6375_s19 = smov 37  }
  0xcd   : > { %v6690_v35 = vpop.permute.xlu0 %1588 }
  0xce   : > { %v1595_v10 = vsel %vm1594_vm15, %v6690_v35, %v6687_v33 }
  0xcf   : > { %5702 = vmatmul.mubr.msk.bf16.vlgmr.msra.gmra.mrb[32].mxu0 %vm221_vm2, %v5700_v27  ;;  %v6700_v39 = vpop.permute.xlu1 %1707  ;;  %3027 = vrot.lane.b32.xlu1 %v6440_v4, %s6370_s23  ;;  %v1601_v13 = vsel %vm225_vm1, %v1595_v10, 0 }
  0xd0   : > { %1182 = vmatpush1.bf16.msra.mxu0 %v1173_v34  ;;  %1213 = vmatprep.mubr.bf16.mxu0 %v6344_v1 }
  0xd1   : > { %6029 = vmatmul.mubr.msk.bf16.vlgmr.msra.gmra.mrb[36].mxu1 %vm221_vm2, %v5704_v36  ;;  %5709 = vmatprep.subr.msk.bf16.mxu0 %vm225_vm1, %v1275_v37  ;;  %v1593_v40 = vpop.permute.xlu0 %1592 }
  0xd2   : > { %6033 = vmatpush3.bf16.msra.mxu1 %v1286_v38  ;;  %6034 = vmatprep.mubr.msk.bf16.mxu1 %vm6343_vm0, %v6342_v0  ;;  %v1596_v2 = vsel %vm1594_vm15, %v6687_v33, %v1593_v40  ;;  %v1607_v3 = vsel %vm225_vm1, %v1593_v40, 0  ;;  %v5732_v33 = vld [vmem:[%s7465_s1 + $0x3c] sm:$0xf]  ;;  %vm2705_vm15 = vcmask 490496  }
  0xd3   : > { %6038 = vmatprep.subr.bf16.mxu1 %v6342_v0  ;;  %v6711_v42 = vpop.permute.xlu1 %1711  ;;  %3029 = vrot.lane.b32.xlu0 %v6443_v5, %s6370_s23 }
  0xd4   : > { %3031 = vrot.lane.b32.xlu1 %v6492_v7, %s6370_s23 }
  0xd5   : > { %v6714_v44 = vpop.permute.xlu0 %1709 }
  0xd6   : > { %v1717_v16 = vsel %vm1715_vm3, %v6714_v44, %v6711_v42  ;;  %v1716_v20 = vsel %vm1715_vm3, %v6700_v39, %v6714_v44 }
  0xd7   : > { %5706 = vmatmul.mubr.msk.bf16.vlgmr.msra.gmra.mrb[36].mxu0 %vm221_vm2, %v5704_v36  ;;  %v6725_v48 = vpop.permute.xlu1 %1817  ;;  %3033 = vrot.lane.b32.xlu0 %v6497_v8, %s6370_s23  ;;  %v1723_v22 = vsel %vm225_vm1, %v1716_v20, 0  ;;  %s6376_s23 = smov 36   ;;  %v5752_v20 = vld [vmem:[%s7465_s1 + $0x50] sm:$0xf] }
  0xd8   : > { %1289 = vmatpush1.bf16.msra.mxu0 %v1280_v43  ;;  %1320 = vmatprep.mubr.bf16.mxu0 %v6344_v1 }
  0xd9   : > { %6035 = vmatmul.mubr.msk.bf16.vlgmr.msra.gmra.mrb[40].mxu1 %vm221_vm2, %v5708_v45  ;;  %5713 = vmatprep.subr.msk.bf16.mxu0 %vm225_vm1, %v1382_v46  ;;  %v1714_v49 = vpop.permute.xlu0 %1713 }
  0xda   : > { %6039 = vmatpush3.bf16.msra.mxu1 %v1393_v47  ;;  %6040 = vmatprep.mubr.msk.bf16.mxu1 %vm6343_vm0, %v6342_v0  ;;  %v1718_v11 = vsel %vm1715_vm3, %v6711_v42, %v1714_v49  ;;  %v5736_v42 = vld [vmem:[%s7465_s1 + $0x40] sm:$0xf]  ;;  %vm2815_vm3 = vcmask 482304  }
  0xdb   : > { %6044 = vmatprep.subr.bf16.mxu1 %v6342_v0  ;;  %v6737_v51 = vpop.permute.xlu1 %1821  ;;  %3137 = vrot.lane.b32.xlu1 %v6440_v4, %s6371_s5  ;;  %v1729_v17 = vsel %vm225_vm1, %v1718_v11, 0  ;;  %v5748_v11 = vld [vmem:[%s7465_s1 + $0x4c] sm:$0xf] }
  0xdc   : > { %3139 = vrot.lane.b32.xlu0 %v6443_v5, %s6371_s5 }
  0xdd   : > { %v6740_v53 = vpop.permute.xlu0 %1819 }
  0xde   : > { %v1827_v26 = vsel %vm1825_vm4, %v6740_v53, %v6737_v51  ;;  %v1826_v29 = vsel %vm1825_vm4, %v6725_v48, %v6740_v53 }
  0xdf   : > { %5710 = vmatmul.mubr.msk.bf16.vlgmr.msra.gmra.mrb[40].mxu0 %vm221_vm2, %v5708_v45  ;;  %v6754_v57 = vpop.permute.xlu1 %1927  ;;  %3141 = vrot.lane.b32.xlu1 %v6492_v7, %s6371_s5  ;;  %v1833_v32 = vsel %vm225_vm1, %v1826_v29, 0  ;;  %v5756_v29 = vld [vmem:[%s7465_s1 + $0x54] sm:$0xf] }
  0xe0   : > { %1396 = vmatpush1.bf16.msra.mxu0 %v1387_v52  ;;  %1427 = vmatprep.mubr.bf16.mxu0 %v6344_v1 }
  0xe1   : > { %6041 = vmatmul.mubr.msk.bf16.vlgmr.msra.gmra.mrb[44].mxu1 %vm221_vm2, %v5712_v54  ;;  %5717 = vmatprep.subr.msk.bf16.mxu0 %vm225_vm1, %v1489_v55  ;;  %v1824_v58 = vpop.permute.xlu0 %1823 }
  0xe2   : > { %6045 = vmatpush3.bf16.msra.mxu1 %v1500_v56  ;;  %6046 = vmatprep.mubr.msk.bf16.mxu1 %vm6343_vm0, %v6342_v0  ;;  %v1828_v21 = vsel %vm1825_vm4, %v6737_v51, %v1824_v58  ;;  %v5740_v51 = vld [vmem:[%s7465_s1 + $0x44] sm:$0xf]  ;;  %vm2925_vm4 = vcmask 474112  }
  0xe3   : > { %3143 = vrot.lane.b32.xlu0 %v6497_v8, %s6371_s5  ;;  %6050 = vmatprep.subr.bf16.mxu1 %v6342_v0  ;;  %v6766_v60 = vpop.permute.xlu1 %1931  ;;  %v1839_v27 = vsel %vm225_vm1, %v1828_v21, 0 }
  0xe4   : > { %3247 = vrot.lane.b32.xlu1 %v6440_v4, %s6372_s8 }
  0xe5   : > { %v6769_v62 = vpop.permute.xlu0 %1929 }
  0xe6   : > { %v1937_v34 = vsel %vm1935_vm5, %v6769_v62, %v6766_v60  ;;  %v1936_v38 = vsel %vm1935_vm5, %v6754_v57, %v6769_v62 }
  0xe7   : > { %5714 = vmatmul.mubr.msk.bf16.vlgmr.msra.gmra.mrb[44].mxu0 %vm221_vm2, %v5712_v54  ;;  %3249 = vrot.lane.b32.xlu0 %v6443_v5, %s6372_s8  ;;  %v6781_v6 = vpop.permute.xlu1 %2037  ;;  %v1943_v40 = vsel %vm225_vm1, %v1936_v38, 0  ;;  %v5760_v38 = vld [vmem:[%s7465_s1 + $0x58] sm:$0xf] }
  0xe8   : > { %1503 = vmatpush1.bf16.msra.mxu0 %v1494_v61  ;;  %1534 = vmatprep.mubr.bf16.mxu0 %v6344_v1 }
  0xe9   : > { %6047 = vmatmul.mubr.msk.bf16.vlgmr.msra.gmra.mrb[48].mxu1 %vm221_vm2, %v5716_v63  ;;  %5721 = vmatprep.subr.msk.bf16.mxu0 %vm225_vm1, %v1596_v2  ;;  %v1934_v9 = vpop.permute.xlu0 %1933 }
  0xea   : > { %6051 = vmatpush3.bf16.msra.mxu1 %v1607_v3  ;;  %3251 = vrot.lane.b32.xlu1 %v6492_v7, %s6372_s8  ;;  %v1938_v31 = vsel %vm1935_vm5, %v6766_v60, %v1934_v9  ;;  %v5744_v60 = vld [vmem:[%s7465_s1 + $0x48] sm:$0xf]  ;;  %vm3035_vm5 = vcmask 465920  }
  0xeb   : > { %6052 = vmatprep.mubr.msk.bf16.mxu1 %vm6343_vm0, %v6342_v0  ;;  %3253 = vrot.lane.b32.xlu0 %v6497_v8, %s6372_s8  ;;  %v6795_v12 = vpop.permute.xlu1 %2041  ;;  %v1949_v35 = vsel %vm225_vm1, %v1938_v31, 0 }
  0xec   : > { %6056 = vmatprep.subr.bf16.mxu1 %v6342_v0 }
  0xed   : > { %v6798_v14 = vpop.permute.xlu0 %2039 }
  0xee   : > { %3357 = vrot.lane.b32.xlu1 %v6440_v4, %s6373_s11  ;;  %v2047_v43 = vsel %vm2045_vm9, %v6798_v14, %v6795_v12  ;;  %v2046_v47 = vsel %vm2045_vm9, %v6781_v6, %v6798_v14 }
  0xef   : > { %5718 = vmatmul.mubr.msk.bf16.vlgmr.msra.gmra.mrb[48].mxu0 %vm221_vm2, %v5716_v63  ;;  %3359 = vrot.lane.b32.xlu0 %v6443_v5, %s6373_s11  ;;  %v6811_v18 = vpop.permute.xlu1 %2147  ;;  %v2053_v49 = vsel %vm225_vm1, %v2046_v47, 0  ;;  %v5764_v47 = vld [vmem:[%s7465_s1 + $0x5c] sm:$0xf] }
  0xf0   : > { %1610 = vmatpush1.bf16.msra.mxu0 %v1601_v13  ;;  %1641 = vmatprep.mubr.bf16.mxu0 %v6344_v1 }
  0xf1   : > { %6053 = vmatmul.mubr.msk.bf16.vlgmr.msra.gmra.mrb[52].mxu1 %vm221_vm2, %v5720_v15  ;;  %5729 = vmatprep.subr.msk.bf16.mxu0 %vm225_vm1, %v1717_v16  ;;  %v2044_v19 = vpop.permute.xlu0 %2043 }
  0xf2   : > { %6057 = vmatpush3.bf16.msra.mxu1 %v1729_v17  ;;  %3361 = vrot.lane.b32.xlu1 %v6492_v7, %s6373_s11  ;;  %v2048_v39 = vsel %vm2045_vm9, %v6795_v12, %v2044_v19  ;;  %vm3145_vm9 = vcmask 457728  }
  0xf3   : > { %6058 = vmatprep.mubr.msk.bf16.mxu1 %vm6343_vm0, %v6342_v0  ;;  %3363 = vrot.lane.b32.xlu0 %v6497_v8, %s6373_s11  ;;  %v6828_v24 = vpop.permute.xlu1 %2151  ;;  %v2059_v44 = vsel %vm225_vm1, %v2048_v39, 0 }
  0xf4   : > { %6062 = vmatprep.subr.bf16.mxu1 %v6342_v0 }
  0xf5   : > { %v6826_v23 = vpop.permute.xlu0 %2149 }
  0xf6   : > { %3467 = vrot.lane.b32.xlu1 %v6440_v4, %s6374_s14  ;;  %v2157_v52 = vsel %vm2155_vm10, %v6826_v23, %v6828_v24  ;;  %v2156_v56 = vsel %vm2155_vm10, %v6811_v18, %v6826_v23 }
  0xf7   : > { %5722 = vmatmul.mubr.msk.bf16.vlgmr.msra.gmra.mrb[52].mxu0 %vm221_vm2, %v5720_v15  ;;  %3469 = vrot.lane.b32.xlu0 %v6443_v5, %s6374_s14  ;;  %v6850_v30 = vpop.permute.xlu1 %2257  ;;  %v2163_v58 = vsel %vm225_vm1, %v2156_v56, 0 }
  0xf8   : > { %1732 = vmatpush1.bf16.msra.mxu0 %v1723_v22  ;;  %1763 = vmatprep.mubr.bf16.mxu0 %v6344_v1 }
  0xf9   : > { %6059 = vmatmul.mubr.msk.bf16.vlgmr.msra.gmra.mrb[56].mxu1 %vm221_vm2, %v5724_v25  ;;  %5733 = vmatprep.subr.msk.bf16.mxu0 %vm225_vm1, %v1827_v26  ;;  %v2154_v28 = vpop.permute.xlu0 %2153 }
  0xfa   : > { %6063 = vmatpush3.bf16.msra.mxu1 %v1839_v27  ;;  %3471 = vrot.lane.b32.xlu1 %v6492_v7, %s6374_s14  ;;  %v2158_v48 = vsel %vm2155_vm10, %v6828_v24, %v2154_v28  ;;  %vm3255_vm10 = vcmask 326656  }
  0xfb   : > { %6064 = vmatprep.mubr.msk.bf16.mxu1 %vm6343_vm0, %v6342_v0  ;;  %3473 = vrot.lane.b32.xlu0 %v6497_v8, %s6374_s14  ;;  %v2169_v53 = vsel %vm225_vm1, %v2158_v48, 0 }
  0xfc   : > { %6068 = vmatprep.subr.bf16.mxu1 %v6342_v0  ;;  %v2262_v37 = vpop.permute.xlu1 %2261 }
  0xfd   : > { %v6866_v36 = vpop.permute.xlu0 %2259 }
  0xfe   : > { %3577 = vrot.lane.b32.xlu1 %v6440_v4, %s6375_s19  ;;  %v2267_v61 = vsel %vm2265_vm11, %v6866_v36, %v2262_v37  ;;  %v2266_v3 = vsel %vm2265_vm11, %v6850_v30, %v6866_v36 }
  0xff   : > { %5730 = vmatmul.mubr.msk.bf16.vlgmr.msra.gmra.mrb[56].mxu0 %vm221_vm2, %v5724_v25  ;;  %3579 = vrot.lane.b32.xlu0 %v6443_v5, %s6375_s19  ;;  %v2273_v9 = vsel %vm225_vm1, %v2266_v3, 0  ;;  %v5772_v3 = vld [vmem:[%s7465_s1 + $0x64] sm:$0xf] }
 0x100   : > { %1842 = vmatpush1.bf16.msra.mxu0 %v1833_v32  ;;  %1873 = vmatprep.mubr.bf16.mxu0 %v6344_v1  ;;  %v6892_v45 = vpop.permute.xlu1 %2367 }
 0x101   : > { %6065 = vmatmul.mubr.msk.bf16.vlgmr.msra.gmra.mrb[60].mxu1 %vm221_vm2, %v5732_v33  ;;  %5737 = vmatprep.subr.msk.bf16.mxu0 %vm225_vm1, %v1937_v34  ;;  %v2264_v41 = vpop.permute.xlu0 %2263 }
 0x102   : > { %6069 = vmatpush3.bf16.msra.mxu1 %v1949_v35  ;;  %3581 = vrot.lane.b32.xlu1 %v6492_v7, %s6375_s19  ;;  %v2268_v57 = vsel %vm2265_vm11, %v2262_v37, %v2264_v41  ;;  %vm3365_vm11 = vcmask 318464  }
 0x103   : > { %6070 = vmatprep.mubr.msk.bf16.mxu1 %vm6343_vm0, %v6342_v0  ;;  %3583 = vrot.lane.b32.xlu0 %v6497_v8, %s6375_s19  ;;  %v2279_v62 = vsel %vm225_vm1, %v2268_v57, 0 }
 0x104   : > { %6074 = vmatprep.subr.bf16.mxu1 %v6342_v0 }
 0x105   : > { %v6897_v46 = vpop.permute.xlu0 %2369 }
 0x106   : > { %3687 = vrot.lane.b32.xlu1 %v6440_v4, %s6376_s23  ;;  %v2372_v50 = vpop.permute.xlu1 %2371  ;;  %v2376_v16 = vsel %vm2375_vm12, %v6892_v45, %v6897_v46 }
 0x107   : > { %5734 = vmatmul.mubr.msk.bf16.vlgmr.msra.gmra.mrb[60].mxu0 %vm221_vm2, %v5732_v33  ;;  %3689 = vrot.lane.b32.xlu0 %v6443_v5, %s6376_s23  ;;  %v2377_v12 = vsel %vm2375_vm12, %v6897_v46, %v2372_v50  ;;  %v2383_v18 = vsel %vm225_vm1, %v2376_v16, 0 }
 0x108   : > { %1952 = vmatpush1.bf16.msra.mxu0 %v1943_v40  ;;  %1983 = vmatprep.mubr.bf16.mxu0 %v6344_v1 }
 0x109   : > { %6071 = vmatmul.mubr.msk.bf16.vlgmr.msra.gmra.mrb[64].mxu1 %vm221_vm2, %v5736_v42  ;;  %5741 = vmatprep.subr.msk.bf16.mxu0 %vm225_vm1, %v2047_v43  ;;  %v2374_v54 = vpop.permute.xlu0 %2373 }
 0x10a   : > { %6075 = vmatpush3.bf16.msra.mxu1 %v2059_v44  ;;  %3691 = vrot.lane.b32.xlu1 %v6492_v7, %s6376_s23  ;;  %v2378_v6 = vsel %vm2375_vm12, %v2372_v50, %v2374_v54  ;;  %vm3475_vm12 = vcmask 310272  }
 0x10b   : > { %6076 = vmatprep.mubr.msk.bf16.mxu1 %vm6343_vm0, %v6342_v0  ;;  %3693 = vrot.lane.b32.xlu0 %v6497_v8, %s6376_s23  ;;  %v2389_v13 = vsel %vm225_vm1, %v2378_v6, 0 }
 0x10c   : > { %6080 = vmatprep.subr.bf16.mxu1 %v6342_v0 }
 0x10d   : > { %v6923_v55 = vpop.permute.xlu1 %2477 }
 0x10e   : > { %3797 = vrot.lane.b32.xlu1 %v6440_v4, %s6377_s29  ;;  %v2480_v59 = vpop.permute.xlu0 %2479 }
 0x10f   : > { %5738 = vmatmul.mubr.msk.bf16.vlgmr.msra.gmra.mrb[64].mxu0 %vm221_vm2, %v5736_v42  ;;  %3799 = vrot.lane.b32.xlu0 %v6443_v5, %s6377_s29  ;;  %v2486_v25 = vsel %vm2485_vm13, %v6923_v55, %v2480_v59  ;;  %v5768_v55 = vld [vmem:[%s7465_s1 + $0x60] sm:$0xf] }
 0x110   : > { %2062 = vmatpush1.bf16.msra.mxu0 %v2053_v49  ;;  %2093 = vmatprep.mubr.bf16.mxu0 %v6344_v1  ;;  %v2493_v27 = vsel %vm225_vm1, %v2486_v25, 0 }
 0x111   : > { %6077 = vmatmul.mubr.msk.bf16.vlgmr.msra.gmra.mrb[68].mxu1 %vm221_vm2, %v5740_v51  ;;  %5745 = vmatprep.subr.msk.bf16.mxu0 %vm225_vm1, %v2157_v52  ;;  %v2482_v63 = vpop.permute.xlu1 %2481 }
 0x112   : > { %6081 = vmatpush3.bf16.msra.mxu1 %v2169_v53  ;;  %3801 = vrot.lane.b32.xlu1 %v6492_v7, %s6377_s29  ;;  %v2487_v21 = vsel %vm2485_vm13, %v2480_v59, %v2482_v63 }
 0x113   : > { %6082 = vmatprep.mubr.msk.bf16.mxu1 %vm6343_vm0, %v6342_v0  ;;  %3803 = vrot.lane.b32.xlu0 %v6497_v8, %s6377_s29 }
 0x114   : > { %6086 = vmatprep.subr.bf16.mxu1 %v6342_v0 }
 0x115   : > { %v2484_v2 = vpop.permute.xlu0 %2483 }
 0x116   : > { %3907 = vrot.lane.b32.xlu1 %v6440_v4, %s6378_s6  ;;  %v2588_v10 = vpop.permute.xlu1 %2587  ;;  %v2488_v17 = vsel %vm2485_vm13, %v2482_v63, %v2484_v2  ;;  %vm3585_vm13 = vcmask 302080  }
 0x117   : > { %5742 = vmatmul.mubr.msk.bf16.vlgmr.msra.gmra.mrb[68].mxu0 %vm221_vm2, %v5740_v51  ;;  %3909 = vrot.lane.b32.xlu0 %v6443_v5, %s6378_s6  ;;  %v2499_v22 = vsel %vm225_vm1, %v2488_v17, 0 }
 0x118   : > { %2172 = vmatpush1.bf16.msra.mxu0 %v2163_v58  ;;  %2203 = vmatprep.mubr.bf16.mxu0 %v6344_v1 }
 0x119   : > { %6083 = vmatmul.mubr.msk.bf16.vlgmr.msra.gmra.mrb[72].mxu1 %vm221_vm2, %v5744_v60  ;;  %5749 = vmatprep.subr.msk.bf16.mxu0 %vm225_vm1, %v2267_v61  ;;  %v2590_v14 = vpop.permute.xlu0 %2589 }
 0x11a   : > { %6087 = vmatpush3.bf16.msra.mxu1 %v2279_v62  ;;  %3911 = vrot.lane.b32.xlu1 %v6492_v7, %s6378_s6  ;;  %v2596_v34 = vsel %vm2595_vm14, %v2588_v10, %v2590_v14 }
 0x11b   : > { %6088 = vmatprep.mubr.msk.bf16.mxu1 %vm6343_vm0, %v6342_v0  ;;  %3913 = vrot.lane.b32.xlu0 %v6497_v8, %s6378_s6  ;;  %v2603_v36 = vsel %vm225_vm1, %v2596_v34, 0 }
 0x11c   : > { %6092 = vmatprep.subr.bf16.mxu1 %v6342_v0 }
 0x11d   : > { %v2592_v15 = vpop.permute.xlu1 %2591 }
 0x11e   : > { %4017 = vrot.lane.b32.xlu1 %v6440_v4, %s6379_s9  ;;  %v2594_v19 = vpop.permute.xlu0 %2593  ;;  %v2597_v30 = vsel %vm2595_vm14, %v2590_v14, %v2592_v15 }
 0x11f   : > { %5746 = vmatmul.mubr.msk.bf16.vlgmr.msra.gmra.mrb[72].mxu0 %vm221_vm2, %v5744_v60  ;;  %4019 = vrot.lane.b32.xlu0 %v6443_v5, %s6379_s9  ;;  %v2598_v26 = vsel %vm2595_vm14, %v2592_v15, %v2594_v19  ;;  %vm3695_vm14 = vcmask 293888  }
 0x120   : > { %2282 = vmatpush1.bf16.msra.mxu0 %v2273_v9  ;;  %2313 = vmatprep.mubr.bf16.mxu0 %v6344_v1  ;;  %v2609_v31 = vsel %vm225_vm1, %v2598_v26, 0 }
 0x121   : > { %6089 = vmatmul.mubr.msk.bf16.vlgmr.msra.gmra.mrb[76].mxu1 %vm221_vm2, %v5748_v11  ;;  %5753 = vmatprep.subr.msk.bf16.mxu0 %vm225_vm1, %v2377_v12  ;;  %v2698_v23 = vpop.permute.xlu1 %2697 }
 0x122   : > { %6093 = vmatpush3.bf16.msra.mxu1 %v2389_v13  ;;  %4021 = vrot.lane.b32.xlu1 %v6492_v7, %s6379_s9 }
 0x123   : > { %6094 = vmatprep.mubr.msk.bf16.mxu1 %vm6343_vm0, %v6342_v0  ;;  %4023 = vrot.lane.b32.xlu0 %v6497_v8, %s6379_s9 }
 0x124   : > { %6098 = vmatprep.subr.bf16.mxu1 %v6342_v0 }
 0x125   : > { %v2700_v24 = vpop.permute.xlu0 %2699 }
 0x126   : > { %4127 = vrot.lane.b32.xlu1 %v6440_v4, %s6380_s12  ;;  %v2702_v28 = vpop.permute.xlu1 %2701  ;;  %v2706_v43 = vsel %vm2705_vm15, %v2698_v23, %v2700_v24 }
 0x127   : > { %5750 = vmatmul.mubr.msk.bf16.vlgmr.msra.gmra.mrb[76].mxu0 %vm221_vm2, %v5748_v11  ;;  %4129 = vrot.lane.b32.xlu0 %v6443_v5, %s6380_s12  ;;  %v2707_v39 = vsel %vm2705_vm15, %v2700_v24, %v2702_v28  ;;  %v2713_v45 = vsel %vm225_vm1, %v2706_v43, 0  ;;  %v4785_v11 = vld [vmem:[%s6434_s20 + $0x4] sm:$0xff] }
 0x128   : > { %2392 = vmatpush1.bf16.msra.mxu0 %v2383_v18  ;;  %2423 = vmatprep.mubr.bf16.mxu0 %v6344_v1 }
 0x129   : > { %6095 = vmatmul.mubr.msk.bf16.vlgmr.msra.gmra.mrb[80].mxu1 %vm221_vm2, %v5752_v20  ;;  %5757 = vmatprep.subr.msk.bf16.mxu0 %vm225_vm1, %v2487_v21  ;;  %v2704_v32 = vpop.permute.xlu0 %2703 }
 0x12a   : > { %6099 = vmatpush3.bf16.msra.mxu1 %v2499_v22  ;;  %4131 = vrot.lane.b32.xlu1 %v6492_v7, %s6380_s12  ;;  %v2708_v35 = vsel %vm2705_vm15, %v2702_v28, %v2704_v32  ;;  %vm3805_vm15 = vcmask 285696  }
 0x12b   : > { %6100 = vmatprep.mubr.msk.bf16.mxu1 %vm6343_vm0, %v6342_v0  ;;  %4133 = vrot.lane.b32.xlu0 %v6497_v8, %s6380_s12  ;;  %v2719_v40 = vsel %vm225_vm1, %v2708_v35, 0 }
 0x12c   : > { %6104 = vmatprep.subr.bf16.mxu1 %v6342_v0 }
 0x12d   : > { %v2808_v33 = vpop.permute.xlu1 %2807 }
 0x12e   : > { %4237 = vrot.lane.b32.xlu1 %v6440_v4, %s6381_s17  ;;  %v2810_v37 = vpop.permute.xlu0 %2809 }
 0x12f   : > { %5754 = vmatmul.mubr.msk.bf16.vlgmr.msra.gmra.mrb[80].mxu0 %vm221_vm2, %v5752_v20  ;;  %4239 = vrot.lane.b32.xlu0 %v6443_v5, %s6381_s17  ;;  %v2816_v52 = vsel %vm2815_vm3, %v2808_v33, %v2810_v37  ;;  %v7110_v20 = vld [vmem:[%s6434_s20 + $0xc] ss:$0 sps:$4 sm:$0xff]  }
 0x130   : > { %2502 = vmatpush1.bf16.msra.mxu0 %v2493_v27  ;;  %2533 = vmatprep.mubr.bf16.mxu0 %v6344_v1  ;;  %v2823_v53 = vsel %vm225_vm1, %v2816_v52, 0 }
 0x131   : > { %6101 = vmatmul.mubr.msk.bf16.vlgmr.msra.gmra.mrb[84].mxu1 %vm221_vm2, %v5756_v29  ;;  %5761 = vmatprep.subr.msk.bf16.mxu0 %vm225_vm1, %v2597_v30  ;;  %v2812_v41 = vpop.permute.xlu1 %2811 }
 0x132   : > { %6105 = vmatpush3.bf16.msra.mxu1 %v2609_v31  ;;  %4241 = vrot.lane.b32.xlu1 %v6492_v7, %s6381_s17  ;;  %v2817_v48 = vsel %vm2815_vm3, %v2810_v37, %v2812_v41 }
 0x133   : > { %6106 = vmatprep.mubr.msk.bf16.mxu1 %vm6343_vm0, %v6342_v0  ;;  %4243 = vrot.lane.b32.xlu0 %v6497_v8, %s6381_s17 }
 0x134   : > { %6110 = vmatprep.subr.bf16.mxu1 %v6342_v0 }
 0x135   : > { %v2814_v42 = vpop.permute.xlu0 %2813 }
 0x136   : > { %4347 = vrot.lane.b32.xlu1 %v6440_v4, %s6382_s21  ;;  %v2818_v44 = vsel %vm2815_vm3, %v2812_v41, %v2814_v42  ;;  %v2918_v46 = vpop.permute.xlu1 %2917  ;;  %vm3915_vm3 = vcmask 277504  }
 0x137   : > { %5758 = vmatmul.mubr.msk.bf16.vlgmr.msra.gmra.mrb[84].mxu0 %vm221_vm2, %v5756_v29  ;;  %4349 = vrot.lane.b32.xlu0 %v6443_v5, %s6382_s21  ;;  %v2829_v49 = vsel %vm225_vm1, %v2818_v44, 0  ;;  %v5780_v29 = vld [vmem:[%s7465_s1 + $0x6c] sm:$0xf] }
 0x138   : > { %2612 = vmatpush1.bf16.msra.mxu0 %v2603_v36  ;;  %2643 = vmatprep.mubr.bf16.mxu0 %v6344_v1 }
 0x139   : > { %6107 = vmatmul.mubr.msk.bf16.vlgmr.msra.gmra.mrb[88].mxu1 %vm221_vm2, %v5760_v38  ;;  %5765 = vmatprep.subr.msk.bf16.mxu0 %vm225_vm1, %v2707_v39  ;;  %v2920_v50 = vpop.permute.xlu0 %2919 }
 0x13a   : > { %6111 = vmatpush3.bf16.msra.mxu1 %v2719_v40  ;;  %4351 = vrot.lane.b32.xlu1 %v6492_v7, %s6382_s21  ;;  %v2926_v61 = vsel %vm2925_vm4, %v2918_v46, %v2920_v50  ;;  %v5784_v46 = vld [vmem:[%s7465_s1 + $0x70] sm:$0xf] }
 0x13b   : > { %6112 = vmatprep.mubr.msk.bf16.mxu1 %vm6343_vm0, %v6342_v0  ;;  %4353 = vrot.lane.b32.xlu0 %v6497_v8, %s6382_s21  ;;  %v2933_v63 = vsel %vm225_vm1, %v2926_v61, 0 }
 0x13c   : > { %6116 = vmatprep.subr.bf16.mxu1 %v6342_v0 }
 0x13d   : > { %v2922_v51 = vpop.permute.xlu1 %2921 }
 0x13e   : > { %4457 = vrot.lane.b32.xlu1 %v6440_v4, %s6383_s27  ;;  %v2924_v54 = vpop.permute.xlu0 %2923  ;;  %v2927_v56 = vsel %vm2925_vm4, %v2920_v50, %v2922_v51 }
 0x13f   : > { %5762 = vmatmul.mubr.msk.bf16.vlgmr.msra.gmra.mrb[88].mxu0 %vm221_vm2, %v5760_v38  ;;  %4459 = vrot.lane.b32.xlu0 %v6443_v5, %s6383_s27  ;;  %v2928_v57 = vsel %vm2925_vm4, %v2922_v51, %v2924_v54  ;;  %vm4025_vm4 = vcmask 146432  }
 0x140   : > { %2722 = vmatpush1.bf16.msra.mxu0 %v2713_v45  ;;  %2753 = vmatprep.mubr.bf16.mxu0 %v6344_v1  ;;  %v2939_v59 = vsel %vm225_vm1, %v2928_v57, 0 }
 0x141   : > { %6113 = vmatmul.mubr.msk.bf16.vlgmr.msra.gmra.mrb[92].mxu1 %vm221_vm2, %v5764_v47  ;;  %5769 = vmatprep.subr.msk.bf16.mxu0 %vm225_vm1, %v2817_v48  ;;  %v3028_v58 = vpop.permute.xlu1 %3027 }
 0x142   : > { %6117 = vmatpush3.bf16.msra.mxu1 %v2829_v49  ;;  %4461 = vrot.lane.b32.xlu1 %v6492_v7, %s6383_s27 }
 0x143   : > { %6118 = vmatprep.mubr.msk.bf16.mxu1 %vm6343_vm0, %v6342_v0  ;;  %4463 = vrot.lane.b32.xlu0 %v6497_v8, %s6383_s27 }
 0x144   : > { %6122 = vmatprep.subr.bf16.mxu1 %v6342_v0 }
 0x145   : > { %v3030_v60 = vpop.permute.xlu0 %3029 }
 0x146   : > { %4567 = vrot.lane.b32.xlu1 %v6440_v4, %s6384_s30  ;;  %v3032_v62 = vpop.permute.xlu1 %3031  ;;  %v3036_v14 = vsel %vm3035_vm5, %v3028_v58, %v3030_v60 }
 0x147   : > { %5766 = vmatmul.mubr.msk.bf16.vlgmr.msra.gmra.mrb[92].mxu0 %vm221_vm2, %v5764_v47  ;;  %4569 = vrot.lane.b32.xlu0 %v6443_v5, %s6384_s30  ;;  %v3037_v6 = vsel %vm3035_vm5, %v3030_v60, %v3032_v62  ;;  %v3043_v16 = vsel %vm225_vm1, %v3036_v14, 0 }
 0x148   : > { %2832 = vmatpush1.bf16.msra.mxu0 %v2823_v53  ;;  %2863 = vmatprep.mubr.bf16.mxu0 %v6344_v1 }
 0x149   : > { %6119 = vmatmul.mubr.msk.bf16.vlgmr.msra.gmra.mrb[96].mxu1 %vm221_vm2, %v5768_v55  ;;  %5773 = vmatprep.subr.msk.bf16.mxu0 %vm225_vm1, %v2927_v56  ;;  %v3034_v2 = vpop.permute.xlu0 %3033 }
 0x14a   : > { %6123 = vmatpush3.bf16.msra.mxu1 %v2939_v59  ;;  %4571 = vrot.lane.b32.xlu1 %v6492_v7, %s6384_s30  ;;  %v3038_v9 = vsel %vm3035_vm5, %v3032_v62, %v3034_v2  ;;  %vm4135_vm5 = vcmask 138240  }
 0x14b   : > { %6124 = vmatprep.mubr.msk.bf16.mxu1 %vm6343_vm0, %v6342_v0  ;;  %4573 = vrot.lane.b32.xlu0 %v6497_v8, %s6384_s30  ;;  %v3049_v10 = vsel %vm225_vm1, %v3038_v9, 0  ;;  %v5788_v9 = vld [vmem:[%s7465_s1 + $0x74] sm:$0xf] }
 0x14c   : > { %6128 = vmatprep.subr.bf16.mxu1 %v6342_v0 }
 0x14d   : > { %v3138_v12 = vpop.permute.xlu1 %3137 }
 0x14e   : > { %4677 = vrot.lane.b32.xlu1 %v6440_v4, %s6385_s7  ;;  %v3140_v13 = vpop.permute.xlu0 %3139  ;;  %v7089_v4 = vcombine.low %v4785_v11, %v4785_v11 }
 0x14f   : > { %5770 = vmatmul.mubr.msk.bf16.vlgmr.msra.gmra.mrb[96].mxu0 %vm221_vm2, %v5768_v55  ;;  %4679 = vrot.lane.b32.xlu0 %v6443_v5, %s6385_s7  ;;  %v7094_v5 = vcombine.high %v4785_v11, %v4785_v11  ;;  %v3146_v23 = vsel %vm3145_vm9, %v3138_v12, %v3140_v13 }
 0x150   : > { %2942 = vmatpush1.bf16.msra.mxu0 %v2933_v63  ;;  %2973 = vmatprep.mubr.bf16.mxu0 %v6344_v1  ;;  %v3153_v26 = vsel %vm225_vm1, %v3146_v23, 0 }
 0x151   : > { %6125 = vmatmul.mubr.msk.bf16.vlgmr.msra.gmra.mrb[100].mxu1 %vm221_vm2, %v5772_v3  ;;  %5777 = vmatprep.subr.msk.bf16.mxu0 %vm225_vm1, %v3037_v6  ;;  %v3142_v15 = vpop.permute.xlu1 %3141 }
 0x152   : > { %6129 = vmatpush3.bf16.msra.mxu1 %v3049_v10  ;;  %4681 = vrot.lane.b32.xlu1 %v6492_v7, %s6385_s7  ;;  %v5776_v7 = vld [vmem:[%s7465_s1 + $0x68] sm:$0xf]  ;;  %v3147_v18 = vsel %vm3145_vm9, %v3140_v13, %v3142_v15 }
 0x153   : > { %6130 = vmatprep.mubr.msk.bf16.mxu1 %vm6343_vm0, %v6342_v0  ;;  %4683 = vrot.lane.b32.xlu0 %v6497_v8, %s6385_s7 }
 0x154   : > { %6134 = vmatprep.subr.bf16.mxu1 %v6342_v0 }
 0x155   : > { %v3144_v17 = vpop.permute.xlu0 %3143 }
 0x156   : > { %v3148_v19 = vsel %vm3145_vm9, %v3142_v15, %v3144_v17  ;;  %4797 = vrot.lane.b32.xlu1 %v7089_v4, %s6348_s24  ;;  %v3248_v21 = vpop.permute.xlu1 %3247  ;;  %vm4245_vm9 = vcmask 130048  }
 0x157   : > { %5774 = vmatmul.mubr.msk.bf16.vlgmr.msra.gmra.mrb[100].mxu0 %vm221_vm2, %v5772_v3  ;;  %v3159_v8 = vsel %vm225_vm1, %v3148_v19, 0  ;;  %4799 = vrot.lane.b32.xlu0 %v7094_v5, %s6348_s24 }
 0x158   : > { %3052 = vmatpush1.bf16.msra.mxu0 %v3043_v16  ;;  %3083 = vmatprep.mubr.bf16.mxu0 %v6344_v1 }
 0x159   : > { %6131 = vmatmul.mubr.msk.bf16.vlgmr.msra.gmra.mrb[104].mxu1 %vm221_vm2, %v5776_v7  ;;  %5781 = vmatprep.subr.msk.bf16.mxu0 %vm225_vm1, %v3147_v18  ;;  %v3250_v22 = vpop.permute.xlu0 %3249 }
 0x15a   : > { %6135 = vmatpush3.bf16.msra.mxu1 %v3159_v8  ;;  %6136 = vmatprep.mubr.msk.bf16.mxu1 %vm6343_vm0, %v6342_v0  ;;  %v3256_v37 = vsel %vm3255_vm10, %v3248_v21, %v3250_v22 }
 0x15b   : > { %4801 = vrot.lane.b32.xlu1 %v7110_v20, %s6348_s24  ;;  %4903 = vrot.lane.b32.xlu0 %v7089_v4, %s6349_s25  ;;  %v310_v24 = vpop.f32.mrb[0].mxu1  ;;  %v3263_v42 = vsel %vm225_vm1, %v3256_v37, 0 }
 0x15c   : > { %v3252_v25 = vpop.permute.xlu1 %3251  ;;  %6140 = vmatprep.subr.bf16.mxu1 %v6342_v0  ;;  %v5976_v27 = vpop.f32.mrb[1].mxu1 }
 0x15d   : > { %v3254_v28 = vpop.permute.xlu0 %3253  ;;  %v313_v30 = vpop.f32.mrb[2].mxu1  ;;  %v3257_v31 = vsel %vm3255_vm10, %v3250_v22, %v3252_v25 }
 0x15e   : > { %v3258_v32 = vsel %vm3255_vm10, %v3252_v25, %v3254_v28  ;;  %v5977_v33 = vpop.f32.mrb[3].mxu1  ;;  %vm4355_vm10 = vcmask 121856  }
 0x15f   : > { %5778 = vmatmul.mubr.msk.bf16.vlgmr.msra.gmra.mrb[104].mxu0 %vm221_vm2, %v5776_v7  ;;  %v3269_v34 = vsel %vm225_vm1, %v3258_v32, 0  ;;  %4905 = vrot.lane.b32.xlu1 %v7094_v5, %s6349_s25 }
 0x160   : > { %3162 = vmatpush1.bf16.msra.mxu0 %v3153_v26  ;;  %3193 = vmatprep.mubr.bf16.mxu0 %v6344_v1  ;;  %v3358_v35 = vpop.permute.xlu1 %3357 }
 0x161   : > { %6137 = vmatmul.mubr.msk.bf16.vlgmr.msra.gmra.mrb[108].mxu1 %vm221_vm2, %v5780_v29  ;;  %5785 = vmatprep.subr.msk.bf16.mxu0 %vm225_vm1, %v3257_v31  ;;  %v3360_v36 = vpop.permute.xlu0 %3359 }
 0x162   : > { %v269_v38 = vpop.f32.mrb[0].mxu0  ;;  %6141 = vmatpush3.bf16.msra.mxu1 %v3269_v34  ;;  %6142 = vmatprep.mubr.msk.bf16.mxu1 %vm6343_vm0, %v6342_v0  ;;  %v3366_v54 = vsel %vm3365_vm11, %v3358_v35, %v3360_v36 }
 0x163   : > { %v271_v39 = vpop.f32.mrb[1].mxu0  ;;  %4907 = vrot.lane.b32.xlu0 %v7110_v20, %s6349_s25  ;;  %5009 = vrot.lane.b32.xlu1 %v7089_v4, %s6350_s26  ;;  %s6386_s25 = smov 121   ;;  %v3373_v63 = vsel %vm225_vm1, %v3366_v54, 0 }
 0x164   : > { %v273_v40 = vpop.f32.mrb[2].mxu0  ;;  %v403_v41 = vpop.f32.mrb[4].mxu1  ;;  %6146 = vmatprep.subr.bf16.mxu1 %v6342_v0 }
 0x165   : > { %v274_v43 = vpop.f32.mrb[3].mxu0  ;;  %v404_v44 = vadd.f32 %v403_v41, %v310_v24  ;;  %v5982_v45 = vpop.f32.mrb[5].mxu1 }
 0x166   : > { %v406_v47 = vpop.f32.mrb[6].mxu1  ;;  %v3362_v48 = vpop.permute.xlu1 %3361 }
 0x167   : > { %5782 = vmatmul.mubr.msk.bf16.vlgmr.msra.gmra.mrb[108].mxu0 %vm221_vm2, %v5780_v29  ;;  %v3367_v49 = vsel %vm3365_vm11, %v3360_v36, %v3362_v48  ;;  %v5983_v50 = vpop.f32.mrb[7].mxu1  ;;  %v3364_v51 = vpop.permute.xlu0 %3363  ;;  %5011 = vrot.lane.b32.xlu0 %v7094_v5, %s6350_s26  ;;  %v5792_v29 = vld [vmem:[%s7465_s1 + $0x78] sm:$0xf] }
 0x168   : > { %3272 = vmatpush1.bf16.msra.mxu0 %v3263_v42  ;;  %v3368_v52 = vsel %vm3365_vm11, %v3362_v48, %v3364_v51  ;;  %3303 = vmatprep.mubr.bf16.mxu0 %v6344_v1  ;;  %v5796_v50 = vld [vmem:[%s7465_s1 + $0x7c] sm:$0xf]  ;;  %vm4465_vm11 = vcmask 113664  }
 0x169   : > { %6143 = vmatmul.mubr.msk.bf16.vlgmr.msra.gmra.mrb[112].mxu1 %vm221_vm2, %v5784_v46  ;;  %v3379_v53 = vsel %vm225_vm1, %v3368_v52, 0  ;;  %5789 = vmatprep.subr.msk.bf16.mxu0 %vm225_vm1, %v3367_v49 }
 0x16a   : > { %v362_v55 = vpop.f32.mrb[4].mxu0  ;;  %v3468_v56 = vpop.permute.xlu1 %3467  ;;  %6147 = vmatpush3.bf16.msra.mxu1 %v3379_v53  ;;  %6148 = vmatprep.mubr.msk.bf16.mxu1 %vm6343_vm0, %v6342_v0 }
 0x16b   : > { %v363_v57 = vadd.f32 %v362_v55, %v269_v38  ;;  %v364_v58 = vpop.f32.mrb[5].mxu0  ;;  %v3470_v59 = vpop.permute.xlu0 %3469  ;;  %5013 = vrot.lane.b32.xlu1 %v7110_v20, %s6350_s26  ;;  %5115 = vrot.lane.b32.xlu0 %v7089_v4, %s6386_s25  ;;  %s6387_s26 = smov 120  }
 0x16c   : > { %v365_v60 = vadd.f32 %v364_v58, %v271_v39  ;;  %v366_v61 = vpop.f32.mrb[6].mxu0  ;;  %v507_v62 = vpop.f32.mrb[8].mxu1  ;;  %6152 = vmatprep.subr.bf16.mxu1 %v6342_v0  ;;  %v3476_v17 = vsel %vm3475_vm12, %v3468_v56, %v3470_v59 }
 0x16d   : > { %v367_v2 = vpop.f32.mrb[7].mxu0  ;;  %v515_v3 = vadd.f32 %v507_v62, %v404_v44  ;;  %v5988_v6 = vpop.f32.mrb[9].mxu1  ;;  %v3483_v25 = vsel %vm225_vm1, %v3476_v17, 0 }
 0x16e   : > { %v510_v10 = vpop.f32.mrb[10].mxu1  ;;  %v3472_v11 = vpop.permute.xlu1 %3471 }
 0x16f   : > { %5786 = vmatmul.mubr.msk.bf16.vlgmr.msra.gmra.mrb[112].mxu0 %vm221_vm2, %v5784_v46  ;;  %v3477_v12 = vsel %vm3475_vm12, %v3470_v59, %v3472_v11  ;;  %v5989_v13 = vpop.f32.mrb[11].mxu1  ;;  %v3474_v14 = vpop.permute.xlu0 %3473  ;;  %5117 = vrot.lane.b32.xlu1 %v7094_v5, %s6386_s25 }
 0x170   : > { %3382 = vmatpush1.bf16.msra.mxu0 %v3373_v63  ;;  %v3478_v15 = vsel %vm3475_vm12, %v3472_v11, %v3474_v14  ;;  %3413 = vmatprep.mubr.bf16.mxu0 %v6344_v1  ;;  %v5800_v13 = vld [vmem:[%s7465_s1 + $0x80] sm:$0xf]  ;;  %vm4575_vm12 = vcmask 105472  }
 0x171   : > { %6149 = vmatmul.mubr.msk.bf16.vlgmr.msra.gmra.mrb[116].mxu1 %vm221_vm2, %v5788_v9  ;;  %v3489_v16 = vsel %vm225_vm1, %v3478_v15, 0  ;;  %5793 = vmatprep.subr.msk.bf16.mxu0 %vm225_vm1, %v3477_v12 }
 0x172   : > { %v466_v7 = vpop.f32.mrb[8].mxu0  ;;  %v3578_v18 = vpop.permute.xlu1 %3577  ;;  %6153 = vmatpush3.bf16.msra.mxu1 %v3489_v16  ;;  %6154 = vmatprep.mubr.msk.bf16.mxu1 %vm6343_vm0, %v6342_v0 }
 0x173   : > { %v513_v19 = vadd.f32 %v466_v7, %v363_v57  ;;  %v468_v8 = vpop.f32.mrb[9].mxu0  ;;  %v3580_v21 = vpop.permute.xlu0 %3579  ;;  %5119 = vrot.lane.b32.xlu0 %v7110_v20, %s6386_s25  ;;  %5222 = vrot.lane.b32.xlu1 %v7089_v4, %s6387_s26  ;;  %s6266_s25 = smul.u32 24, %s7470_s16 }
 0x174   : > { %v514_v22 = vadd.f32 %v468_v8, %v365_v60  ;;  %v470_v23 = vpop.f32.mrb[10].mxu0  ;;  %v614_v24 = vpop.f32.mrb[12].mxu1  ;;  %6158 = vmatprep.subr.bf16.mxu1 %v6342_v0  ;;  %v3586_v37 = vsel %vm3585_vm13, %v3578_v18, %v3580_v21 }
 0x175   : > { %v471_v26 = vpop.f32.mrb[11].mxu0  ;;  %v622_v27 = vadd.f32 %v614_v24, %v515_v3  ;;  %v5994_v28 = vpop.f32.mrb[13].mxu1  ;;  %v3593_v46 = vsel %vm225_vm1, %v3586_v37, 0 }
 0x176   : > { %v3582_v30 = vpop.permute.xlu1 %3581  ;;  %v617_v31 = vpop.f32.mrb[14].mxu1 }
 0x177   : > { %5790 = vmatmul.mubr.msk.bf16.vlgmr.msra.gmra.mrb[116].mxu0 %vm221_vm2, %v5788_v9  ;;  %v3587_v32 = vsel %vm3585_vm13, %v3580_v21, %v3582_v30  ;;  %v5995_v33 = vpop.f32.mrb[15].mxu1  ;;  %v3584_v34 = vpop.permute.xlu0 %3583  ;;  %5224 = vrot.lane.b32.xlu0 %v7094_v5, %s6387_s26  ;;  %v5804_v31 = vld [vmem:[%s7465_s1 + $0x84] sm:$0xf] }
 0x178   : > { %3492 = vmatpush1.bf16.msra.mxu0 %v3483_v25  ;;  %v3588_v35 = vsel %vm3585_vm13, %v3582_v30, %v3584_v34  ;;  %3523 = vmatprep.mubr.bf16.mxu0 %v6344_v1  ;;  %vm4685_vm13 = vcmask 97280  }
 0x179   : > { %6155 = vmatmul.mubr.msk.bf16.vlgmr.msra.gmra.mrb[120].mxu1 %vm221_vm2, %v5792_v29  ;;  %v3599_v36 = vsel %vm225_vm1, %v3588_v35, 0  ;;  %5797 = vmatprep.subr.msk.bf16.mxu0 %vm225_vm1, %v3587_v32 }
 0x17a   : > { %v573_v38 = vpop.f32.mrb[12].mxu0  ;;  %v3688_v39 = vpop.permute.xlu1 %3687  ;;  %6159 = vmatpush3.bf16.msra.mxu1 %v3599_v36  ;;  %6160 = vmatprep.mubr.msk.bf16.mxu1 %vm6343_vm0, %v6342_v0 }
 0x17b   : > { %v620_v40 = vadd.f32 %v573_v38, %v513_v19  ;;  %v575_v41 = vpop.f32.mrb[13].mxu0  ;;  %v3690_v42 = vpop.permute.xlu0 %3689  ;;  %5226 = vrot.lane.b32.xlu1 %v7110_v20, %s6387_s26  ;;  %5329 = vrot.lane.b32.xlu0 %v7089_v4, %s6388_s18  ;;  %s197_s26 = scalar_lea.vmem %s7468_s4, %s6266_s25 }
 0x17c   : > { %v621_v43 = vadd.f32 %v575_v41, %v514_v22  ;;  %v577_v44 = vpop.f32.mrb[14].mxu0  ;;  %v721_v45 = vpop.f32.mrb[16].mxu1  ;;  %6164 = vmatprep.subr.bf16.mxu1 %v6342_v0  ;;  %v3696_v58 = vsel %vm3695_vm14, %v3688_v39, %v3690_v42 }
 0x17d   : > { %v578_v47 = vpop.f32.mrb[15].mxu0  ;;  %v729_v48 = vadd.f32 %v721_v45, %v622_v27  ;;  %v6000_v49 = vpop.f32.mrb[17].mxu1  ;;  %v3703_v9 = vsel %vm225_vm1, %v3696_v58, 0 }
 0x17e   : > { %v3692_v51 = vpop.permute.xlu1 %3691  ;;  %v724_v52 = vpop.f32.mrb[18].mxu1 }
 0x17f   : > { %5794 = vmatmul.mubr.msk.bf16.vlgmr.msra.gmra.mrb[120].mxu0 %vm221_vm2, %v5792_v29  ;;  %v3697_v53 = vsel %vm3695_vm14, %v3690_v42, %v3692_v51  ;;  %v6001_v54 = vpop.f32.mrb[19].mxu1  ;;  %v3694_v55 = vpop.permute.xlu0 %3693  ;;  %5331 = vrot.lane.b32.xlu1 %v7094_v5, %s6388_s18 }
 0x180   : > { %3602 = vmatpush1.bf16.msra.mxu0 %v3593_v46  ;;  %v3698_v56 = vsel %vm3695_vm14, %v3692_v51, %v3694_v55  ;;  %3633 = vmatprep.mubr.bf16.mxu0 %v6344_v1  ;;  %v5808_v51 = vld [vmem:[%s7465_s1 + $0x88] sm:$0xf]  ;;  %vm5442_vm14 = vcmask 965632  }
 0x181   : > { %6161 = vmatmul.mubr.msk.bf16.vlgmr.msra.gmra.mrb[124].mxu1 %vm221_vm2, %v5796_v50  ;;  %v3709_v57 = vsel %vm225_vm1, %v3698_v56, 0  ;;  %5801 = vmatprep.subr.msk.bf16.mxu0 %vm225_vm1, %v3697_v53 }
 0x182   : > { %v680_v59 = vpop.f32.mrb[16].mxu0  ;;  %v3798_v60 = vpop.permute.xlu1 %3797  ;;  %6165 = vmatpush3.bf16.msra.mxu1 %v3709_v57  ;;  %6166 = vmatprep.mubr.msk.bf16.mxu1 %vm6343_vm0, %v6342_v0 }
 0x183   : > { %v727_v61 = vadd.f32 %v680_v59, %v620_v40  ;;  %v682_v62 = vpop.f32.mrb[17].mxu0  ;;  %v3800_v63 = vpop.permute.xlu0 %3799  ;;  %5333 = vrot.lane.b32.xlu0 %v7110_v20, %s6388_s18  ;;  %5436 = vrot.lane.b32.xlu1 %v7089_v4, %s6389_s22 }
 0x184   : > { %v728_v2 = vadd.f32 %v682_v62, %v621_v43  ;;  %v684_v3 = vpop.f32.mrb[18].mxu0  ;;  %v828_v6 = vpop.f32.mrb[20].mxu1  ;;  %6170 = vmatprep.subr.bf16.mxu1 %v6342_v0  ;;  %v3806_v19 = vsel %vm3805_vm15, %v3798_v60, %v3800_v63 }
 0x185   : > { %v685_v10 = vpop.f32.mrb[19].mxu0  ;;  %v836_v11 = vadd.f32 %v828_v6, %v729_v48  ;;  %v6006_v12 = vpop.f32.mrb[21].mxu1  ;;  %v3813_v27 = vsel %vm225_vm1, %v3806_v19, 0 }
 0x186   : > { %v3802_v14 = vpop.permute.xlu1 %3801  ;;  %v831_v15 = vpop.f32.mrb[22].mxu1 }
 0x187   : > { %5798 = vmatmul.mubr.msk.bf16.vlgmr.msra.gmra.mrb[124].mxu0 %vm221_vm2, %v5796_v50  ;;  %v3807_v4 = vsel %vm3805_vm15, %v3800_v63, %v3802_v14  ;;  %v6007_v16 = vpop.f32.mrb[23].mxu1  ;;  %v3804_v17 = vpop.permute.xlu0 %3803  ;;  %5438 = vrot.lane.b32.xlu0 %v7094_v5, %s6389_s22 }
 0x188   : > { %3712 = vmatpush1.bf16.msra.mxu0 %v3703_v9  ;;  %v3808_v7 = vsel %vm3805_vm15, %v3802_v14, %v3804_v17  ;;  %3743 = vmatprep.mubr.bf16.mxu0 %v6344_v1  ;;  %v5812_v14 = vld [vmem:[%s7465_s1 + $0x8c] sm:$0xf] }
 0x189   : > { %6167 = vmatmul.mubr.msk.bf16.vlgmr.msra.gmra.mrb[128].mxu1 %vm221_vm2, %v5800_v13  ;;  %v3819_v18 = vsel %vm225_vm1, %v3808_v7, 0  ;;  %5805 = vmatprep.subr.msk.bf16.mxu0 %vm225_vm1, %v3807_v4 }
 0x18a   : > { %v787_v8 = vpop.f32.mrb[20].mxu0  ;;  %v3908_v21 = vpop.permute.xlu1 %3907  ;;  %6171 = vmatpush3.bf16.msra.mxu1 %v3819_v18  ;;  %6172 = vmatprep.mubr.msk.bf16.mxu1 %vm6343_vm0, %v6342_v0 }
 0x18b   : > { %v834_v5 = vadd.f32 %v787_v8, %v727_v61  ;;  %v789_v22 = vpop.f32.mrb[21].mxu0  ;;  %v3910_v23 = vpop.permute.xlu0 %3909  ;;  %5440 = vrot.lane.b32.xlu1 %v7110_v20, %s6389_s22  ;;  %6176 = vmatprep.subr.bf16.mxu1 %v6342_v0 }
 0x18c   : > { %v835_v24 = vadd.f32 %v789_v22, %v728_v2  ;;  %v791_v25 = vpop.f32.mrb[22].mxu0  ;;  %v935_v26 = vpop.f32.mrb[24].mxu1  ;;  %v3916_v38 = vsel %vm3915_vm3, %v3908_v21, %v3910_v23 }
 0x18d   : > { %v792_v28 = vpop.f32.mrb[23].mxu0  ;;  %v943_v29 = vadd.f32 %v935_v26, %v836_v11  ;;  %v6012_v30 = vpop.f32.mrb[25].mxu1  ;;  %v3923_v47 = vsel %vm225_vm1, %v3916_v38, 0 }
 0x18e   : > { %v3912_v32 = vpop.permute.xlu1 %3911  ;;  %v938_v33 = vpop.f32.mrb[26].mxu1 }
 0x18f   : > { %5802 = vmatmul.mubr.msk.bf16.vlgmr.msra.gmra.mrb[128].mxu0 %vm221_vm2, %v5800_v13  ;;  %v3917_v20 = vsel %vm3915_vm3, %v3910_v23, %v3912_v32  ;;  %v6013_v34 = vpop.f32.mrb[27].mxu1  ;;  %v3914_v35 = vpop.permute.xlu0 %3913 }
 0x190   : > { %3822 = vmatpush1.bf16.msra.mxu0 %v3813_v27  ;;  %v3918_v36 = vsel %vm3915_vm3, %v3912_v32, %v3914_v35  ;;  %3853 = vmatprep.mubr.bf16.mxu0 %v6344_v1  ;;  %v5816_v32 = vld [vmem:[%s7465_s1 + $0x90] sm:$0xf] }
 0x191   : > { %6173 = vmatmul.mubr.msk.bf16.vlgmr.msra.gmra.mrb[132].mxu1 %vm221_vm2, %v5804_v31  ;;  %v3929_v37 = vsel %vm225_vm1, %v3918_v36, 0  ;;  %5809 = vmatprep.subr.msk.bf16.mxu0 %vm225_vm1, %v3917_v20 }
 0x192   : > { %v894_v39 = vpop.f32.mrb[24].mxu0  ;;  %v4018_v40 = vpop.permute.xlu1 %4017  ;;  %6177 = vmatpush3.bf16.msra.mxu1 %v3929_v37  ;;  %6178 = vmatprep.mubr.msk.bf16.mxu1 %vm6343_vm0, %v6342_v0 }
 0x193   : > { %v941_v41 = vadd.f32 %v894_v39, %v834_v5  ;;  %v896_v42 = vpop.f32.mrb[25].mxu0  ;;  %v4020_v43 = vpop.permute.xlu0 %4019  ;;  %6182 = vmatprep.subr.bf16.mxu1 %v6342_v0 }
 0x194   : > { %v942_v44 = vadd.f32 %v896_v42, %v835_v24  ;;  %v898_v45 = vpop.f32.mrb[26].mxu0  ;;  %v1042_v46 = vpop.f32.mrb[28].mxu1  ;;  %v4026_v59 = vsel %vm4025_vm4, %v4018_v40, %v4020_v43 }
 0x195   : > { %v899_v48 = vpop.f32.mrb[27].mxu0  ;;  %v1050_v49 = vadd.f32 %v1042_v46, %v943_v29  ;;  %v6018_v50 = vpop.f32.mrb[29].mxu1  ;;  %v4033_v10 = vsel %vm225_vm1, %v4026_v59, 0 }
 0x196   : > { %v4022_v52 = vpop.permute.xlu1 %4021  ;;  %v1045_v53 = vpop.f32.mrb[30].mxu1 }
 0x197   : > { %5806 = vmatmul.mubr.msk.bf16.vlgmr.msra.gmra.mrb[132].mxu0 %vm221_vm2, %v5804_v31  ;;  %v4027_v54 = vsel %vm4025_vm4, %v4020_v43, %v4022_v52  ;;  %v6019_v55 = vpop.f32.mrb[31].mxu1  ;;  %v4024_v56 = vpop.permute.xlu0 %4023 }
 0x198   : > { %3932 = vmatpush1.bf16.msra.mxu0 %v3923_v47  ;;  %v4028_v57 = vsel %vm4025_vm4, %v4022_v52, %v4024_v56  ;;  %3963 = vmatprep.mubr.bf16.mxu0 %v6344_v1  ;;  %v5820_v52 = vld [vmem:[%s7465_s1 + $0x94] sm:$0xf] }
 0x199   : > { %6179 = vmatmul.mubr.msk.bf16.vlgmr.msra.gmra.mrb[136].mxu1 %vm221_vm2, %v5808_v51  ;;  %v4039_v58 = vsel %vm225_vm1, %v4028_v57, 0  ;;  %5813 = vmatprep.subr.msk.bf16.mxu0 %vm225_vm1, %v4027_v54 }
 0x19a   : > { %v1001_v60 = vpop.f32.mrb[28].mxu0  ;;  %v4128_v61 = vpop.permute.xlu1 %4127  ;;  %6183 = vmatpush3.bf16.msra.mxu1 %v4039_v58  ;;  %6184 = vmatprep.mubr.msk.bf16.mxu1 %vm6343_vm0, %v6342_v0 }
 0x19b   : > { %v1048_v62 = vadd.f32 %v1001_v60, %v941_v41  ;;  %v1003_v63 = vpop.f32.mrb[29].mxu0  ;;  %v4130_v2 = vpop.permute.xlu0 %4129  ;;  %6188 = vmatprep.subr.bf16.mxu1 %v6342_v0 }
 0x19c   : > { %v1049_v3 = vadd.f32 %v1003_v63, %v942_v44  ;;  %v1005_v6 = vpop.f32.mrb[30].mxu0  ;;  %v1149_v9 = vpop.f32.mrb[32].mxu1  ;;  %v4136_v8 = vsel %vm4135_vm5, %v4128_v61, %v4130_v2 }
 0x19d   : > { %v1006_v11 = vpop.f32.mrb[31].mxu0  ;;  %v1157_v12 = vadd.f32 %v1149_v9, %v1050_v49  ;;  %v6024_v13 = vpop.f32.mrb[33].mxu1  ;;  %v4143_v28 = vsel %vm225_vm1, %v4136_v8, 0 }
 0x19e   : > { %v4132_v15 = vpop.permute.xlu1 %4131  ;;  %v1152_v4 = vpop.f32.mrb[34].mxu1 }
 0x19f   : > { %5810 = vmatmul.mubr.msk.bf16.vlgmr.msra.gmra.mrb[136].mxu0 %vm221_vm2, %v5808_v51  ;;  %v4137_v16 = vsel %vm4135_vm5, %v4130_v2, %v4132_v15  ;;  %v6025_v17 = vpop.f32.mrb[35].mxu1  ;;  %v4134_v7 = vpop.permute.xlu0 %4133 }
 0x1a0   : > { %4042 = vmatpush1.bf16.msra.mxu0 %v4033_v10  ;;  %v4138_v18 = vsel %vm4135_vm5, %v4132_v15, %v4134_v7  ;;  %4073 = vmatprep.mubr.bf16.mxu0 %v6344_v1  ;;  %v5824_v15 = vld [vmem:[%s7465_s1 + $0x98] sm:$0xf] }
 0x1a1   : > { %6185 = vmatmul.mubr.msk.bf16.vlgmr.msra.gmra.mrb[140].mxu1 %vm221_vm2, %v5812_v14  ;;  %v4149_v19 = vsel %vm225_vm1, %v4138_v18, 0  ;;  %5817 = vmatprep.subr.msk.bf16.mxu0 %vm225_vm1, %v4137_v16 }
 0x1a2   : > { %v1108_v21 = vpop.f32.mrb[32].mxu0  ;;  %v4238_v5 = vpop.permute.xlu1 %4237  ;;  %6189 = vmatpush3.bf16.msra.mxu1 %v4149_v19  ;;  %6190 = vmatprep.mubr.msk.bf16.mxu1 %vm6343_vm0, %v6342_v0 }
 0x1a3   : > { %v1155_v22 = vadd.f32 %v1108_v21, %v1048_v62  ;;  %v1110_v23 = vpop.f32.mrb[33].mxu0  ;;  %v4240_v24 = vpop.permute.xlu0 %4239  ;;  %6194 = vmatprep.subr.bf16.mxu1 %v6342_v0 }
 0x1a4   : > { %v1156_v25 = vadd.f32 %v1110_v23, %v1049_v3  ;;  %v1112_v26 = vpop.f32.mrb[34].mxu0  ;;  %v1256_v27 = vpop.f32.mrb[36].mxu1  ;;  %v4246_v39 = vsel %vm4245_vm9, %v4238_v5, %v4240_v24 }
 0x1a5   : > { %v1113_v29 = vpop.f32.mrb[35].mxu0  ;;  %v1264_v30 = vadd.f32 %v1256_v27, %v1157_v12  ;;  %v6030_v31 = vpop.f32.mrb[37].mxu1  ;;  %v4253_v48 = vsel %vm225_vm1, %v4246_v39, 0 }
 0x1a6   : > { %v4242_v33 = vpop.permute.xlu1 %4241  ;;  %v1259_v20 = vpop.f32.mrb[38].mxu1 }
 0x1a7   : > { %5814 = vmatmul.mubr.msk.bf16.vlgmr.msra.gmra.mrb[140].mxu0 %vm221_vm2, %v5812_v14  ;;  %v4247_v34 = vsel %vm4245_vm9, %v4240_v24, %v4242_v33  ;;  %v6031_v35 = vpop.f32.mrb[39].mxu1  ;;  %v4244_v36 = vpop.permute.xlu0 %4243 }
 0x1a8   : > { %4152 = vmatpush1.bf16.msra.mxu0 %v4143_v28  ;;  %v4248_v37 = vsel %vm4245_vm9, %v4242_v33, %v4244_v36  ;;  %4183 = vmatprep.mubr.bf16.mxu0 %v6344_v1  ;;  %v5828_v33 = vld [vmem:[%s7465_s1 + $0x9c] sm:$0xf] }
 0x1a9   : > { %6191 = vmatmul.mubr.msk.bf16.vlgmr.msra.gmra.mrb[144].mxu1 %vm221_vm2, %v5816_v32  ;;  %v4259_v38 = vsel %vm225_vm1, %v4248_v37, 0  ;;  %5821 = vmatprep.subr.msk.bf16.mxu0 %vm225_vm1, %v4247_v34 }
 0x1aa   : > { %v1215_v40 = vpop.f32.mrb[36].mxu0  ;;  %v4348_v41 = vpop.permute.xlu1 %4347  ;;  %6195 = vmatpush3.bf16.msra.mxu1 %v4259_v38  ;;  %6196 = vmatprep.mubr.msk.bf16.mxu1 %vm6343_vm0, %v6342_v0 }
 0x1ab   : > { %v1262_v42 = vadd.f32 %v1215_v40, %v1155_v22  ;;  %v1217_v43 = vpop.f32.mrb[37].mxu0  ;;  %v4350_v44 = vpop.permute.xlu0 %4349  ;;  %6200 = vmatprep.subr.bf16.mxu1 %v6342_v0 }
 0x1ac   : > { %v1263_v45 = vadd.f32 %v1217_v43, %v1156_v25  ;;  %v1219_v46 = vpop.f32.mrb[38].mxu0  ;;  %v1363_v47 = vpop.f32.mrb[40].mxu1  ;;  %v4356_v60 = vsel %vm4355_vm10, %v4348_v41, %v4350_v44 }
 0x1ad   : > { %v1220_v49 = vpop.f32.mrb[39].mxu0  ;;  %v1371_v50 = vadd.f32 %v1363_v47, %v1264_v30  ;;  %v6036_v51 = vpop.f32.mrb[41].mxu1  ;;  %v4363_v11 = vsel %vm225_vm1, %v4356_v60, 0 }
 0x1ae   : > { %v4352_v53 = vpop.permute.xlu1 %4351  ;;  %v1366_v54 = vpop.f32.mrb[42].mxu1 }
 0x1af   : > { %5818 = vmatmul.mubr.msk.bf16.vlgmr.msra.gmra.mrb[144].mxu0 %vm221_vm2, %v5816_v32  ;;  %v4357_v55 = vsel %vm4355_vm10, %v4350_v44, %v4352_v53  ;;  %v6037_v56 = vpop.f32.mrb[43].mxu1  ;;  %v4354_v57 = vpop.permute.xlu0 %4353 }
 0x1b0   : > { %4262 = vmatpush1.bf16.msra.mxu0 %v4253_v48  ;;  %v4358_v58 = vsel %vm4355_vm10, %v4352_v53, %v4354_v57  ;;  %4293 = vmatprep.mubr.bf16.mxu0 %v6344_v1  ;;  %v5832_v53 = vld [vmem:[%s7465_s1 + $0xa0] sm:$0xf] }
 0x1b1   : > { %6197 = vmatmul.mubr.msk.bf16.vlgmr.msra.gmra.mrb[148].mxu1 %vm221_vm2, %v5820_v52  ;;  %v4369_v59 = vsel %vm225_vm1, %v4358_v58, 0  ;;  %5825 = vmatprep.subr.msk.bf16.mxu0 %vm225_vm1, %v4357_v55 }
 0x1b2   : > { %v1322_v61 = vpop.f32.mrb[40].mxu0  ;;  %v4458_v62 = vpop.permute.xlu1 %4457  ;;  %6201 = vmatpush3.bf16.msra.mxu1 %v4369_v59  ;;  %6202 = vmatprep.mubr.msk.bf16.mxu1 %vm6343_vm0, %v6342_v0 }
 0x1b3   : > { %v1369_v63 = vadd.f32 %v1322_v61, %v1262_v42  ;;  %v1324_v2 = vpop.f32.mrb[41].mxu0  ;;  %v4460_v3 = vpop.permute.xlu0 %4459  ;;  %6206 = vmatprep.subr.bf16.mxu1 %v6342_v0 }
 0x1b4   : > { %v1370_v6 = vadd.f32 %v1324_v2, %v1263_v45  ;;  %v1326_v9 = vpop.f32.mrb[42].mxu0  ;;  %v1470_v10 = vpop.f32.mrb[44].mxu1  ;;  %v4466_v21 = vsel %vm4465_vm11, %v4458_v62, %v4460_v3 }
 0x1b5   : > { %v1327_v12 = vpop.f32.mrb[43].mxu0  ;;  %v1478_v13 = vadd.f32 %v1470_v10, %v1371_v50  ;;  %v6042_v14 = vpop.f32.mrb[45].mxu1  ;;  %v4473_v29 = vsel %vm225_vm1, %v4466_v21, 0 }
 0x1b6   : > { %v4462_v4 = vpop.permute.xlu1 %4461  ;;  %v1473_v16 = vpop.f32.mrb[46].mxu1 }
 0x1b7   : > { %5822 = vmatmul.mubr.msk.bf16.vlgmr.msra.gmra.mrb[148].mxu0 %vm221_vm2, %v5820_v52  ;;  %v4467_v17 = vsel %vm4465_vm11, %v4460_v3, %v4462_v4  ;;  %v6043_v7 = vpop.f32.mrb[47].mxu1  ;;  %v4464_v18 = vpop.permute.xlu0 %4463 }
 0x1b8   : > { %4372 = vmatpush1.bf16.msra.mxu0 %v4363_v11  ;;  %v4468_v19 = vsel %vm4465_vm11, %v4462_v4, %v4464_v18  ;;  %4403 = vmatprep.mubr.bf16.mxu0 %v6344_v1  ;;  %v5836_v4 = vld [vmem:[%s7465_s1 + $0xa4] sm:$0xf] }
 0x1b9   : > { %6203 = vmatmul.mubr.msk.bf16.vlgmr.msra.gmra.mrb[152].mxu1 %vm221_vm2, %v5824_v15  ;;  %v4479_v8 = vsel %vm225_vm1, %v4468_v19, 0  ;;  %5829 = vmatprep.subr.msk.bf16.mxu0 %vm225_vm1, %v4467_v17 }
 0x1ba   : > { %v1429_v5 = vpop.f32.mrb[44].mxu0  ;;  %v4568_v22 = vpop.permute.xlu1 %4567  ;;  %6207 = vmatpush3.bf16.msra.mxu1 %v4479_v8  ;;  %6208 = vmatprep.mubr.msk.bf16.mxu1 %vm6343_vm0, %v6342_v0 }
 0x1bb   : > { %v1476_v23 = vadd.f32 %v1429_v5, %v1369_v63  ;;  %v1431_v24 = vpop.f32.mrb[45].mxu0  ;;  %v4570_v25 = vpop.permute.xlu0 %4569  ;;  %6212 = vmatprep.subr.bf16.mxu1 %v6342_v0 }
 0x1bc   : > { %v1477_v26 = vadd.f32 %v1431_v24, %v1370_v6  ;;  %v1433_v27 = vpop.f32.mrb[46].mxu0  ;;  %v1577_v28 = vpop.f32.mrb[48].mxu1  ;;  %v4576_v40 = vsel %vm4575_vm12, %v4568_v22, %v4570_v25 }
 0x1bd   : > { %v1434_v30 = vpop.f32.mrb[47].mxu0  ;;  %v1585_v31 = vadd.f32 %v1577_v28, %v1478_v13  ;;  %v6048_v32 = vpop.f32.mrb[49].mxu1  ;;  %v4583_v49 = vsel %vm225_vm1, %v4576_v40, 0 }
 0x1be   : > { %v4572_v20 = vpop.permute.xlu1 %4571  ;;  %v1580_v34 = vpop.f32.mrb[50].mxu1  ;;  %v5840_v32 = vld [vmem:[%s7465_s1 + $0xa8] sm:$0xf] }
 0x1bf   : > { %5826 = vmatmul.mubr.msk.bf16.vlgmr.msra.gmra.mrb[152].mxu0 %vm221_vm2, %v5824_v15  ;;  %v4577_v35 = vsel %vm4575_vm12, %v4570_v25, %v4572_v20  ;;  %v6049_v36 = vpop.f32.mrb[51].mxu1  ;;  %v4574_v37 = vpop.permute.xlu0 %4573 }
 0x1c0   : > { %4482 = vmatpush1.bf16.msra.mxu0 %v4473_v29  ;;  %v4578_v38 = vsel %vm4575_vm12, %v4572_v20, %v4574_v37  ;;  %4513 = vmatprep.mubr.bf16.mxu0 %v6344_v1 }
 0x1c1   : > { %6209 = vmatmul.mubr.msk.bf16.vlgmr.msra.gmra.mrb[156].mxu1 %vm221_vm2, %v5828_v33  ;;  %v4589_v39 = vsel %vm225_vm1, %v4578_v38, 0  ;;  %5833 = vmatprep.subr.msk.bf16.mxu0 %vm225_vm1, %v4577_v35 }
 0x1c2   : > { %v1536_v41 = vpop.f32.mrb[48].mxu0  ;;  %v4678_v42 = vpop.permute.xlu1 %4677  ;;  %6213 = vmatpush3.bf16.msra.mxu1 %v4589_v39  ;;  %6214 = vmatprep.mubr.msk.bf16.mxu1 %vm6343_vm0, %v6342_v0 }
 0x1c3   : > { %v1583_v43 = vadd.f32 %v1536_v41, %v1476_v23  ;;  %v1538_v44 = vpop.f32.mrb[49].mxu0  ;;  %v4680_v45 = vpop.permute.xlu0 %4679  ;;  %6218 = vmatprep.subr.bf16.mxu1 %v6342_v0 }
 0x1c4   : > { %v1584_v46 = vadd.f32 %v1538_v44, %v1477_v26  ;;  %v1540_v47 = vpop.f32.mrb[50].mxu0  ;;  %v1684_v48 = vpop.f32.mrb[52].mxu1  ;;  %v4686_v61 = vsel %vm4685_vm13, %v4678_v42, %v4680_v45 }
 0x1c5   : > { %v1541_v50 = vpop.f32.mrb[51].mxu0  ;;  %v1692_v51 = vadd.f32 %v1684_v48, %v1585_v31  ;;  %v6054_v52 = vpop.f32.mrb[53].mxu1  ;;  %v4693_v12 = vsel %vm225_vm1, %v4686_v61, 0 }
 0x1c6   : > { %v4682_v54 = vpop.permute.xlu1 %4681  ;;  %v1687_v55 = vpop.f32.mrb[54].mxu1  ;;  %v5541_v50 = vld [vmem:[%s7466_s2] sm:$0xff] }
 0x1c7   : > { %5830 = vmatmul.mubr.msk.bf16.vlgmr.msra.gmra.mrb[156].mxu0 %vm221_vm2, %v5828_v33  ;;  %v4687_v56 = vsel %vm4685_vm13, %v4680_v45, %v4682_v54  ;;  %v6055_v57 = vpop.f32.mrb[55].mxu1  ;;  %v4684_v58 = vpop.permute.xlu0 %4683  ;;  %5544 = vperm.xlu0 %6323, %v5541_v50  }
 0x1c8   : > { %4592 = vmatpush1.bf16.msra.mxu0 %v4583_v49  ;;  %v4688_v59 = vsel %vm4685_vm13, %v4682_v54, %v4684_v58  ;;  %4623 = vmatprep.mubr.bf16.mxu0 %v6344_v1 }
 0x1c9   : > { %6215 = vmatmul.mubr.msk.bf16.vlgmr.msra.gmra.mrb[160].mxu1 %vm221_vm2, %v5832_v53  ;;  %v4699_v60 = vsel %vm225_vm1, %v4688_v59, 0  ;;  %5837 = vmatprep.subr.msk.bf16.mxu0 %vm225_vm1, %v4687_v56 }
 0x1ca   : > { %v1643_v62 = vpop.f32.mrb[52].mxu0  ;;  %6219 = vmatpush3.bf16.msra.mxu1 %v4699_v60  ;;  %v4798_v63 = vpop.permute.xlu1 %4797  ;;  %6220 = vmatprep.mubr.msk.bf16.mxu1 %vm6343_vm0, %v6342_v0 }
 0x1cb   : > { %v1690_v2 = vadd.f32 %v1643_v62, %v1583_v43  ;;  %v1645_v3 = vpop.f32.mrb[53].mxu0  ;;  %v4800_v6 = vpop.permute.xlu0 %4799  ;;  %6224 = vmatprep.subr.bf16.mxu1 %v6342_v0 }
 0x1cc   : > { %v1691_v9 = vadd.f32 %v1645_v3, %v1584_v46  ;;  %v1647_v10 = vpop.f32.mrb[54].mxu0  ;;  %v1806_v11 = vpop.f32.mrb[56].mxu1  ;;  %v4803_v21 = vsel %vm631_vm6, %v4798_v63, %v4800_v6 }
 0x1cd   : > { %v1648_v13 = vpop.f32.mrb[55].mxu0  ;;  %v1814_v14 = vadd.f32 %v1806_v11, %v1692_v51  ;;  %v6060_v15 = vpop.f32.mrb[57].mxu1  ;;  %v4809_v28 = vsel %vm225_vm1, %v4803_v21, 0  ;;  %v5847_v51 = vld [vmem:[%s7465_s1 + $0xac] sm:$0xf] }
 0x1ce   : > { %v1809_v16 = vpop.f32.mrb[58].mxu1  ;;  %v4802_v17 = vpop.permute.xlu1 %4801 }
 0x1cf   : > { %5834 = vmatmul.mubr.msk.bf16.vlgmr.msra.gmra.mrb[160].mxu0 %vm221_vm2, %v5832_v53  ;;  %v4804_v7 = vsel %vm631_vm6, %v4800_v6, %v4802_v17  ;;  %v4815_v18 = vsel %vm225_vm1, %v4802_v17, 0  ;;  %v6061_v19 = vpop.f32.mrb[59].mxu1  ;;  %v4904_v8 = vpop.permute.xlu0 %4903  ;;  %vm5121_vm6 = vcmask 990208  }
 0x1d0   : > { %4702 = vmatpush1.bf16.msra.mxu0 %v4693_v12  ;;  %4733 = vmatprep.mubr.bf16.mxu0 %v6344_v1  ;;  %v5851_v12 = vld [vmem:[%s7465_s1 + $0xb0] sm:$0xf] }
 0x1d1   : > { %6221 = vmatmul.mubr.msk.bf16.vlgmr.msra.gmra.mrb[164].mxu1 %vm221_vm2, %v5836_v4  ;;  %5844 = vmatprep.subr.msk.bf16.mxu0 %vm225_vm1, %v4804_v7 }
 0x1d2   : > { %v1765_v5 = vpop.f32.mrb[56].mxu0  ;;  %6225 = vmatpush3.bf16.msra.mxu1 %v4815_v18  ;;  %v4906_v22 = vpop.permute.xlu1 %4905  ;;  %6226 = vmatprep.mubr.msk.bf16.mxu1 %vm6343_vm0, %v6342_v0 }
 0x1d3   : > { %v1812_v23 = vadd.f32 %v1765_v5, %v1690_v2  ;;  %v1767_v24 = vpop.f32.mrb[57].mxu0  ;;  %6230 = vmatprep.subr.bf16.mxu1 %v6342_v0  ;;  %v4909_v38 = vsel %vm738_vm7, %v4904_v8, %v4906_v22 }
 0x1d4   : > { %v1813_v25 = vadd.f32 %v1767_v24, %v1691_v9  ;;  %v1769_v26 = vpop.f32.mrb[58].mxu0  ;;  %v1916_v27 = vpop.f32.mrb[60].mxu1  ;;  %v4915_v46 = vsel %vm225_vm1, %v4909_v38, 0 }
 0x1d5   : > { %v1770_v29 = vpop.f32.mrb[59].mxu0  ;;  %v1924_v30 = vadd.f32 %v1916_v27, %v1814_v14  ;;  %v6066_v31 = vpop.f32.mrb[61].mxu1 }
 0x1d6   : > { %v1919_v33 = vpop.f32.mrb[62].mxu1  ;;  %v4908_v20 = vpop.permute.xlu0 %4907 }
 0x1d7   : > { %5838 = vmatmul.mubr.msk.bf16.vlgmr.msra.gmra.mrb[164].mxu0 %vm221_vm2, %v5836_v4  ;;  %v6067_v34 = vpop.f32.mrb[63].mxu1  ;;  %v4910_v35 = vsel %vm738_vm7, %v4906_v22, %v4908_v20  ;;  %v4921_v36 = vsel %vm225_vm1, %v4908_v20, 0  ;;  %v5010_v37 = vpop.permute.xlu1 %5009  ;;  %vm5228_vm7 = vcmask 982016  }
 0x1d8   : > { %4818 = vmatpush1.bf16.msra.mxu0 %v4809_v28  ;;  %4849 = vmatprep.mubr.bf16.mxu0 %v6344_v1  ;;  %v5855_v28 = vld [vmem:[%s7465_s1 + $0xb4] sm:$0xf] }
 0x1d9   : > { %6227 = vmatmul.mubr.msk.bf16.vlgmr.msra.gmra.mrb[168].mxu1 %vm221_vm2, %v5840_v32  ;;  %5848 = vmatprep.subr.msk.bf16.mxu0 %vm225_vm1, %v4910_v35 }
 0x1da   : > { %v1875_v39 = vpop.f32.mrb[60].mxu0  ;;  %6231 = vmatpush3.bf16.msra.mxu1 %v4921_v36  ;;  %6232 = vmatprep.mubr.msk.bf16.mxu1 %vm6343_vm0, %v6342_v0  ;;  %v5012_v40 = vpop.permute.xlu0 %5011 }
 0x1db   : > { %v1922_v41 = vadd.f32 %v1875_v39, %v1812_v23  ;;  %v1877_v42 = vpop.f32.mrb[61].mxu0  ;;  %6236 = vmatprep.subr.bf16.mxu1 %v6342_v0  ;;  %v5015_v58 = vsel %vm845_vm8, %v5010_v37, %v5012_v40 }
 0x1dc   : > { %v1923_v43 = vadd.f32 %v1877_v42, %v1813_v25  ;;  %v1879_v44 = vpop.f32.mrb[62].mxu0  ;;  %v2026_v45 = vpop.f32.mrb[64].mxu1  ;;  %v5021_v6 = vsel %vm225_vm1, %v5015_v58, 0 }
 0x1dd   : > { %v1880_v47 = vpop.f32.mrb[63].mxu0  ;;  %v2034_v48 = vadd.f32 %v2026_v45, %v1924_v30  ;;  %v6072_v49 = vpop.f32.mrb[65].mxu1 }
 0x1de   : > { %v2029_v52 = vpop.f32.mrb[66].mxu1  ;;  %v5014_v53 = vpop.permute.xlu1 %5013 }
 0x1df   : > { %5845 = vmatmul.mubr.msk.bf16.vlgmr.msra.gmra.mrb[168].mxu0 %vm221_vm2, %v5840_v32  ;;  %v5016_v54 = vsel %vm845_vm8, %v5012_v40, %v5014_v53  ;;  %v5027_v55 = vsel %vm225_vm1, %v5014_v53, 0  ;;  %v6073_v56 = vpop.f32.mrb[67].mxu1  ;;  %v5116_v57 = vpop.permute.xlu0 %5115  ;;  %vm5335_vm8 = vcmask 973824  }
 0x1e0   : > { %4924 = vmatpush1.bf16.msra.mxu0 %v4915_v46  ;;  %4955 = vmatprep.mubr.bf16.mxu0 %v6344_v1  ;;  %v5859_v46 = vld [vmem:[%s7465_s1 + $0xb8] sm:$0xf] }
 0x1e1   : > { %6233 = vmatmul.mubr.msk.bf16.vlgmr.msra.gmra.mrb[172].mxu1 %vm221_vm2, %v5847_v51  ;;  %5852 = vmatprep.subr.msk.bf16.mxu0 %vm225_vm1, %v5016_v54 }
 0x1e2   : > { %v1985_v59 = vpop.f32.mrb[64].mxu0  ;;  %6237 = vmatpush3.bf16.msra.mxu1 %v5027_v55  ;;  %v5118_v60 = vpop.permute.xlu1 %5117  ;;  %6238 = vmatprep.mubr.msk.bf16.mxu1 %vm6343_vm0, %v6342_v0 }
 0x1e3   : > { %v2032_v61 = vadd.f32 %v1985_v59, %v1922_v41  ;;  %v1987_v62 = vpop.f32.mrb[65].mxu0  ;;  %6242 = vmatprep.subr.bf16.mxu1 %v6342_v0  ;;  %v5122_v7 = vsel %vm5121_vm6, %v5116_v57, %v5118_v60 }
 0x1e4   : > { %v2033_v63 = vadd.f32 %v1987_v62, %v1923_v43  ;;  %v1989_v2 = vpop.f32.mrb[66].mxu0  ;;  %v2136_v3 = vpop.f32.mrb[68].mxu1  ;;  %v5128_v24 = vsel %vm225_vm1, %v5122_v7, 0 }
 0x1e5   : > { %v1990_v9 = vpop.f32.mrb[67].mxu0  ;;  %v2144_v10 = vadd.f32 %v2136_v3, %v2034_v48  ;;  %v6078_v11 = vpop.f32.mrb[69].mxu1  ;;  %v5863_v3 = vld [vmem:[%s7465_s1 + $0xbc] sm:$0xf] }
 0x1e6   : > { %v2139_v13 = vpop.f32.mrb[70].mxu1  ;;  %v5120_v14 = vpop.permute.xlu0 %5119 }
 0x1e7   : > { %5849 = vmatmul.mubr.msk.bf16.vlgmr.msra.gmra.mrb[172].mxu0 %vm221_vm2, %v5847_v51  ;;  %v6079_v15 = vpop.f32.mrb[71].mxu1  ;;  %v5123_v4 = vsel %vm5121_vm6, %v5118_v60, %v5120_v14  ;;  %v5134_v16 = vsel %vm225_vm1, %v5120_v14, 0  ;;  %v5223_v17 = vpop.permute.xlu1 %5222 }
 0x1e8   : > { %5030 = vmatpush1.bf16.msra.mxu0 %v5021_v6  ;;  %5061 = vmatprep.mubr.bf16.mxu0 %v6344_v1 }
 0x1e9   : > { %6239 = vmatmul.mubr.msk.bf16.vlgmr.msra.gmra.mrb[176].mxu1 %vm221_vm2, %v5851_v12  ;;  %5856 = vmatprep.subr.msk.bf16.mxu0 %vm225_vm1, %v5123_v4 }
 0x1ea   : > { %v2095_v18 = vpop.f32.mrb[68].mxu0  ;;  %6243 = vmatpush3.bf16.msra.mxu1 %v5134_v16  ;;  %6244 = vmatprep.mubr.msk.bf16.mxu1 %vm6343_vm0, %v6342_v0  ;;  %v5225_v19 = vpop.permute.xlu0 %5224 }
 0x1eb   : > { %v2142_v8 = vadd.f32 %v2095_v18, %v2032_v61  ;;  %v2097_v21 = vpop.f32.mrb[69].mxu0  ;;  %6248 = vmatprep.subr.bf16.mxu1 %v6342_v0  ;;  %v5229_v34 = vsel %vm5228_vm7, %v5223_v17, %v5225_v19 }
 0x1ec   : > { %v2143_v5 = vadd.f32 %v2097_v21, %v2033_v63  ;;  %v2099_v22 = vpop.f32.mrb[70].mxu0  ;;  %v2246_v23 = vpop.f32.mrb[72].mxu1  ;;  %v5235_v42 = vsel %vm225_vm1, %v5229_v34, 0 }
 0x1ed   : > { %v2100_v25 = vpop.f32.mrb[71].mxu0  ;;  %v2254_v26 = vadd.f32 %v2246_v23, %v2144_v10  ;;  %v6084_v27 = vpop.f32.mrb[73].mxu1 }
 0x1ee   : > { %v2249_v29 = vpop.f32.mrb[74].mxu1  ;;  %v5227_v30 = vpop.permute.xlu1 %5226 }
 0x1ef   : > { %5853 = vmatmul.mubr.msk.bf16.vlgmr.msra.gmra.mrb[176].mxu0 %vm221_vm2, %v5851_v12  ;;  %v5230_v31 = vsel %vm5228_vm7, %v5225_v19, %v5227_v30  ;;  %v5241_v32 = vsel %vm225_vm1, %v5227_v30, 0  ;;  %v6085_v33 = vpop.f32.mrb[75].mxu1  ;;  %v5330_v20 = vpop.permute.xlu0 %5329 }
 0x1f0   : > { %5137 = vmatpush1.bf16.msra.mxu0 %v5128_v24  ;;  %5168 = vmatprep.mubr.bf16.mxu0 %v6344_v1 }
 0x1f1   : > { %6245 = vmatmul.mubr.msk.bf16.vlgmr.msra.gmra.mrb[180].mxu1 %vm221_vm2, %v5855_v28  ;;  %5860 = vmatprep.subr.msk.bf16.mxu0 %vm225_vm1, %v5230_v31 }
 0x1f2   : > { %v2205_v35 = vpop.f32.mrb[72].mxu0  ;;  %6249 = vmatpush3.bf16.msra.mxu1 %v5241_v32  ;;  %v5332_v36 = vpop.permute.xlu1 %5331  ;;  %6250 = vmatprep.mubr.msk.bf16.mxu1 %vm6343_vm0, %v6342_v0 }
 0x1f3   : > { %v2252_v37 = vadd.f32 %v2205_v35, %v2142_v8  ;;  %v2207_v38 = vpop.f32.mrb[73].mxu0  ;;  %6254 = vmatprep.subr.bf16.mxu1 %v6342_v0  ;;  %v5336_v53 = vsel %vm5335_vm8, %v5330_v20, %v5332_v36 }
 0x1f4   : > { %v2253_v39 = vadd.f32 %v2207_v38, %v2143_v5  ;;  %v2209_v40 = vpop.f32.mrb[74].mxu0  ;;  %v2356_v41 = vpop.f32.mrb[76].mxu1  ;;  %v5342_v61 = vsel %vm225_vm1, %v5336_v53, 0  ;;  %v5867_v5 = vld [vmem:[%s7465_s1 + $0xc0] sm:$0xf] }
 0x1f5   : > { %v2210_v43 = vpop.f32.mrb[75].mxu0  ;;  %v2364_v44 = vadd.f32 %v2356_v41, %v2254_v26  ;;  %v6090_v45 = vpop.f32.mrb[77].mxu1 }
 0x1f6   : > { %v2359_v47 = vpop.f32.mrb[78].mxu1  ;;  %v5334_v48 = vpop.permute.xlu0 %5333 }
 0x1f7   : > { %5857 = vmatmul.mubr.msk.bf16.vlgmr.msra.gmra.mrb[180].mxu0 %vm221_vm2, %v5855_v28  ;;  %v6091_v49 = vpop.f32.mrb[79].mxu1  ;;  %v5337_v50 = vsel %vm5335_vm8, %v5332_v36, %v5334_v48  ;;  %v5348_v51 = vsel %vm225_vm1, %v5334_v48, 0  ;;  %v5437_v52 = vpop.permute.xlu1 %5436 }
 0x1f8   : > { %5244 = vmatpush1.bf16.msra.mxu0 %v5235_v42  ;;  %5275 = vmatprep.mubr.bf16.mxu0 %v6344_v1 }
 0x1f9   : > { %6251 = vmatmul.mubr.msk.bf16.vlgmr.msra.gmra.mrb[184].mxu1 %vm221_vm2, %v5859_v46  ;;  %5864 = vmatprep.subr.msk.bf16.mxu0 %vm225_vm1, %v5337_v50 }
 0x1fa   : > { %v2315_v54 = vpop.f32.mrb[76].mxu0  ;;  %6255 = vmatpush3.bf16.msra.mxu1 %v5348_v51  ;;  %6256 = vmatprep.mubr.msk.bf16.mxu1 %vm6343_vm0, %v6342_v0  ;;  %v5439_v57 = vpop.permute.xlu0 %5438 }
 0x1fb   : > { %v2362_v55 = vadd.f32 %v2315_v54, %v2252_v37  ;;  %v2317_v56 = vpop.f32.mrb[77].mxu0  ;;  %6260 = vmatprep.subr.bf16.mxu1 %v6342_v0  ;;  %v5443_v13 = vsel %vm5442_vm14, %v5437_v52, %v5439_v57 }
 0x1fc   : > { %v2363_v58 = vadd.f32 %v2317_v56, %v2253_v39  ;;  %v2319_v59 = vpop.f32.mrb[78].mxu0  ;;  %v2466_v60 = vpop.f32.mrb[80].mxu1  ;;  %v5449_v18 = vsel %vm225_vm1, %v5443_v13, 0 }
 0x1fd   : > { %v2320_v62 = vpop.f32.mrb[79].mxu0  ;;  %v2474_v63 = vadd.f32 %v2466_v60, %v2364_v44  ;;  %v6096_v2 = vpop.f32.mrb[81].mxu1 }
 0x1fe   : > { %v2469_v6 = vpop.f32.mrb[82].mxu1  ;;  %v5441_v9 = vpop.permute.xlu1 %5440 }
 0x1ff   : > { %5861 = vmatmul.mubr.msk.bf16.vlgmr.msra.gmra.mrb[184].mxu0 %vm221_vm2, %v5859_v46  ;;  %v5444_v10 = vsel %vm5442_vm14, %v5439_v57, %v5441_v9  ;;  %v5455_v11 = vsel %vm225_vm1, %v5441_v9, 0  ;;  %v6097_v12 = vpop.f32.mrb[83].mxu1 }
 0x200   : > { %5351 = vmatpush1.bf16.msra.mxu0 %v5342_v61  ;;  %5382 = vmatprep.mubr.bf16.mxu0 %v6344_v1 }
 0x201   : > { %6257 = vmatmul.mubr.msk.bf16.vlgmr.msra.gmra.mrb[188].mxu1 %vm221_vm2, %v5863_v3  ;;  %5868 = vmatprep.subr.msk.bf16.mxu0 %vm225_vm1, %v5444_v10 }
 0x202   : > { %v2425_v14 = vpop.f32.mrb[80].mxu0  ;;  %6261 = vmatpush3.bf16.msra.mxu1 %v5455_v11  ;;  %6262 = vmatprep.mubr.msk.bf16.mxu1 %vm6343_vm0, %v6342_v0  ;;  %vm5571_vm0 = vcmask 785408  }
 0x203   : > { %v2472_v15 = vadd.f32 %v2425_v14, %v2362_v55  ;;  %v2427_v4 = vpop.f32.mrb[81].mxu0 }
 0x204   : > { %v2473_v16 = vadd.f32 %v2427_v4, %v2363_v58  ;;  %v2429_v17 = vpop.f32.mrb[82].mxu0  ;;  %v2576_v7 = vpop.f32.mrb[84].mxu1 }
 0x205   : > { %v2430_v19 = vpop.f32.mrb[83].mxu0  ;;  %v2584_v8 = vadd.f32 %v2576_v7, %v2474_v63  ;;  %v6102_v21 = vpop.f32.mrb[85].mxu1 }
 0x206   : > { %v2579_v22 = vpop.f32.mrb[86].mxu1 }
 0x207   : > { %5865 = vmatmul.mubr.msk.bf16.vlgmr.msra.gmra.mrb[188].mxu0 %vm221_vm2, %v5863_v3  ;;  %v6103_v23 = vpop.f32.mrb[87].mxu1 }
 0x208   : > { %5458 = vmatpush1.bf16.msra.mxu0 %v5449_v18  ;;  %5489 = vmatprep.mubr.bf16.mxu0 %v6344_v1 }
 0x209   : > { %6263 = vmatmul.mubr.msk.bf16.vlgmr.msra.gmra.mrb[192].mxu1 %vm221_vm2, %v5867_v5 }
 0x20a   : > { %v2535_v0 = vpop.f32.mrb[84].mxu0 }
 0x20b   : > { %v2582_v24 = vadd.f32 %v2535_v0, %v2472_v15  ;;  %v2537_v25 = vpop.f32.mrb[85].mxu0 }
 0x20c   : > { %v2583_v26 = vadd.f32 %v2537_v25, %v2473_v16  ;;  %v2539_v27 = vpop.f32.mrb[86].mxu0  ;;  %v2686_v28 = vpop.f32.mrb[88].mxu1 }
 0x20d   : > { %v2540_v29 = vpop.f32.mrb[87].mxu0  ;;  %v2694_v30 = vadd.f32 %v2686_v28, %v2584_v8  ;;  %v6108_v31 = vpop.f32.mrb[89].mxu1 }
 0x20e   : > { %v2689_v32 = vpop.f32.mrb[90].mxu1 }
 0x20f   : > { %5869 = vmatmul.mubr.msk.bf16.vlgmr.msra.gmra.mrb[192].mxu0 %vm221_vm2, %v5867_v5  ;;  %v6109_v33 = vpop.f32.mrb[91].mxu1 }
 0x212   : > { %v2645_v20 = vpop.f32.mrb[88].mxu0 }
 0x213   : > { %v2692_v34 = vadd.f32 %v2645_v20, %v2582_v24  ;;  %v2647_v35 = vpop.f32.mrb[89].mxu0 }
 0x214   : > { %v2693_v36 = vadd.f32 %v2647_v35, %v2583_v26  ;;  %v2649_v1 = vpop.f32.mrb[90].mxu0  ;;  %v2796_v37 = vpop.f32.mrb[92].mxu1 }
 0x215   : > { %v2650_v38 = vpop.f32.mrb[91].mxu0  ;;  %v2804_v39 = vadd.f32 %v2796_v37, %v2694_v30  ;;  %v6114_v40 = vpop.f32.mrb[93].mxu1 }
 0x216   : > { %v2799_v41 = vpop.f32.mrb[94].mxu1 }
 0x217   : > { %v6115_v42 = vpop.f32.mrb[95].mxu1 }
 0x21a   : > { %v2755_v43 = vpop.f32.mrb[92].mxu0 }
 0x21b   : > { %v2802_v44 = vadd.f32 %v2755_v43, %v2692_v34  ;;  %v2757_v45 = vpop.f32.mrb[93].mxu0 }
 0x21c   : > { %v2803_v46 = vadd.f32 %v2757_v45, %v2693_v36  ;;  %v2759_v47 = vpop.f32.mrb[94].mxu0  ;;  %v2906_v48 = vpop.f32.mrb[96].mxu1 }
 0x21d   : > { %v2760_v49 = vpop.f32.mrb[95].mxu0  ;;  %v2914_v50 = vadd.f32 %v2906_v48, %v2804_v39  ;;  %v6120_v51 = vpop.f32.mrb[97].mxu1 }
 0x21e   : > { %v2909_v52 = vpop.f32.mrb[98].mxu1 }
 0x21f   : > { %v6121_v53 = vpop.f32.mrb[99].mxu1 }
 0x222   : > { %v2865_v54 = vpop.f32.mrb[96].mxu0 }
 0x223   : > { %v2912_v55 = vadd.f32 %v2865_v54, %v2802_v44  ;;  %v2867_v56 = vpop.f32.mrb[97].mxu0 }
 0x224   : > { %v2913_v57 = vadd.f32 %v2867_v56, %v2803_v46  ;;  %v2869_v58 = vpop.f32.mrb[98].mxu0  ;;  %v3016_v59 = vpop.f32.mrb[100].mxu1 }
 0x225   : > { %v2870_v60 = vpop.f32.mrb[99].mxu0  ;;  %v3024_v61 = vadd.f32 %v3016_v59, %v2914_v50  ;;  %v6126_v62 = vpop.f32.mrb[101].mxu1 }
 0x226   : > { %v3019_v63 = vpop.f32.mrb[102].mxu1 }
 0x227   : > { %v6127_v2 = vpop.f32.mrb[103].mxu1 }
 0x22a   : > { %v2975_v3 = vpop.f32.mrb[100].mxu0 }
 0x22b   : > { %v3022_v6 = vadd.f32 %v2975_v3, %v2912_v55  ;;  %v2977_v9 = vpop.f32.mrb[101].mxu0 }
 0x22c   : > { %v3023_v10 = vadd.f32 %v2977_v9, %v2913_v57  ;;  %v2979_v11 = vpop.f32.mrb[102].mxu0  ;;  %v3126_v12 = vpop.f32.mrb[104].mxu1 }
 0x22d   : > { %v2980_v13 = vpop.f32.mrb[103].mxu0  ;;  %v3134_v14 = vadd.f32 %v3126_v12, %v3024_v61  ;;  %v6132_v15 = vpop.f32.mrb[105].mxu1 }
 0x22e   : > { %v3129_v4 = vpop.f32.mrb[106].mxu1 }
 0x22f   : > { %v6133_v16 = vpop.f32.mrb[107].mxu1 }
 0x232   : > { %v3085_v17 = vpop.f32.mrb[104].mxu0 }
 0x233   : > { %v3132_v7 = vadd.f32 %v3085_v17, %v3022_v6  ;;  %v3087_v18 = vpop.f32.mrb[105].mxu0 }
 0x234   : > { %v3133_v19 = vadd.f32 %v3087_v18, %v3023_v10  ;;  %v3089_v8 = vpop.f32.mrb[106].mxu0  ;;  %v3236_v21 = vpop.f32.mrb[108].mxu1 }
 0x235   : > { %v3090_v5 = vpop.f32.mrb[107].mxu0  ;;  %v3244_v22 = vadd.f32 %v3236_v21, %v3134_v14  ;;  %v6138_v23 = vpop.f32.mrb[109].mxu1 }
 0x236   : > { %v3239_v0 = vpop.f32.mrb[110].mxu1 }
 0x237   : > { %v6139_v24 = vpop.f32.mrb[111].mxu1 }
 0x23a   : > { %v3195_v25 = vpop.f32.mrb[108].mxu0 }
 0x23b   : > { %v3242_v26 = vadd.f32 %v3195_v25, %v3132_v7  ;;  %v3197_v27 = vpop.f32.mrb[109].mxu0 }
 0x23c   : > { %v3243_v28 = vadd.f32 %v3197_v27, %v3133_v19  ;;  %v3199_v29 = vpop.f32.mrb[110].mxu0  ;;  %v3346_v30 = vpop.f32.mrb[112].mxu1 }
 0x23d   : > { %v3200_v31 = vpop.f32.mrb[111].mxu0  ;;  %v3354_v32 = vadd.f32 %v3346_v30, %v3244_v22  ;;  %v6144_v33 = vpop.f32.mrb[113].mxu1 }
 0x23e   : > { %v3349_v20 = vpop.f32.mrb[114].mxu1 }
 0x23f   : > { %v6145_v34 = vpop.f32.mrb[115].mxu1 }
 0x242   : > { %v3305_v35 = vpop.f32.mrb[112].mxu0 }
 0x243   : > { %v3352_v36 = vadd.f32 %v3305_v35, %v3242_v26  ;;  %v3307_v1 = vpop.f32.mrb[113].mxu0 }
 0x244   : > { %v3353_v37 = vadd.f32 %v3307_v1, %v3243_v28  ;;  %v3309_v38 = vpop.f32.mrb[114].mxu0  ;;  %v3456_v39 = vpop.f32.mrb[116].mxu1 }
 0x245   : > { %v3310_v40 = vpop.f32.mrb[115].mxu0  ;;  %v3464_v41 = vadd.f32 %v3456_v39, %v3354_v32  ;;  %v6150_v42 = vpop.f32.mrb[117].mxu1 }
 0x246   : > { %v3459_v43 = vpop.f32.mrb[118].mxu1 }
 0x247   : > { %v6151_v44 = vpop.f32.mrb[119].mxu1 }
 0x24a   : > { %v3415_v45 = vpop.f32.mrb[116].mxu0 }
 0x24b   : > { %v3462_v46 = vadd.f32 %v3415_v45, %v3352_v36  ;;  %v3417_v47 = vpop.f32.mrb[117].mxu0 }
 0x24c   : > { %v3463_v48 = vadd.f32 %v3417_v47, %v3353_v37  ;;  %v3419_v49 = vpop.f32.mrb[118].mxu0  ;;  %v3566_v50 = vpop.f32.mrb[120].mxu1 }
 0x24d   : > { %v3420_v51 = vpop.f32.mrb[119].mxu0  ;;  %v3574_v52 = vadd.f32 %v3566_v50, %v3464_v41  ;;  %v6156_v53 = vpop.f32.mrb[121].mxu1 }
 0x24e   : > { %v3569_v54 = vpop.f32.mrb[122].mxu1 }
 0x24f   : > { %v6157_v55 = vpop.f32.mrb[123].mxu1 }
 0x252   : > { %v3525_v56 = vpop.f32.mrb[120].mxu0 }
 0x253   : > { %v3572_v57 = vadd.f32 %v3525_v56, %v3462_v46  ;;  %v3527_v58 = vpop.f32.mrb[121].mxu0 }
 0x254   : > { %v3573_v59 = vadd.f32 %v3527_v58, %v3463_v48  ;;  %v3529_v60 = vpop.f32.mrb[122].mxu0  ;;  %v3676_v61 = vpop.f32.mrb[124].mxu1 }
 0x255   : > { %v3530_v62 = vpop.f32.mrb[123].mxu0  ;;  %v3684_v63 = vadd.f32 %v3676_v61, %v3574_v52  ;;  %v6162_v2 = vpop.f32.mrb[125].mxu1 }
 0x256   : > { %v3679_v3 = vpop.f32.mrb[126].mxu1 }
 0x257   : > { %v6163_v6 = vpop.f32.mrb[127].mxu1 }
 0x25a   : > { %v3635_v9 = vpop.f32.mrb[124].mxu0 }
 0x25b   : > { %v3682_v10 = vadd.f32 %v3635_v9, %v3572_v57  ;;  %v3637_v11 = vpop.f32.mrb[125].mxu0 }
 0x25c   : > { %v3683_v12 = vadd.f32 %v3637_v11, %v3573_v59  ;;  %v3639_v13 = vpop.f32.mrb[126].mxu0  ;;  %v3786_v14 = vpop.f32.mrb[128].mxu1 }
 0x25d   : > { %v3640_v15 = vpop.f32.mrb[127].mxu0  ;;  %v3794_v4 = vadd.f32 %v3786_v14, %v3684_v63  ;;  %v6168_v16 = vpop.f32.mrb[129].mxu1 }
 0x25e   : > { %v3789_v17 = vpop.f32.mrb[130].mxu1 }
 0x25f   : > { %v6169_v7 = vpop.f32.mrb[131].mxu1 }
 0x262   : > { %v3745_v18 = vpop.f32.mrb[128].mxu0 }
 0x263   : > { %v3792_v19 = vadd.f32 %v3745_v18, %v3682_v10  ;;  %v3747_v8 = vpop.f32.mrb[129].mxu0 }
 0x264   : > { %v3793_v21 = vadd.f32 %v3747_v8, %v3683_v12  ;;  %v3749_v5 = vpop.f32.mrb[130].mxu0  ;;  %v3896_v22 = vpop.f32.mrb[132].mxu1 }
 0x265   : > { %v3750_v23 = vpop.f32.mrb[131].mxu0  ;;  %v3904_v0 = vadd.f32 %v3896_v22, %v3794_v4  ;;  %v6174_v24 = vpop.f32.mrb[133].mxu1 }
 0x266   : > { %v3899_v25 = vpop.f32.mrb[134].mxu1 }
 0x267   : > { %v6175_v26 = vpop.f32.mrb[135].mxu1 }
 0x26a   : > { %v3855_v27 = vpop.f32.mrb[132].mxu0 }
 0x26b   : > { %v3902_v28 = vadd.f32 %v3855_v27, %v3792_v19  ;;  %v3857_v29 = vpop.f32.mrb[133].mxu0 }
 0x26c   : > { %v3903_v30 = vadd.f32 %v3857_v29, %v3793_v21  ;;  %v3859_v31 = vpop.f32.mrb[134].mxu0  ;;  %v4006_v32 = vpop.f32.mrb[136].mxu1 }
 0x26d   : > { %v3860_v33 = vpop.f32.mrb[135].mxu0  ;;  %v4014_v20 = vadd.f32 %v4006_v32, %v3904_v0  ;;  %v6180_v34 = vpop.f32.mrb[137].mxu1 }
 0x26e   : > { %v4009_v35 = vpop.f32.mrb[138].mxu1 }
 0x26f   : > { %v6181_v36 = vpop.f32.mrb[139].mxu1 }
 0x272   : > { %v3965_v1 = vpop.f32.mrb[136].mxu0 }
 0x273   : > { %v4012_v37 = vadd.f32 %v3965_v1, %v3902_v28  ;;  %v3967_v38 = vpop.f32.mrb[137].mxu0 }
 0x274   : > { %v4013_v39 = vadd.f32 %v3967_v38, %v3903_v30  ;;  %v3969_v40 = vpop.f32.mrb[138].mxu0  ;;  %v4116_v41 = vpop.f32.mrb[140].mxu1 }
 0x275   : > { %v3970_v42 = vpop.f32.mrb[139].mxu0  ;;  %v4124_v43 = vadd.f32 %v4116_v41, %v4014_v20  ;;  %v6186_v44 = vpop.f32.mrb[141].mxu1 }
 0x276   : > { %v4119_v45 = vpop.f32.mrb[142].mxu1 }
 0x277   : > { %v6187_v46 = vpop.f32.mrb[143].mxu1 }
 0x27a   : > { %v4075_v47 = vpop.f32.mrb[140].mxu0 }
 0x27b   : > { %v4122_v48 = vadd.f32 %v4075_v47, %v4012_v37  ;;  %v4077_v49 = vpop.f32.mrb[141].mxu0 }
 0x27c   : > { %v4123_v50 = vadd.f32 %v4077_v49, %v4013_v39  ;;  %v4079_v51 = vpop.f32.mrb[142].mxu0  ;;  %v4226_v52 = vpop.f32.mrb[144].mxu1 }
 0x27d   : > { %v4080_v53 = vpop.f32.mrb[143].mxu0  ;;  %v4234_v54 = vadd.f32 %v4226_v52, %v4124_v43  ;;  %v6192_v55 = vpop.f32.mrb[145].mxu1 }
 0x27e   : > { %v4229_v56 = vpop.f32.mrb[146].mxu1 }
 0x27f   : > { %v6193_v57 = vpop.f32.mrb[147].mxu1 }
 0x282   : > { %v4185_v58 = vpop.f32.mrb[144].mxu0 }
 0x283   : > { %v4232_v59 = vadd.f32 %v4185_v58, %v4122_v48  ;;  %v4187_v60 = vpop.f32.mrb[145].mxu0 }
 0x284   : > { %v4233_v61 = vadd.f32 %v4187_v60, %v4123_v50  ;;  %v4189_v62 = vpop.f32.mrb[146].mxu0  ;;  %v4336_v63 = vpop.f32.mrb[148].mxu1 }
 0x285   : > { %v4190_v2 = vpop.f32.mrb[147].mxu0  ;;  %v4344_v3 = vadd.f32 %v4336_v63, %v4234_v54  ;;  %v6198_v6 = vpop.f32.mrb[149].mxu1 }
 0x286   : > { %v4339_v9 = vpop.f32.mrb[150].mxu1 }
 0x287   : > { %v6199_v10 = vpop.f32.mrb[151].mxu1 }
 0x28a   : > { %v4295_v11 = vpop.f32.mrb[148].mxu0 }
 0x28b   : > { %v4342_v12 = vadd.f32 %v4295_v11, %v4232_v59  ;;  %v4297_v13 = vpop.f32.mrb[149].mxu0 }
 0x28c   : > { %v4343_v14 = vadd.f32 %v4297_v13, %v4233_v61  ;;  %v4299_v15 = vpop.f32.mrb[150].mxu0  ;;  %v4446_v4 = vpop.f32.mrb[152].mxu1 }
 0x28d   : > { %v4300_v16 = vpop.f32.mrb[151].mxu0  ;;  %v4454_v17 = vadd.f32 %v4446_v4, %v4344_v3  ;;  %v6204_v7 = vpop.f32.mrb[153].mxu1 }
 0x28e   : > { %v4449_v18 = vpop.f32.mrb[154].mxu1 }
 0x28f   : > { %v6205_v19 = vpop.f32.mrb[155].mxu1 }
 0x292   : > { %v4405_v8 = vpop.f32.mrb[152].mxu0 }
 0x293   : > { %v4452_v21 = vadd.f32 %v4405_v8, %v4342_v12  ;;  %v4407_v5 = vpop.f32.mrb[153].mxu0 }
 0x294   : > { %v4453_v22 = vadd.f32 %v4407_v5, %v4343_v14  ;;  %v4409_v23 = vpop.f32.mrb[154].mxu0  ;;  %v4556_v0 = vpop.f32.mrb[156].mxu1 }
 0x295   : > { %v4410_v24 = vpop.f32.mrb[155].mxu0  ;;  %v4564_v25 = vadd.f32 %v4556_v0, %v4454_v17  ;;  %v6210_v26 = vpop.f32.mrb[157].mxu1 }
 0x296   : > { %v4559_v27 = vpop.f32.mrb[158].mxu1 }
 0x297   : > { %v6211_v28 = vpop.f32.mrb[159].mxu1 }
 0x29a   : > { %v4515_v29 = vpop.f32.mrb[156].mxu0 }
 0x29b   : > { %v4562_v30 = vadd.f32 %v4515_v29, %v4452_v21  ;;  %v4517_v31 = vpop.f32.mrb[157].mxu0 }
 0x29c   : > { %v4563_v32 = vadd.f32 %v4517_v31, %v4453_v22  ;;  %v4519_v33 = vpop.f32.mrb[158].mxu0  ;;  %v4666_v20 = vpop.f32.mrb[160].mxu1 }
 0x29d   : > { %v4520_v34 = vpop.f32.mrb[159].mxu0  ;;  %v4674_v35 = vadd.f32 %v4666_v20, %v4564_v25  ;;  %v6216_v36 = vpop.f32.mrb[161].mxu1 }
 0x29e   : > { %v4669_v1 = vpop.f32.mrb[162].mxu1 }
 0x29f   : > { %v6217_v37 = vpop.f32.mrb[163].mxu1 }
 0x2a2   : > { %v4625_v38 = vpop.f32.mrb[160].mxu0 }
 0x2a3   : > { %v4672_v39 = vadd.f32 %v4625_v38, %v4562_v30  ;;  %v4627_v40 = vpop.f32.mrb[161].mxu0 }
 0x2a4   : > { %v4673_v41 = vadd.f32 %v4627_v40, %v4563_v32  ;;  %v4629_v42 = vpop.f32.mrb[162].mxu0  ;;  %v4776_v43 = vpop.f32.mrb[164].mxu1 }
 0x2a5   : > { %v4630_v44 = vpop.f32.mrb[163].mxu0  ;;  %v4784_v45 = vadd.f32 %v4776_v43, %v4674_v35  ;;  %v6222_v46 = vpop.f32.mrb[165].mxu1 }
 0x2a6   : > { %v4779_v47 = vpop.f32.mrb[166].mxu1 }
 0x2a7   : > { %v6223_v48 = vpop.f32.mrb[167].mxu1 }
 0x2aa   : > { %v4735_v49 = vpop.f32.mrb[164].mxu0 }
 0x2ab   : > { %v4782_v50 = vadd.f32 %v4735_v49, %v4672_v39  ;;  %v4737_v51 = vpop.f32.mrb[165].mxu0 }
 0x2ac   : > { %v4783_v52 = vadd.f32 %v4737_v51, %v4673_v41  ;;  %v4739_v53 = vpop.f32.mrb[166].mxu0  ;;  %v4892_v54 = vpop.f32.mrb[168].mxu1  ;;  %v5552_v51 = vlaneseq }
 0x2ad   : > { %v4740_v55 = vpop.f32.mrb[167].mxu0  ;;  %v4900_v56 = vadd.f32 %v4892_v54, %v4784_v45  ;;  %v6228_v57 = vpop.f32.mrb[169].mxu1 }
 0x2ae   : > { %v4895_v58 = vpop.f32.mrb[170].mxu1  ;;  %v5553_v55 = vshrl.u32 %v5552_v51, 7 }
 0x2af   : > { %v6229_v59 = vpop.f32.mrb[171].mxu1 }
 0x2b2   : > { %v4851_v60 = vpop.f32.mrb[168].mxu0 }
 0x2b3   : > { %v4898_v61 = vadd.f32 %v4851_v60, %v4782_v50  ;;  %v4853_v62 = vpop.f32.mrb[169].mxu0 }
 0x2b4   : > { %v4899_v63 = vadd.f32 %v4853_v62, %v4783_v52  ;;  %v4855_v2 = vpop.f32.mrb[170].mxu0  ;;  %v4998_v3 = vpop.f32.mrb[172].mxu1 }
 0x2b5   : > { %v4856_v6 = vpop.f32.mrb[171].mxu0  ;;  %v5006_v9 = vadd.f32 %v4998_v3, %v4900_v56  ;;  %v6234_v10 = vpop.f32.mrb[173].mxu1  ;;  %v5554_v2 = vsub.s32 0, %v5553_v55 }
 0x2b6   : > { %v5001_v11 = vpop.f32.mrb[174].mxu1  ;;  %v5550_v6 = vld [vmem:[%s7467_s3] sm:$0x7]  ;;  %v5558_v10 = vsub.s32 1, %v5553_v55 }
 0x2b7   : > { %v6235_v12 = vpop.f32.mrb[175].mxu1 }
 0x2ba   : > { %v4957_v13 = vpop.f32.mrb[172].mxu0 }
 0x2bb   : > { %v5004_v14 = vadd.f32 %v4957_v13, %v4898_v61  ;;  %v4959_v15 = vpop.f32.mrb[173].mxu0 }
 0x2bc   : > { %v5005_v4 = vadd.f32 %v4959_v15, %v4899_v63  ;;  %v4961_v16 = vpop.f32.mrb[174].mxu0  ;;  %v5104_v17 = vpop.f32.mrb[176].mxu1  ;;  %v5562_v63 = vsub.s32 2, %v5553_v55  ;;  %v5555_v15 = vrot.slane %v5550_v6, %v5554_v2 }
 0x2bd   : > { %v4962_v7 = vpop.f32.mrb[175].mxu0  ;;  %v5112_v18 = vadd.f32 %v5104_v17, %v5006_v9  ;;  %v6240_v19 = vpop.f32.mrb[177].mxu1  ;;  %v5559_v17 = vrot.slane %v5550_v6, %v5558_v10 }
 0x2be   : > { %v5107_v8 = vpop.f32.mrb[178].mxu1  ;;  %v5545_v9 = vpop.permute.xlu0 %5544  ;;  %v5563_v12 = vrot.slane %v5550_v6, %v5562_v63 }
 0x2bf   : > { %v6241_v21 = vpop.f32.mrb[179].mxu1 }
 0x2c2   : > { %v5063_v5 = vpop.f32.mrb[176].mxu0 }
 0x2c3   : > { %v5110_v22 = vadd.f32 %v5063_v5, %v5004_v14  ;;  %v5065_v23 = vpop.f32.mrb[177].mxu0 }
 0x2c4   : > { %v5111_v0 = vadd.f32 %v5065_v23, %v5005_v4  ;;  %v5067_v24 = vpop.f32.mrb[178].mxu0  ;;  %v5211_v25 = vpop.f32.mrb[180].mxu1 }
 0x2c5   : > { %v5068_v26 = vpop.f32.mrb[179].mxu0  ;;  %v5219_v27 = vadd.f32 %v5211_v25, %v5112_v18  ;;  %v6246_v28 = vpop.f32.mrb[181].mxu1 }
 0x2c6   : > { %v5214_v29 = vpop.f32.mrb[182].mxu1 }
 0x2c7   : > { %v6247_v30 = vpop.f32.mrb[183].mxu1 }
 0x2ca   : > { %v5170_v31 = vpop.f32.mrb[180].mxu0 }
 0x2cb   : > { %v5217_v32 = vadd.f32 %v5170_v31, %v5110_v22  ;;  %v5172_v33 = vpop.f32.mrb[181].mxu0 }
 0x2cc   : > { %v5218_v20 = vadd.f32 %v5172_v33, %v5111_v0  ;;  %v5174_v34 = vpop.f32.mrb[182].mxu0  ;;  %v5318_v35 = vpop.f32.mrb[184].mxu1 }
 0x2cd   : > { %v5175_v36 = vpop.f32.mrb[183].mxu0  ;;  %v5326_v1 = vadd.f32 %v5318_v35, %v5219_v27  ;;  %v6252_v37 = vpop.f32.mrb[185].mxu1 }
 0x2ce   : > { %v5321_v38 = vpop.f32.mrb[186].mxu1 }
 0x2cf   : > { %v6253_v39 = vpop.f32.mrb[187].mxu1 }
 0x2d2   : > { %v5277_v40 = vpop.f32.mrb[184].mxu0 }
 0x2d3   : > { %v5324_v41 = vadd.f32 %v5277_v40, %v5217_v32  ;;  %v5279_v42 = vpop.f32.mrb[185].mxu0 }
 0x2d4   : > { %v5325_v43 = vadd.f32 %v5279_v42, %v5218_v20  ;;  %v5281_v44 = vpop.f32.mrb[186].mxu0  ;;  %v5425_v45 = vpop.f32.mrb[188].mxu1 }
 0x2d5   : > { %v5282_v46 = vpop.f32.mrb[187].mxu0  ;;  %v5433_v47 = vadd.f32 %v5425_v45, %v5326_v1  ;;  %v6258_v48 = vpop.f32.mrb[189].mxu1 }
 0x2d6   : > { %v5428_v49 = vpop.f32.mrb[190].mxu1 }
 0x2d7   : > { %v6259_v50 = vpop.f32.mrb[191].mxu1 }
 0x2da   : > { %v5384_v52 = vpop.f32.mrb[188].mxu0 }
 0x2db   : > { %v5431_v53 = vadd.f32 %v5384_v52, %v5324_v41  ;;  %v5386_v54 = vpop.f32.mrb[189].mxu0 }
 0x2dc   : > { %v5432_v56 = vadd.f32 %v5386_v54, %v5325_v43  ;;  %v5388_v57 = vpop.f32.mrb[190].mxu0  ;;  %v5532_v58 = vpop.f32.mrb[192].mxu1 }
 0x2dd   : > { %v5389_v59 = vpop.f32.mrb[191].mxu0  ;;  %v5540_v60 = vadd.f32 %v5532_v58, %v5433_v47  ;;  %v6264_v61 = vpop.f32.mrb[193].mxu1 }
 0x2de   : > { %v5535_v62 = vpop.f32.mrb[194].mxu1 }
 0x2df   : > { %v6265_v3 = vpop.f32.mrb[195].mxu1  ;;  %v5549_v13 = vadd.f32 %v5545_v9, %v5540_v60 }
 0x2e1   : > { %v5569_v21 = vmul.f32 %v5563_v12, %v5549_v13 }
 0x2e2   : > { %v5491_v11 = vpop.f32.mrb[192].mxu0 }
 0x2e3   : > { %v5538_v14 = vadd.f32 %v5491_v11, %v5431_v53  ;;  %v5493_v4 = vpop.f32.mrb[193].mxu0  ;;  %v5572_v0 = vsel %vm5571_vm0, %v5569_v21, 0.0 }
 0x2e4   : > { %v5539_v16 = vadd.f32 %v5493_v4, %v5432_v56  ;;  %v5495_v7 = vpop.f32.mrb[194].mxu0 }
 0x2e5   : > { %v5547_v18 = vadd.f32 %v5545_v9, %v5538_v14  ;;  %v5496_v19 = vpop.f32.mrb[195].mxu0 }
 0x2e6   : > { %v5548_v8 = vadd.f32 %v5545_v9, %v5539_v16 }
 0x2e7   : > { %v5567_v5 = vmul.f32 %v5555_v15, %v5547_v18 }
 0x2e8   : > { %v5568_v22 = vmul.f32 %v5559_v17, %v5548_v8 }
 0x2ea   : > { %v5570_v23 = vadd.f32 %v5568_v22, %v5567_v5 }
 0x2ec   : > { %v5573_v24 = vadd.f32 %v5572_v0, %v5570_v23 }
 0x2ee   : > { %5574 = vadd.xlane.f32.xlu1 %v5573_v24 }
 0x37b   : > { %v5575_v25 = vpop.xlane.xlu1 %5574 }
 0x37c   : > { %v5576_v26 = vmul.f32 0.00390625, %v5575_v25 }
 0x37e   : > { %v5577_v27 = vsub.f32 %v5547_v18, %v5576_v26  ;;  %v5578_v28 = vsub.f32 %v5548_v8, %v5576_v26  ;;  %v5579_v29 = vsub.f32 %v5549_v13, %v5576_v26 }
 0x380   : > { %v5580_v30 = vmul.f32 %v5577_v27, %v5577_v27  ;;  %v5581_v31 = vmul.f32 %v5578_v28, %v5578_v28  ;;  %v5582_v32 = vmul.f32 %v5579_v29, %v5579_v29 }
 0x382   : > { %v5583_v33 = vmul.f32 %v5580_v30, %v5555_v15  ;;  %v5584_v20 = vmul.f32 %v5581_v31, %v5559_v17  ;;  %v5585_v34 = vmul.f32 %v5582_v32, %v5563_v12 }
 0x384   : > { %v5586_v35 = vadd.f32 %v5584_v20, %v5583_v33  ;;  %v5587_v36 = vsel %vm5571_vm0, %v5585_v34, 0.0 }
 0x386   : > { %v5588_v1 = vadd.f32 %v5587_v36, %v5586_v35 }
 0x388   : > { %5589 = vadd.xlane.f32.xlu0 %v5588_v1 }
 0x415   : > { %v5590_v37 = vpop.xlane.xlu0 %5589 }
 0x416   : > { %v5591_v38 = vmul.f32 0.00390625, %v5590_v37 }
 0x418   : > { %v5592_v39 = vadd.f32 1e-05, %v5591_v38 }
 0x41a   : > { %6332 = vrsqrt.f32 %v5592_v39 }
 0x424   : > { %v6333_v40 = vpop.eup %6332 }
 0x425   : > { %v5594_v41 = vmul.f32 %v6333_v40, %v5577_v27  ;;  %v5595_v42 = vmul.f32 %v6333_v40, %v5578_v28  ;;  %v5596_v43 = vmul.f32 %v6333_v40, %v5579_v29 }
 0x427   : > { %v5597_v44 = vmax.f32 %v5594_v41, 0.0  ;;  %v5598_v45 = vmax.f32 %v5595_v42, 0.0  ;;  %v5599_v46 = vmax.f32 %v5596_v43, 0.0 }
 0x429   : > { %5600 = vst [vmem:[%s197_s26] sm:$0xff] %v5597_v44  ;;  %5601 = vst [vmem:[%s197_s26 + $0x8] sm:$0xff] %v5598_v45 }
 0x42a   : > { %5602 = vst.msk [vmem:[%s197_s26 + $0x10] sm:$0xff] %vm5571_vm0, %v5599_v46 }
 0x42b PF: > { %s14_s15 = sadd.s32 1, %s6340_s15  }
 0x42c   : > { %p11_p4 = scmp.ge.s32.totalorder %s14_s15, 4  }
 0x42e   :  { %13 = sbr.rel (!%p11_p4) target bundleno = 1 (0x1), region = 114 }

// kernel: encoder_forward.7
= control target key start
LH: loop header
LB: loop body
LE: loop exit
PB: predicated region body
PF: predicated region fallthrough
CT: control target
= control target key end

     0   :  { %s2052_s15 = smov 0   ;;  %s2238_s0 = inlined_call_operand.vmem [shape: bf16[2,4,16,128], index: 0, kind: input, shape index: {}]   ;;  %s2239_s1 = inlined_call_operand.vmem [shape: bf16[16,32,16], index: 1, kind: input, shape index: {}]   ;;  %s2240_s2 = inlined_call_operand.vmem [shape: f32[32,1], index: 2, kind: input, shape index: {}]   ;;  %s2241_s3 = inlined_call_operand.vmem [shape: f32[1,20], index: 3, kind: input, shape index: {}]   ;;  %s2242_s4 = inlined_call_operand.vmem [shape: f32[2,32,20], index: 4, kind: output, shape index: {}]  }
   0x1 LB: > { %s1605_s16 = sadd.s32 4294967295, %s2021_s15   ;;  %p1609_p0 = scmp.ge.s32.totalorder %s2021_s15, 1  ;;  %s2021_s15 = sphi %s2052_s15, %s14_s15  }
   0x2   : > { %p162_p1 = scmp.lt.s32.totalorder %s2021_s15, 3 }
   0x4   : > { %p163_p2 = pnand %p1609_p0, %p162_p1 }
   0x5   : > { %p188_p3 = scmp.lt.s32.totalorder (!%p163_p2), %s1605_s16, 1  ;;  %v1975_v0 = vld [vmem:[%s2239_s1 + $0x10] sm:$0xff] (!%p163_p2)   ;;  %vm229_vm0 = vcmask (!%p163_p2), 130048   ;;  %v1979_v1 = vld [vmem:[%s2239_s1 + $0x80] sm:$0xff] (!%p163_p2)   ;;  %s2023_s25 = smov (!%p163_p2), 127   ;;  %v1976_v4 = vld [vmem:[%s2239_s1 + $0x18] sm:$0xff] (!%p163_p2)  }
   0x6   : > { %166 = sbr.rel (%p163_p2) target bundleno = 760 (0x2f8), region = 36  ;;  %1803 = vmatprep.mubr.msk.bf16.mxu1 (!%p163_p2), %vm229_vm0, %v1975_v0  ;;  %1851 = vmatprep.mubr.msk.bf16.mxu0 (!%p163_p2), %vm229_vm0, %v1979_v1  ;;  %s2024_s26 = smov (!%p163_p2), 123   ;;  %v1977_v5 = vld [vmem:[%s2239_s1] sm:$0xff] (!%p163_p2)   ;;  %v1978_v8 = vld [vmem:[%s2239_s1 + $0x8] sm:$0xff] (!%p163_p2)   ;;  %v2026_v12 = vmov (!%p163_p2), 0   ;;  %v1448_v13 = vld [vmem:[%s2240_s2 + $0x10] sm:$0xff] (!%p163_p2) }
   0x7   : > { %s2025_s5 = smov (!%p163_p2), 122   ;;  %v1980_v9 = vld [vmem:[%s2239_s1 + $0x20] sm:$0xff] (!%p163_p2)   ;;  %v1447_v10 = vld [vmem:[%s2240_s2 + $0x8] sm:$0xff] (!%p163_p2)  ;;  %1970 = vset.pattern.permute.xlu1 (!%p163_p2), %v2026_v12  ;;  %1969 = vset.pattern.permute.xlu0 (!%p163_p2), %v2026_v12  ;;  %v1449_v14 = vld [vmem:[%s2240_s2 + $0x18] sm:$0xff] (!%p163_p2)  ;;  %vm1485_vm1 = vcmask (!%p163_p2), 162816  }
   0x8   : > { %v1446_v11 = vld [vmem:[%s2240_s2] sm:$0xff] (!%p163_p2)  ;;  %v1981_v17 = vld [vmem:[%s2239_s1 + $0x28] sm:$0xff] (!%p163_p2)   ;;  %v1983_v19 = vld [vmem:[%s2239_s1 + $0x30] sm:$0xff] (!%p163_p2)  }
   0x9   : > { %v1982_v18 = vld [vmem:[%s2239_s1 + $0x88] sm:$0xff] (!%p163_p2)   ;;  %v1984_v20 = vld [vmem:[%s2239_s1 + $0x90] sm:$0xff] (!%p163_p2)   ;;  %v1985_v24 = vld [vmem:[%s2239_s1 + $0x38] sm:$0xff] (!%p163_p2)  }
   0xa   : > { %v1986_v25 = vld [vmem:[%s2239_s1 + $0x98] sm:$0xff] (!%p163_p2)   ;;  %v1987_v26 = vld [vmem:[%s2239_s1 + $0x40] sm:$0xff] (!%p163_p2)   ;;  %v1989_v30 = vld [vmem:[%s2239_s1 + $0x48] sm:$0xff] (!%p163_p2)  }
   0xb   : > { %v1988_v27 = vld [vmem:[%s2239_s1 + $0xa0] sm:$0xff] (!%p163_p2)   ;;  %v1990_v31 = vld [vmem:[%s2239_s1 + $0xa8] sm:$0xff] (!%p163_p2)   ;;  %v1991_v32 = vld [vmem:[%s2239_s1 + $0x50] sm:$0xff] (!%p163_p2)  }
   0xc   : > { %v1992_v33 = vld [vmem:[%s2239_s1 + $0xb0] sm:$0xff] (!%p163_p2)   ;;  %v1993_v35 = vld [vmem:[%s2239_s1 + $0x58] sm:$0xff] (!%p163_p2)   ;;  %v1995_v37 = vld [vmem:[%s2239_s1 + $0x60] sm:$0xff] (!%p163_p2)  }
   0xd   : > { %s2244_s16 = smov (!%p188_p3, %s1605_s16), 1  ;;  %v1994_v36 = vld [vmem:[%s2239_s1 + $0xb8] sm:$0xff]   ;;  %v1996_v38 = vld [vmem:[%s2239_s1 + $0xc0] sm:$0xff]   ;;  %v1997_v41 = vld [vmem:[%s2239_s1 + $0x68] sm:$0xff]  }
   0xe   : > { %s1751_s19 = sshll.u32 %s2244_s16, 5  ;;  %v1998_v42 = vld [vmem:[%s2239_s1 + $0xc8] sm:$0xff]   ;;  %v1999_v43 = vld [vmem:[%s2239_s1 + $0x70] sm:$0xff]   ;;  %v2001_v46 = vld [vmem:[%s2239_s1 + $0x78] sm:$0xff]  }
   0xf   : > { %s192_s22 = scalar_lea.vmem %s2238_s0, %s1751_s19  ;;  %v2000_v44 = vld [vmem:[%s2239_s1 + $0xd0] sm:$0xff]   ;;  %v2002_v47 = vld [vmem:[%s2239_s1 + $0xd8] sm:$0xff]   ;;  %v2003_v48 = vld [vmem:[%s2239_s1 + $0xe0] sm:$0xff]  }
  0x10   : > { %v1971_v2 = vld [vmem:[%s192_s22] sm:$0xff]   ;;  %v1972_v3 = vld [vmem:[%s192_s22 + $0x8] sm:$0xff]   ;;  %v1973_v6 = vld [vmem:[%s192_s22 + $0x10] sm:$0xff]  }
  0x11   : > { %371 = vrot.lane.b32.xlu1 %v1971_v2, %s2023_s25  ;;  %845 = vrot.lane.b32.xlu0 %v1971_v2, %s2024_s26  ;;  %v2084_v7 = vld [vmem:[%s192_s22 + $0x18] sm:$0xff]   ;;  %v2004_v50 = vld [vmem:[%s2239_s1 + $0xe8] sm:$0xff]  }
  0x12   : > { %1801 = vmatprep.subr.bf16.mxu1 %v1972_v3  ;;  %v2005_v51 = vld [vmem:[%s2239_s1 + $0xf0] sm:$0xff]   ;;  %v2006_v52 = vld [vmem:[%s2239_s1 + $0xf8] sm:$0xff]  }
  0x13   : > { %1802 = vmatpush3.bf16.msra.mxu1 %v1972_v3 }
  0x14   : > { %1807 = vmatprep.subr.bf16.mxu1 %v1971_v2 }
  0x15   : > { %922 = vrot.lane.b32.xlu0 %v1972_v3, %s2024_s26  ;;  %999 = vrot.lane.b32.xlu1 %v1971_v2, %s2025_s5 }
  0x16   : > { %1804 = vmatmul.mubr.msk.bf16.vlgmr.msra.gmra.mrb[0].mxu1 %vm229_vm0, %v1976_v4  ;;  %v1748_v4 = vld [vmem:[%s2241_s3] ss:$0 sm:$0xff] }
  0x17   : > { %1808 = vmatpush3.bf16.msra.mxu1 %v1971_v2  ;;  %1809 = vmatprep.mubr.msk.bf16.mxu1 %vm229_vm0, %v1977_v5 }
  0x19   : > { %448 = vrot.lane.b32.xlu0 %v1972_v3, %s2023_s25  ;;  %1076 = vrot.lane.b32.xlu1 %v1972_v3, %s2025_s5 }
  0x1d   : > { %1153 = vrot.lane.b32.xlu0 %v1973_v6, %s2024_s26  ;;  %1230 = vrot.lane.b32.xlu1 %v2084_v7, %s2024_s26 }
  0x21   : > { %691 = vrot.lane.b32.xlu0 %v1973_v6, %s2023_s25  ;;  %1307 = vrot.lane.b32.xlu1 %v1973_v6, %s2025_s5 }
  0x22   : > { %1810 = vmatmul.mubr.msk.bf16.vlgmr.msra.gmra.mrb[0].mxu1 %vm229_vm0, %v1978_v8 }
  0x23   : > { %1815 = vmatprep.mubr.msk.bf16.mxu1 %vm229_vm0, %v1980_v9 }
  0x25   : > { %768 = vrot.lane.b32.xlu0 %v2084_v7, %s2023_s25  ;;  %1384 = vrot.lane.b32.xlu1 %v2084_v7, %s2025_s5  ;;  %s197_s5 = scalar_lea.vmem %s2242_s4, %s1751_s19 }
  0x29   : > { %1457 = vperm.xlu1 %1970, %v1447_v10   ;;  %1452 = vperm.xlu0 %1969, %v1446_v11  }
  0x2d   : > { %1462 = vperm.xlu1 %1970, %v1448_v13   ;;  %1467 = vperm.xlu0 %1969, %v1449_v14  }
  0x83   : > { %v372_v15 = vpop.permute.xlu1 %371  ;;  %v846_v16 = vpop.permute.xlu0 %845 }
  0x84   : > { %1813 = vmatprep.subr.bf16.mxu1 %v372_v15  ;;  %1849 = vmatprep.subr.bf16.mxu0 %v846_v16 }
  0x85   : > { %1814 = vmatpush3.bf16.msra.mxu1 %v372_v15  ;;  %1850 = vmatpush3.bf16.msra.mxu0 %v846_v16 }
  0x87   : > { %v923_v21 = vpop.permute.xlu0 %922  ;;  %v1000_v22 = vpop.permute.xlu1 %999 }
  0x88   : > { %1816 = vmatmul.mubr.msk.bf16.vlgmr.msra.gmra.mrb[0].mxu1 %vm229_vm0, %v1981_v17  ;;  %1852 = vmatmul.mubr.msk.bf16.vlgmr.msra.gmra.mrb[0].mxu0 %vm229_vm0, %v1982_v18 }
  0x89   : > { %1855 = vmatprep.subr.bf16.mxu0 %v923_v21  ;;  %1821 = vmatprep.mubr.msk.bf16.mxu1 %vm229_vm0, %v1983_v19 }
  0x8a   : > { %1856 = vmatpush3.bf16.msra.mxu0 %v923_v21  ;;  %1857 = vmatprep.mubr.msk.bf16.mxu0 %vm229_vm0, %v1984_v20 }
  0x8b   : > { %v449_v23 = vpop.permute.xlu0 %448  ;;  %1861 = vmatprep.subr.bf16.mxu0 %v1000_v22  ;;  %v1077_v28 = vpop.permute.xlu1 %1076 }
  0x8c   : > { %1819 = vmatprep.subr.bf16.mxu1 %v449_v23 }
  0x8d   : > { %1820 = vmatpush3.bf16.msra.mxu1 %v449_v23 }
  0x8e   : > { %1825 = vmatprep.subr.bf16.mxu1 %v1973_v6 }
  0x8f   : > { %v1154_v29 = vpop.permute.xlu0 %1153  ;;  %v1231_v39 = vpop.permute.xlu1 %1230 }
  0x93   : > { %v692_v34 = vpop.permute.xlu0 %691  ;;  %v1308_v45 = vpop.permute.xlu1 %1307 }
  0x94   : > { %1822 = vmatmul.mubr.msk.bf16.vlgmr.msra.gmra.mrb[0].mxu1 %vm229_vm0, %v1985_v24  ;;  %1858 = vmatmul.mubr.msk.bf16.vlgmr.msra.gmra.mrb[0].mxu0 %vm229_vm0, %v1986_v25 }
  0x95   : > { %1862 = vmatpush3.bf16.msra.mxu0 %v1000_v22  ;;  %1826 = vmatpush3.bf16.msra.mxu1 %v1973_v6 }
  0x96   : > { %1827 = vmatprep.mubr.msk.bf16.mxu1 %vm229_vm0, %v1987_v26  ;;  %1863 = vmatprep.mubr.msk.bf16.mxu0 %vm229_vm0, %v1988_v27 }
  0x97   : > { %1867 = vmatprep.subr.bf16.mxu0 %v1077_v28  ;;  %1831 = vmatprep.subr.bf16.mxu1 %v2084_v7  ;;  %v769_v40 = vpop.permute.xlu0 %768  ;;  %v1385_v49 = vpop.permute.xlu1 %1384 }
  0xa0   : > { %1828 = vmatmul.mubr.msk.bf16.vlgmr.msra.gmra.mrb[0].mxu1 %vm229_vm0, %v1989_v30  ;;  %1864 = vmatmul.mubr.msk.bf16.vlgmr.msra.gmra.mrb[0].mxu0 %vm229_vm0, %v1990_v31 }
  0xa1   : > { %1868 = vmatpush3.bf16.msra.mxu0 %v1077_v28  ;;  %1832 = vmatpush3.bf16.msra.mxu1 %v2084_v7 }
  0xa2   : > { %1833 = vmatprep.mubr.msk.bf16.mxu1 %vm229_vm0, %v1991_v32  ;;  %1869 = vmatprep.mubr.msk.bf16.mxu0 %vm229_vm0, %v1992_v33 }
  0xa3   : > { %1873 = vmatprep.subr.bf16.mxu0 %v1154_v29  ;;  %1837 = vmatprep.subr.bf16.mxu1 %v692_v34 }
  0xa8   : > { %v1453_v57 = vpop.permute.xlu0 %1452  ;;  %v1458_v58 = vpop.permute.xlu1 %1457 }
  0xac   : > { %1834 = vmatmul.mubr.msk.bf16.vlgmr.msra.gmra.mrb[0].mxu1 %vm229_vm0, %v1993_v35  ;;  %1870 = vmatmul.mubr.msk.bf16.vlgmr.msra.gmra.mrb[0].mxu0 %vm229_vm0, %v1994_v36  ;;  %v1468_v0 = vpop.permute.xlu0 %1467  ;;  %v1463_v1 = vpop.permute.xlu1 %1462 }
  0xad   : > { %1874 = vmatpush3.bf16.msra.mxu0 %v1154_v29  ;;  %1838 = vmatpush3.bf16.msra.mxu1 %v692_v34 }
  0xae   : > { %1839 = vmatprep.mubr.msk.bf16.mxu1 %vm229_vm0, %v1995_v37  ;;  %1875 = vmatprep.mubr.msk.bf16.mxu0 %vm229_vm0, %v1996_v38 }
  0xaf   : > { %1879 = vmatprep.subr.bf16.mxu0 %v1231_v39  ;;  %1843 = vmatprep.subr.bf16.mxu1 %v769_v40 }
  0xb8   : > { %1840 = vmatmul.mubr.msk.bf16.vlgmr.msra.gmra.mrb[0].mxu1 %vm229_vm0, %v1997_v41  ;;  %1876 = vmatmul.mubr.msk.bf16.vlgmr.msra.gmra.mrb[0].mxu0 %vm229_vm0, %v1998_v42 }
  0xb9   : > { %1880 = vmatpush3.bf16.msra.mxu0 %v1231_v39  ;;  %1844 = vmatpush3.bf16.msra.mxu1 %v769_v40 }
  0xba   : > { %1845 = vmatprep.mubr.msk.bf16.mxu1 %vm229_vm0, %v1999_v43  ;;  %1881 = vmatprep.mubr.msk.bf16.mxu0 %vm229_vm0, %v2000_v44 }
  0xbb   : > { %1885 = vmatprep.subr.bf16.mxu0 %v1308_v45 }
  0xc4   : > { %1846 = vmatmul.mubr.msk.bf16.vlgmr.msra.gmra.mrb[0].mxu1 %vm229_vm0, %v2001_v46  ;;  %1882 = vmatmul.mubr.msk.bf16.vlgmr.msra.gmra.mrb[0].mxu0 %vm229_vm0, %v2002_v47 }
  0xc5   : > { %1886 = vmatpush3.bf16.msra.mxu0 %v1308_v45  ;;  %1887 = vmatprep.mubr.msk.bf16.mxu0 %vm229_vm0, %v2003_v48 }
  0xc6   : > { %1891 = vmatprep.subr.bf16.mxu0 %v1385_v49 }
  0xd0   : > { %1888 = vmatmul.mubr.msk.bf16.vlgmr.msra.gmra.mrb[0].mxu0 %vm229_vm0, %v2004_v50 }
  0xd1   : > { %1892 = vmatpush3.bf16.msra.mxu0 %v1385_v49  ;;  %1893 = vmatprep.mubr.msk.bf16.mxu0 %vm229_vm0, %v2005_v51 }
  0xdc   : > { %1894 = vmatmul.mubr.msk.bf16.vlgmr.msra.gmra.mrb[0].mxu0 %vm229_vm0, %v2006_v52 }
 0x197   : > { %v1847_v53 = vpop.f32.mrb[0].mxu1 }
 0x198   : > { %v811_v54 = vpop.f32.mrb[1].mxu1 }
 0x199   : > { %v1848_v55 = vpop.f32.mrb[2].mxu1 }
 0x19a   : > { %v814_v56 = vpop.f32.mrb[3].mxu1 }
 0x1af   : > { %v1895_v59 = vpop.f32.mrb[0].mxu0 }
 0x1b0   : > { %v1897_v60 = vadd.f32 %v1895_v59, %v1847_v53  ;;  %v1427_v61 = vpop.f32.mrb[1].mxu0 }
 0x1b1   : > { %v1898_v62 = vadd.f32 %v1427_v61, %v811_v54  ;;  %v1896_v63 = vpop.f32.mrb[2].mxu0 }
 0x1b2   : > { %v1899_v2 = vadd.f32 %v1896_v63, %v1848_v55  ;;  %v1430_v3 = vpop.f32.mrb[3].mxu0  ;;  %v1472_v8 = vadd.f32 %v1897_v60, %v1463_v1 }
 0x1b3   : > { %v1470_v5 = vadd.f32 %v1898_v62, %v1453_v57  ;;  %v1900_v6 = vadd.f32 %v1430_v3, %v814_v56 }
 0x1b4   : > { %v1473_v7 = vadd.f32 %v1899_v2, %v1468_v0  ;;  %v1483_v15 = vmul.f32 %v1748_v4, %v1472_v8 }
 0x1b5   : > { %v1471_v9 = vadd.f32 %v1900_v6, %v1458_v58  ;;  %v1481_v10 = vmul.f32 %v1748_v4, %v1470_v5 }
 0x1b6   : > { %v1484_v13 = vmul.f32 %v1748_v4, %v1473_v7  ;;  %v1492_v17 = vsel %vm1485_vm1, %v1483_v15, 0.0 }
 0x1b7   : > { %v1486_v11 = vsel %vm1485_vm1, %v1481_v10, 0.0  ;;  %v1482_v12 = vmul.f32 %v1748_v4, %v1471_v9 }
 0x1b8   : > { %1487 = vadd.xlane.f32.xlu1 %v1486_v11  ;;  %v1495_v16 = vsel %vm1485_vm1, %v1484_v13, 0.0 }
 0x1b9   : > { %v1489_v14 = vsel %vm1485_vm1, %v1482_v12, 0.0 }
 0x1ba   : > { %1490 = vadd.xlane.f32.xlu0 %v1489_v14 }
 0x1bc   : > { %1496 = vadd.xlane.f32.xlu1 %v1495_v16 }
 0x1be   : > { %1493 = vadd.xlane.f32.xlu0 %v1492_v17 }
 0x245   : > { %v1488_v18 = vpop.xlane.xlu1 %1487 }
 0x246   : > { %v1498_v19 = vmul.f32 0.0625, %v1488_v18 }
 0x247   : > { %v1491_v20 = vpop.xlane.xlu0 %1490 }
 0x248   : > { %v1502_v21 = vsub.f32 %v1470_v5, %v1498_v19  ;;  %v1499_v22 = vmul.f32 0.0625, %v1491_v20 }
 0x249   : > { %v1497_v23 = vpop.xlane.xlu1 %1496 }
 0x24a   : > { %v1503_v24 = vsub.f32 %v1471_v9, %v1499_v22  ;;  %v1501_v25 = vmul.f32 0.0625, %v1497_v23  ;;  %v1506_v26 = vmul.f32 %v1502_v21, %v1502_v21 }
 0x24b   : > { %v1494_v27 = vpop.xlane.xlu0 %1493 }
 0x24c   : > { %v1505_v28 = vsub.f32 %v1473_v7, %v1501_v25  ;;  %v1500_v29 = vmul.f32 0.0625, %v1494_v27  ;;  %v1510_v30 = vmul.f32 %v1748_v4, %v1506_v26  ;;  %v1507_v31 = vmul.f32 %v1503_v24, %v1503_v24 }
 0x24e   : > { %v1504_v32 = vsub.f32 %v1472_v8, %v1500_v29  ;;  %v1514_v33 = vsel %vm1485_vm1, %v1510_v30, 0.0  ;;  %v1511_v34 = vmul.f32 %v1748_v4, %v1507_v31  ;;  %v1509_v35 = vmul.f32 %v1505_v28, %v1505_v28 }
 0x24f   : > { %1515 = vadd.xlane.f32.xlu0 %v1514_v33 }
 0x250   : > { %v1517_v36 = vsel %vm1485_vm1, %v1511_v34, 0.0  ;;  %v1513_v37 = vmul.f32 %v1748_v4, %v1509_v35  ;;  %v1508_v38 = vmul.f32 %v1504_v32, %v1504_v32 }
 0x251   : > { %1518 = vadd.xlane.f32.xlu1 %v1517_v36 }
 0x252   : > { %v1512_v39 = vmul.f32 %v1748_v4, %v1508_v38  ;;  %v1523_v40 = vsel %vm1485_vm1, %v1513_v37, 0.0 }
 0x254   : > { %v1520_v41 = vsel %vm1485_vm1, %v1512_v39, 0.0 }
 0x255   : > { %1524 = vadd.xlane.f32.xlu1 %v1523_v40  ;;  %1521 = vadd.xlane.f32.xlu0 %v1520_v41 }
 0x2dc   : > { %v1516_v42 = vpop.xlane.xlu0 %1515 }
 0x2dd   : > { %v1526_v43 = vmul.f32 0.0625, %v1516_v42 }
 0x2de   : > { %v1519_v44 = vpop.xlane.xlu1 %1518 }
 0x2df   : > { %v1530_v45 = vadd.f32 1e-05, %v1526_v43  ;;  %v1527_v46 = vmul.f32 0.0625, %v1519_v44 }
 0x2e1   : > { %2007 = vrsqrt.f32 %v1530_v45  ;;  %v1531_v47 = vadd.f32 1e-05, %v1527_v46 }
 0x2e2   : > { %v1525_v48 = vpop.xlane.xlu1 %1524  ;;  %v1522_v49 = vpop.xlane.xlu0 %1521 }
 0x2e3   : > { %2009 = vrsqrt.f32 %v1531_v47  ;;  %v1529_v50 = vmul.f32 0.0625, %v1525_v48  ;;  %v1528_v51 = vmul.f32 0.0625, %v1522_v49 }
 0x2e5   : > { %v1533_v52 = vadd.f32 1e-05, %v1529_v50  ;;  %v1532_v53 = vadd.f32 1e-05, %v1528_v51 }
 0x2e7   : > { %2011 = vrsqrt.f32 %v1533_v52 }
 0x2e8   : > { %2013 = vrsqrt.f32 %v1532_v53 }
 0x2eb   : > { %v2008_v54 = vpop.eup %2007 }
 0x2ec   : > { %v1538_v55 = vmul.f32 %v2008_v54, %v1502_v21 }
 0x2ed   : > { %v2010_v56 = vpop.eup %2009 }
 0x2ee   : > { %v1542_v57 = vmax.f32 %v1538_v55, 0.0  ;;  %v1539_v58 = vmul.f32 %v2010_v56, %v1503_v24 }
 0x2f0   : > { %1546 = vst.msk [vmem:[%s197_s5] sm:$0xff] %vm1485_vm1, %v1542_v57  ;;  %v1543_v59 = vmax.f32 %v1539_v58, 0.0 }
 0x2f1   : > { %v2012_v60 = vpop.eup %2011 }
 0x2f2   : > { %v2014_v61 = vpop.eup %2013  ;;  %1547 = vst.msk [vmem:[%s197_s5 + $0x8] sm:$0xff] %vm1485_vm1, %v1543_v59  ;;  %v1541_v62 = vmul.f32 %v2012_v60, %v1505_v28 }
 0x2f3   : > { %v1540_v63 = vmul.f32 %v2014_v61, %v1504_v32 }
 0x2f4   : > { %v1545_v0 = vmax.f32 %v1541_v62, 0.0 }
 0x2f5   : > { %v1544_v1 = vmax.f32 %v1540_v63, 0.0 }
 0x2f6   : > { %1549 = vst.msk [vmem:[%s197_s5 + $0x18] sm:$0xff] %vm1485_vm1, %v1545_v0 }
 0x2f7   : > { %1548 = vst.msk [vmem:[%s197_s5 + $0x10] sm:$0xff] %vm1485_vm1, %v1544_v1 }
 0x2f8 PF: > { %s14_s15 = sadd.s32 1, %s2021_s15  }
 0x2f9   : > { %p11_p4 = scmp.ge.s32.totalorder %s14_s15, 4  }
 0x2fb   :  { %13 = sbr.rel (!%p11_p4) target bundleno = 1 (0x1), region = 84 }

// kernel: encoder_forward.8
= control target key start
LH: loop header
LB: loop body
LE: loop exit
PB: predicated region body
PF: predicated region fallthrough
CT: control target
= control target key end

     0   :  { %s1393_s15 = smov 0   ;;  %s1537_s0 = inlined_call_operand.vmem [shape: bf16[2,1,32,128], index: 0, kind: input, shape index: {}]   ;;  %s1538_s1 = inlined_call_operand.vmem [shape: bf16[9,32,32], index: 1, kind: input, shape index: {}]   ;;  %s1539_s2 = inlined_call_operand.vmem [shape: f32[32,1], index: 2, kind: input, shape index: {}]   ;;  %s1540_s3 = inlined_call_operand.vmem [shape: f32[1,24], index: 3, kind: input, shape index: {}]   ;;  %s1541_s4 = inlined_call_operand.vmem [shape: f32[2,32,24], index: 4, kind: output, shape index: {}]  }
   0x1 LB: > { %s1080_s16 = sadd.s32 4294967295, %s1357_s15   ;;  %p1084_p0 = scmp.ge.s32.totalorder %s1357_s15, 1  ;;  %s1357_s15 = sphi %s1393_s15, %s14_s15  }
   0x2   : > { %p162_p1 = scmp.lt.s32.totalorder %s1357_s15, 3 }
   0x4   : > { %p163_p2 = pnand %p1084_p0, %p162_p1 }
   0x5   : > { %p188_p3 = scmp.lt.s32.totalorder (!%p163_p2), %s1080_s16, 1  ;;  %vm238_vm0 = vcmask (!%p163_p2), 261120   ;;  %v1325_v0 = vld [vmem:[%s1538_s1 + $0x40] sm:$0xff] (!%p163_p2)   ;;  %v1327_v1 = vld [vmem:[%s1538_s1 + $0x10] sm:$0xff] (!%p163_p2)   ;;  %s1359_s25 = smov (!%p163_p2), 121   ;;  %v922_v4 = vld [vmem:[%s1539_s2 + $0x8] sm:$0xff] (!%p163_p2) }
   0x6   : > { %166 = sbr.rel (%p163_p2) target bundleno = 728 (0x2d8), region = 36  ;;  %1236 = vmatprep.mubr.msk.bf16.mxu0 (!%p163_p2), %vm238_vm0, %v1325_v0  ;;  %1204 = vmatprep.mubr.msk.bf16.mxu1 (!%p163_p2), %vm238_vm0, %v1327_v1  ;;  %s1360_s26 = smov (!%p163_p2), 127   ;;  %v921_v5 = vld [vmem:[%s1539_s2] sm:$0xff] (!%p163_p2)  ;;  %v1367_v6 = vmov (!%p163_p2), 0   ;;  %v923_v7 = vld [vmem:[%s1539_s2 + $0x10] sm:$0xff] (!%p163_p2)  ;;  %v924_v8 = vld [vmem:[%s1539_s2 + $0x18] sm:$0xff] (!%p163_p2) }
   0x7   : > { %s1361_s27 = smov (!%p163_p2), 120   ;;  %s1362_s28 = smov (!%p163_p2), 116   ;;  %1322 = vset.pattern.permute.xlu1 (!%p163_p2), %v1367_v6  ;;  %1321 = vset.pattern.permute.xlu0 (!%p163_p2), %v1367_v6  ;;  %v1326_v13 = vld [vmem:[%s1538_s1 + $0x48] sm:$0xff] (!%p163_p2)   ;;  %v1329_v16 = vld [vmem:[%s1538_s1 + $0x50] sm:$0xff] (!%p163_p2)   ;;  %v1328_v17 = vld [vmem:[%s1538_s1 + $0x18] sm:$0xff] (!%p163_p2)   ;;  %vm960_vm1 = vcmask (!%p163_p2), 195584  }
   0x8   : > { %s1363_s29 = smov (!%p163_p2), 126   ;;  %s1364_s30 = smov (!%p163_p2), 115   ;;  %v1331_v19 = vld [vmem:[%s1538_s1] sm:$0xff] (!%p163_p2)   ;;  %v1330_v21 = vld [vmem:[%s1538_s1 + $0x58] sm:$0xff] (!%p163_p2)   ;;  %v1332_v24 = vld [vmem:[%s1538_s1 + $0x8] sm:$0xff] (!%p163_p2)  }
   0x9   : > { %s1365_s5 = smov (!%p163_p2), 122   ;;  %s1366_s6 = smov (!%p163_p2), 114   ;;  %v1333_v22 = vld [vmem:[%s1538_s1 + $0x60] sm:$0xff] (!%p163_p2)   ;;  %v1334_v29 = vld [vmem:[%s1538_s1 + $0x68] sm:$0xff] (!%p163_p2)   ;;  %v1337_v30 = vld [vmem:[%s1538_s1 + $0x70] sm:$0xff] (!%p163_p2)  }
   0xa   : > { %v1335_v27 = vld [vmem:[%s1538_s1 + $0x20] sm:$0xff] (!%p163_p2)   ;;  %v1336_v32 = vld [vmem:[%s1538_s1 + $0x28] sm:$0xff] (!%p163_p2)   ;;  %v1339_v35 = vld [vmem:[%s1538_s1 + $0x30] sm:$0xff] (!%p163_p2)  }
   0xb   : > { %v1338_v36 = vld [vmem:[%s1538_s1 + $0x78] sm:$0xff] (!%p163_p2)   ;;  %v1341_v37 = vld [vmem:[%s1538_s1 + $0x80] sm:$0xff] (!%p163_p2)   ;;  %v1342_v40 = vld [vmem:[%s1538_s1 + $0x88] sm:$0xff] (!%p163_p2)  }
   0xc   : > { %v1340_v39 = vld [vmem:[%s1538_s1 + $0x38] sm:$0xff] (!%p163_p2)   ;;  %v1159_v56 = vld [vmem:[%s1540_s3] ss:$0 sm:$0xff] (!%p163_p2) }
   0xd   : > { %s1543_s16 = smov (!%p188_p3, %s1080_s16), 1 }
   0xe   : > { %s1162_s19 = sshll.u32 %s1543_s16, 4 }
   0xf   : > { %s192_s24 = scalar_lea.vmem %s1537_s0, %s1162_s19 }
  0x10   : > { %v1414_v2 = vld [vmem:[%s192_s24] sm:$0xff]   ;;  %v1419_v3 = vld [vmem:[%s192_s24 + $0x8] sm:$0xff]  }
  0x11   : > { %536 = vrot.lane.b32.xlu0 %v1414_v2, %s1359_s25  ;;  %232 = vrot.lane.b32.xlu1 %v1414_v2, %s1360_s26 }
  0x15   : > { %538 = vrot.lane.b32.xlu0 %v1419_v3, %s1359_s25  ;;  %616 = vrot.lane.b32.xlu1 %v1414_v2, %s1361_s27 }
  0x19   : > { %234 = vrot.lane.b32.xlu0 %v1419_v3, %s1360_s26  ;;  %618 = vrot.lane.b32.xlu1 %v1419_v3, %s1361_s27  ;;  %s1163_s27 = sshll.u32 %s1543_s16, 5 }
  0x1d   : > { %696 = vrot.lane.b32.xlu0 %v1414_v2, %s1362_s28  ;;  %698 = vrot.lane.b32.xlu1 %v1419_v3, %s1362_s28 }
  0x21   : > { %376 = vrot.lane.b32.xlu0 %v1414_v2, %s1363_s29  ;;  %776 = vrot.lane.b32.xlu1 %v1414_v2, %s1364_s30 }
  0x25   : > { %378 = vrot.lane.b32.xlu0 %v1419_v3, %s1363_s29  ;;  %778 = vrot.lane.b32.xlu1 %v1419_v3, %s1364_s30  ;;  %s197_s30 = scalar_lea.vmem %s1541_s4, %s1163_s27 }
  0x29   : > { %456 = vrot.lane.b32.xlu0 %v1414_v2, %s1365_s5  ;;  %856 = vrot.lane.b32.xlu1 %v1414_v2, %s1366_s6 }
  0x2d   : > { %458 = vrot.lane.b32.xlu0 %v1419_v3, %s1365_s5  ;;  %858 = vrot.lane.b32.xlu1 %v1419_v3, %s1366_s6 }
  0x31   : > { %932 = vperm.xlu1 %1322, %v922_v4   ;;  %927 = vperm.xlu0 %1321, %v921_v5  }
  0x35   : > { %937 = vperm.xlu1 %1322, %v923_v7   ;;  %942 = vperm.xlu0 %1321, %v924_v8  }
  0x83   : > { %v537_v9 = vpop.permute.xlu0 %536  ;;  %v233_v10 = vpop.permute.xlu1 %232 }
  0x84   : > { %1232 = vmatprep.subr.bf16.mxu0 %v537_v9  ;;  %1200 = vmatprep.subr.bf16.mxu1 %v233_v10 }
  0x85   : > { %1233 = vmatpush3.bf16.msra.mxu0 %v537_v9  ;;  %1201 = vmatpush3.bf16.msra.mxu1 %v233_v10 }
  0x87   : > { %v539_v11 = vpop.permute.xlu0 %538  ;;  %v617_v12 = vpop.permute.xlu1 %616 }
  0x88   : > { %1234 = vmatprep.subr.bf16.mxu0 %v539_v11 }
  0x89   : > { %1235 = vmatpush3.bf16.msra.mxu0 %v539_v11 }
  0x8a   : > { %1240 = vmatprep.subr.bf16.mxu0 %v617_v12 }
  0x8b   : > { %v235_v14 = vpop.permute.xlu0 %234  ;;  %v619_v15 = vpop.permute.xlu1 %618 }
  0x8c   : > { %1202 = vmatprep.subr.bf16.mxu1 %v235_v14  ;;  %1237 = vmatmul.mubr.msk.bf16.vlgmr.msra.gmra.mrb[0].mxu0 %vm238_vm0, %v1326_v13 }
  0x8d   : > { %1203 = vmatpush3.bf16.msra.mxu1 %v235_v14  ;;  %1241 = vmatpush3.bf16.msra.mxu0 %v617_v12 }
  0x8e   : > { %1242 = vmatprep.subr.bf16.mxu0 %v619_v15  ;;  %1208 = vmatprep.subr.bf16.mxu1 %v1414_v2 }
  0x8f   : > { %v697_v18 = vpop.permute.xlu0 %696  ;;  %1244 = vmatprep.mubr.msk.bf16.mxu0 %vm238_vm0, %v1329_v16  ;;  %v699_v23 = vpop.permute.xlu1 %698 }
  0x90   : > { %1205 = vmatmul.mubr.msk.bf16.vlgmr.msra.gmra.mrb[0].mxu1 %vm238_vm0, %v1328_v17 }
  0x91   : > { %1243 = vmatpush3.bf16.msra.mxu0 %v619_v15  ;;  %1209 = vmatpush3.bf16.msra.mxu1 %v1414_v2 }
  0x92   : > { %1248 = vmatprep.subr.bf16.mxu0 %v697_v18  ;;  %1210 = vmatprep.subr.bf16.mxu1 %v1419_v3 }
  0x93   : > { %1212 = vmatprep.mubr.msk.bf16.mxu1 %vm238_vm0, %v1331_v19  ;;  %v377_v20 = vpop.permute.xlu0 %376  ;;  %v777_v25 = vpop.permute.xlu1 %776 }
  0x95   : > { %1211 = vmatpush3.bf16.msra.mxu1 %v1419_v3 }
  0x96   : > { %1216 = vmatprep.subr.bf16.mxu1 %v377_v20 }
  0x97   : > { %v379_v26 = vpop.permute.xlu0 %378  ;;  %v779_v31 = vpop.permute.xlu1 %778 }
  0x98   : > { %1245 = vmatmul.mubr.msk.bf16.vlgmr.msra.gmra.mrb[0].mxu0 %vm238_vm0, %v1330_v21 }
  0x99   : > { %1249 = vmatpush3.bf16.msra.mxu0 %v697_v18  ;;  %1252 = vmatprep.mubr.msk.bf16.mxu0 %vm238_vm0, %v1333_v22 }
  0x9a   : > { %1250 = vmatprep.subr.bf16.mxu0 %v699_v23 }
  0x9b   : > { %v457_v28 = vpop.permute.xlu0 %456  ;;  %v857_v33 = vpop.permute.xlu1 %856 }
  0x9c   : > { %1213 = vmatmul.mubr.msk.bf16.vlgmr.msra.gmra.mrb[0].mxu1 %vm238_vm0, %v1332_v24 }
  0x9d   : > { %1251 = vmatpush3.bf16.msra.mxu0 %v699_v23  ;;  %1217 = vmatpush3.bf16.msra.mxu1 %v377_v20 }
  0x9e   : > { %1256 = vmatprep.subr.bf16.mxu0 %v777_v25  ;;  %1218 = vmatprep.subr.bf16.mxu1 %v379_v26 }
  0x9f   : > { %1220 = vmatprep.mubr.msk.bf16.mxu1 %vm238_vm0, %v1335_v27  ;;  %v459_v34 = vpop.permute.xlu0 %458  ;;  %v859_v38 = vpop.permute.xlu1 %858 }
  0xa1   : > { %1219 = vmatpush3.bf16.msra.mxu1 %v379_v26 }
  0xa2   : > { %1224 = vmatprep.subr.bf16.mxu1 %v457_v28 }
  0xa4   : > { %1253 = vmatmul.mubr.msk.bf16.vlgmr.msra.gmra.mrb[0].mxu0 %vm238_vm0, %v1334_v29 }
  0xa5   : > { %1257 = vmatpush3.bf16.msra.mxu0 %v777_v25  ;;  %1260 = vmatprep.mubr.msk.bf16.mxu0 %vm238_vm0, %v1337_v30 }
  0xa6   : > { %1258 = vmatprep.subr.bf16.mxu0 %v779_v31 }
  0xa8   : > { %1221 = vmatmul.mubr.msk.bf16.vlgmr.msra.gmra.mrb[0].mxu1 %vm238_vm0, %v1336_v32 }
  0xa9   : > { %1259 = vmatpush3.bf16.msra.mxu0 %v779_v31  ;;  %1225 = vmatpush3.bf16.msra.mxu1 %v457_v28 }
  0xaa   : > { %1264 = vmatprep.subr.bf16.mxu0 %v857_v33  ;;  %1226 = vmatprep.subr.bf16.mxu1 %v459_v34 }
  0xab   : > { %1228 = vmatprep.mubr.msk.bf16.mxu1 %vm238_vm0, %v1339_v35 }
  0xad   : > { %1227 = vmatpush3.bf16.msra.mxu1 %v459_v34 }
  0xb0   : > { %1261 = vmatmul.mubr.msk.bf16.vlgmr.msra.gmra.mrb[0].mxu0 %vm238_vm0, %v1338_v36  ;;  %v928_v45 = vpop.permute.xlu0 %927  ;;  %v933_v46 = vpop.permute.xlu1 %932 }
  0xb1   : > { %1265 = vmatpush3.bf16.msra.mxu0 %v857_v33  ;;  %1268 = vmatprep.mubr.msk.bf16.mxu0 %vm238_vm0, %v1341_v37 }
  0xb2   : > { %1266 = vmatprep.subr.bf16.mxu0 %v859_v38 }
  0xb4   : > { %1229 = vmatmul.mubr.msk.bf16.vlgmr.msra.gmra.mrb[0].mxu1 %vm238_vm0, %v1340_v39  ;;  %v943_v52 = vpop.permute.xlu0 %942  ;;  %v938_v53 = vpop.permute.xlu1 %937 }
  0xb5   : > { %1267 = vmatpush3.bf16.msra.mxu0 %v859_v38 }
  0xbc   : > { %1269 = vmatmul.mubr.msk.bf16.vlgmr.msra.gmra.mrb[0].mxu0 %vm238_vm0, %v1342_v40 }
 0x187   : > { %v1230_v41 = vpop.f32.mrb[0].mxu1 }
 0x188   : > { %v502_v42 = vpop.f32.mrb[1].mxu1 }
 0x189   : > { %v1231_v43 = vpop.f32.mrb[2].mxu1 }
 0x18a   : > { %v505_v44 = vpop.f32.mrb[3].mxu1 }
 0x18f   : > { %v1270_v47 = vpop.f32.mrb[0].mxu0 }
 0x190   : > { %v1272_v48 = vadd.f32 %v1270_v47, %v1230_v41  ;;  %v902_v49 = vpop.f32.mrb[1].mxu0 }
 0x191   : > { %v1273_v50 = vadd.f32 %v902_v49, %v502_v42  ;;  %v1271_v51 = vpop.f32.mrb[2].mxu0 }
 0x192   : > { %v1274_v54 = vadd.f32 %v1271_v51, %v1231_v43  ;;  %v905_v55 = vpop.f32.mrb[3].mxu0  ;;  %v947_v60 = vadd.f32 %v1272_v48, %v938_v53 }
 0x193   : > { %v945_v57 = vadd.f32 %v1273_v50, %v928_v45  ;;  %v1275_v58 = vadd.f32 %v905_v55, %v505_v44 }
 0x194   : > { %v948_v59 = vadd.f32 %v1274_v54, %v943_v52  ;;  %v958_v3 = vmul.f32 %v1159_v56, %v947_v60 }
 0x195   : > { %v946_v61 = vadd.f32 %v1275_v58, %v933_v46  ;;  %v956_v62 = vmul.f32 %v1159_v56, %v945_v57 }
 0x196   : > { %v959_v1 = vmul.f32 %v1159_v56, %v948_v59  ;;  %v967_v5 = vsel %vm960_vm1, %v958_v3, 0.0 }
 0x197   : > { %v961_v63 = vsel %vm960_vm1, %v956_v62, 0.0  ;;  %v957_v0 = vmul.f32 %v1159_v56, %v946_v61 }
 0x198   : > { %962 = vadd.xlane.f32.xlu1 %v961_v63  ;;  %v970_v4 = vsel %vm960_vm1, %v959_v1, 0.0 }
 0x199   : > { %v964_v2 = vsel %vm960_vm1, %v957_v0, 0.0 }
 0x19a   : > { %965 = vadd.xlane.f32.xlu0 %v964_v2 }
 0x19c   : > { %971 = vadd.xlane.f32.xlu1 %v970_v4 }
 0x19e   : > { %968 = vadd.xlane.f32.xlu0 %v967_v5 }
 0x225   : > { %v963_v6 = vpop.xlane.xlu1 %962 }
 0x226   : > { %v973_v7 = vmul.f32 0.0625, %v963_v6 }
 0x227   : > { %v966_v8 = vpop.xlane.xlu0 %965 }
 0x228   : > { %v977_v9 = vsub.f32 %v945_v57, %v973_v7  ;;  %v974_v10 = vmul.f32 0.0625, %v966_v8 }
 0x229   : > { %v972_v11 = vpop.xlane.xlu1 %971 }
 0x22a   : > { %v978_v12 = vsub.f32 %v946_v61, %v974_v10  ;;  %v976_v13 = vmul.f32 0.0625, %v972_v11  ;;  %v981_v14 = vmul.f32 %v977_v9, %v977_v9 }
 0x22b   : > { %v969_v15 = vpop.xlane.xlu0 %968 }
 0x22c   : > { %v980_v16 = vsub.f32 %v948_v59, %v976_v13  ;;  %v975_v17 = vmul.f32 0.0625, %v969_v15  ;;  %v985_v18 = vmul.f32 %v1159_v56, %v981_v14  ;;  %v982_v19 = vmul.f32 %v978_v12, %v978_v12 }
 0x22e   : > { %v979_v20 = vsub.f32 %v947_v60, %v975_v17  ;;  %v989_v21 = vsel %vm960_vm1, %v985_v18, 0.0  ;;  %v986_v22 = vmul.f32 %v1159_v56, %v982_v19  ;;  %v984_v23 = vmul.f32 %v980_v16, %v980_v16 }
 0x22f   : > { %990 = vadd.xlane.f32.xlu0 %v989_v21 }
 0x230   : > { %v992_v24 = vsel %vm960_vm1, %v986_v22, 0.0  ;;  %v988_v25 = vmul.f32 %v1159_v56, %v984_v23  ;;  %v983_v26 = vmul.f32 %v979_v20, %v979_v20 }
 0x231   : > { %993 = vadd.xlane.f32.xlu1 %v992_v24 }
 0x232   : > { %v987_v27 = vmul.f32 %v1159_v56, %v983_v26  ;;  %v998_v28 = vsel %vm960_vm1, %v988_v25, 0.0 }
 0x234   : > { %v995_v29 = vsel %vm960_vm1, %v987_v27, 0.0 }
 0x235   : > { %999 = vadd.xlane.f32.xlu1 %v998_v28  ;;  %996 = vadd.xlane.f32.xlu0 %v995_v29 }
 0x2bc   : > { %v991_v30 = vpop.xlane.xlu0 %990 }
 0x2bd   : > { %v1001_v31 = vmul.f32 0.0625, %v991_v30 }
 0x2be   : > { %v994_v32 = vpop.xlane.xlu1 %993 }
 0x2bf   : > { %v1005_v33 = vadd.f32 1e-05, %v1001_v31  ;;  %v1002_v34 = vmul.f32 0.0625, %v994_v32 }
 0x2c1   : > { %1343 = vrsqrt.f32 %v1005_v33  ;;  %v1006_v35 = vadd.f32 1e-05, %v1002_v34 }
 0x2c2   : > { %v1000_v36 = vpop.xlane.xlu1 %999  ;;  %v997_v37 = vpop.xlane.xlu0 %996 }
 0x2c3   : > { %1345 = vrsqrt.f32 %v1006_v35  ;;  %v1004_v38 = vmul.f32 0.0625, %v1000_v36  ;;  %v1003_v39 = vmul.f32 0.0625, %v997_v37 }
 0x2c5   : > { %v1008_v40 = vadd.f32 1e-05, %v1004_v38  ;;  %v1007_v41 = vadd.f32 1e-05, %v1003_v39 }
 0x2c7   : > { %1347 = vrsqrt.f32 %v1008_v40 }
 0x2c8   : > { %1349 = vrsqrt.f32 %v1007_v41 }
 0x2cb   : > { %v1344_v42 = vpop.eup %1343 }
 0x2cc   : > { %v1013_v43 = vmul.f32 %v1344_v42, %v977_v9 }
 0x2cd   : > { %v1346_v44 = vpop.eup %1345 }
 0x2ce   : > { %v1017_v45 = vmax.f32 %v1013_v43, 0.0  ;;  %v1014_v46 = vmul.f32 %v1346_v44, %v978_v12 }
 0x2d0   : > { %1021 = vst.msk [vmem:[%s197_s30] sm:$0xff] %vm960_vm1, %v1017_v45  ;;  %v1018_v47 = vmax.f32 %v1014_v46, 0.0 }
 0x2d1   : > { %v1348_v48 = vpop.eup %1347 }
 0x2d2   : > { %v1350_v49 = vpop.eup %1349  ;;  %1022 = vst.msk [vmem:[%s197_s30 + $0x8] sm:$0xff] %vm960_vm1, %v1018_v47  ;;  %v1016_v50 = vmul.f32 %v1348_v48, %v980_v16 }
 0x2d3   : > { %v1015_v51 = vmul.f32 %v1350_v49, %v979_v20 }
 0x2d4   : > { %v1020_v52 = vmax.f32 %v1016_v50, 0.0 }
 0x2d5   : > { %v1019_v53 = vmax.f32 %v1015_v51, 0.0 }
 0x2d6   : > { %1024 = vst.msk [vmem:[%s197_s30 + $0x18] sm:$0xff] %vm960_vm1, %v1020_v52 }
 0x2d7   : > { %1023 = vst.msk [vmem:[%s197_s30 + $0x10] sm:$0xff] %vm960_vm1, %v1019_v53 }
 0x2d8 PF: > { %s14_s15 = sadd.s32 1, %s1357_s15  }
 0x2d9   : > { %p11_p4 = scmp.ge.s32.totalorder %s14_s15, 4  }
 0x2db   :  { %13 = sbr.rel (!%p11_p4) target bundleno = 1 (0x1), region = 74 }

// kernel: encoder_forward.9
= control target key start
LH: loop header
LB: loop body
LE: loop exit
PB: predicated region body
PF: predicated region fallthrough
CT: control target
= control target key end

     0   :  { %s1464_s18 = smov 0   ;;  %s1611_s0 = inlined_call_operand.vmem [shape: bf16[2,1,32,128], index: 0, kind: input, shape index: {}]   ;;  %s1612_s1 = inlined_call_operand.vmem [shape: bf16[9,32,32], index: 1, kind: input, shape index: {}]   ;;  %s1613_s2 = inlined_call_operand.vmem [shape: f32[32,1], index: 2, kind: input, shape index: {}]   ;;  %s1614_s3 = inlined_call_operand.vmem [shape: f32[1,24], index: 3, kind: input, shape index: {}]   ;;  %s1615_s4 = inlined_call_operand.vmem [shape: f32[2,32,24], index: 4, kind: input, shape index: {}]   ;;  %s1616_s5 = inlined_call_operand.vmem [shape: f32[2,32,24], index: 5, kind: output, shape index: {}]  }
   0x1 LB: > { %s1143_s19 = sadd.s32 4294967295, %s1423_s18   ;;  %p1147_p0 = scmp.ge.s32.totalorder %s1423_s18, 1  ;;  %s1423_s18 = sphi %s1464_s18, %s15_s18  }
   0x2   : > { %p197_p1 = scmp.lt.s32.totalorder %s1423_s18, 3 }
   0x4   : > { %p198_p2 = pnand %p1147_p0, %p197_p1 }
   0x5   : > { %p230_p3 = scmp.lt.s32.totalorder (!%p198_p2), %s1143_s19, 1  ;;  %vm285_vm0 = vcmask (!%p198_p2), 261120   ;;  %v1391_v0 = vld [vmem:[%s1612_s1 + $0x40] sm:$0xff] (!%p198_p2)   ;;  %v1393_v1 = vld [vmem:[%s1612_s1 + $0x10] sm:$0xff] (!%p198_p2)   ;;  %s1425_s28 = smov (!%p198_p2), 121   ;;  %v969_v4 = vld [vmem:[%s1613_s2 + $0x8] sm:$0xff] (!%p198_p2) }
   0x6   : > { %201 = sbr.rel (%p198_p2) target bundleno = 728 (0x2d8), region = 40  ;;  %1302 = vmatprep.mubr.msk.bf16.mxu0 (!%p198_p2), %vm285_vm0, %v1391_v0  ;;  %1270 = vmatprep.mubr.msk.bf16.mxu1 (!%p198_p2), %vm285_vm0, %v1393_v1  ;;  %s1426_s29 = smov (!%p198_p2), 127   ;;  %v968_v5 = vld [vmem:[%s1613_s2] sm:$0xff] (!%p198_p2)  ;;  %v1433_v6 = vmov (!%p198_p2), 0   ;;  %v970_v7 = vld [vmem:[%s1613_s2 + $0x10] sm:$0xff] (!%p198_p2)  ;;  %v971_v8 = vld [vmem:[%s1613_s2 + $0x18] sm:$0xff] (!%p198_p2) }
   0x7   : > { %s1427_s30 = smov (!%p198_p2), 120   ;;  %s1428_s6 = smov (!%p198_p2), 116   ;;  %1388 = vset.pattern.permute.xlu1 (!%p198_p2), %v1433_v6  ;;  %1387 = vset.pattern.permute.xlu0 (!%p198_p2), %v1433_v6  ;;  %v1392_v13 = vld [vmem:[%s1612_s1 + $0x48] sm:$0xff] (!%p198_p2)   ;;  %v1395_v16 = vld [vmem:[%s1612_s1 + $0x50] sm:$0xff] (!%p198_p2)   ;;  %v1394_v17 = vld [vmem:[%s1612_s1 + $0x18] sm:$0xff] (!%p198_p2)   ;;  %vm1007_vm1 = vcmask (!%p198_p2), 195584  }
   0x8   : > { %s1429_s7 = smov (!%p198_p2), 126   ;;  %s1430_s8 = smov (!%p198_p2), 115   ;;  %v1397_v19 = vld [vmem:[%s1612_s1] sm:$0xff] (!%p198_p2)   ;;  %v1396_v21 = vld [vmem:[%s1612_s1 + $0x58] sm:$0xff] (!%p198_p2)   ;;  %v1398_v24 = vld [vmem:[%s1612_s1 + $0x8] sm:$0xff] (!%p198_p2)  }
   0x9   : > { %s1431_s9 = smov (!%p198_p2), 122   ;;  %s1432_s10 = smov (!%p198_p2), 114   ;;  %v1399_v22 = vld [vmem:[%s1612_s1 + $0x60] sm:$0xff] (!%p198_p2)   ;;  %v1400_v29 = vld [vmem:[%s1612_s1 + $0x68] sm:$0xff] (!%p198_p2)   ;;  %v1403_v30 = vld [vmem:[%s1612_s1 + $0x70] sm:$0xff] (!%p198_p2)  }
   0xa   : > { %v1401_v27 = vld [vmem:[%s1612_s1 + $0x20] sm:$0xff] (!%p198_p2)   ;;  %v1402_v32 = vld [vmem:[%s1612_s1 + $0x28] sm:$0xff] (!%p198_p2)   ;;  %v1405_v35 = vld [vmem:[%s1612_s1 + $0x30] sm:$0xff] (!%p198_p2)  }
   0xb   : > { %v1404_v36 = vld [vmem:[%s1612_s1 + $0x78] sm:$0xff] (!%p198_p2)   ;;  %v1407_v37 = vld [vmem:[%s1612_s1 + $0x80] sm:$0xff] (!%p198_p2)   ;;  %v1408_v40 = vld [vmem:[%s1612_s1 + $0x88] sm:$0xff] (!%p198_p2)  }
   0xc   : > { %v1406_v39 = vld [vmem:[%s1612_s1 + $0x38] sm:$0xff] (!%p198_p2)   ;;  %v1224_v56 = vld [vmem:[%s1614_s3] ss:$0 sm:$0xff] (!%p198_p2) }
   0xd   : > { %s1618_s19 = smov (!%p230_p3, %s1143_s19), 1 }
   0xe   : > { %s1227_s22 = sshll.u32 %s1618_s19, 4 }
   0xf   : > { %s234_s27 = scalar_lea.vmem %s1611_s0, %s1227_s22 }
  0x10   : > { %v1485_v2 = vld [vmem:[%s234_s27] sm:$0xff]   ;;  %v1490_v3 = vld [vmem:[%s234_s27 + $0x8] sm:$0xff]  }
  0x11   : > { %583 = vrot.lane.b32.xlu0 %v1485_v2, %s1425_s28  ;;  %279 = vrot.lane.b32.xlu1 %v1485_v2, %s1426_s29 }
  0x15   : > { %585 = vrot.lane.b32.xlu0 %v1490_v3, %s1425_s28  ;;  %663 = vrot.lane.b32.xlu1 %v1485_v2, %s1427_s30 }
  0x19   : > { %281 = vrot.lane.b32.xlu0 %v1490_v3, %s1426_s29  ;;  %665 = vrot.lane.b32.xlu1 %v1490_v3, %s1427_s30 }
  0x1d   : > { %743 = vrot.lane.b32.xlu0 %v1485_v2, %s1428_s6  ;;  %745 = vrot.lane.b32.xlu1 %v1490_v3, %s1428_s6 }
  0x21   : > { %423 = vrot.lane.b32.xlu0 %v1485_v2, %s1429_s7  ;;  %823 = vrot.lane.b32.xlu1 %v1485_v2, %s1430_s8 }
  0x25   : > { %425 = vrot.lane.b32.xlu0 %v1490_v3, %s1429_s7  ;;  %825 = vrot.lane.b32.xlu1 %v1490_v3, %s1430_s8  ;;  %s1228_s7 = sshll.u32 %s1618_s19, 5 }
  0x26   : > { %s244_s13 = scalar_lea.vmem %s1616_s5, %s1228_s7 }
  0x29   : > { %503 = vrot.lane.b32.xlu0 %v1485_v2, %s1431_s9  ;;  %903 = vrot.lane.b32.xlu1 %v1485_v2, %s1432_s10 }
  0x2d   : > { %505 = vrot.lane.b32.xlu0 %v1490_v3, %s1431_s9  ;;  %905 = vrot.lane.b32.xlu1 %v1490_v3, %s1432_s10  ;;  %s239_s10 = scalar_lea.vmem %s1615_s4, %s1228_s7 }
  0x31   : > { %979 = vperm.xlu1 %1388, %v969_v4   ;;  %974 = vperm.xlu0 %1387, %v968_v5  }
  0x35   : > { %984 = vperm.xlu1 %1388, %v970_v7   ;;  %989 = vperm.xlu0 %1387, %v971_v8  }
  0x83   : > { %v584_v9 = vpop.permute.xlu0 %583  ;;  %v280_v10 = vpop.permute.xlu1 %279 }
  0x84   : > { %1298 = vmatprep.subr.bf16.mxu0 %v584_v9  ;;  %1266 = vmatprep.subr.bf16.mxu1 %v280_v10 }
  0x85   : > { %1299 = vmatpush3.bf16.msra.mxu0 %v584_v9  ;;  %1267 = vmatpush3.bf16.msra.mxu1 %v280_v10 }
  0x87   : > { %v586_v11 = vpop.permute.xlu0 %585  ;;  %v664_v12 = vpop.permute.xlu1 %663 }
  0x88   : > { %1300 = vmatprep.subr.bf16.mxu0 %v586_v11 }
  0x89   : > { %1301 = vmatpush3.bf16.msra.mxu0 %v586_v11 }
  0x8a   : > { %1306 = vmatprep.subr.bf16.mxu0 %v664_v12 }
  0x8b   : > { %v282_v14 = vpop.permute.xlu0 %281  ;;  %v666_v15 = vpop.permute.xlu1 %665 }
  0x8c   : > { %1268 = vmatprep.subr.bf16.mxu1 %v282_v14  ;;  %1303 = vmatmul.mubr.msk.bf16.vlgmr.msra.gmra.mrb[0].mxu0 %vm285_vm0, %v1392_v13 }
  0x8d   : > { %1269 = vmatpush3.bf16.msra.mxu1 %v282_v14  ;;  %1307 = vmatpush3.bf16.msra.mxu0 %v664_v12 }
  0x8e   : > { %1308 = vmatprep.subr.bf16.mxu0 %v666_v15  ;;  %1274 = vmatprep.subr.bf16.mxu1 %v1485_v2 }
  0x8f   : > { %v744_v18 = vpop.permute.xlu0 %743  ;;  %1310 = vmatprep.mubr.msk.bf16.mxu0 %vm285_vm0, %v1395_v16  ;;  %v746_v23 = vpop.permute.xlu1 %745 }
  0x90   : > { %1271 = vmatmul.mubr.msk.bf16.vlgmr.msra.gmra.mrb[0].mxu1 %vm285_vm0, %v1394_v17 }
  0x91   : > { %1309 = vmatpush3.bf16.msra.mxu0 %v666_v15  ;;  %1275 = vmatpush3.bf16.msra.mxu1 %v1485_v2 }
  0x92   : > { %1314 = vmatprep.subr.bf16.mxu0 %v744_v18  ;;  %1276 = vmatprep.subr.bf16.mxu1 %v1490_v3 }
  0x93   : > { %1278 = vmatprep.mubr.msk.bf16.mxu1 %vm285_vm0, %v1397_v19  ;;  %v424_v20 = vpop.permute.xlu0 %423  ;;  %v824_v25 = vpop.permute.xlu1 %823 }
  0x95   : > { %1277 = vmatpush3.bf16.msra.mxu1 %v1490_v3 }
  0x96   : > { %1282 = vmatprep.subr.bf16.mxu1 %v424_v20 }
  0x97   : > { %v426_v26 = vpop.permute.xlu0 %425  ;;  %v826_v31 = vpop.permute.xlu1 %825 }
  0x98   : > { %1311 = vmatmul.mubr.msk.bf16.vlgmr.msra.gmra.mrb[0].mxu0 %vm285_vm0, %v1396_v21 }
  0x99   : > { %1315 = vmatpush3.bf16.msra.mxu0 %v744_v18  ;;  %1318 = vmatprep.mubr.msk.bf16.mxu0 %vm285_vm0, %v1399_v22 }
  0x9a   : > { %1316 = vmatprep.subr.bf16.mxu0 %v746_v23 }
  0x9b   : > { %v504_v28 = vpop.permute.xlu0 %503  ;;  %v904_v33 = vpop.permute.xlu1 %903 }
  0x9c   : > { %1279 = vmatmul.mubr.msk.bf16.vlgmr.msra.gmra.mrb[0].mxu1 %vm285_vm0, %v1398_v24 }
  0x9d   : > { %1317 = vmatpush3.bf16.msra.mxu0 %v746_v23  ;;  %1283 = vmatpush3.bf16.msra.mxu1 %v424_v20 }
  0x9e   : > { %1322 = vmatprep.subr.bf16.mxu0 %v824_v25  ;;  %1284 = vmatprep.subr.bf16.mxu1 %v426_v26 }
  0x9f   : > { %1286 = vmatprep.mubr.msk.bf16.mxu1 %vm285_vm0, %v1401_v27  ;;  %v506_v34 = vpop.permute.xlu0 %505  ;;  %v906_v38 = vpop.permute.xlu1 %905 }
  0xa1   : > { %1285 = vmatpush3.bf16.msra.mxu1 %v426_v26 }
  0xa2   : > { %1290 = vmatprep.subr.bf16.mxu1 %v504_v28 }
  0xa4   : > { %1319 = vmatmul.mubr.msk.bf16.vlgmr.msra.gmra.mrb[0].mxu0 %vm285_vm0, %v1400_v29 }
  0xa5   : > { %1323 = vmatpush3.bf16.msra.mxu0 %v824_v25  ;;  %1326 = vmatprep.mubr.msk.bf16.mxu0 %vm285_vm0, %v1403_v30 }
  0xa6   : > { %1324 = vmatprep.subr.bf16.mxu0 %v826_v31 }
  0xa8   : > { %1287 = vmatmul.mubr.msk.bf16.vlgmr.msra.gmra.mrb[0].mxu1 %vm285_vm0, %v1402_v32 }
  0xa9   : > { %1325 = vmatpush3.bf16.msra.mxu0 %v826_v31  ;;  %1291 = vmatpush3.bf16.msra.mxu1 %v504_v28 }
  0xaa   : > { %1330 = vmatprep.subr.bf16.mxu0 %v904_v33  ;;  %1292 = vmatprep.subr.bf16.mxu1 %v506_v34 }
  0xab   : > { %1294 = vmatprep.mubr.msk.bf16.mxu1 %vm285_vm0, %v1405_v35 }
  0xad   : > { %1293 = vmatpush3.bf16.msra.mxu1 %v506_v34 }
  0xb0   : > { %1327 = vmatmul.mubr.msk.bf16.vlgmr.msra.gmra.mrb[0].mxu0 %vm285_vm0, %v1404_v36  ;;  %v975_v45 = vpop.permute.xlu0 %974  ;;  %v980_v46 = vpop.permute.xlu1 %979 }
  0xb1   : > { %1331 = vmatpush3.bf16.msra.mxu0 %v904_v33  ;;  %1334 = vmatprep.mubr.msk.bf16.mxu0 %vm285_vm0, %v1407_v37 }
  0xb2   : > { %1332 = vmatprep.subr.bf16.mxu0 %v906_v38 }
  0xb4   : > { %1295 = vmatmul.mubr.msk.bf16.vlgmr.msra.gmra.mrb[0].mxu1 %vm285_vm0, %v1406_v39  ;;  %v990_v52 = vpop.permute.xlu0 %989  ;;  %v985_v53 = vpop.permute.xlu1 %984 }
  0xb5   : > { %1333 = vmatpush3.bf16.msra.mxu0 %v906_v38 }
  0xbc   : > { %1335 = vmatmul.mubr.msk.bf16.vlgmr.msra.gmra.mrb[0].mxu0 %vm285_vm0, %v1408_v40 }
 0x187   : > { %v1296_v41 = vpop.f32.mrb[0].mxu1 }
 0x188   : > { %v549_v42 = vpop.f32.mrb[1].mxu1 }
 0x189   : > { %v1297_v43 = vpop.f32.mrb[2].mxu1 }
 0x18a   : > { %v552_v44 = vpop.f32.mrb[3].mxu1 }
 0x18f   : > { %v1336_v47 = vpop.f32.mrb[0].mxu0 }
 0x190   : > { %v1338_v48 = vadd.f32 %v1336_v47, %v1296_v41  ;;  %v949_v49 = vpop.f32.mrb[1].mxu0 }
 0x191   : > { %v1339_v50 = vadd.f32 %v949_v49, %v549_v42  ;;  %v1337_v51 = vpop.f32.mrb[2].mxu0 }
 0x192   : > { %v1340_v54 = vadd.f32 %v1337_v51, %v1297_v43  ;;  %v952_v55 = vpop.f32.mrb[3].mxu0  ;;  %v994_v60 = vadd.f32 %v1338_v48, %v985_v53  ;;  %v1064_v43 = vld [vmem:[%s239_s10] sm:$0xff]  ;;  %v1067_v51 = vld [vmem:[%s239_s10 + $0x18] sm:$0xff] }
 0x193   : > { %v992_v57 = vadd.f32 %v1339_v50, %v975_v45  ;;  %v1341_v58 = vadd.f32 %v952_v55, %v552_v44 }
 0x194   : > { %v995_v59 = vadd.f32 %v1340_v54, %v990_v52  ;;  %v1005_v3 = vmul.f32 %v1224_v56, %v994_v60  ;;  %v1066_v54 = vld [vmem:[%s239_s10 + $0x10] sm:$0xff] }
 0x195   : > { %v993_v61 = vadd.f32 %v1341_v58, %v980_v46  ;;  %v1003_v62 = vmul.f32 %v1224_v56, %v992_v57  ;;  %v1065_v46 = vld [vmem:[%s239_s10 + $0x8] sm:$0xff] }
 0x196   : > { %v1006_v1 = vmul.f32 %v1224_v56, %v995_v59  ;;  %v1014_v5 = vsel %vm1007_vm1, %v1005_v3, 0.0 }
 0x197   : > { %v1008_v63 = vsel %vm1007_vm1, %v1003_v62, 0.0  ;;  %v1004_v0 = vmul.f32 %v1224_v56, %v993_v61 }
 0x198   : > { %1009 = vadd.xlane.f32.xlu1 %v1008_v63  ;;  %v1017_v4 = vsel %vm1007_vm1, %v1006_v1, 0.0 }
 0x199   : > { %v1011_v2 = vsel %vm1007_vm1, %v1004_v0, 0.0 }
 0x19a   : > { %1012 = vadd.xlane.f32.xlu0 %v1011_v2 }
 0x19c   : > { %1018 = vadd.xlane.f32.xlu1 %v1017_v4 }
 0x19e   : > { %1015 = vadd.xlane.f32.xlu0 %v1014_v5 }
 0x225   : > { %v1010_v6 = vpop.xlane.xlu1 %1009 }
 0x226   : > { %v1020_v7 = vmul.f32 0.0625, %v1010_v6 }
 0x227   : > { %v1013_v8 = vpop.xlane.xlu0 %1012 }
 0x228   : > { %v1024_v9 = vsub.f32 %v992_v57, %v1020_v7  ;;  %v1021_v10 = vmul.f32 0.0625, %v1013_v8 }
 0x229   : > { %v1019_v11 = vpop.xlane.xlu1 %1018 }
 0x22a   : > { %v1025_v12 = vsub.f32 %v993_v61, %v1021_v10  ;;  %v1023_v13 = vmul.f32 0.0625, %v1019_v11  ;;  %v1028_v14 = vmul.f32 %v1024_v9, %v1024_v9 }
 0x22b   : > { %v1016_v15 = vpop.xlane.xlu0 %1015 }
 0x22c   : > { %v1027_v16 = vsub.f32 %v995_v59, %v1023_v13  ;;  %v1022_v17 = vmul.f32 0.0625, %v1016_v15  ;;  %v1032_v18 = vmul.f32 %v1224_v56, %v1028_v14  ;;  %v1029_v19 = vmul.f32 %v1025_v12, %v1025_v12 }
 0x22e   : > { %v1026_v20 = vsub.f32 %v994_v60, %v1022_v17  ;;  %v1036_v21 = vsel %vm1007_vm1, %v1032_v18, 0.0  ;;  %v1033_v22 = vmul.f32 %v1224_v56, %v1029_v19  ;;  %v1031_v23 = vmul.f32 %v1027_v16, %v1027_v16 }
 0x22f   : > { %1037 = vadd.xlane.f32.xlu0 %v1036_v21 }
 0x230   : > { %v1039_v24 = vsel %vm1007_vm1, %v1033_v22, 0.0  ;;  %v1035_v25 = vmul.f32 %v1224_v56, %v1031_v23  ;;  %v1030_v26 = vmul.f32 %v1026_v20, %v1026_v20 }
 0x231   : > { %1040 = vadd.xlane.f32.xlu1 %v1039_v24 }
 0x232   : > { %v1034_v27 = vmul.f32 %v1224_v56, %v1030_v26  ;;  %v1045_v28 = vsel %vm1007_vm1, %v1035_v25, 0.0 }
 0x234   : > { %v1042_v29 = vsel %vm1007_vm1, %v1034_v27, 0.0 }
 0x235   : > { %1046 = vadd.xlane.f32.xlu1 %v1045_v28  ;;  %1043 = vadd.xlane.f32.xlu0 %v1042_v29 }
 0x2bc   : > { %v1038_v30 = vpop.xlane.xlu0 %1037 }
 0x2bd   : > { %v1048_v31 = vmul.f32 0.0625, %v1038_v30 }
 0x2be   : > { %v1041_v32 = vpop.xlane.xlu1 %1040 }
 0x2bf   : > { %v1052_v33 = vadd.f32 1e-05, %v1048_v31  ;;  %v1049_v34 = vmul.f32 0.0625, %v1041_v32 }
 0x2c1   : > { %1409 = vrsqrt.f32 %v1052_v33  ;;  %v1053_v35 = vadd.f32 1e-05, %v1049_v34 }
 0x2c2   : > { %v1047_v36 = vpop.xlane.xlu1 %1046  ;;  %v1044_v37 = vpop.xlane.xlu0 %1043 }
 0x2c3   : > { %1411 = vrsqrt.f32 %v1053_v35  ;;  %v1051_v38 = vmul.f32 0.0625, %v1047_v36  ;;  %v1050_v39 = vmul.f32 0.0625, %v1044_v37 }
 0x2c5   : > { %v1055_v40 = vadd.f32 1e-05, %v1051_v38  ;;  %v1054_v41 = vadd.f32 1e-05, %v1050_v39 }
 0x2c7   : > { %1413 = vrsqrt.f32 %v1055_v40 }
 0x2c8   : > { %1415 = vrsqrt.f32 %v1054_v41 }
 0x2cb   : > { %v1410_v42 = vpop.eup %1409 }
 0x2cc   : > { %v1060_v44 = vmul.f32 %v1410_v42, %v1024_v9 }
 0x2cd   : > { %v1412_v45 = vpop.eup %1411 }
 0x2ce   : > { %v1068_v47 = vadd.f32 %v1064_v43, %v1060_v44  ;;  %v1061_v48 = vmul.f32 %v1412_v45, %v1025_v12 }
 0x2d0   : > { %1072 = vst.msk [vmem:[%s244_s13] sm:$0xff] %vm1007_vm1, %v1068_v47  ;;  %v1069_v49 = vadd.f32 %v1065_v46, %v1061_v48 }
 0x2d1   : > { %v1414_v50 = vpop.eup %1413 }
 0x2d2   : > { %v1416_v52 = vpop.eup %1415  ;;  %1073 = vst.msk [vmem:[%s244_s13 + $0x8] sm:$0xff] %vm1007_vm1, %v1069_v49  ;;  %v1063_v53 = vmul.f32 %v1414_v50, %v1027_v16 }
 0x2d3   : > { %v1062_v55 = vmul.f32 %v1416_v52, %v1026_v20 }
 0x2d4   : > { %v1071_v56 = vadd.f32 %v1067_v51, %v1063_v53 }
 0x2d5   : > { %v1070_v57 = vadd.f32 %v1066_v54, %v1062_v55 }
 0x2d6   : > { %1075 = vst.msk [vmem:[%s244_s13 + $0x18] sm:$0xff] %vm1007_vm1, %v1071_v56 }
 0x2d7   : > { %1074 = vst.msk [vmem:[%s244_s13 + $0x10] sm:$0xff] %vm1007_vm1, %v1070_v57 }
 0x2d8 PF: > { %s15_s18 = sadd.s32 1, %s1423_s18  }
 0x2d9   : > { %p12_p4 = scmp.ge.s32.totalorder %s15_s18, 4  }
 0x2db   :  { %14 = sbr.rel (!%p12_p4) target bundleno = 1 (0x1), region = 81 }

</bundles_post_ra>
